<compile_context>
chip_gen: v7x
topology: tpu7x:2x2x1
jax: 0.10.0
libtpu: 0.0.40
codegen_flags: <defaults>
</compile_context>

<pallas_src>
import functools

import numpy as np

import jax
import jax.numpy as jnp
from jax.experimental import pallas as pl
from jax.experimental.pallas import tpu as pltpu

EPS = 1e-5
VMEM_LIMIT = 32 * 1024 * 1024


# ----------------------------------------------------------------------------
# Host-side constant builders (0/1 scatter / mask matrices; depend only on
# static shapes, built with numpy at wrap time).
# ----------------------------------------------------------------------------
def build_mask0(cin, k=4):
    """(16*cin, (k+3)*(k+2)) : row p*cin+i has a 1 at the padded-flat position
    of spatial tap p = ki*k + kj (same column for every i)."""
    hpad, wpad = k + 3, k + 2
    m = np.zeros((k * k * cin, hpad * wpad), np.float32)
    for ki in range(k):
        for kj in range(k):
            p = ki * k + kj
            col = (1 + ki) * wpad + (1 + kj)
            m[p * cin:(p + 1) * cin, col] = 1.0
    return m


def build_valid0(k=4):
    """(1, (k+3)*(k+2)) 0/1 mask of the 16 valid (non-pad) positions."""
    hpad, wpad = k + 3, k + 2
    v = np.zeros((1, hpad * wpad), np.float32)
    for ki in range(k):
        for kj in range(k):
            v[0, (1 + ki) * wpad + (1 + kj)] = 1.0
    return v


def build_valid_mask(H, W):
    """(1, H*(W+2)) 0/1 mask: 1 on real columns, 0 on the 2 wrap-around junk
    columns of each flattened row (used for the InstanceNorm statistics)."""
    Wp = W + 2
    v = np.zeros((1, H * Wp), np.float32)
    for h in range(H):
        v[0, h * Wp:h * Wp + W] = 1.0
    return v


def build_scatter(H, W, pad_next):
    """(4, H*(W+2), L) 0/1 scatter matrices: phase (a,b) position (h, w<W)
    -> next layer's padded row-flat position (or plain flat NCHW if not
    pad_next).  Junk columns (w>=W) map to zero rows; pad border stays 0."""
    Wp = W + 2
    OH, OW = 2 * H, 2 * W
    if pad_next:
        rows, cols, roff, coff = OH + 3, OW + 2, 1, 1
    else:
        rows, cols, roff, coff = OH, OW, 0, 0
    g = np.zeros((4, H * Wp, rows * cols), np.float32)
    for a in range(2):
        for b in range(2):
            p = a * 2 + b
            for h in range(H):
                for w in range(W):
                    g[p, h * Wp + w,
                      (roff + 2 * h + a) * cols + (coff + 2 * w + b)] = 1.0
    return g


def prep_w_fused(w):
    """w: (Cin, Cout, 4, 4) torch ConvT layout -> (4, Cout, 4*Cin) bf16.
    Phase p = a*2+b; K block blk = di*2+dj holds W[:, :, 3-a-2di, 3-b-2dj].T."""
    phases = []
    for a in range(2):
        for b in range(2):
            blocks = []
            for di in range(2):
                for dj in range(2):
                    blocks.append(jnp.transpose(w[:, :, 3 - a - 2 * di,
                                                  3 - b - 2 * dj]))
            phases.append(jnp.concatenate(blocks, axis=1))
    return jnp.stack(phases, axis=0).astype(jnp.bfloat16)


# ----------------------------------------------------------------------------
# The single fused kernel: whole Generator forward for one batch element.
# ----------------------------------------------------------------------------
def _generator_kernel(*refs, n_mid, dims, slope, eps):
    z_ref, mask0_ref, valid0_ref, w0_ref, g0_ref, b0_ref = refs[0:6]
    base = 6 + 5 * n_mid
    w_last_ref, s_last_ref = refs[base], refs[base + 1]
    o_ref = refs[base + 2]
    act_refs = refs[base + 3:]          # (n_mid + 1) bf16 VMEM activations

    def leaky(v):
        return jnp.where(v >= 0.0, v, slope * v)

    # ---- layer 0: ConvT(k=4) on a 1x1 input, fused IN(affine)+LeakyReLU,
    #      emitted directly in layer-1's padded row-flat layout (Cout0, 7*6).
    zsc = (z_ref[0] * mask0_ref[...]).astype(jnp.bfloat16)      # (16*Cin0, 42)
    x0 = jnp.dot(w0_ref[...], zsc,
                 preferred_element_type=jnp.float32)            # (Cout0, 42)
    # pad columns of x0 are exactly 0 (zero columns in zsc), so unmasked sums
    # over the 42 lanes equal sums over the 16 valid positions.
    mean = jnp.sum(x0, axis=1, keepdims=True) * (1.0 / 16.0)
    var = jnp.sum(x0 * x0, axis=1, keepdims=True) * (1.0 / 16.0) - mean * mean
    scale = jax.lax.rsqrt(var + eps) * g0_ref[...]
    shift = b0_ref[...] - mean * scale
    act_refs[0][...] = (valid0_ref[...] *
                        leaky(x0 * scale + shift)).astype(jnp.bfloat16)

    # ---- stride-2 ConvT layers (sub-pixel phases, K-fused taps) -------------
    for li in range(n_mid + 1):
        last = (li == n_mid)
        H, W, cin, cout = dims[li]
        Wp = W + 2
        M = H * Wp
        x_ref = act_refs[li]            # (Cin, (H+3)*(W+2)) bf16, zero-padded
        if last:
            w_ref, s_ref = w_last_ref, s_last_ref
            g_ref = b_ref = v_ref = None
        else:
            w_ref, g_ref, b_ref, v_ref, s_ref = refs[6 + 5 * li: 11 + 5 * li]

        convs = []
        ssum = jnp.zeros((cout, 1), jnp.float32)
        ssq = jnp.zeros((cout, 1), jnp.float32)
        for p in range(4):              # phase (a, b) = (oh % 2, ow % 2)
            a, b = p // 2, p % 2
            # K-fused RHS: the 4 (di, dj) tap windows stacked along sublanes.
            rhs = jnp.concatenate(
                [x_ref[:, (a + di) * Wp + (b + dj):
                          (a + di) * Wp + (b + dj) + M]
                 for di in range(2) for dj in range(2)], axis=0)   # (4Cin, M)
            c = jnp.dot(w_ref[p], rhs,
                        preferred_element_type=jnp.float32)        # (Cout, M)
            convs.append(c)
            if not last:
                m = c * v_ref[...]      # zero the 2 junk columns per row
                ssum = ssum + jnp.sum(m, axis=1, keepdims=True)
                ssq = ssq + jnp.sum(m * m, axis=1, keepdims=True)

        if last:
            # Tanh, then exact 0/1 f32 scatter to flat (Cout, OH*OW) output.
            acc = jnp.zeros((cout, s_ref.shape[2]), jnp.float32)
            for p in range(4):
                acc = acc + jnp.dot(jnp.tanh(convs[p]), s_ref[p],
                                    preferred_element_type=jnp.float32)
            o_ref[0] = acc
        else:
            inv_cnt = 1.0 / (4.0 * H * W)
            mean = ssum * inv_cnt
            var = ssq * inv_cnt - mean * mean
            scale = jax.lax.rsqrt(var + eps) * g_ref[...]
            shift = b_ref[...] - mean * scale
            # Normalize + LeakyReLU per phase, cast to bf16 once, and scatter
            # (MXU, exact 0/1) straight into the next layer's padded layout.
            acc = jnp.zeros((cout, s_ref.shape[2]), jnp.float32)
            for p in range(4):
                yp = leaky(convs[p] * scale + shift).astype(jnp.bfloat16)
                acc = acc + jnp.dot(yp, s_ref[p],
                                    preferred_element_type=jnp.float32)
            act_refs[li + 1][...] = acc.astype(jnp.bfloat16)


# ----------------------------------------------------------------------------
# Wrapper: precompute all constant operands once, return z -> image forward.
# ----------------------------------------------------------------------------
def make_generator_forward(convs, norms, slope, eps=EPS):
    n_conv = len(convs)
    n_mid = n_conv - 2

    w0 = convs[0][0]
    cin0, cout0 = int(w0.shape[0]), int(w0.shape[1])

    # layer-0 constants
    w0_stack = jnp.transpose(w0, (1, 2, 3, 0)).reshape(
        cout0, 16 * cin0).astype(jnp.bfloat16)
    const_ops = [
        jnp.asarray(build_mask0(cin0)),                       # (16*Cin0, 42)
        jnp.asarray(build_valid0()),                          # (1, 42)
        w0_stack,                                             # (Cout0, 16*Cin0)
        jnp.asarray(norms[0][0], jnp.float32).reshape(cout0, 1),
        jnp.asarray(norms[0][1], jnp.float32).reshape(cout0, 1),
    ]

    dims = []
    act_shapes = [(cout0, 7 * 6)]
    H, W, cin = 4, 4, cout0
    for li in range(1, n_conv):
        w = convs[li][0]
        cout = int(w.shape[1])
        last = (li == n_conv - 1)
        dims.append((H, W, cin, cout))
        wf = prep_w_fused(w)
        scat = build_scatter(H, W, pad_next=not last)
        if last:
            const_ops.append(wf)
            const_ops.append(jnp.asarray(scat, jnp.float32))  # exact final scatter
        else:
            const_ops.extend([
                wf,
                jnp.asarray(norms[li][0], jnp.float32).reshape(cout, 1),
                jnp.asarray(norms[li][1], jnp.float32).reshape(cout, 1),
                jnp.asarray(build_valid_mask(H, W)),
                jnp.asarray(scat, jnp.bfloat16),
            ])
            act_shapes.append((cout, (2 * H + 3) * (2 * W + 2)))
        H, W, cin = 2 * H, 2 * W, cout

    out_side = H
    cout_last = int(convs[-1][0].shape[1])
    out_len = out_side * out_side

    kern = functools.partial(_generator_kernel, n_mid=n_mid, dims=tuple(dims),
                             slope=float(slope), eps=float(eps))

    in_specs = [pl.BlockSpec((1, 16 * cin0, 1), lambda n: (n, 0, 0))]
    for arr in const_ops:
        in_specs.append(pl.BlockSpec(arr.shape,
                                     lambda n, _nd=arr.ndim: (0,) * _nd))
    scratch = [pltpu.VMEM(s, jnp.bfloat16) for s in act_shapes]

    def forward(z_nchw):
        N = z_nchw.shape[0]
        # latent tiled over the 16 spatial taps (trivial XLA on a (N, Cin) input)
        z_t = jnp.tile(z_nchw.reshape(N, cin0, 1).astype(jnp.float32),
                       (1, 16, 1))
        out = pl.pallas_call(
            kern,
            out_shape=jax.ShapeDtypeStruct((N, cout_last, out_len),
                                           jnp.float32),
            grid=(N,),
            in_specs=in_specs,
            out_specs=pl.BlockSpec((1, cout_last, out_len),
                                   lambda n: (n, 0, 0)),
            scratch_shapes=scratch,
            compiler_params=pltpu.CompilerParams(
                dimension_semantics=("parallel",),
                vmem_limit_bytes=VMEM_LIMIT),
        )(z_t, *const_ops)
        return out.reshape(N, cout_last, out_side, out_side)

    return forward


# ----------------------------------------------------------------------------
# Plain-JAX reference (same bf16 matmul operands, f32 accumulation)
# ----------------------------------------------------------------------------
def generator_forward_ref(z, convs, norms, slope):
    x = z
    n_conv = len(convs)
    for li, (w, stride, pad) in enumerate(convs):
        k = w.shape[2]
        w_conv = jnp.flip(jnp.transpose(w, (1, 0, 2, 3)), axis=(2, 3))
        x = jax.lax.conv_general_dilated(
            x.astype(jnp.bfloat16), w_conv.astype(jnp.bfloat16),
            window_strides=(1, 1),
            padding=[(k - 1 - pad, k - 1 - pad)] * 2,
            lhs_dilation=(stride, stride),
            dimension_numbers=("NCHW", "OIHW", "NCHW"),
            preferred_element_type=jnp.float32)
        if li < n_conv - 1:
            g, b = norms[li]
            mean = jnp.mean(x, axis=(2, 3), keepdims=True)
            var = jnp.mean((x - mean) ** 2, axis=(2, 3), keepdims=True)
            y = (x - mean) * jax.lax.rsqrt(var + EPS)
            y = y * g[None, :, None, None] + b[None, :, None, None]
            x = jnp.where(y >= 0.0, y, slope * y)
        else:
            x = jnp.tanh(x)
    return x


# ----------------------------------------------------------------------------
# Synthetic parameters mirroring Generator.__init__ shapes (demo scale)
# ----------------------------------------------------------------------------
def init_generator_params(key, base_channel=4, nlayers=4, n_item=2, n_cls=0):
    start_channel = base_channel * n_item
    mchannel = base_channel * n_item * 4

    convs = []   # (weight (Cin,Cout,4,4), stride, padding)
    norms = []   # (gamma (C,), beta (C,))

    def w_init(k_, shape):
        return jax.random.normal(k_, shape, jnp.float32) * 0.05

    key, k0, k1, k2 = jax.random.split(key, 4)
    convs.append((w_init(k0, (start_channel + n_cls, mchannel, 4, 4)), 1, 0))
    norms.append((1.0 + 0.1 * jax.random.normal(k1, (mchannel,), jnp.float32),
                  0.1 * jax.random.normal(k2, (mchannel,), jnp.float32)))

    cur = mchannel
    for _ in range(nlayers - 2):
        out_c = cur // 2
        key, k0, k1, k2 = jax.random.split(key, 4)
        convs.append((w_init(k0, (cur, out_c, 4, 4)), 2, 1))
        norms.append((1.0 + 0.1 * jax.random.normal(k1, (out_c,), jnp.float32),
                      0.1 * jax.random.normal(k2, (out_c,), jnp.float32)))
        cur = out_c

    key, k0 = jax.random.split(key)
    convs.append((w_init(k0, (cur, 3, 4, 4)), 2, 1))
    return convs, norms


if __name__ == "__main__":
    key = jax.random.PRNGKey(0)

    # demo config: base_channel=4, nlayers=4, n_item=2, n_cls=0, LeakyReLU 0.01
    base_channel, nlayers, n_item, n_cls, LR = 4, 4, 2, 0, 0.01
    pkey, zkey = jax.random.split(key)
    convs, norms = init_generator_params(pkey, base_channel, nlayers,
                                         n_item, n_cls)

    start_channel = base_channel * n_item            # 8
    z = jax.random.normal(zkey, (2, start_channel + n_cls, 1, 1), jnp.float32)

    fwd = jax.jit(make_generator_forward(convs, norms, LR))
    out = jax.block_until_ready(fwd(z))

    ref = jax.block_until_ready(
        jax.jit(functools.partial(generator_forward_ref,
                                  convs=convs, norms=norms, slope=LR))(z))

    assert out.shape == (2, 3, 32, 32), out.shape
    assert bool(jnp.all(jnp.isfinite(out)))
    max_err = float(jnp.max(jnp.abs(out - ref)))
    assert max_err < 2e-2, f"Pallas/ref mismatch: max abs err {max_err}"

    print("KERNEL_OK")
</pallas_src>

<mosaic_0001>
module attributes {stable_mosaic.version = 11 : i64} {
  func.func @_generator_kernel(%arg0: i32, %arg1: memref<1x128x1xf32, #tpu.memory_space<vmem>>, %arg2: memref<128x42xf32, #tpu.memory_space<vmem>>, %arg3: memref<1x42xf32, #tpu.memory_space<vmem>>, %arg4: memref<32x128xbf16, #tpu.memory_space<vmem>>, %arg5: memref<32x1xf32, #tpu.memory_space<vmem>>, %arg6: memref<32x1xf32, #tpu.memory_space<vmem>>, %arg7: memref<4x16x128xbf16, #tpu.memory_space<vmem>>, %arg8: memref<16x1xf32, #tpu.memory_space<vmem>>, %arg9: memref<16x1xf32, #tpu.memory_space<vmem>>, %arg10: memref<1x24xf32, #tpu.memory_space<vmem>>, %arg11: memref<4x24x110xbf16, #tpu.memory_space<vmem>>, %arg12: memref<4x8x64xbf16, #tpu.memory_space<vmem>>, %arg13: memref<8x1xf32, #tpu.memory_space<vmem>>, %arg14: memref<8x1xf32, #tpu.memory_space<vmem>>, %arg15: memref<1x80xf32, #tpu.memory_space<vmem>>, %arg16: memref<4x80x342xbf16, #tpu.memory_space<vmem>>, %arg17: memref<4x3x32xbf16, #tpu.memory_space<vmem>>, %arg18: memref<4x288x1024xf32, #tpu.memory_space<vmem>>, %arg19: memref<1x3x1024xf32, #tpu.memory_space<vmem>>, %arg20: memref<32x42xbf16, #tpu.memory_space<vmem>>, %arg21: memref<16x110xbf16, #tpu.memory_space<vmem>>, %arg22: memref<8x342xbf16, #tpu.memory_space<vmem>>) attributes {dimension_semantics = [#tpu.dimension_semantics<parallel>], iteration_bounds = array<i64: 2>, scalar_prefetch = 0 : i64, scratch_operands = 3 : i64, tpu.core_type = #tpu.core_type<tc>, window_params = [{transform_indices = @transform_0, window_bounds = array<i64: 1, 128, 1>}, {pipeline_mode = #tpu.pipeline_mode<synchronous>, transform_indices = @transform_1, window_bounds = array<i64: 128, 42>}, {pipeline_mode = #tpu.pipeline_mode<synchronous>, transform_indices = @transform_2, window_bounds = array<i64: 1, 42>}, {pipeline_mode = #tpu.pipeline_mode<synchronous>, transform_indices = @transform_3, window_bounds = array<i64: 32, 128>}, {pipeline_mode = #tpu.pipeline_mode<synchronous>, transform_indices = @transform_4, window_bounds = array<i64: 32, 1>}, {pipeline_mode = #tpu.pipeline_mode<synchronous>, transform_indices = @transform_5, window_bounds = array<i64: 32, 1>}, {pipeline_mode = #tpu.pipeline_mode<synchronous>, transform_indices = @transform_6, window_bounds = array<i64: 4, 16, 128>}, {pipeline_mode = #tpu.pipeline_mode<synchronous>, transform_indices = @transform_7, window_bounds = array<i64: 16, 1>}, {pipeline_mode = #tpu.pipeline_mode<synchronous>, transform_indices = @transform_8, window_bounds = array<i64: 16, 1>}, {pipeline_mode = #tpu.pipeline_mode<synchronous>, transform_indices = @transform_9, window_bounds = array<i64: 1, 24>}, {pipeline_mode = #tpu.pipeline_mode<synchronous>, transform_indices = @transform_10, window_bounds = array<i64: 4, 24, 110>}, {pipeline_mode = #tpu.pipeline_mode<synchronous>, transform_indices = @transform_11, window_bounds = array<i64: 4, 8, 64>}, {pipeline_mode = #tpu.pipeline_mode<synchronous>, transform_indices = @transform_12, window_bounds = array<i64: 8, 1>}, {pipeline_mode = #tpu.pipeline_mode<synchronous>, transform_indices = @transform_13, window_bounds = array<i64: 8, 1>}, {pipeline_mode = #tpu.pipeline_mode<synchronous>, transform_indices = @transform_14, window_bounds = array<i64: 1, 80>}, {pipeline_mode = #tpu.pipeline_mode<synchronous>, transform_indices = @transform_15, window_bounds = array<i64: 4, 80, 342>}, {pipeline_mode = #tpu.pipeline_mode<synchronous>, transform_indices = @transform_16, window_bounds = array<i64: 4, 3, 32>}, {pipeline_mode = #tpu.pipeline_mode<synchronous>, transform_indices = @transform_17, window_bounds = array<i64: 4, 288, 1024>}, {transform_indices = @transform_18, window_bounds = array<i64: 1, 3, 1024>}]} {
    %c0 = arith.constant 0 : index
    %c0_0 = arith.constant 0 : index
    %c0_1 = arith.constant 0 : index
    %0 = vector.load %arg1[%c0, %c0_0, %c0_1] : memref<1x128x1xf32, #tpu.memory_space<vmem>>, vector<1x128x1xf32>
    %1 = vector.shape_cast %0 : vector<1x128x1xf32> to vector<128x1xf32>
    %c0_2 = arith.constant 0 : index
    %c0_3 = arith.constant 0 : index
    %2 = vector.load %arg2[%c0_2, %c0_3] : memref<128x42xf32, #tpu.memory_space<vmem>>, vector<128x42xf32>
    %3 = vector.broadcast %1 : vector<128x1xf32> to vector<128x42xf32>
    %4 = arith.mulf %3, %2 : vector<128x42xf32>
    %5 = arith.truncf %4 : vector<128x42xf32> to vector<128x42xbf16>
    %c0_4 = arith.constant 0 : index
    %c0_5 = arith.constant 0 : index
    %6 = vector.load %arg4[%c0_4, %c0_5] : memref<32x128xbf16, #tpu.memory_space<vmem>>, vector<32x128xbf16>
    %cst = arith.constant dense<0.000000e+00> : vector<32x42xf32>
    %7 = tpu.matmul %6, %5, %cst {dimension_numbers = #tpu.dot_dimension_numbers<[1], [0], [0], [1], [0, 0, 1, 1], [], []>} : vector<32x128xbf16>, vector<128x42xbf16>, vector<32x42xf32> -> vector<32x42xf32>
    %cst_6 = arith.constant dense<0.000000e+00> : vector<32xf32>
    %8 = vector.multi_reduction <add>, %7, %cst_6 [1] : vector<32x42xf32> to vector<32xf32>
    %9 = vector.shape_cast %8 : vector<32xf32> to vector<32x1xf32>
    %cst_7 = arith.constant 6.250000e-02 : f32
    %10 = vector.broadcast %cst_7 : f32 to vector<32x1xf32>
    %11 = arith.mulf %9, %10 : vector<32x1xf32>
    %12 = arith.mulf %7, %7 : vector<32x42xf32>
    %cst_8 = arith.constant dense<0.000000e+00> : vector<32xf32>
    %13 = vector.multi_reduction <add>, %12, %cst_8 [1] : vector<32x42xf32> to vector<32xf32>
    %14 = vector.shape_cast %13 : vector<32xf32> to vector<32x1xf32>
    %cst_9 = arith.constant 6.250000e-02 : f32
    %15 = vector.broadcast %cst_9 : f32 to vector<32x1xf32>
    %16 = arith.mulf %14, %15 : vector<32x1xf32>
    %17 = arith.mulf %11, %11 : vector<32x1xf32>
    %18 = arith.subf %16, %17 : vector<32x1xf32>
    %cst_10 = arith.constant 9.99999974E-6 : f32
    %19 = vector.broadcast %cst_10 : f32 to vector<32x1xf32>
    %20 = arith.addf %18, %19 : vector<32x1xf32>
    %21 = math.rsqrt %20 : vector<32x1xf32>
    %c0_11 = arith.constant 0 : index
    %c0_12 = arith.constant 0 : index
    %22 = vector.load %arg5[%c0_11, %c0_12] : memref<32x1xf32, #tpu.memory_space<vmem>>, vector<32x1xf32>
    %23 = arith.mulf %21, %22 : vector<32x1xf32>
    %c0_13 = arith.constant 0 : index
    %c0_14 = arith.constant 0 : index
    %24 = vector.load %arg6[%c0_13, %c0_14] : memref<32x1xf32, #tpu.memory_space<vmem>>, vector<32x1xf32>
    %25 = arith.mulf %11, %23 : vector<32x1xf32>
    %26 = arith.subf %24, %25 : vector<32x1xf32>
    %c0_15 = arith.constant 0 : index
    %c0_16 = arith.constant 0 : index
    %27 = vector.load %arg3[%c0_15, %c0_16] : memref<1x42xf32, #tpu.memory_space<vmem>>, vector<1x42xf32>
    %28 = vector.broadcast %23 : vector<32x1xf32> to vector<32x42xf32>
    %29 = arith.mulf %7, %28 : vector<32x42xf32>
    %30 = vector.broadcast %26 : vector<32x1xf32> to vector<32x42xf32>
    %31 = arith.addf %29, %30 : vector<32x42xf32>
    %cst_17 = arith.constant 0.000000e+00 : f32
    %32 = vector.broadcast %cst_17 : f32 to vector<32x42xf32>
    %33 = arith.cmpf oge, %31, %32 : vector<32x42xf32>
    %cst_18 = arith.constant 0.00999999977 : f32
    %34 = vector.broadcast %cst_18 : f32 to vector<32x42xf32>
    %35 = arith.mulf %34, %31 : vector<32x42xf32>
    %36 = arith.select %33, %31, %35 : vector<32x42xi1>, vector<32x42xf32>
    %37 = vector.broadcast %27 : vector<1x42xf32> to vector<32x42xf32>
    %38 = arith.mulf %37, %36 : vector<32x42xf32>
    %39 = arith.truncf %38 : vector<32x42xf32> to vector<32x42xbf16>
    %c0_19 = arith.constant 0 : index
    %c0_20 = arith.constant 0 : index
    %40 = vector.load %arg20[%c0_19, %c0_20] : memref<32x42xbf16, #tpu.memory_space<vmem>>, vector<32x42xbf16>
    tpu.vector_store %arg20[%c0_19, %c0_20], %39 {strides = array<i32>} : memref<32x42xbf16, #tpu.memory_space<vmem>>, vector<32x42xbf16>,
    %cst_21 = arith.constant 0.000000e+00 : f32
    %41 = vector.broadcast %cst_21 : f32 to vector<16x1xf32>
    %cst_22 = arith.constant 0.000000e+00 : f32
    %42 = vector.broadcast %cst_22 : f32 to vector<16x1xf32>
    %c0_23 = arith.constant 0 : index
    %c0_24 = arith.constant 0 : index
    %43 = vector.load %arg20[%c0_23, %c0_24] : memref<32x42xbf16, #tpu.memory_space<vmem>>, vector<32x24xbf16>
    %c0_25 = arith.constant 0 : index
    %c1 = arith.constant 1 : index
    %44 = vector.load %arg20[%c0_25, %c1] : memref<32x42xbf16, #tpu.memory_space<vmem>>, vector<32x24xbf16>
    %c0_26 = arith.constant 0 : index
    %c6 = arith.constant 6 : index
    %45 = vector.load %arg20[%c0_26, %c6] : memref<32x42xbf16, #tpu.memory_space<vmem>>, vector<32x24xbf16>
    %c0_27 = arith.constant 0 : index
    %c7 = arith.constant 7 : index
    %46 = vector.load %arg20[%c0_27, %c7] : memref<32x42xbf16, #tpu.memory_space<vmem>>, vector<32x24xbf16>
    %47 = tpu.concatenate %43, %44, %45, %46 in 0 : vector<32x24xbf16>, vector<32x24xbf16>, vector<32x24xbf16>, vector<32x24xbf16> -> vector<128x24xbf16>
    %c0_28 = arith.constant 0 : index
    %c0_29 = arith.constant 0 : index
    %c0_30 = arith.constant 0 : index
    %48 = vector.load %arg7[%c0_28, %c0_29, %c0_30] : memref<4x16x128xbf16, #tpu.memory_space<vmem>>, vector<1x16x128xbf16>
    %49 = vector.shape_cast %48 : vector<1x16x128xbf16> to vector<16x128xbf16>
    %cst_31 = arith.constant dense<0.000000e+00> : vector<16x24xf32>
    %50 = tpu.matmul %49, %47, %cst_31 {dimension_numbers = #tpu.dot_dimension_numbers<[1], [0], [0], [1], [0, 0, 1, 1], [], []>} : vector<16x128xbf16>, vector<128x24xbf16>, vector<16x24xf32> -> vector<16x24xf32>
    %c0_32 = arith.constant 0 : index
    %c0_33 = arith.constant 0 : index
    %51 = vector.load %arg10[%c0_32, %c0_33] : memref<1x24xf32, #tpu.memory_space<vmem>>, vector<1x24xf32>
    %52 = vector.broadcast %51 : vector<1x24xf32> to vector<16x24xf32>
    %53 = arith.mulf %50, %52 : vector<16x24xf32>
    %cst_34 = arith.constant dense<0.000000e+00> : vector<16xf32>
    %54 = vector.multi_reduction <add>, %53, %cst_34 [1] : vector<16x24xf32> to vector<16xf32>
    %55 = vector.shape_cast %54 : vector<16xf32> to vector<16x1xf32>
    %56 = arith.addf %41, %55 : vector<16x1xf32>
    %57 = arith.mulf %53, %53 : vector<16x24xf32>
    %cst_35 = arith.constant dense<0.000000e+00> : vector<16xf32>
    %58 = vector.multi_reduction <add>, %57, %cst_35 [1] : vector<16x24xf32> to vector<16xf32>
    %59 = vector.shape_cast %58 : vector<16xf32> to vector<16x1xf32>
    %60 = arith.addf %42, %59 : vector<16x1xf32>
    %c0_36 = arith.constant 0 : index
    %c1_37 = arith.constant 1 : index
    %61 = vector.load %arg20[%c0_36, %c1_37] : memref<32x42xbf16, #tpu.memory_space<vmem>>, vector<32x24xbf16>
    %c0_38 = arith.constant 0 : index
    %c2 = arith.constant 2 : index
    %62 = vector.load %arg20[%c0_38, %c2] : memref<32x42xbf16, #tpu.memory_space<vmem>>, vector<32x24xbf16>
    %c0_39 = arith.constant 0 : index
    %c7_40 = arith.constant 7 : index
    %63 = vector.load %arg20[%c0_39, %c7_40] : memref<32x42xbf16, #tpu.memory_space<vmem>>, vector<32x24xbf16>
    %c0_41 = arith.constant 0 : index
    %c8 = arith.constant 8 : index
    %64 = vector.load %arg20[%c0_41, %c8] : memref<32x42xbf16, #tpu.memory_space<vmem>>, vector<32x24xbf16>
    %65 = tpu.concatenate %61, %62, %63, %64 in 0 : vector<32x24xbf16>, vector<32x24xbf16>, vector<32x24xbf16>, vector<32x24xbf16> -> vector<128x24xbf16>
    %c1_42 = arith.constant 1 : index
    %c0_43 = arith.constant 0 : index
    %c0_44 = arith.constant 0 : index
    %66 = vector.load %arg7[%c1_42, %c0_43, %c0_44] : memref<4x16x128xbf16, #tpu.memory_space<vmem>>, vector<1x16x128xbf16>
    %67 = vector.shape_cast %66 : vector<1x16x128xbf16> to vector<16x128xbf16>
    %cst_45 = arith.constant dense<0.000000e+00> : vector<16x24xf32>
    %68 = tpu.matmul %67, %65, %cst_45 {dimension_numbers = #tpu.dot_dimension_numbers<[1], [0], [0], [1], [0, 0, 1, 1], [], []>} : vector<16x128xbf16>, vector<128x24xbf16>, vector<16x24xf32> -> vector<16x24xf32>
    %c0_46 = arith.constant 0 : index
    %c0_47 = arith.constant 0 : index
    %69 = vector.load %arg10[%c0_46, %c0_47] : memref<1x24xf32, #tpu.memory_space<vmem>>, vector<1x24xf32>
    %70 = vector.broadcast %69 : vector<1x24xf32> to vector<16x24xf32>
    %71 = arith.mulf %68, %70 : vector<16x24xf32>
    %cst_48 = arith.constant dense<0.000000e+00> : vector<16xf32>
    %72 = vector.multi_reduction <add>, %71, %cst_48 [1] : vector<16x24xf32> to vector<16xf32>
    %73 = vector.shape_cast %72 : vector<16xf32> to vector<16x1xf32>
    %74 = arith.addf %56, %73 : vector<16x1xf32>
    %75 = arith.mulf %71, %71 : vector<16x24xf32>
    %cst_49 = arith.constant dense<0.000000e+00> : vector<16xf32>
    %76 = vector.multi_reduction <add>, %75, %cst_49 [1] : vector<16x24xf32> to vector<16xf32>
    %77 = vector.shape_cast %76 : vector<16xf32> to vector<16x1xf32>
    %78 = arith.addf %60, %77 : vector<16x1xf32>
    %c0_50 = arith.constant 0 : index
    %c6_51 = arith.constant 6 : index
    %79 = vector.load %arg20[%c0_50, %c6_51] : memref<32x42xbf16, #tpu.memory_space<vmem>>, vector<32x24xbf16>
    %c0_52 = arith.constant 0 : index
    %c7_53 = arith.constant 7 : index
    %80 = vector.load %arg20[%c0_52, %c7_53] : memref<32x42xbf16, #tpu.memory_space<vmem>>, vector<32x24xbf16>
    %c0_54 = arith.constant 0 : index
    %c12 = arith.constant 12 : index
    %81 = vector.load %arg20[%c0_54, %c12] : memref<32x42xbf16, #tpu.memory_space<vmem>>, vector<32x24xbf16>
    %c0_55 = arith.constant 0 : index
    %c13 = arith.constant 13 : index
    %82 = vector.load %arg20[%c0_55, %c13] : memref<32x42xbf16, #tpu.memory_space<vmem>>, vector<32x24xbf16>
    %83 = tpu.concatenate %79, %80, %81, %82 in 0 : vector<32x24xbf16>, vector<32x24xbf16>, vector<32x24xbf16>, vector<32x24xbf16> -> vector<128x24xbf16>
    %c2_56 = arith.constant 2 : index
    %c0_57 = arith.constant 0 : index
    %c0_58 = arith.constant 0 : index
    %84 = vector.load %arg7[%c2_56, %c0_57, %c0_58] : memref<4x16x128xbf16, #tpu.memory_space<vmem>>, vector<1x16x128xbf16>
    %85 = vector.shape_cast %84 : vector<1x16x128xbf16> to vector<16x128xbf16>
    %cst_59 = arith.constant dense<0.000000e+00> : vector<16x24xf32>
    %86 = tpu.matmul %85, %83, %cst_59 {dimension_numbers = #tpu.dot_dimension_numbers<[1], [0], [0], [1], [0, 0, 1, 1], [], []>} : vector<16x128xbf16>, vector<128x24xbf16>, vector<16x24xf32> -> vector<16x24xf32>
    %c0_60 = arith.constant 0 : index
    %c0_61 = arith.constant 0 : index
    %87 = vector.load %arg10[%c0_60, %c0_61] : memref<1x24xf32, #tpu.memory_space<vmem>>, vector<1x24xf32>
    %88 = vector.broadcast %87 : vector<1x24xf32> to vector<16x24xf32>
    %89 = arith.mulf %86, %88 : vector<16x24xf32>
    %cst_62 = arith.constant dense<0.000000e+00> : vector<16xf32>
    %90 = vector.multi_reduction <add>, %89, %cst_62 [1] : vector<16x24xf32> to vector<16xf32>
    %91 = vector.shape_cast %90 : vector<16xf32> to vector<16x1xf32>
    %92 = arith.addf %74, %91 : vector<16x1xf32>
    %93 = arith.mulf %89, %89 : vector<16x24xf32>
    %cst_63 = arith.constant dense<0.000000e+00> : vector<16xf32>
    %94 = vector.multi_reduction <add>, %93, %cst_63 [1] : vector<16x24xf32> to vector<16xf32>
    %95 = vector.shape_cast %94 : vector<16xf32> to vector<16x1xf32>
    %96 = arith.addf %78, %95 : vector<16x1xf32>
    %c0_64 = arith.constant 0 : index
    %c7_65 = arith.constant 7 : index
    %97 = vector.load %arg20[%c0_64, %c7_65] : memref<32x42xbf16, #tpu.memory_space<vmem>>, vector<32x24xbf16>
    %c0_66 = arith.constant 0 : index
    %c8_67 = arith.constant 8 : index
    %98 = vector.load %arg20[%c0_66, %c8_67] : memref<32x42xbf16, #tpu.memory_space<vmem>>, vector<32x24xbf16>
    %c0_68 = arith.constant 0 : index
    %c13_69 = arith.constant 13 : index
    %99 = vector.load %arg20[%c0_68, %c13_69] : memref<32x42xbf16, #tpu.memory_space<vmem>>, vector<32x24xbf16>
    %c0_70 = arith.constant 0 : index
    %c14 = arith.constant 14 : index
    %100 = vector.load %arg20[%c0_70, %c14] : memref<32x42xbf16, #tpu.memory_space<vmem>>, vector<32x24xbf16>
    %101 = tpu.concatenate %97, %98, %99, %100 in 0 : vector<32x24xbf16>, vector<32x24xbf16>, vector<32x24xbf16>, vector<32x24xbf16> -> vector<128x24xbf16>
    %c3 = arith.constant 3 : index
    %c0_71 = arith.constant 0 : index
    %c0_72 = arith.constant 0 : index
    %102 = vector.load %arg7[%c3, %c0_71, %c0_72] : memref<4x16x128xbf16, #tpu.memory_space<vmem>>, vector<1x16x128xbf16>
    %103 = vector.shape_cast %102 : vector<1x16x128xbf16> to vector<16x128xbf16>
    %cst_73 = arith.constant dense<0.000000e+00> : vector<16x24xf32>
    %104 = tpu.matmul %103, %101, %cst_73 {dimension_numbers = #tpu.dot_dimension_numbers<[1], [0], [0], [1], [0, 0, 1, 1], [], []>} : vector<16x128xbf16>, vector<128x24xbf16>, vector<16x24xf32> -> vector<16x24xf32>
    %c0_74 = arith.constant 0 : index
    %c0_75 = arith.constant 0 : index
    %105 = vector.load %arg10[%c0_74, %c0_75] : memref<1x24xf32, #tpu.memory_space<vmem>>, vector<1x24xf32>
    %106 = vector.broadcast %105 : vector<1x24xf32> to vector<16x24xf32>
    %107 = arith.mulf %104, %106 : vector<16x24xf32>
    %cst_76 = arith.constant dense<0.000000e+00> : vector<16xf32>
    %108 = vector.multi_reduction <add>, %107, %cst_76 [1] : vector<16x24xf32> to vector<16xf32>
    %109 = vector.shape_cast %108 : vector<16xf32> to vector<16x1xf32>
    %110 = arith.addf %92, %109 : vector<16x1xf32>
    %111 = arith.mulf %107, %107 : vector<16x24xf32>
    %cst_77 = arith.constant dense<0.000000e+00> : vector<16xf32>
    %112 = vector.multi_reduction <add>, %111, %cst_77 [1] : vector<16x24xf32> to vector<16xf32>
    %113 = vector.shape_cast %112 : vector<16xf32> to vector<16x1xf32>
    %114 = arith.addf %96, %113 : vector<16x1xf32>
    %cst_78 = arith.constant 1.562500e-02 : f32
    %115 = vector.broadcast %cst_78 : f32 to vector<16x1xf32>
    %116 = arith.mulf %110, %115 : vector<16x1xf32>
    %cst_79 = arith.constant 1.562500e-02 : f32
    %117 = vector.broadcast %cst_79 : f32 to vector<16x1xf32>
    %118 = arith.mulf %114, %117 : vector<16x1xf32>
    %119 = arith.mulf %116, %116 : vector<16x1xf32>
    %120 = arith.subf %118, %119 : vector<16x1xf32>
    %cst_80 = arith.constant 9.99999974E-6 : f32
    %121 = vector.broadcast %cst_80 : f32 to vector<16x1xf32>
    %122 = arith.addf %120, %121 : vector<16x1xf32>
    %123 = math.rsqrt %122 : vector<16x1xf32>
    %c0_81 = arith.constant 0 : index
    %c0_82 = arith.constant 0 : index
    %124 = vector.load %arg8[%c0_81, %c0_82] : memref<16x1xf32, #tpu.memory_space<vmem>>, vector<16x1xf32>
    %125 = arith.mulf %123, %124 : vector<16x1xf32>
    %c0_83 = arith.constant 0 : index
    %c0_84 = arith.constant 0 : index
    %126 = vector.load %arg9[%c0_83, %c0_84] : memref<16x1xf32, #tpu.memory_space<vmem>>, vector<16x1xf32>
    %127 = arith.mulf %116, %125 : vector<16x1xf32>
    %128 = arith.subf %126, %127 : vector<16x1xf32>
    %cst_85 = arith.constant 0.000000e+00 : f32
    %129 = vector.broadcast %cst_85 : f32 to vector<16x110xf32>
    %130 = vector.broadcast %125 : vector<16x1xf32> to vector<16x24xf32>
    %131 = arith.mulf %50, %130 : vector<16x24xf32>
    %132 = vector.broadcast %128 : vector<16x1xf32> to vector<16x24xf32>
    %133 = arith.addf %131, %132 : vector<16x24xf32>
    %cst_86 = arith.constant 0.000000e+00 : f32
    %134 = vector.broadcast %cst_86 : f32 to vector<16x24xf32>
    %135 = arith.cmpf oge, %133, %134 : vector<16x24xf32>
    %cst_87 = arith.constant 0.00999999977 : f32
    %136 = vector.broadcast %cst_87 : f32 to vector<16x24xf32>
    %137 = arith.mulf %136, %133 : vector<16x24xf32>
    %138 = arith.select %135, %133, %137 : vector<16x24xi1>, vector<16x24xf32>
    %139 = arith.truncf %138 : vector<16x24xf32> to vector<16x24xbf16>
    %c0_88 = arith.constant 0 : index
    %c0_89 = arith.constant 0 : index
    %c0_90 = arith.constant 0 : index
    %140 = vector.load %arg11[%c0_88, %c0_89, %c0_90] : memref<4x24x110xbf16, #tpu.memory_space<vmem>>, vector<1x24x110xbf16>
    %141 = vector.shape_cast %140 : vector<1x24x110xbf16> to vector<24x110xbf16>
    %cst_91 = arith.constant dense<0.000000e+00> : vector<16x110xf32>
    %142 = tpu.matmul %139, %141, %cst_91 {dimension_numbers = #tpu.dot_dimension_numbers<[1], [0], [0], [1], [0, 0, 1, 1], [], []>} : vector<16x24xbf16>, vector<24x110xbf16>, vector<16x110xf32> -> vector<16x110xf32>
    %143 = arith.addf %129, %142 : vector<16x110xf32>
    %144 = vector.broadcast %125 : vector<16x1xf32> to vector<16x24xf32>
    %145 = arith.mulf %68, %144 : vector<16x24xf32>
    %146 = vector.broadcast %128 : vector<16x1xf32> to vector<16x24xf32>
    %147 = arith.addf %145, %146 : vector<16x24xf32>
    %cst_92 = arith.constant 0.000000e+00 : f32
    %148 = vector.broadcast %cst_92 : f32 to vector<16x24xf32>
    %149 = arith.cmpf oge, %147, %148 : vector<16x24xf32>
    %cst_93 = arith.constant 0.00999999977 : f32
    %150 = vector.broadcast %cst_93 : f32 to vector<16x24xf32>
    %151 = arith.mulf %150, %147 : vector<16x24xf32>
    %152 = arith.select %149, %147, %151 : vector<16x24xi1>, vector<16x24xf32>
    %153 = arith.truncf %152 : vector<16x24xf32> to vector<16x24xbf16>
    %c1_94 = arith.constant 1 : index
    %c0_95 = arith.constant 0 : index
    %c0_96 = arith.constant 0 : index
    %154 = vector.load %arg11[%c1_94, %c0_95, %c0_96] : memref<4x24x110xbf16, #tpu.memory_space<vmem>>, vector<1x24x110xbf16>
    %155 = vector.shape_cast %154 : vector<1x24x110xbf16> to vector<24x110xbf16>
    %cst_97 = arith.constant dense<0.000000e+00> : vector<16x110xf32>
    %156 = tpu.matmul %153, %155, %cst_97 {dimension_numbers = #tpu.dot_dimension_numbers<[1], [0], [0], [1], [0, 0, 1, 1], [], []>} : vector<16x24xbf16>, vector<24x110xbf16>, vector<16x110xf32> -> vector<16x110xf32>
    %157 = arith.addf %143, %156 : vector<16x110xf32>
    %158 = vector.broadcast %125 : vector<16x1xf32> to vector<16x24xf32>
    %159 = arith.mulf %86, %158 : vector<16x24xf32>
    %160 = vector.broadcast %128 : vector<16x1xf32> to vector<16x24xf32>
    %161 = arith.addf %159, %160 : vector<16x24xf32>
    %cst_98 = arith.constant 0.000000e+00 : f32
    %162 = vector.broadcast %cst_98 : f32 to vector<16x24xf32>
    %163 = arith.cmpf oge, %161, %162 : vector<16x24xf32>
    %cst_99 = arith.constant 0.00999999977 : f32
    %164 = vector.broadcast %cst_99 : f32 to vector<16x24xf32>
    %165 = arith.mulf %164, %161 : vector<16x24xf32>
    %166 = arith.select %163, %161, %165 : vector<16x24xi1>, vector<16x24xf32>
    %167 = arith.truncf %166 : vector<16x24xf32> to vector<16x24xbf16>
    %c2_100 = arith.constant 2 : index
    %c0_101 = arith.constant 0 : index
    %c0_102 = arith.constant 0 : index
    %168 = vector.load %arg11[%c2_100, %c0_101, %c0_102] : memref<4x24x110xbf16, #tpu.memory_space<vmem>>, vector<1x24x110xbf16>
    %169 = vector.shape_cast %168 : vector<1x24x110xbf16> to vector<24x110xbf16>
    %cst_103 = arith.constant dense<0.000000e+00> : vector<16x110xf32>
    %170 = tpu.matmul %167, %169, %cst_103 {dimension_numbers = #tpu.dot_dimension_numbers<[1], [0], [0], [1], [0, 0, 1, 1], [], []>} : vector<16x24xbf16>, vector<24x110xbf16>, vector<16x110xf32> -> vector<16x110xf32>
    %171 = arith.addf %157, %170 : vector<16x110xf32>
    %172 = vector.broadcast %125 : vector<16x1xf32> to vector<16x24xf32>
    %173 = arith.mulf %104, %172 : vector<16x24xf32>
    %174 = vector.broadcast %128 : vector<16x1xf32> to vector<16x24xf32>
    %175 = arith.addf %173, %174 : vector<16x24xf32>
    %cst_104 = arith.constant 0.000000e+00 : f32
    %176 = vector.broadcast %cst_104 : f32 to vector<16x24xf32>
    %177 = arith.cmpf oge, %175, %176 : vector<16x24xf32>
    %cst_105 = arith.constant 0.00999999977 : f32
    %178 = vector.broadcast %cst_105 : f32 to vector<16x24xf32>
    %179 = arith.mulf %178, %175 : vector<16x24xf32>
    %180 = arith.select %177, %175, %179 : vector<16x24xi1>, vector<16x24xf32>
    %181 = arith.truncf %180 : vector<16x24xf32> to vector<16x24xbf16>
    %c3_106 = arith.constant 3 : index
    %c0_107 = arith.constant 0 : index
    %c0_108 = arith.constant 0 : index
    %182 = vector.load %arg11[%c3_106, %c0_107, %c0_108] : memref<4x24x110xbf16, #tpu.memory_space<vmem>>, vector<1x24x110xbf16>
    %183 = vector.shape_cast %182 : vector<1x24x110xbf16> to vector<24x110xbf16>
    %cst_109 = arith.constant dense<0.000000e+00> : vector<16x110xf32>
    %184 = tpu.matmul %181, %183, %cst_109 {dimension_numbers = #tpu.dot_dimension_numbers<[1], [0], [0], [1], [0, 0, 1, 1], [], []>} : vector<16x24xbf16>, vector<24x110xbf16>, vector<16x110xf32> -> vector<16x110xf32>
    %185 = arith.addf %171, %184 : vector<16x110xf32>
    %186 = arith.truncf %185 : vector<16x110xf32> to vector<16x110xbf16>
    %c0_110 = arith.constant 0 : index
    %c0_111 = arith.constant 0 : index
    %187 = vector.load %arg21[%c0_110, %c0_111] : memref<16x110xbf16, #tpu.memory_space<vmem>>, vector<16x110xbf16>
    tpu.vector_store %arg21[%c0_110, %c0_111], %186 {strides = array<i32>} : memref<16x110xbf16, #tpu.memory_space<vmem>>, vector<16x110xbf16>,
    %cst_112 = arith.constant 0.000000e+00 : f32
    %188 = vector.broadcast %cst_112 : f32 to vector<8x1xf32>
    %cst_113 = arith.constant 0.000000e+00 : f32
    %189 = vector.broadcast %cst_113 : f32 to vector<8x1xf32>
    %c0_114 = arith.constant 0 : index
    %c0_115 = arith.constant 0 : index
    %190 = vector.load %arg21[%c0_114, %c0_115] : memref<16x110xbf16, #tpu.memory_space<vmem>>, vector<16x80xbf16>
    %c0_116 = arith.constant 0 : index
    %c1_117 = arith.constant 1 : index
    %191 = vector.load %arg21[%c0_116, %c1_117] : memref<16x110xbf16, #tpu.memory_space<vmem>>, vector<16x80xbf16>
    %c0_118 = arith.constant 0 : index
    %c10 = arith.constant 10 : index
    %192 = vector.load %arg21[%c0_118, %c10] : memref<16x110xbf16, #tpu.memory_space<vmem>>, vector<16x80xbf16>
    %c0_119 = arith.constant 0 : index
    %c11 = arith.constant 11 : index
    %193 = vector.load %arg21[%c0_119, %c11] : memref<16x110xbf16, #tpu.memory_space<vmem>>, vector<16x80xbf16>
    %194 = tpu.concatenate %190, %191, %192, %193 in 0 : vector<16x80xbf16>, vector<16x80xbf16>, vector<16x80xbf16>, vector<16x80xbf16> -> vector<64x80xbf16>
    %c0_120 = arith.constant 0 : index
    %c0_121 = arith.constant 0 : index
    %c0_122 = arith.constant 0 : index
    %195 = vector.load %arg12[%c0_120, %c0_121, %c0_122] : memref<4x8x64xbf16, #tpu.memory_space<vmem>>, vector<1x8x64xbf16>
    %196 = vector.shape_cast %195 : vector<1x8x64xbf16> to vector<8x64xbf16>
    %cst_123 = arith.constant dense<0.000000e+00> : vector<8x80xf32>
    %197 = tpu.matmul %196, %194, %cst_123 {dimension_numbers = #tpu.dot_dimension_numbers<[1], [0], [0], [1], [0, 0, 1, 1], [], []>} : vector<8x64xbf16>, vector<64x80xbf16>, vector<8x80xf32> -> vector<8x80xf32>
    %c0_124 = arith.constant 0 : index
    %c0_125 = arith.constant 0 : index
    %198 = vector.load %arg15[%c0_124, %c0_125] : memref<1x80xf32, #tpu.memory_space<vmem>>, vector<1x80xf32>
    %199 = vector.broadcast %198 : vector<1x80xf32> to vector<8x80xf32>
    %200 = arith.mulf %197, %199 : vector<8x80xf32>
    %cst_126 = arith.constant dense<0.000000e+00> : vector<8xf32>
    %201 = vector.multi_reduction <add>, %200, %cst_126 [1] : vector<8x80xf32> to vector<8xf32>
    %202 = vector.shape_cast %201 : vector<8xf32> to vector<8x1xf32>
    %203 = arith.addf %188, %202 : vector<8x1xf32>
    %204 = arith.mulf %200, %200 : vector<8x80xf32>
    %cst_127 = arith.constant dense<0.000000e+00> : vector<8xf32>
    %205 = vector.multi_reduction <add>, %204, %cst_127 [1] : vector<8x80xf32> to vector<8xf32>
    %206 = vector.shape_cast %205 : vector<8xf32> to vector<8x1xf32>
    %207 = arith.addf %189, %206 : vector<8x1xf32>
    %c0_128 = arith.constant 0 : index
    %c1_129 = arith.constant 1 : index
    %208 = vector.load %arg21[%c0_128, %c1_129] : memref<16x110xbf16, #tpu.memory_space<vmem>>, vector<16x80xbf16>
    %c0_130 = arith.constant 0 : index
    %c2_131 = arith.constant 2 : index
    %209 = vector.load %arg21[%c0_130, %c2_131] : memref<16x110xbf16, #tpu.memory_space<vmem>>, vector<16x80xbf16>
    %c0_132 = arith.constant 0 : index
    %c11_133 = arith.constant 11 : index
    %210 = vector.load %arg21[%c0_132, %c11_133] : memref<16x110xbf16, #tpu.memory_space<vmem>>, vector<16x80xbf16>
    %c0_134 = arith.constant 0 : index
    %c12_135 = arith.constant 12 : index
    %211 = vector.load %arg21[%c0_134, %c12_135] : memref<16x110xbf16, #tpu.memory_space<vmem>>, vector<16x80xbf16>
    %212 = tpu.concatenate %208, %209, %210, %211 in 0 : vector<16x80xbf16>, vector<16x80xbf16>, vector<16x80xbf16>, vector<16x80xbf16> -> vector<64x80xbf16>
    %c1_136 = arith.constant 1 : index
    %c0_137 = arith.constant 0 : index
    %c0_138 = arith.constant 0 : index
    %213 = vector.load %arg12[%c1_136, %c0_137, %c0_138] : memref<4x8x64xbf16, #tpu.memory_space<vmem>>, vector<1x8x64xbf16>
    %214 = vector.shape_cast %213 : vector<1x8x64xbf16> to vector<8x64xbf16>
    %cst_139 = arith.constant dense<0.000000e+00> : vector<8x80xf32>
    %215 = tpu.matmul %214, %212, %cst_139 {dimension_numbers = #tpu.dot_dimension_numbers<[1], [0], [0], [1], [0, 0, 1, 1], [], []>} : vector<8x64xbf16>, vector<64x80xbf16>, vector<8x80xf32> -> vector<8x80xf32>
    %c0_140 = arith.constant 0 : index
    %c0_141 = arith.constant 0 : index
    %216 = vector.load %arg15[%c0_140, %c0_141] : memref<1x80xf32, #tpu.memory_space<vmem>>, vector<1x80xf32>
    %217 = vector.broadcast %216 : vector<1x80xf32> to vector<8x80xf32>
    %218 = arith.mulf %215, %217 : vector<8x80xf32>
    %cst_142 = arith.constant dense<0.000000e+00> : vector<8xf32>
    %219 = vector.multi_reduction <add>, %218, %cst_142 [1] : vector<8x80xf32> to vector<8xf32>
    %220 = vector.shape_cast %219 : vector<8xf32> to vector<8x1xf32>
    %221 = arith.addf %203, %220 : vector<8x1xf32>
    %222 = arith.mulf %218, %218 : vector<8x80xf32>
    %cst_143 = arith.constant dense<0.000000e+00> : vector<8xf32>
    %223 = vector.multi_reduction <add>, %222, %cst_143 [1] : vector<8x80xf32> to vector<8xf32>
    %224 = vector.shape_cast %223 : vector<8xf32> to vector<8x1xf32>
    %225 = arith.addf %207, %224 : vector<8x1xf32>
    %c0_144 = arith.constant 0 : index
    %c10_145 = arith.constant 10 : index
    %226 = vector.load %arg21[%c0_144, %c10_145] : memref<16x110xbf16, #tpu.memory_space<vmem>>, vector<16x80xbf16>
    %c0_146 = arith.constant 0 : index
    %c11_147 = arith.constant 11 : index
    %227 = vector.load %arg21[%c0_146, %c11_147] : memref<16x110xbf16, #tpu.memory_space<vmem>>, vector<16x80xbf16>
    %c0_148 = arith.constant 0 : index
    %c20 = arith.constant 20 : index
    %228 = vector.load %arg21[%c0_148, %c20] : memref<16x110xbf16, #tpu.memory_space<vmem>>, vector<16x80xbf16>
    %c0_149 = arith.constant 0 : index
    %c21 = arith.constant 21 : index
    %229 = vector.load %arg21[%c0_149, %c21] : memref<16x110xbf16, #tpu.memory_space<vmem>>, vector<16x80xbf16>
    %230 = tpu.concatenate %226, %227, %228, %229 in 0 : vector<16x80xbf16>, vector<16x80xbf16>, vector<16x80xbf16>, vector<16x80xbf16> -> vector<64x80xbf16>
    %c2_150 = arith.constant 2 : index
    %c0_151 = arith.constant 0 : index
    %c0_152 = arith.constant 0 : index
    %231 = vector.load %arg12[%c2_150, %c0_151, %c0_152] : memref<4x8x64xbf16, #tpu.memory_space<vmem>>, vector<1x8x64xbf16>
    %232 = vector.shape_cast %231 : vector<1x8x64xbf16> to vector<8x64xbf16>
    %cst_153 = arith.constant dense<0.000000e+00> : vector<8x80xf32>
    %233 = tpu.matmul %232, %230, %cst_153 {dimension_numbers = #tpu.dot_dimension_numbers<[1], [0], [0], [1], [0, 0, 1, 1], [], []>} : vector<8x64xbf16>, vector<64x80xbf16>, vector<8x80xf32> -> vector<8x80xf32>
    %c0_154 = arith.constant 0 : index
    %c0_155 = arith.constant 0 : index
    %234 = vector.load %arg15[%c0_154, %c0_155] : memref<1x80xf32, #tpu.memory_space<vmem>>, vector<1x80xf32>
    %235 = vector.broadcast %234 : vector<1x80xf32> to vector<8x80xf32>
    %236 = arith.mulf %233, %235 : vector<8x80xf32>
    %cst_156 = arith.constant dense<0.000000e+00> : vector<8xf32>
    %237 = vector.multi_reduction <add>, %236, %cst_156 [1] : vector<8x80xf32> to vector<8xf32>
    %238 = vector.shape_cast %237 : vector<8xf32> to vector<8x1xf32>
    %239 = arith.addf %221, %238 : vector<8x1xf32>
    %240 = arith.mulf %236, %236 : vector<8x80xf32>
    %cst_157 = arith.constant dense<0.000000e+00> : vector<8xf32>
    %241 = vector.multi_reduction <add>, %240, %cst_157 [1] : vector<8x80xf32> to vector<8xf32>
    %242 = vector.shape_cast %241 : vector<8xf32> to vector<8x1xf32>
    %243 = arith.addf %225, %242 : vector<8x1xf32>
    %c0_158 = arith.constant 0 : index
    %c11_159 = arith.constant 11 : index
    %244 = vector.load %arg21[%c0_158, %c11_159] : memref<16x110xbf16, #tpu.memory_space<vmem>>, vector<16x80xbf16>
    %c0_160 = arith.constant 0 : index
    %c12_161 = arith.constant 12 : index
    %245 = vector.load %arg21[%c0_160, %c12_161] : memref<16x110xbf16, #tpu.memory_space<vmem>>, vector<16x80xbf16>
    %c0_162 = arith.constant 0 : index
    %c21_163 = arith.constant 21 : index
    %246 = vector.load %arg21[%c0_162, %c21_163] : memref<16x110xbf16, #tpu.memory_space<vmem>>, vector<16x80xbf16>
    %c0_164 = arith.constant 0 : index
    %c22 = arith.constant 22 : index
    %247 = vector.load %arg21[%c0_164, %c22] : memref<16x110xbf16, #tpu.memory_space<vmem>>, vector<16x80xbf16>
    %248 = tpu.concatenate %244, %245, %246, %247 in 0 : vector<16x80xbf16>, vector<16x80xbf16>, vector<16x80xbf16>, vector<16x80xbf16> -> vector<64x80xbf16>
    %c3_165 = arith.constant 3 : index
    %c0_166 = arith.constant 0 : index
    %c0_167 = arith.constant 0 : index
    %249 = vector.load %arg12[%c3_165, %c0_166, %c0_167] : memref<4x8x64xbf16, #tpu.memory_space<vmem>>, vector<1x8x64xbf16>
    %250 = vector.shape_cast %249 : vector<1x8x64xbf16> to vector<8x64xbf16>
    %cst_168 = arith.constant dense<0.000000e+00> : vector<8x80xf32>
    %251 = tpu.matmul %250, %248, %cst_168 {dimension_numbers = #tpu.dot_dimension_numbers<[1], [0], [0], [1], [0, 0, 1, 1], [], []>} : vector<8x64xbf16>, vector<64x80xbf16>, vector<8x80xf32> -> vector<8x80xf32>
    %c0_169 = arith.constant 0 : index
    %c0_170 = arith.constant 0 : index
    %252 = vector.load %arg15[%c0_169, %c0_170] : memref<1x80xf32, #tpu.memory_space<vmem>>, vector<1x80xf32>
    %253 = vector.broadcast %252 : vector<1x80xf32> to vector<8x80xf32>
    %254 = arith.mulf %251, %253 : vector<8x80xf32>
    %cst_171 = arith.constant dense<0.000000e+00> : vector<8xf32>
    %255 = vector.multi_reduction <add>, %254, %cst_171 [1] : vector<8x80xf32> to vector<8xf32>
    %256 = vector.shape_cast %255 : vector<8xf32> to vector<8x1xf32>
    %257 = arith.addf %239, %256 : vector<8x1xf32>
    %258 = arith.mulf %254, %254 : vector<8x80xf32>
    %cst_172 = arith.constant dense<0.000000e+00> : vector<8xf32>
    %259 = vector.multi_reduction <add>, %258, %cst_172 [1] : vector<8x80xf32> to vector<8xf32>
    %260 = vector.shape_cast %259 : vector<8xf32> to vector<8x1xf32>
    %261 = arith.addf %243, %260 : vector<8x1xf32>
    %cst_173 = arith.constant 3.906250e-03 : f32
    %262 = vector.broadcast %cst_173 : f32 to vector<8x1xf32>
    %263 = arith.mulf %257, %262 : vector<8x1xf32>
    %cst_174 = arith.constant 3.906250e-03 : f32
    %264 = vector.broadcast %cst_174 : f32 to vector<8x1xf32>
    %265 = arith.mulf %261, %264 : vector<8x1xf32>
    %266 = arith.mulf %263, %263 : vector<8x1xf32>
    %267 = arith.subf %265, %266 : vector<8x1xf32>
    %cst_175 = arith.constant 9.99999974E-6 : f32
    %268 = vector.broadcast %cst_175 : f32 to vector<8x1xf32>
    %269 = arith.addf %267, %268 : vector<8x1xf32>
    %270 = math.rsqrt %269 : vector<8x1xf32>
    %c0_176 = arith.constant 0 : index
    %c0_177 = arith.constant 0 : index
    %271 = vector.load %arg13[%c0_176, %c0_177] : memref<8x1xf32, #tpu.memory_space<vmem>>, vector<8x1xf32>
    %272 = arith.mulf %270, %271 : vector<8x1xf32>
    %c0_178 = arith.constant 0 : index
    %c0_179 = arith.constant 0 : index
    %273 = vector.load %arg14[%c0_178, %c0_179] : memref<8x1xf32, #tpu.memory_space<vmem>>, vector<8x1xf32>
    %274 = arith.mulf %263, %272 : vector<8x1xf32>
    %275 = arith.subf %273, %274 : vector<8x1xf32>
    %cst_180 = arith.constant 0.000000e+00 : f32
    %276 = vector.broadcast %cst_180 : f32 to vector<8x342xf32>
    %277 = vector.broadcast %272 : vector<8x1xf32> to vector<8x80xf32>
    %278 = arith.mulf %197, %277 : vector<8x80xf32>
    %279 = vector.broadcast %275 : vector<8x1xf32> to vector<8x80xf32>
    %280 = arith.addf %278, %279 : vector<8x80xf32>
    %cst_181 = arith.constant 0.000000e+00 : f32
    %281 = vector.broadcast %cst_181 : f32 to vector<8x80xf32>
    %282 = arith.cmpf oge, %280, %281 : vector<8x80xf32>
    %cst_182 = arith.constant 0.00999999977 : f32
    %283 = vector.broadcast %cst_182 : f32 to vector<8x80xf32>
    %284 = arith.mulf %283, %280 : vector<8x80xf32>
    %285 = arith.select %282, %280, %284 : vector<8x80xi1>, vector<8x80xf32>
    %286 = arith.truncf %285 : vector<8x80xf32> to vector<8x80xbf16>
    %c0_183 = arith.constant 0 : index
    %c0_184 = arith.constant 0 : index
    %c0_185 = arith.constant 0 : index
    %287 = vector.load %arg16[%c0_183, %c0_184, %c0_185] : memref<4x80x342xbf16, #tpu.memory_space<vmem>>, vector<1x80x342xbf16>
    %288 = vector.shape_cast %287 : vector<1x80x342xbf16> to vector<80x342xbf16>
    %cst_186 = arith.constant dense<0.000000e+00> : vector<8x342xf32>
    %289 = tpu.matmul %286, %288, %cst_186 {dimension_numbers = #tpu.dot_dimension_numbers<[1], [0], [0], [1], [0, 0, 1, 1], [], []>} : vector<8x80xbf16>, vector<80x342xbf16>, vector<8x342xf32> -> vector<8x342xf32>
    %290 = arith.addf %276, %289 : vector<8x342xf32>
    %291 = vector.broadcast %272 : vector<8x1xf32> to vector<8x80xf32>
    %292 = arith.mulf %215, %291 : vector<8x80xf32>
    %293 = vector.broadcast %275 : vector<8x1xf32> to vector<8x80xf32>
    %294 = arith.addf %292, %293 : vector<8x80xf32>
    %cst_187 = arith.constant 0.000000e+00 : f32
    %295 = vector.broadcast %cst_187 : f32 to vector<8x80xf32>
    %296 = arith.cmpf oge, %294, %295 : vector<8x80xf32>
    %cst_188 = arith.constant 0.00999999977 : f32
    %297 = vector.broadcast %cst_188 : f32 to vector<8x80xf32>
    %298 = arith.mulf %297, %294 : vector<8x80xf32>
    %299 = arith.select %296, %294, %298 : vector<8x80xi1>, vector<8x80xf32>
    %300 = arith.truncf %299 : vector<8x80xf32> to vector<8x80xbf16>
    %c1_189 = arith.constant 1 : index
    %c0_190 = arith.constant 0 : index
    %c0_191 = arith.constant 0 : index
    %301 = vector.load %arg16[%c1_189, %c0_190, %c0_191] : memref<4x80x342xbf16, #tpu.memory_space<vmem>>, vector<1x80x342xbf16>
    %302 = vector.shape_cast %301 : vector<1x80x342xbf16> to vector<80x342xbf16>
    %cst_192 = arith.constant dense<0.000000e+00> : vector<8x342xf32>
    %303 = tpu.matmul %300, %302, %cst_192 {dimension_numbers = #tpu.dot_dimension_numbers<[1], [0], [0], [1], [0, 0, 1, 1], [], []>} : vector<8x80xbf16>, vector<80x342xbf16>, vector<8x342xf32> -> vector<8x342xf32>
    %304 = arith.addf %290, %303 : vector<8x342xf32>
    %305 = vector.broadcast %272 : vector<8x1xf32> to vector<8x80xf32>
    %306 = arith.mulf %233, %305 : vector<8x80xf32>
    %307 = vector.broadcast %275 : vector<8x1xf32> to vector<8x80xf32>
    %308 = arith.addf %306, %307 : vector<8x80xf32>
    %cst_193 = arith.constant 0.000000e+00 : f32
    %309 = vector.broadcast %cst_193 : f32 to vector<8x80xf32>
    %310 = arith.cmpf oge, %308, %309 : vector<8x80xf32>
    %cst_194 = arith.constant 0.00999999977 : f32
    %311 = vector.broadcast %cst_194 : f32 to vector<8x80xf32>
    %312 = arith.mulf %311, %308 : vector<8x80xf32>
    %313 = arith.select %310, %308, %312 : vector<8x80xi1>, vector<8x80xf32>
    %314 = arith.truncf %313 : vector<8x80xf32> to vector<8x80xbf16>
    %c2_195 = arith.constant 2 : index
    %c0_196 = arith.constant 0 : index
    %c0_197 = arith.constant 0 : index
    %315 = vector.load %arg16[%c2_195, %c0_196, %c0_197] : memref<4x80x342xbf16, #tpu.memory_space<vmem>>, vector<1x80x342xbf16>
    %316 = vector.shape_cast %315 : vector<1x80x342xbf16> to vector<80x342xbf16>
    %cst_198 = arith.constant dense<0.000000e+00> : vector<8x342xf32>
    %317 = tpu.matmul %314, %316, %cst_198 {dimension_numbers = #tpu.dot_dimension_numbers<[1], [0], [0], [1], [0, 0, 1, 1], [], []>} : vector<8x80xbf16>, vector<80x342xbf16>, vector<8x342xf32> -> vector<8x342xf32>
    %318 = arith.addf %304, %317 : vector<8x342xf32>
    %319 = vector.broadcast %272 : vector<8x1xf32> to vector<8x80xf32>
    %320 = arith.mulf %251, %319 : vector<8x80xf32>
    %321 = vector.broadcast %275 : vector<8x1xf32> to vector<8x80xf32>
    %322 = arith.addf %320, %321 : vector<8x80xf32>
    %cst_199 = arith.constant 0.000000e+00 : f32
    %323 = vector.broadcast %cst_199 : f32 to vector<8x80xf32>
    %324 = arith.cmpf oge, %322, %323 : vector<8x80xf32>
    %cst_200 = arith.constant 0.00999999977 : f32
    %325 = vector.broadcast %cst_200 : f32 to vector<8x80xf32>
    %326 = arith.mulf %325, %322 : vector<8x80xf32>
    %327 = arith.select %324, %322, %326 : vector<8x80xi1>, vector<8x80xf32>
    %328 = arith.truncf %327 : vector<8x80xf32> to vector<8x80xbf16>
    %c3_201 = arith.constant 3 : index
    %c0_202 = arith.constant 0 : index
    %c0_203 = arith.constant 0 : index
    %329 = vector.load %arg16[%c3_201, %c0_202, %c0_203] : memref<4x80x342xbf16, #tpu.memory_space<vmem>>, vector<1x80x342xbf16>
    %330 = vector.shape_cast %329 : vector<1x80x342xbf16> to vector<80x342xbf16>
    %cst_204 = arith.constant dense<0.000000e+00> : vector<8x342xf32>
    %331 = tpu.matmul %328, %330, %cst_204 {dimension_numbers = #tpu.dot_dimension_numbers<[1], [0], [0], [1], [0, 0, 1, 1], [], []>} : vector<8x80xbf16>, vector<80x342xbf16>, vector<8x342xf32> -> vector<8x342xf32>
    %332 = arith.addf %318, %331 : vector<8x342xf32>
    %333 = arith.truncf %332 : vector<8x342xf32> to vector<8x342xbf16>
    %c0_205 = arith.constant 0 : index
    %c0_206 = arith.constant 0 : index
    %334 = vector.load %arg22[%c0_205, %c0_206] : memref<8x342xbf16, #tpu.memory_space<vmem>>, vector<8x342xbf16>
    tpu.vector_store %arg22[%c0_205, %c0_206], %333 {strides = array<i32>} : memref<8x342xbf16, #tpu.memory_space<vmem>>, vector<8x342xbf16>,
    %c0_207 = arith.constant 0 : index
    %c0_208 = arith.constant 0 : index
    %335 = vector.load %arg22[%c0_207, %c0_208] : memref<8x342xbf16, #tpu.memory_space<vmem>>, vector<8x288xbf16>
    %c0_209 = arith.constant 0 : index
    %c1_210 = arith.constant 1 : index
    %336 = vector.load %arg22[%c0_209, %c1_210] : memref<8x342xbf16, #tpu.memory_space<vmem>>, vector<8x288xbf16>
    %c0_211 = arith.constant 0 : index
    %c18 = arith.constant 18 : index
    %337 = vector.load %arg22[%c0_211, %c18] : memref<8x342xbf16, #tpu.memory_space<vmem>>, vector<8x288xbf16>
    %c0_212 = arith.constant 0 : index
    %c19 = arith.constant 19 : index
    %338 = vector.load %arg22[%c0_212, %c19] : memref<8x342xbf16, #tpu.memory_space<vmem>>, vector<8x288xbf16>
    %339 = tpu.concatenate %335, %336, %337, %338 in 0 : vector<8x288xbf16>, vector<8x288xbf16>, vector<8x288xbf16>, vector<8x288xbf16> -> vector<32x288xbf16>
    %c0_213 = arith.constant 0 : index
    %c0_214 = arith.constant 0 : index
    %c0_215 = arith.constant 0 : index
    %340 = vector.load %arg17[%c0_213, %c0_214, %c0_215] : memref<4x3x32xbf16, #tpu.memory_space<vmem>>, vector<1x3x32xbf16>
    %341 = vector.shape_cast %340 : vector<1x3x32xbf16> to vector<3x32xbf16>
    %cst_216 = arith.constant dense<0.000000e+00> : vector<3x288xf32>
    %342 = tpu.matmul %341, %339, %cst_216 {dimension_numbers = #tpu.dot_dimension_numbers<[1], [0], [0], [1], [0, 0, 1, 1], [], []>} : vector<3x32xbf16>, vector<32x288xbf16>, vector<3x288xf32> -> vector<3x288xf32>
    %c0_217 = arith.constant 0 : index
    %c1_218 = arith.constant 1 : index
    %343 = vector.load %arg22[%c0_217, %c1_218] : memref<8x342xbf16, #tpu.memory_space<vmem>>, vector<8x288xbf16>
    %c0_219 = arith.constant 0 : index
    %c2_220 = arith.constant 2 : index
    %344 = vector.load %arg22[%c0_219, %c2_220] : memref<8x342xbf16, #tpu.memory_space<vmem>>, vector<8x288xbf16>
    %c0_221 = arith.constant 0 : index
    %c19_222 = arith.constant 19 : index
    %345 = vector.load %arg22[%c0_221, %c19_222] : memref<8x342xbf16, #tpu.memory_space<vmem>>, vector<8x288xbf16>
    %c0_223 = arith.constant 0 : index
    %c20_224 = arith.constant 20 : index
    %346 = vector.load %arg22[%c0_223, %c20_224] : memref<8x342xbf16, #tpu.memory_space<vmem>>, vector<8x288xbf16>
    %347 = tpu.concatenate %343, %344, %345, %346 in 0 : vector<8x288xbf16>, vector<8x288xbf16>, vector<8x288xbf16>, vector<8x288xbf16> -> vector<32x288xbf16>
    %c1_225 = arith.constant 1 : index
    %c0_226 = arith.constant 0 : index
    %c0_227 = arith.constant 0 : index
    %348 = vector.load %arg17[%c1_225, %c0_226, %c0_227] : memref<4x3x32xbf16, #tpu.memory_space<vmem>>, vector<1x3x32xbf16>
    %349 = vector.shape_cast %348 : vector<1x3x32xbf16> to vector<3x32xbf16>
    %cst_228 = arith.constant dense<0.000000e+00> : vector<3x288xf32>
    %350 = tpu.matmul %349, %347, %cst_228 {dimension_numbers = #tpu.dot_dimension_numbers<[1], [0], [0], [1], [0, 0, 1, 1], [], []>} : vector<3x32xbf16>, vector<32x288xbf16>, vector<3x288xf32> -> vector<3x288xf32>
    %c0_229 = arith.constant 0 : index
    %c18_230 = arith.constant 18 : index
    %351 = vector.load %arg22[%c0_229, %c18_230] : memref<8x342xbf16, #tpu.memory_space<vmem>>, vector<8x288xbf16>
    %c0_231 = arith.constant 0 : index
    %c19_232 = arith.constant 19 : index
    %352 = vector.load %arg22[%c0_231, %c19_232] : memref<8x342xbf16, #tpu.memory_space<vmem>>, vector<8x288xbf16>
    %c0_233 = arith.constant 0 : index
    %c36 = arith.constant 36 : index
    %353 = vector.load %arg22[%c0_233, %c36] : memref<8x342xbf16, #tpu.memory_space<vmem>>, vector<8x288xbf16>
    %c0_234 = arith.constant 0 : index
    %c37 = arith.constant 37 : index
    %354 = vector.load %arg22[%c0_234, %c37] : memref<8x342xbf16, #tpu.memory_space<vmem>>, vector<8x288xbf16>
    %355 = tpu.concatenate %351, %352, %353, %354 in 0 : vector<8x288xbf16>, vector<8x288xbf16>, vector<8x288xbf16>, vector<8x288xbf16> -> vector<32x288xbf16>
    %c2_235 = arith.constant 2 : index
    %c0_236 = arith.constant 0 : index
    %c0_237 = arith.constant 0 : index
    %356 = vector.load %arg17[%c2_235, %c0_236, %c0_237] : memref<4x3x32xbf16, #tpu.memory_space<vmem>>, vector<1x3x32xbf16>
    %357 = vector.shape_cast %356 : vector<1x3x32xbf16> to vector<3x32xbf16>
    %cst_238 = arith.constant dense<0.000000e+00> : vector<3x288xf32>
    %358 = tpu.matmul %357, %355, %cst_238 {dimension_numbers = #tpu.dot_dimension_numbers<[1], [0], [0], [1], [0, 0, 1, 1], [], []>} : vector<3x32xbf16>, vector<32x288xbf16>, vector<3x288xf32> -> vector<3x288xf32>
    %c0_239 = arith.constant 0 : index
    %c19_240 = arith.constant 19 : index
    %359 = vector.load %arg22[%c0_239, %c19_240] : memref<8x342xbf16, #tpu.memory_space<vmem>>, vector<8x288xbf16>
    %c0_241 = arith.constant 0 : index
    %c20_242 = arith.constant 20 : index
    %360 = vector.load %arg22[%c0_241, %c20_242] : memref<8x342xbf16, #tpu.memory_space<vmem>>, vector<8x288xbf16>
    %c0_243 = arith.constant 0 : index
    %c37_244 = arith.constant 37 : index
    %361 = vector.load %arg22[%c0_243, %c37_244] : memref<8x342xbf16, #tpu.memory_space<vmem>>, vector<8x288xbf16>
    %c0_245 = arith.constant 0 : index
    %c38 = arith.constant 38 : index
    %362 = vector.load %arg22[%c0_245, %c38] : memref<8x342xbf16, #tpu.memory_space<vmem>>, vector<8x288xbf16>
    %363 = tpu.concatenate %359, %360, %361, %362 in 0 : vector<8x288xbf16>, vector<8x288xbf16>, vector<8x288xbf16>, vector<8x288xbf16> -> vector<32x288xbf16>
    %c3_246 = arith.constant 3 : index
    %c0_247 = arith.constant 0 : index
    %c0_248 = arith.constant 0 : index
    %364 = vector.load %arg17[%c3_246, %c0_247, %c0_248] : memref<4x3x32xbf16, #tpu.memory_space<vmem>>, vector<1x3x32xbf16>
    %365 = vector.shape_cast %364 : vector<1x3x32xbf16> to vector<3x32xbf16>
    %cst_249 = arith.constant dense<0.000000e+00> : vector<3x288xf32>
    %366 = tpu.matmul %365, %363, %cst_249 {dimension_numbers = #tpu.dot_dimension_numbers<[1], [0], [0], [1], [0, 0, 1, 1], [], []>} : vector<3x32xbf16>, vector<32x288xbf16>, vector<3x288xf32> -> vector<3x288xf32>
    %cst_250 = arith.constant 0.000000e+00 : f32
    %367 = vector.broadcast %cst_250 : f32 to vector<3x1024xf32>
    %368 = math.tanh %342 : vector<3x288xf32>
    %c0_251 = arith.constant 0 : index
    %c0_252 = arith.constant 0 : index
    %c0_253 = arith.constant 0 : index
    %369 = vector.load %arg18[%c0_251, %c0_252, %c0_253] : memref<4x288x1024xf32, #tpu.memory_space<vmem>>, vector<1x288x1024xf32>
    %370 = vector.shape_cast %369 : vector<1x288x1024xf32> to vector<288x1024xf32>
    %cst_254 = arith.constant dense<0.000000e+00> : vector<3x1024xf32>
    %371 = tpu.matmul %368, %370, %cst_254 {dimension_numbers = #tpu.dot_dimension_numbers<[1], [0], [0], [1], [0, 0, 1, 1], [], []>} : vector<3x288xf32>, vector<288x1024xf32>, vector<3x1024xf32> -> vector<3x1024xf32>
    %372 = arith.addf %367, %371 : vector<3x1024xf32>
    %373 = math.tanh %350 : vector<3x288xf32>
    %c1_255 = arith.constant 1 : index
    %c0_256 = arith.constant 0 : index
    %c0_257 = arith.constant 0 : index
    %374 = vector.load %arg18[%c1_255, %c0_256, %c0_257] : memref<4x288x1024xf32, #tpu.memory_space<vmem>>, vector<1x288x1024xf32>
    %375 = vector.shape_cast %374 : vector<1x288x1024xf32> to vector<288x1024xf32>
    %cst_258 = arith.constant dense<0.000000e+00> : vector<3x1024xf32>
    %376 = tpu.matmul %373, %375, %cst_258 {dimension_numbers = #tpu.dot_dimension_numbers<[1], [0], [0], [1], [0, 0, 1, 1], [], []>} : vector<3x288xf32>, vector<288x1024xf32>, vector<3x1024xf32> -> vector<3x1024xf32>
    %377 = arith.addf %372, %376 : vector<3x1024xf32>
    %378 = math.tanh %358 : vector<3x288xf32>
    %c2_259 = arith.constant 2 : index
    %c0_260 = arith.constant 0 : index
    %c0_261 = arith.constant 0 : index
    %379 = vector.load %arg18[%c2_259, %c0_260, %c0_261] : memref<4x288x1024xf32, #tpu.memory_space<vmem>>, vector<1x288x1024xf32>
    %380 = vector.shape_cast %379 : vector<1x288x1024xf32> to vector<288x1024xf32>
    %cst_262 = arith.constant dense<0.000000e+00> : vector<3x1024xf32>
    %381 = tpu.matmul %378, %380, %cst_262 {dimension_numbers = #tpu.dot_dimension_numbers<[1], [0], [0], [1], [0, 0, 1, 1], [], []>} : vector<3x288xf32>, vector<288x1024xf32>, vector<3x1024xf32> -> vector<3x1024xf32>
    %382 = arith.addf %377, %381 : vector<3x1024xf32>
    %383 = math.tanh %366 : vector<3x288xf32>
    %c3_263 = arith.constant 3 : index
    %c0_264 = arith.constant 0 : index
    %c0_265 = arith.constant 0 : index
    %384 = vector.load %arg18[%c3_263, %c0_264, %c0_265] : memref<4x288x1024xf32, #tpu.memory_space<vmem>>, vector<1x288x1024xf32>
    %385 = vector.shape_cast %384 : vector<1x288x1024xf32> to vector<288x1024xf32>
    %cst_266 = arith.constant dense<0.000000e+00> : vector<3x1024xf32>
    %386 = tpu.matmul %383, %385, %cst_266 {dimension_numbers = #tpu.dot_dimension_numbers<[1], [0], [0], [1], [0, 0, 1, 1], [], []>} : vector<3x288xf32>, vector<288x1024xf32>, vector<3x1024xf32> -> vector<3x1024xf32>
    %387 = arith.addf %382, %386 : vector<3x1024xf32>
    %c0_267 = arith.constant 0 : index
    %c0_268 = arith.constant 0 : index
    %c0_269 = arith.constant 0 : index
    %388 = vector.load %arg19[%c0_267, %c0_268, %c0_269] : memref<1x3x1024xf32, #tpu.memory_space<vmem>>, vector<1x3x1024xf32>
    %389 = vector.shape_cast %388 : vector<1x3x1024xf32> to vector<3x1024xf32>
    %390 = vector.shape_cast %387 : vector<3x1024xf32> to vector<1x3x1024xf32>
    tpu.vector_store %arg19[%c0_267, %c0_268, %c0_269], %390 {strides = array<i32>} : memref<1x3x1024xf32, #tpu.memory_space<vmem>>, vector<1x3x1024xf32>,
    return
  }
  func.func @transform_0(%arg0: i32) -> (i32, i32, i32) {
    %c0_i32 = arith.constant 0 : i32
    %c0_i32_0 = arith.constant 0 : i32
    %c0_i32_1 = arith.constant 0 : i32
    return %arg0, %c0_i32, %c0_i32_0 : i32, i32, i32
  }
  func.func @transform_1(%arg0: i32) -> (i32, i32) {
    %c0_i32 = arith.constant 0 : i32
    %c0_i32_0 = arith.constant 0 : i32
    %c0_i32_1 = arith.constant 0 : i32
    return %c0_i32, %c0_i32_0 : i32, i32
  }
  func.func @transform_2(%arg0: i32) -> (i32, i32) {
    %c0_i32 = arith.constant 0 : i32
    %c0_i32_0 = arith.constant 0 : i32
    %c0_i32_1 = arith.constant 0 : i32
    return %c0_i32, %c0_i32_0 : i32, i32
  }
  func.func @transform_3(%arg0: i32) -> (i32, i32) {
    %c0_i32 = arith.constant 0 : i32
    %c0_i32_0 = arith.constant 0 : i32
    %c0_i32_1 = arith.constant 0 : i32
    return %c0_i32, %c0_i32_0 : i32, i32
  }
  func.func @transform_4(%arg0: i32) -> (i32, i32) {
    %c0_i32 = arith.constant 0 : i32
    %c0_i32_0 = arith.constant 0 : i32
    %c0_i32_1 = arith.constant 0 : i32
    return %c0_i32, %c0_i32_0 : i32, i32
  }
  func.func @transform_5(%arg0: i32) -> (i32, i32) {
    %c0_i32 = arith.constant 0 : i32
    %c0_i32_0 = arith.constant 0 : i32
    %c0_i32_1 = arith.constant 0 : i32
    return %c0_i32, %c0_i32_0 : i32, i32
  }
  func.func @transform_6(%arg0: i32) -> (i32, i32, i32) {
    %c0_i32 = arith.constant 0 : i32
    %c0_i32_0 = arith.constant 0 : i32
    %c0_i32_1 = arith.constant 0 : i32
    %c0_i32_2 = arith.constant 0 : i32
    return %c0_i32, %c0_i32_0, %c0_i32_1 : i32, i32, i32
  }
  func.func @transform_7(%arg0: i32) -> (i32, i32) {
    %c0_i32 = arith.constant 0 : i32
    %c0_i32_0 = arith.constant 0 : i32
    %c0_i32_1 = arith.constant 0 : i32
    return %c0_i32, %c0_i32_0 : i32, i32
  }
  func.func @transform_8(%arg0: i32) -> (i32, i32) {
    %c0_i32 = arith.constant 0 : i32
    %c0_i32_0 = arith.constant 0 : i32
    %c0_i32_1 = arith.constant 0 : i32
    return %c0_i32, %c0_i32_0 : i32, i32
  }
  func.func @transform_9(%arg0: i32) -> (i32, i32) {
    %c0_i32 = arith.constant 0 : i32
    %c0_i32_0 = arith.constant 0 : i32
    %c0_i32_1 = arith.constant 0 : i32
    return %c0_i32, %c0_i32_0 : i32, i32
  }
  func.func @transform_10(%arg0: i32) -> (i32, i32, i32) {
    %c0_i32 = arith.constant 0 : i32
    %c0_i32_0 = arith.constant 0 : i32
    %c0_i32_1 = arith.constant 0 : i32
    %c0_i32_2 = arith.constant 0 : i32
    return %c0_i32, %c0_i32_0, %c0_i32_1 : i32, i32, i32
  }
  func.func @transform_11(%arg0: i32) -> (i32, i32, i32) {
    %c0_i32 = arith.constant 0 : i32
    %c0_i32_0 = arith.constant 0 : i32
    %c0_i32_1 = arith.constant 0 : i32
    %c0_i32_2 = arith.constant 0 : i32
    return %c0_i32, %c0_i32_0, %c0_i32_1 : i32, i32, i32
  }
  func.func @transform_12(%arg0: i32) -> (i32, i32) {
    %c0_i32 = arith.constant 0 : i32
    %c0_i32_0 = arith.constant 0 : i32
    %c0_i32_1 = arith.constant 0 : i32
    return %c0_i32, %c0_i32_0 : i32, i32
  }
  func.func @transform_13(%arg0: i32) -> (i32, i32) {
    %c0_i32 = arith.constant 0 : i32
    %c0_i32_0 = arith.constant 0 : i32
    %c0_i32_1 = arith.constant 0 : i32
    return %c0_i32, %c0_i32_0 : i32, i32
  }
  func.func @transform_14(%arg0: i32) -> (i32, i32) {
    %c0_i32 = arith.constant 0 : i32
    %c0_i32_0 = arith.constant 0 : i32
    %c0_i32_1 = arith.constant 0 : i32
    return %c0_i32, %c0_i32_0 : i32, i32
  }
  func.func @transform_15(%arg0: i32) -> (i32, i32, i32) {
    %c0_i32 = arith.constant 0 : i32
    %c0_i32_0 = arith.constant 0 : i32
    %c0_i32_1 = arith.constant 0 : i32
    %c0_i32_2 = arith.constant 0 : i32
    return %c0_i32, %c0_i32_0, %c0_i32_1 : i32, i32, i32
  }
  func.func @transform_16(%arg0: i32) -> (i32, i32, i32) {
    %c0_i32 = arith.constant 0 : i32
    %c0_i32_0 = arith.constant 0 : i32
    %c0_i32_1 = arith.constant 0 : i32
    %c0_i32_2 = arith.constant 0 : i32
    return %c0_i32, %c0_i32_0, %c0_i32_1 : i32, i32, i32
  }
  func.func @transform_17(%arg0: i32) -> (i32, i32, i32) {
    %c0_i32 = arith.constant 0 : i32
    %c0_i32_0 = arith.constant 0 : i32
    %c0_i32_1 = arith.constant 0 : i32
    %c0_i32_2 = arith.constant 0 : i32
    return %c0_i32, %c0_i32_0, %c0_i32_1 : i32, i32, i32
  }
  func.func @transform_18(%arg0: i32) -> (i32, i32, i32) {
    %c0_i32 = arith.constant 0 : i32
    %c0_i32_0 = arith.constant 0 : i32
    %c0_i32_1 = arith.constant 0 : i32
    return %arg0, %c0_i32, %c0_i32_0 : i32, i32, i32
  }
}

</mosaic_0001>

<bundles_post_ra>
// kernel: forward.1
= control target key start
LH: loop header
LB: loop body
LE: loop exit
PB: predicated region body
PF: predicated region fallthrough
CT: control target
= control target key end

     0   :  { %s10978_s0 = inlined_call_operand.vmem [shape: f32[2,128,1], index: 0, kind: input, shape index: {}]   ;;  %s10979_s1 = inlined_call_operand.hbm [shape: f32[128,42], index: 1, kind: input, shape index: {}]   ;;  %s10980_s2 = inlined_call_operand.hbm [shape: f32[1,42], index: 2, kind: input, shape index: {}]   ;;  %s10981_s3 = inlined_call_operand.hbm [shape: bf16[32,128], index: 3, kind: input, shape index: {}]   ;;  %s10982_s4 = inlined_call_operand.hbm [shape: f32[32,1], index: 4, kind: input, shape index: {}]   ;;  %s10983_s5 = inlined_call_operand.hbm [shape: f32[32,1], index: 5, kind: input, shape index: {}]   ;;  %s10984_s6 = inlined_call_operand.hbm [shape: bf16[4,16,128], index: 6, kind: input, shape index: {}]   ;;  %s10985_s7 = inlined_call_operand.hbm [shape: f32[16,1], index: 7, kind: input, shape index: {}]   ;;  %s10986_s8 = inlined_call_operand.hbm [shape: f32[16,1], index: 8, kind: input, shape index: {}]   ;;  %s10987_s9 = inlined_call_operand.hbm [shape: f32[1,24], index: 9, kind: input, shape index: {}]   ;;  %s10988_s10 = inlined_call_operand.hbm [shape: bf16[4,24,110], index: 10, kind: input, shape index: {}]   ;;  %s10989_s11 = inlined_call_operand.hbm [shape: bf16[4,8,64], index: 11, kind: input, shape index: {}]   ;;  %s10990_s12 = inlined_call_operand.hbm [shape: f32[8,1], index: 12, kind: input, shape index: {}]   ;;  %s10991_s13 = inlined_call_operand.hbm [shape: f32[8,1], index: 13, kind: input, shape index: {}]   ;;  %s10992_s14 = inlined_call_operand.hbm [shape: f32[1,80], index: 14, kind: input, shape index: {}]   ;;  %s10993_s15 = inlined_call_operand.vmem [shape: bf16[4,80,342], index: 15, kind: input, shape index: {}]   ;;  %s10994_s16 = inlined_call_operand.hbm [shape: bf16[4,3,32], index: 16, kind: input, shape index: {}]   ;;  %s10995_s17 = inlined_call_operand.hbm [shape: f32[4,288,1024], index: 17, kind: input, shape index: {}]   ;;  %s10996_s18 = inlined_call_operand.vmem [shape: f32[2,3,1024], index: 18, kind: output, shape index: {}]  }
   0x1   :  { %11015 = sst [smem:[#allocation42_spill]] %s10978_s0 }
   0x2   :  { %11016 = sst [smem:[#allocation43_spill]] %s10979_s1 }
   0x3   :  { %11017 = sst [smem:[#allocation44_spill]] %s10980_s2 }
   0x4   :  { %11018 = sst [smem:[#allocation45_spill]] %s10982_s4 }
   0x5   :  { %11019 = sst [smem:[#allocation46_spill]] %s10984_s6 }
   0x6   :  { %11020 = sst [smem:[#allocation47_spill]] %s10986_s8 }
   0x7   :  { %11021 = sst [smem:[#allocation48_spill]] %s10993_s15 }
   0x8   :  { %11022 = sst [smem:[#allocation49_spill]] %s10996_s18 }
   0x9   :  { %23 = vsyncpa [#allocation6], 0 }
   0xa   :  { %24 = vsyncpa [#allocation8], 0 }
   0xb   :  { %25 = vsyncpa [#allocation11], 0 }
   0xc   :  { %26 = vsyncpa [#allocation14], 0 }
   0xd   :  { %27 = vsyncpa [#allocation17], 0 }
   0xe   :  { %28 = vsyncpa [#allocation20], 0 }
   0xf   :  { %29 = vsyncpa [#allocation23], 0 }
  0x10   :  { %30 = vsyncpa [#allocation26], 0 }
  0x11   :  { %31 = vsyncpa [#allocation29], 0  ;;  %s9889_s27 = smov 0  }
  0x12 LB: > { %11023 = sst [smem:[#allocation39_spill]] %s9759_s27  ;;  %s9761_s28 = smov [#allocation7]   ;;  %s9759_s27 = sphi %s9889_s27, %s37_s27  }
  0x13   : > { %s477_s29 = sshll.u32 %s9761_s28, 4  ;;  %s9895_s30 = sadd.s32 4294967295, %s9759_s27   ;;  %s478_s29 = int_to_ptr.vmem [resolvable:$true] %s477_s29 }
  0x14   : > { %11024 = sst [smem:[#allocation40_spill]] %s9895_s30  ;;  %p7093_p0 = scmp.ge.s32.totalorder %s9759_s27, 1 }
  0x15   : > { %p451_p1 = scmp.lt.s32.totalorder %s9759_s27, 3  ;;  %p11000_p2 = scmp.eq.s32.totalorder %s9895_s30, 0 }
  0x16   : > { %s9762_s19 = smov [#allocation10]   ;;  %s9763_s21 = smov [#allocation13]  }
  0x17   : > { %p9900_p3 = pnand %p7093_p0, %p451_p1  ;;  %s500_s1 = sshll.u32 %s9762_s19, 4  ;;  %s9906_s1 = int_to_ptr.vmem [resolvable:$true] %s500_s1 }
  0x18   : > { %s9914_s22 = sshll.u32 %s9763_s21, 4  ;;  %s11028_s24 = sld [smem:[#allocation44_spill]]  ;;  %s527_s22 = int_to_ptr.vmem [resolvable:$true] %s9914_s22 }
  0x19   : > { %s11025_s0 = scalar_select %p9900_p3, 1, 0 }
  0x1a   : > { %p9010_p4 = pneg %p9900_p3 }
  0x1b   : > { %11026 = sst [smem:[#allocation41_spill]] %s11025_s0 }
  0x1c   : > { %p9910_p5 = pnand %p11000_p2, %p9010_p4 }
  0x1e   : > { %s9269_s25 = scalar_lea.hbm %s11028_s24, 16  ;;  %p9924_p7 = pneg %p9910_p5 }
  0x1f   : > { %p9270_p6 = scmp.ne.s32.totalorder %s11028_s24, %s9269_s25  ;;  %p9276_p10 = scmp.lt.u32.totalorder %s9269_s25, %s11028_s24 }
  0x21   : > { %p9272_p8 = pnand %p9924_p7, %p9270_p6 }
  0x23   : > { %p9273_p9 = pneg %p9272_p8 }
  0x25   : > { %p9278_p11 = pnand %p9276_p10, %p9273_p9 }
  0x27   : > { %9281 = shalt.err (!%p9278_p11)
}
  0x28   : > { %s9282_s2 = scalar_lea.vmem %s478_s29, 16  ;;  %s9289_s23 = scalar_lea.vmem %s478_s29, 32 }
  0x29   : > { %p9283_p12 = scmp.ne.s32.totalorder %s478_s29, %s9282_s2  ;;  %p9290_p1 = scmp.lt.s32.totalorder %s478_s29, %s478_s29 }
  0x2a   : > { %p9291_p4 = scmp.lt.s32.totalorder %s9289_s23, %s9282_s2 }
  0x2b   : > { %p9285_p13 = pnand %p9283_p12, %p9924_p7 }
  0x2c   : > { %p9292_p2 = por %p9291_p4, %p9290_p1 }
  0x2d   : > { %p9286_p0 = pneg %p9285_p13 }
  0x2f   : > { %p9293_p3 = pnand %p9292_p2, %p9286_p0 }
  0x31   : > { %9296 = shalt.err (!%p9293_p3)
}
  0x32   : > { %9016 = dma.hbm_to_vmem [thread:$0]  (!%p9910_p5), %s11028_s24, 16, %s478_s29, [#allocation8]  }
  0x33   : > { %s11030_s4 = sld [smem:[#allocation45_spill]] }
  0x39   : > { %s9297_s21 = scalar_lea.hbm %s11030_s4, 512 }
  0x3a   : > { %p9298_p6 = scmp.ne.s32.totalorder %s11030_s4, %s9297_s21  ;;  %p9304_p2 = scmp.lt.u32.totalorder %s9297_s21, %s11030_s4 }
  0x3c   : > { %p9300_p8 = pnand %p9298_p6, %p9924_p7 }
  0x3e   : > { %p9301_p9 = pneg %p9300_p8 }
  0x40   : > { %p9306_p3 = pnand %p9304_p2, %p9301_p9 }
  0x42   : > { %9309 = shalt.err (!%p9306_p3)
}
  0x43   : > { %s9310_s29 = scalar_lea.vmem %s9906_s1, 512  ;;  %p9318_p13 = scmp.lt.s32.totalorder %s9906_s1, %s9906_s1 }
  0x44   : > { %p9311_p10 = scmp.ne.s32.totalorder %s9906_s1, %s9310_s29  ;;  %p9319_p0 = scmp.lt.s32.totalorder %s9310_s29, %s9310_s29 }
  0x46   : > { %p9313_p11 = pnand %p9311_p10, %p9924_p7  ;;  %p9320_p1 = por %p9319_p0, %p9318_p13 }
  0x48   : > { %p9314_p12 = pneg %p9313_p11 }
  0x4a   : > { %p9321_p4 = pnand %p9320_p1, %p9314_p12 }
  0x4c   : > { %9324 = shalt.err (!%p9321_p4)
}
  0x4d   : > { %s11011_s15 = smov 128   ;;  %s11013_s18 = smov 8  }
  0x4e   : > { %9022 = dma.hbm_to_vmem [thread:$0]  (!%p9910_p5), %s11030_s4, 512, %s9906_s1, [#allocation11], %s11011_s15, %s11011_s15, %s11013_s18  }
  0x4f   : > { %s9766_s27 = smov [#allocation16]   ;;  %s11031_s6 = sld [smem:[#allocation46_spill]] }
  0x50   : > { %s552_s25 = sshll.u32 %s9766_s27, 4  ;;  %s553_s25 = int_to_ptr.vmem [resolvable:$true] %s552_s25 }
  0x55   : > { %s9325_s23 = scalar_lea.hbm %s11031_s6, 512 }
  0x56   : > { %p9326_p6 = scmp.ne.s32.totalorder %s11031_s6, %s9325_s23  ;;  %p9332_p2 = scmp.lt.u32.totalorder %s9325_s23, %s11031_s6 }
  0x58   : > { %p9328_p8 = pnand %p9326_p6, %p9924_p7 }
  0x5a   : > { %p9329_p9 = pneg %p9328_p8 }
  0x5c   : > { %p9334_p3 = pnand %p9332_p2, %p9329_p9 }
  0x5e   : > { %9337 = shalt.err (!%p9334_p3)
}
  0x5f   : > { %s9338_s1 = scalar_lea.vmem %s527_s22, 512  ;;  %p9346_p13 = scmp.lt.s32.totalorder %s527_s22, %s527_s22 }
  0x60   : > { %p9339_p10 = scmp.ne.s32.totalorder %s527_s22, %s9338_s1  ;;  %p9347_p0 = scmp.lt.s32.totalorder %s9338_s1, %s9338_s1 }
  0x62   : > { %p9341_p11 = pnand %p9339_p10, %p9924_p7  ;;  %p9348_p1 = por %p9347_p0, %p9346_p13 }
  0x64   : > { %p9342_p12 = pneg %p9341_p11 }
  0x66   : > { %p9349_p4 = pnand %p9348_p1, %p9342_p12 }
  0x68   : > { %9352 = shalt.err (!%p9349_p4)
}
  0x69   : > { %s11007_s24 = smov 64   ;;  %s11009_s26 = smov 4  }
  0x6a   : > { %9028 = dma.hbm_to_vmem [thread:$0]  (!%p9910_p5), %s11031_s6, 512, %s527_s22, [#allocation14], %s11007_s24, %s11007_s24, %s11009_s26  }
  0x6b   : > { %s11032_s8 = sld [smem:[#allocation47_spill]] }
  0x71   : > { %s9353_s21 = scalar_lea.hbm %s11032_s8, 256 }
  0x72   : > { %p9354_p6 = scmp.ne.s32.totalorder %s11032_s8, %s9353_s21  ;;  %p9360_p2 = scmp.lt.u32.totalorder %s9353_s21, %s11032_s8 }
  0x74   : > { %p9356_p8 = pnand %p9354_p6, %p9924_p7 }
  0x76   : > { %p9357_p9 = pneg %p9356_p8 }
  0x78   : > { %p9362_p3 = pnand %p9360_p2, %p9357_p9 }
  0x7a   : > { %9365 = shalt.err (!%p9362_p3)
}
  0x7b   : > { %s9366_s30 = scalar_lea.vmem %s553_s25, 256  ;;  %p9374_p13 = scmp.lt.s32.totalorder %s553_s25, %s553_s25 }
  0x7c   : > { %p9367_p10 = scmp.ne.s32.totalorder %s553_s25, %s9366_s30  ;;  %p9375_p0 = scmp.lt.s32.totalorder %s9366_s30, %s9366_s30 }
  0x7e   : > { %p9369_p11 = pnand %p9367_p10, %p9924_p7  ;;  %p9376_p1 = por %p9375_p0, %p9374_p13 }
  0x80   : > { %p9370_p12 = pneg %p9369_p11 }
  0x82   : > { %p9377_p4 = pnand %p9376_p1, %p9370_p12 }
  0x84   : > { %9380 = shalt.err (!%p9377_p4)
}
  0x85   : > { %9034 = dma.hbm_to_vmem [thread:$0]  (!%p9910_p5), %s11032_s8, 256, %s553_s25, [#allocation17], %s11011_s15, %s11011_s15, %s11013_s18  }
  0x86   : > { %s9769_s28 = smov [#allocation19]   ;;  %s9770_s21 = smov [#allocation22]  }
  0x87   : > { %s576_s27 = sshll.u32 %s9769_s28, 4  ;;  %s603_s2 = sshll.u32 %s9770_s21, 4  ;;  %s577_s27 = int_to_ptr.vmem [resolvable:$true] %s576_s27  ;;  %s604_s2 = int_to_ptr.vmem [resolvable:$true] %s603_s2 }
  0x88   : > { %s9381_s1 = scalar_lea.hbm %s10988_s10, 768 }
  0x89   : > { %p9382_p6 = scmp.ne.s32.totalorder %s10988_s10, %s9381_s1  ;;  %p9388_p2 = scmp.lt.u32.totalorder %s9381_s1, %s10988_s10 }
  0x8b   : > { %p9384_p8 = pnand %p9382_p6, %p9924_p7 }
  0x8d   : > { %p9385_p9 = pneg %p9384_p8 }
  0x8f   : > { %p9390_p3 = pnand %p9388_p2, %p9385_p9 }
  0x91   : > { %9393 = shalt.err (!%p9390_p3)
}
  0x92   : > { %s9394_s25 = scalar_lea.vmem %s577_s27, 768  ;;  %p9402_p13 = scmp.lt.s32.totalorder %s577_s27, %s577_s27 }
  0x93   : > { %p9395_p10 = scmp.ne.s32.totalorder %s577_s27, %s9394_s25  ;;  %p9403_p0 = scmp.lt.s32.totalorder %s9394_s25, %s9394_s25 }
  0x95   : > { %p9397_p11 = pnand %p9395_p10, %p9924_p7  ;;  %p9404_p1 = por %p9403_p0, %p9402_p13 }
  0x97   : > { %p9398_p12 = pneg %p9397_p11 }
  0x99   : > { %p9405_p4 = pnand %p9404_p1, %p9398_p12 }
  0x9b   : > { %9408 = shalt.err (!%p9405_p4)
}
  0x9c   : > { %s11033_s24 = smov 4   ;;  %s11034_s0 = smov 64  }
  0x9d   : > { %9040 = dma.hbm_to_vmem [thread:$0]  (!%p9910_p5), %s10988_s10, 768, %s577_s27, [#allocation20], %s11034_s0, %s11034_s0, %s11033_s24  }
  0x9e   : > { %s9409_s29 = scalar_lea.hbm %s10990_s12, 128 }
  0x9f   : > { %p9410_p6 = scmp.ne.s32.totalorder %s10990_s12, %s9409_s29  ;;  %p9416_p2 = scmp.lt.u32.totalorder %s9409_s29, %s10990_s12 }
  0xa1   : > { %p9412_p8 = pnand %p9410_p6, %p9924_p7 }
  0xa3   : > { %p9413_p9 = pneg %p9412_p8 }
  0xa5   : > { %p9418_p3 = pnand %p9416_p2, %p9413_p9 }
  0xa7   : > { %9421 = shalt.err (!%p9418_p3)
}
  0xa8   : > { %s9422_s26 = scalar_lea.vmem %s604_s2, 128  ;;  %p9430_p13 = scmp.lt.s32.totalorder %s604_s2, %s604_s2 }
  0xa9   : > { %p9423_p10 = scmp.ne.s32.totalorder %s604_s2, %s9422_s26  ;;  %p9431_p0 = scmp.lt.s32.totalorder %s9422_s26, %s9422_s26 }
  0xab   : > { %p9425_p11 = pnand %p9423_p10, %p9924_p7  ;;  %p9432_p1 = por %p9431_p0, %p9430_p13 }
  0xad   : > { %p9426_p12 = pneg %p9425_p11 }
  0xaf   : > { %p9433_p4 = pnand %p9432_p1, %p9426_p12 }
  0xb1   : > { %9436 = shalt.err (!%p9433_p4)
}
  0xb2   : > { %9046 = dma.hbm_to_vmem [thread:$0]  (!%p9910_p5), %s10990_s12, 128, %s604_s2, [#allocation23]  }
  0xb3   : > { %s9771_s21 = smov [#allocation25]   ;;  %s9772_s29 = smov [#allocation5]  }
  0xb4   : > { %s625_s23 = sshll.u32 %s9771_s21, 4  ;;  %s463_s1 = sshll.u32 %s9772_s29, 4  ;;  %s626_s23 = int_to_ptr.vmem [resolvable:$true] %s625_s23  ;;  %s464_s1 = int_to_ptr.vmem [resolvable:$true] %s463_s1 }
  0xb5   : > { %s9437_s25 = scalar_lea.hbm %s10992_s14, 16 }
  0xb6   : > { %p9438_p6 = scmp.ne.s32.totalorder %s10992_s14, %s9437_s25  ;;  %p9444_p2 = scmp.lt.u32.totalorder %s9437_s25, %s10992_s14 }
  0xb8   : > { %p9440_p8 = pnand %p9438_p6, %p9924_p7 }
  0xba   : > { %p9441_p9 = pneg %p9440_p8 }
  0xbc   : > { %p9446_p3 = pnand %p9444_p2, %p9441_p9 }
  0xbe   : > { %9449 = shalt.err (!%p9446_p3)
}
  0xbf   : > { %s9450_s2 = scalar_lea.vmem %s626_s23, 16  ;;  %s9457_s28 = scalar_lea.vmem %s626_s23, 32 }
  0xc0   : > { %p9451_p10 = scmp.ne.s32.totalorder %s626_s23, %s9450_s2  ;;  %p9458_p13 = scmp.lt.s32.totalorder %s626_s23, %s626_s23 }
  0xc1   : > { %p9459_p0 = scmp.lt.s32.totalorder %s9457_s28, %s9450_s2 }
  0xc2   : > { %p9453_p11 = pnand %p9451_p10, %p9924_p7 }
  0xc3   : > { %p9460_p1 = por %p9459_p0, %p9458_p13 }
  0xc4   : > { %p9454_p12 = pneg %p9453_p11 }
  0xc6   : > { %p9461_p4 = pnand %p9460_p1, %p9454_p12 }
  0xc8   : > { %9464 = shalt.err (!%p9461_p4)
}
  0xc9   : > { %9052 = dma.hbm_to_vmem [thread:$0]  (!%p9910_p5), %s10992_s14, 16, %s626_s23, [#allocation26]  }
  0xca   : > { %s11035_s30 = sld [smem:[#allocation43_spill]] }
  0xd0   : > { %s9465_s22 = scalar_lea.hbm %s11035_s30, 2048 }
  0xd1   : > { %p9466_p6 = scmp.ne.s32.totalorder %s11035_s30, %s9465_s22  ;;  %p9472_p2 = scmp.lt.u32.totalorder %s9465_s22, %s11035_s30 }
  0xd3   : > { %p9468_p8 = pnand %p9466_p6, %p9924_p7 }
  0xd5   : > { %p9469_p9 = pneg %p9468_p8 }
  0xd7   : > { %p9474_p3 = pnand %p9472_p2, %p9469_p9 }
  0xd9   : > { %9477 = shalt.err (!%p9474_p3)
}
  0xda   : > { %s9478_s28 = scalar_lea.vmem %s464_s1, 2048  ;;  %p9486_p13 = scmp.lt.s32.totalorder %s464_s1, %s464_s1 }
  0xdb   : > { %p9479_p10 = scmp.ne.s32.totalorder %s464_s1, %s9478_s28  ;;  %p9487_p0 = scmp.lt.s32.totalorder %s9478_s28, %s9478_s28 }
  0xdd   : > { %p9481_p11 = pnand %p9479_p10, %p9924_p7  ;;  %p9488_p1 = por %p9487_p0, %p9486_p13 }
  0xdf   : > { %p9482_p12 = pneg %p9481_p11 }
  0xe1   : > { %p9489_p4 = pnand %p9488_p1, %p9482_p12 }
  0xe3   : > { %9492 = shalt.err (!%p9489_p4)
}
  0xe4   : > { %s11036_s23 = smov 8   ;;  %s11037_s15 = smov 128  }
  0xe5   : > { %9013 = dma.hbm_to_vmem [thread:$0]  (!%p9910_p5), %s11035_s30, 2048, %s464_s1, [#allocation6], %s11037_s15, %s11037_s15, %s11036_s23  }
  0xe6   : > { %s9773_s29 = smov [#allocation9]   ;;  %s9774_s25 = smov [#allocation12]  }
  0xe7   : > { %s487_s22 = sshll.u32 %s9773_s29, 4  ;;  %s513_s26 = sshll.u32 %s9774_s25, 4  ;;  %s488_s22 = int_to_ptr.vmem [resolvable:$true] %s487_s22  ;;  %s514_s26 = int_to_ptr.vmem [resolvable:$true] %s513_s26 }
  0xe8   : > { %s9493_s28 = scalar_lea.hbm %s10981_s3, 256 }
  0xe9   : > { %p9494_p6 = scmp.ne.s32.totalorder %s10981_s3, %s9493_s28  ;;  %p9500_p2 = scmp.lt.u32.totalorder %s9493_s28, %s10981_s3 }
  0xeb   : > { %p9496_p8 = pnand %p9494_p6, %p9924_p7 }
  0xed   : > { %p9497_p9 = pneg %p9496_p8 }
  0xef   : > { %p9502_p3 = pnand %p9500_p2, %p9497_p9 }
  0xf1   : > { %9505 = shalt.err (!%p9502_p3)
}
  0xf2   : > { %s9506_s1 = scalar_lea.vmem %s488_s22, 256  ;;  %p9514_p13 = scmp.lt.s32.totalorder %s488_s22, %s488_s22 }
  0xf3   : > { %p9507_p10 = scmp.ne.s32.totalorder %s488_s22, %s9506_s1  ;;  %p9515_p0 = scmp.lt.s32.totalorder %s9506_s1, %s9506_s1 }
  0xf5   : > { %p9509_p11 = pnand %p9507_p10, %p9924_p7  ;;  %p9516_p1 = por %p9515_p0, %p9514_p13 }
  0xf7   : > { %p9510_p12 = pneg %p9509_p11 }
  0xf9   : > { %p9517_p4 = pnand %p9516_p1, %p9510_p12 }
  0xfb   : > { %9520 = shalt.err (!%p9517_p4)
}
  0xfc   : > { %9019 = dma.hbm_to_vmem [thread:$0]  (!%p9910_p5), %s10981_s3, 256, %s488_s22, [#allocation8], %s11034_s0, %s11034_s0, %s11033_s24  }
  0xfd   : > { %s9521_s29 = scalar_lea.hbm %s10983_s5, 512 }
  0xfe   : > { %p9522_p6 = scmp.ne.s32.totalorder %s10983_s5, %s9521_s29  ;;  %p9528_p2 = scmp.lt.u32.totalorder %s9521_s29, %s10983_s5 }
 0x100   : > { %p9524_p8 = pnand %p9522_p6, %p9924_p7 }
 0x102   : > { %p9525_p9 = pneg %p9524_p8 }
 0x104   : > { %p9530_p3 = pnand %p9528_p2, %p9525_p9 }
 0x106   : > { %9533 = shalt.err (!%p9530_p3)
}
 0x107   : > { %s9534_s21 = scalar_lea.vmem %s514_s26, 512  ;;  %p9542_p13 = scmp.lt.s32.totalorder %s514_s26, %s514_s26 }
 0x108   : > { %p9535_p10 = scmp.ne.s32.totalorder %s514_s26, %s9534_s21  ;;  %p9543_p0 = scmp.lt.s32.totalorder %s9534_s21, %s9534_s21 }
 0x10a   : > { %p9537_p11 = pnand %p9535_p10, %p9924_p7  ;;  %p9544_p1 = por %p9543_p0, %p9542_p13 }
 0x10c   : > { %p9538_p12 = pneg %p9537_p11 }
 0x10e   : > { %p9545_p4 = pnand %p9544_p1, %p9538_p12 }
 0x110   : > { %9548 = shalt.err (!%p9545_p4)
}
 0x111   : > { %9025 = dma.hbm_to_vmem [thread:$0]  (!%p9910_p5), %s10983_s5, 512, %s514_s26, [#allocation11], %s11037_s15, %s11037_s15, %s11036_s23  }
 0x112   : > { %s9775_s4 = smov [#allocation15]   ;;  %s9776_s8 = smov [#allocation18]  }
 0x113   : > { %s539_s6 = sshll.u32 %s9775_s4, 4  ;;  %s566_s18 = sshll.u32 %s9776_s8, 4  ;;  %s540_s6 = int_to_ptr.vmem [resolvable:$true] %s539_s6  ;;  %s567_s18 = int_to_ptr.vmem [resolvable:$true] %s566_s18 }
 0x114   : > { %s9549_s27 = scalar_lea.hbm %s10985_s7, 256 }
 0x115   : > { %p9550_p6 = scmp.ne.s32.totalorder %s10985_s7, %s9549_s27  ;;  %p9556_p2 = scmp.lt.u32.totalorder %s9549_s27, %s10985_s7 }
 0x117   : > { %p9552_p8 = pnand %p9550_p6, %p9924_p7 }
 0x119   : > { %p9553_p9 = pneg %p9552_p8 }
 0x11b   : > { %p9558_p3 = pnand %p9556_p2, %p9553_p9 }
 0x11d   : > { %9561 = shalt.err (!%p9558_p3)
}
 0x11e   : > { %s9562_s26 = scalar_lea.vmem %s540_s6, 256  ;;  %p9570_p13 = scmp.lt.s32.totalorder %s540_s6, %s540_s6 }
 0x11f   : > { %p9563_p10 = scmp.ne.s32.totalorder %s540_s6, %s9562_s26  ;;  %p9571_p0 = scmp.lt.s32.totalorder %s9562_s26, %s9562_s26 }
 0x121   : > { %p9565_p11 = pnand %p9563_p10, %p9924_p7  ;;  %p9572_p1 = por %p9571_p0, %p9570_p13 }
 0x123   : > { %p9566_p12 = pneg %p9565_p11 }
 0x125   : > { %p9573_p4 = pnand %p9572_p1, %p9566_p12 }
 0x127   : > { %9576 = shalt.err (!%p9573_p4)
}
 0x128   : > { %9031 = dma.hbm_to_vmem [thread:$0]  (!%p9910_p5), %s10985_s7, 256, %s540_s6, [#allocation14], %s11037_s15, %s11037_s15, %s11036_s23  }
 0x129   : > { %s9577_s25 = scalar_lea.hbm %s10987_s9, 16 }
 0x12a   : > { %p9578_p6 = scmp.ne.s32.totalorder %s10987_s9, %s9577_s25  ;;  %p9584_p2 = scmp.lt.u32.totalorder %s9577_s25, %s10987_s9 }
 0x12c   : > { %p9580_p8 = pnand %p9578_p6, %p9924_p7 }
 0x12e   : > { %p9581_p9 = pneg %p9580_p8 }
 0x130   : > { %p9586_p3 = pnand %p9584_p2, %p9581_p9 }
 0x132   : > { %9589 = shalt.err (!%p9586_p3)
}
 0x133   : > { %s9590_s22 = scalar_lea.vmem %s567_s18, 16  ;;  %s9597_s23 = scalar_lea.vmem %s567_s18, 32 }
 0x134   : > { %p9591_p10 = scmp.ne.s32.totalorder %s567_s18, %s9590_s22  ;;  %p9598_p13 = scmp.lt.s32.totalorder %s567_s18, %s567_s18 }
 0x135   : > { %p9599_p0 = scmp.lt.s32.totalorder %s9597_s23, %s9590_s22 }
 0x136   : > { %p9593_p11 = pnand %p9591_p10, %p9924_p7 }
 0x137   : > { %p9600_p1 = por %p9599_p0, %p9598_p13 }
 0x138   : > { %p9594_p12 = pneg %p9593_p11 }
 0x13a   : > { %p9601_p4 = pnand %p9600_p1, %p9594_p12 }
 0x13c   : > { %9604 = shalt.err (!%p9601_p4)
}
 0x13d   : > { %9037 = dma.hbm_to_vmem [thread:$0]  (!%p9910_p5), %s10987_s9, 16, %s567_s18, [#allocation17]  }
 0x13e   : > { %s9777_s26 = smov [#allocation21]   ;;  %s9778_s4 = smov [#allocation24]  }
 0x13f   : > { %s589_s1 = sshll.u32 %s9777_s26, 4  ;;  %s614_s8 = sshll.u32 %s9778_s4, 4  ;;  %s590_s1 = int_to_ptr.vmem [resolvable:$true] %s589_s1  ;;  %s615_s8 = int_to_ptr.vmem [resolvable:$true] %s614_s8 }
 0x140   : > { %s9605_s27 = scalar_lea.hbm %s10989_s11, 256 }
 0x141   : > { %p9606_p6 = scmp.ne.s32.totalorder %s10989_s11, %s9605_s27  ;;  %p9612_p2 = scmp.lt.u32.totalorder %s9605_s27, %s10989_s11 }
 0x143   : > { %p9608_p8 = pnand %p9606_p6, %p9924_p7 }
 0x145   : > { %p9609_p9 = pneg %p9608_p8 }
 0x147   : > { %p9614_p3 = pnand %p9612_p2, %p9609_p9 }
 0x149   : > { %9617 = shalt.err (!%p9614_p3)
}
 0x14a   : > { %s9618_s18 = scalar_lea.vmem %s590_s1, 256  ;;  %p9626_p13 = scmp.lt.s32.totalorder %s590_s1, %s590_s1 }
 0x14b   : > { %p9619_p10 = scmp.ne.s32.totalorder %s590_s1, %s9618_s18  ;;  %p9627_p0 = scmp.lt.s32.totalorder %s9618_s18, %s9618_s18 }
 0x14d   : > { %p9621_p11 = pnand %p9619_p10, %p9924_p7  ;;  %p9628_p1 = por %p9627_p0, %p9626_p13 }
 0x14f   : > { %p9622_p12 = pneg %p9621_p11 }
 0x151   : > { %p9629_p4 = pnand %p9628_p1, %p9622_p12 }
 0x153   : > { %9632 = shalt.err (!%p9629_p4)
}
 0x154   : > { %9043 = dma.hbm_to_vmem [thread:$0]  (!%p9910_p5), %s10989_s11, 256, %s590_s1, [#allocation20], %s11034_s0, %s11034_s0, %s11033_s24  }
 0x155   : > { %s9633_s4 = scalar_lea.hbm %s10991_s13, 128 }
 0x156   : > { %p9634_p6 = scmp.ne.s32.totalorder %s10991_s13, %s9633_s4  ;;  %p9640_p2 = scmp.lt.u32.totalorder %s9633_s4, %s10991_s13 }
 0x158   : > { %p9636_p8 = pnand %p9634_p6, %p9924_p7 }
 0x15a   : > { %p9637_p9 = pneg %p9636_p8 }
 0x15c   : > { %p9642_p3 = pnand %p9640_p2, %p9637_p9 }
 0x15e   : > { %9645 = shalt.err (!%p9642_p3)
}
 0x15f   : > { %s9646_s28 = scalar_lea.vmem %s615_s8, 128  ;;  %p9654_p13 = scmp.lt.s32.totalorder %s615_s8, %s615_s8 }
 0x160   : > { %p9647_p10 = scmp.ne.s32.totalorder %s615_s8, %s9646_s28  ;;  %p9655_p0 = scmp.lt.s32.totalorder %s9646_s28, %s9646_s28 }
 0x162   : > { %p9649_p11 = pnand %p9647_p10, %p9924_p7  ;;  %p9656_p1 = por %p9655_p0, %p9654_p13 }
 0x164   : > { %p9650_p12 = pneg %p9649_p11 }
 0x166   : > { %p9657_p4 = pnand %p9656_p1, %p9650_p12 }
 0x168   : > { %9660 = shalt.err (!%p9657_p4)
}
 0x169   : > { %9049 = dma.hbm_to_vmem [thread:$0]  (!%p9910_p5), %s10991_s13, 128, %s615_s8, [#allocation23]  }
 0x16a   : > { %s9779_s21 = smov [#allocation27]   ;;  %s9661_s15 = scalar_lea.hbm %s10994_s16, 128 }
 0x16b   : > { %s638_s22 = sshll.u32 %s9779_s21, 4  ;;  %p9662_p6 = scmp.ne.s32.totalorder %s10994_s16, %s9661_s15  ;;  %s639_s22 = int_to_ptr.vmem [resolvable:$true] %s638_s22 }
 0x16c   : > { %p9668_p2 = scmp.lt.u32.totalorder %s9661_s15, %s10994_s16 }
 0x16d   : > { %p9664_p8 = pnand %p9662_p6, %p9924_p7 }
 0x16f   : > { %p9665_p9 = pneg %p9664_p8 }
 0x171   : > { %p9670_p3 = pnand %p9668_p2, %p9665_p9 }
 0x173   : > { %9673 = shalt.err (!%p9670_p3)
}
 0x174   : > { %s9674_s8 = scalar_lea.vmem %s639_s22, 128  ;;  %p9682_p13 = scmp.lt.s32.totalorder %s639_s22, %s639_s22 }
 0x175   : > { %p9675_p10 = scmp.ne.s32.totalorder %s639_s22, %s9674_s8  ;;  %p9683_p0 = scmp.lt.s32.totalorder %s9674_s8, %s9674_s8 }
 0x177   : > { %p9677_p11 = pnand %p9675_p10, %p9924_p7  ;;  %p9684_p1 = por %p9683_p0, %p9682_p13 }
 0x179   : > { %p9678_p12 = pneg %p9677_p11 }
 0x17b   : > { %p9685_p4 = pnand %p9684_p1, %p9678_p12 }
 0x17d   : > { %9688 = shalt.err (!%p9685_p4)
}
 0x17e   : > { %s9780_s25 = smov 32   ;;  %s9781_s27 = smov 2  }
 0x17f   : > { %9055 = dma.hbm_to_vmem [thread:$0]  (!%p9910_p5), %s10994_s16, 128, %s639_s22, [#allocation26], %s9780_s25, %s9780_s25, %s9781_s27  }
 0x180   : > { %s9782_s24 = smov [#allocation28]   ;;  %s9689_s23 = scalar_lea.hbm %s10995_s17, 147456 }
 0x181   : > { %s651_s1 = sshll.u32 %s9782_s24, 4  ;;  %p9690_p6 = scmp.ne.s32.totalorder %s10995_s17, %s9689_s23  ;;  %s652_s1 = int_to_ptr.vmem [resolvable:$true] %s651_s1 }
 0x182   : > { %p9696_p2 = scmp.lt.u32.totalorder %s9689_s23, %s10995_s17 }
 0x183   : > { %p9692_p8 = pnand %p9690_p6, %p9924_p7 }
 0x185   : > { %p9693_p9 = pneg %p9692_p8 }
 0x187   : > { %p9698_p3 = pnand %p9696_p2, %p9693_p9 }
 0x189   : > { %9701 = shalt.err (!%p9698_p3)
}
 0x18a   : > { %s9702_s22 = scalar_lea.vmem %s652_s1, 147456  ;;  %p9710_p13 = scmp.lt.s32.totalorder %s652_s1, %s652_s1 }
 0x18b   : > { %p9703_p10 = scmp.ne.s32.totalorder %s652_s1, %s9702_s22  ;;  %p9711_p0 = scmp.lt.s32.totalorder %s9702_s22, %s9702_s22 }
 0x18d   : > { %p9705_p11 = pnand %p9703_p10, %p9924_p7  ;;  %p9712_p1 = por %p9711_p0, %p9710_p13 }
 0x18f   : > { %p9706_p12 = pneg %p9705_p11 }
 0x191   : > { %p9713_p4 = pnand %p9712_p1, %p9706_p12 }
 0x193   : > { %9716 = shalt.err (!%p9713_p4)
}
 0x194   : > { %s9783_s29 = smov 1024   ;;  %s11038_s27 = sld [smem:[#allocation41_spill]] }
 0x195   : > { %9058 = dma.hbm_to_vmem [thread:$0]  (!%p9910_p5), %s10995_s17, 147456, %s652_s1, [#allocation29], %s9783_s29, %s9783_s29, %s11034_s0  }
 0x19a   : > { %p11039_p6 = scmp.ne.s32.totalorder %s11038_s27, 0 }
 0x19b   : > { %s11040_s2 = sld [smem:[#allocation40_spill]] (!%p11039_p6) }
 0x19c   : > { %675 = sbr.rel (%p11039_p6) target bundleno = 4501 (0x1195), region = 92 }
 0x1a1   : > { %p11041_p8 = scmp.eq.s32.totalorder (!%p11039_p6), %s11040_s2, 0 }
 0x1a3   : > { %9722 = dma.done.wait (%p11041_p8), [#allocation6], 2048   ;;  %p11042_p7 = pmov %p11041_p8 }
 0x1a5   : > { %9724 = vsyncadd (%p11042_p7), [#allocation6], 4294965248  ;;  %p11043_p9 = pmov %p11042_p7 }
 0x1a6   : > { %p11044_p2 = pmov %p11042_p7 }
 0x1a7   : > { %9726 = dma.done.wait (%p11043_p9), [#allocation8], 272  }
 0x1a8   : > { %9728 = vsyncadd (%p11044_p2), [#allocation8], 4294967024  ;;  %p11045_p3 = pmov %p11044_p2 }
 0x1a9   : > { %p11046_p5 = pmov %p11044_p2 }
 0x1aa   : > { %9730 = dma.done.wait (%p11045_p3), [#allocation11], 1024  }
 0x1ab   : > { %9732 = vsyncadd (%p11046_p5), [#allocation11], 4294966272  ;;  %p11047_p10 = pmov %p11044_p2 }
 0x1ac   : > { %p11048_p11 = pmov %p11044_p2 }
 0x1ad   : > { %9734 = dma.done.wait (%p11047_p10), [#allocation14], 768  }
 0x1ae   : > { %9736 = vsyncadd (%p11048_p11), [#allocation14], 4294966528  ;;  %p11049_p12 = pmov %p11044_p2 }
 0x1af   : > { %p11050_p13 = pmov %p11044_p2 }
 0x1b0   : > { %9738 = dma.done.wait (%p11049_p12), [#allocation17], 272  }
 0x1b1   : > { %9740 = vsyncadd (%p11050_p13), [#allocation17], 4294967024  ;;  %p11051_p0 = pmov %p11044_p2 }
 0x1b3   : > { %9742 = dma.done.wait (%p11051_p0), [#allocation20], 1024   ;;  %p11052_p1 = pmov %p11051_p0 }
 0x1b4   : > { %p11053_p4 = pmov %p11051_p0 }
 0x1b5   : > { %9744 = vsyncadd (%p11052_p1), [#allocation20], 4294966272 }
 0x1b6   : > { %9746 = dma.done.wait (%p11053_p4), [#allocation23], 256   ;;  %p11054_p6 = pmov %p11051_p0 }
 0x1b7   : > { %p11055_p8 = pmov %p11051_p0 }
 0x1b8   : > { %9748 = vsyncadd (%p11054_p6), [#allocation23], 4294967040 }
 0x1b9   : > { %9750 = dma.done.wait (%p11055_p8), [#allocation26], 144   ;;  %p11056_p7 = pmov %p11051_p0 }
 0x1ba   : > { %p11057_p9 = pmov %p11051_p0 }
 0x1bb   : > { %9752 = vsyncadd (%p11056_p7), [#allocation26], 4294967152 }
 0x1bc   : > { %9754 = dma.done.wait (%p11057_p9), [#allocation29], 147456   ;;  %p11058_p2 = pmov %p11051_p0 }
 0x1bd   : > { %p789_p3 = scmp.lt.s32.totalorder %s11040_s2, 1  ;;  %v9784_v0 = vmov 0   ;;  %s11059_s28 = sld [smem:[#allocation42_spill]]  ;;  %v9134_v17 = vld [vmem:[#allocation9] sm:$0xff]   ;;  %v818_v20 = vld [vmem:[#allocation5 + $0x10] sm:$0xff]  ;;  %v819_v22 = vld [vmem:[#allocation5 + $0x18] sm:$0xff] }
 0x1be   : > { %9756 = vsyncadd (%p11058_p2), [#allocation29], 4294819840  ;;  %9133 = vset.pattern.permute.xlu1 %v9784_v0  ;;  %9132 = vset.pattern.permute.xlu0 %v9784_v0  ;;  %v816_v21 = vld [vmem:[#allocation5] sm:$0xff]  ;;  %v817_v23 = vld [vmem:[#allocation5 + $0x8] sm:$0xff]  ;;  %vm1001_vm0 = vcmask 343040   ;;  %s9786_s1 = smov 127  }
 0x1bf   : > { %s11064_s2 = smov (!%p789_p3, %s11040_s2), 1  ;;  %7450 = vmatprep.mubr.bf16.mxu0 %v9134_v17  ;;  %v821_v30 = vld [vmem:[#allocation5 + $0x28] sm:$0xff]  ;;  %v820_v31 = vld [vmem:[#allocation5 + $0x20] sm:$0xff]  ;;  %v823_v38 = vld [vmem:[#allocation5 + $0x38] sm:$0xff]  ;;  %s9787_s21 = smov 122   ;;  %vm9789_vm5 = vmmov 0  }
 0x1c0   : > { %s7316_s20 = sshll.u32 %s11064_s2, 7  ;;  %v822_v39 = vld [vmem:[#allocation5 + $0x30] sm:$0xff]  ;;  %v825_v45 = vld [vmem:[#allocation5 + $0x48] sm:$0xff]  ;;  %v824_v46 = vld [vmem:[#allocation5 + $0x40] sm:$0xff]  ;;  %s9788_s18 = smov 121   ;;  %vm1229_vm6 = vcmask 195584  }
 0x1c1   : > { %v827_v52 = vld [vmem:[#allocation5 + $0x58] sm:$0xff]  ;;  %v826_v53 = vld [vmem:[#allocation5 + $0x50] sm:$0xff]  ;;  %v829_v59 = vld [vmem:[#allocation5 + $0x68] sm:$0xff]  ;;  %vm1595_vm7 = vcmask 1043456   ;;  %s9790_s23 = smov 118   ;;  %s9791_s15 = smov 117  }
 0x1c2   : > { %v828_v60 = vld [vmem:[#allocation5 + $0x60] sm:$0xff]  ;;  %s11060_s4 = sld [smem:[#allocation48_spill]]  ;;  %s9792_s19 = smov 110  }
 0x1c3   : > { %s793_s24 = scalar_lea.vmem %s11059_s28, %s7316_s20  ;;  %s9793_s0 = smov 109  }
 0x1c4   : > { %v802_v1 = vld [vmem:[%s793_s24 + $0x10] sm:$0xff]  ;;  %v800_v2 = vld [vmem:[%s793_s24] sm:$0xff]  ;;  %v803_v3 = vld [vmem:[%s793_s24 + $0x18] sm:$0xff] }
 0x1c5   : > { %844 = vperm.xlu1 %9133, %v802_v1   ;;  %834 = vperm.xlu0 %9132, %v800_v2   ;;  %v801_v4 = vld [vmem:[%s793_s24 + $0x8] sm:$0xff]  ;;  %v804_v6 = vld [vmem:[%s793_s24 + $0x20] sm:$0xff]  ;;  %v807_v7 = vld [vmem:[%s793_s24 + $0x38] sm:$0xff] }
 0x1c6   : > { %v805_v5 = vld [vmem:[%s793_s24 + $0x28] sm:$0xff]  ;;  %v806_v8 = vld [vmem:[%s793_s24 + $0x30] sm:$0xff]  ;;  %v808_v10 = vld [vmem:[%s793_s24 + $0x40] sm:$0xff] }
 0x1c7   : > { %v809_v9 = vld [vmem:[%s793_s24 + $0x48] sm:$0xff]  ;;  %v811_v11 = vld [vmem:[%s793_s24 + $0x58] sm:$0xff]  ;;  %v810_v12 = vld [vmem:[%s793_s24 + $0x50] sm:$0xff] }
 0x1c8   : > { %v813_v13 = vld [vmem:[%s793_s24 + $0x68] sm:$0xff]  ;;  %v812_v14 = vld [vmem:[%s793_s24 + $0x60] sm:$0xff]  ;;  %v815_v15 = vld [vmem:[%s793_s24 + $0x78] sm:$0xff] }
 0x1c9   : > { %849 = vperm.xlu1 %9133, %v803_v3   ;;  %839 = vperm.xlu0 %9132, %v801_v4   ;;  %v814_v16 = vld [vmem:[%s793_s24 + $0x70] sm:$0xff]  ;;  %v831_v3 = vld [vmem:[#allocation5 + $0x78] sm:$0xff] }
 0x1ca   : > { %v830_v4 = vld [vmem:[#allocation5 + $0x70] sm:$0xff] }
 0x1cd   : > { %859 = vperm.xlu1 %9133, %v805_v5   ;;  %854 = vperm.xlu0 %9132, %v804_v6  }
 0x1d1   : > { %869 = vperm.xlu1 %9133, %v807_v7   ;;  %864 = vperm.xlu0 %9132, %v806_v8  }
 0x1d5   : > { %879 = vperm.xlu1 %9133, %v809_v9   ;;  %874 = vperm.xlu0 %9132, %v808_v10  }
 0x1d9   : > { %889 = vperm.xlu1 %9133, %v811_v11   ;;  %884 = vperm.xlu0 %9132, %v810_v12   ;;  %v9135_v11 = vld [vmem:[#allocation9 + $0x8] sm:$0xff]  }
 0x1dd   : > { %899 = vperm.xlu1 %9133, %v813_v13   ;;  %894 = vperm.xlu0 %9132, %v812_v14  }
 0x1e1   : > { %909 = vperm.xlu1 %9133, %v815_v15   ;;  %904 = vperm.xlu0 %9132, %v814_v16  }
 0x244   : > { %v845_v18 = vpop.permute.xlu1 %844  ;;  %v835_v19 = vpop.permute.xlu0 %834 }
 0x245   : > { %v914_v26 = vmul.f32 %v845_v18, %v818_v20  ;;  %v912_v27 = vmul.f32 %v835_v19, %v816_v21 }
 0x248   : > { %v850_v24 = vpop.permute.xlu1 %849  ;;  %v840_v25 = vpop.permute.xlu0 %839 }
 0x249   : > { %v915_v28 = vmul.f32 %v850_v24, %v819_v22  ;;  %v913_v29 = vmul.f32 %v840_v25, %v817_v23 }
 0x24b   : > { %v928_v32 = vpack.c.bf16 %v913_v29, %v912_v27  ;;  %v929_v35 = vpack.c.bf16 %v915_v28, %v914_v26 }
 0x24c   : > { %v860_v33 = vpop.permute.xlu1 %859  ;;  %v855_v34 = vpop.permute.xlu0 %854 }
 0x24d   : > { %v917_v36 = vmul.f32 %v860_v33, %v821_v30  ;;  %v916_v37 = vmul.f32 %v855_v34, %v820_v31  ;;  %7434 = vmatprep.subr.bf16.mxu0 %v928_v32 }
 0x24e   : > { %7435 = vmatpush3.bf16.msra.mxu0 %v928_v32 }
 0x24f   : > { %7436 = vmatprep.subr.bf16.mxu0 %v929_v35  ;;  %v930_v42 = vpack.c.bf16 %v917_v36, %v916_v37 }
 0x250   : > { %v870_v40 = vpop.permute.xlu1 %869  ;;  %v865_v41 = vpop.permute.xlu0 %864 }
 0x251   : > { %v919_v43 = vmul.f32 %v870_v40, %v823_v38  ;;  %v918_v44 = vmul.f32 %v865_v41, %v822_v39 }
 0x252   : > { %7437 = vmatpush3.bf16.msra.mxu0 %v929_v35 }
 0x253   : > { %7438 = vmatprep.subr.bf16.mxu0 %v930_v42  ;;  %v931_v49 = vpack.c.bf16 %v919_v43, %v918_v44 }
 0x254   : > { %v880_v47 = vpop.permute.xlu1 %879  ;;  %v875_v48 = vpop.permute.xlu0 %874 }
 0x255   : > { %v921_v50 = vmul.f32 %v880_v47, %v825_v45  ;;  %v920_v51 = vmul.f32 %v875_v48, %v824_v46 }
 0x256   : > { %7439 = vmatpush3.bf16.msra.mxu0 %v930_v42 }
 0x257   : > { %7440 = vmatprep.subr.bf16.mxu0 %v931_v49  ;;  %v932_v56 = vpack.c.bf16 %v921_v50, %v920_v51 }
 0x258   : > { %v890_v54 = vpop.permute.xlu1 %889  ;;  %v885_v55 = vpop.permute.xlu0 %884 }
 0x259   : > { %v923_v57 = vmul.f32 %v890_v54, %v827_v52  ;;  %v922_v58 = vmul.f32 %v885_v55, %v826_v53 }
 0x25a   : > { %7441 = vmatpush3.bf16.msra.mxu0 %v931_v49 }
 0x25b   : > { %7442 = vmatprep.subr.bf16.mxu0 %v932_v56  ;;  %v933_v63 = vpack.c.bf16 %v923_v57, %v922_v58 }
 0x25c   : > { %v900_v61 = vpop.permute.xlu1 %899  ;;  %v895_v62 = vpop.permute.xlu0 %894 }
 0x25d   : > { %v925_v1 = vmul.f32 %v900_v61, %v829_v59  ;;  %v924_v2 = vmul.f32 %v895_v62, %v828_v60  ;;  %v1055_v60 = vld [vmem:[#allocation10 + $0x8] sm:$0xff]  ;;  %v1056_v61 = vld [vmem:[#allocation10 + $0x10] sm:$0xff] }
 0x25e   : > { %7443 = vmatpush3.bf16.msra.mxu0 %v932_v56  ;;  %v1054_v56 = vld [vmem:[#allocation10] sm:$0xff] }
 0x25f   : > { %7444 = vmatprep.subr.bf16.mxu0 %v933_v63  ;;  %v934_v7 = vpack.c.bf16 %v925_v1, %v924_v2  ;;  %v1057_v2 = vld [vmem:[#allocation10 + $0x18] sm:$0xff] }
 0x260   : > { %v910_v5 = vpop.permute.xlu1 %909  ;;  %v905_v6 = vpop.permute.xlu0 %904 }
 0x261   : > { %v927_v8 = vmul.f32 %v910_v5, %v831_v3  ;;  %v926_v9 = vmul.f32 %v905_v6, %v830_v4 }
 0x262   : > { %7445 = vmatpush3.bf16.msra.mxu0 %v933_v63 }
 0x263   : > { %7446 = vmatprep.subr.bf16.mxu0 %v934_v7  ;;  %v935_v10 = vpack.c.bf16 %v927_v8, %v926_v9  ;;  %v1064_v8 = vld [vmem:[#allocation12 + $0x10] sm:$0xff] }
 0x266   : > { %7447 = vmatpush3.bf16.msra.mxu0 %v934_v7  ;;  %v1062_v7 = vld [vmem:[#allocation12] sm:$0xff] }
 0x267   : > { %7448 = vmatprep.subr.bf16.mxu0 %v935_v10 }
 0x26a   : > { %7449 = vmatpush3.bf16.msra.mxu0 %v935_v10 }
 0x26d   : > { %7451 = vmatmul.mubr.bf16.vlgmr.msra.gmra.mrb[0].mxu0 %v9135_v11 }
 0x340   : > { %v10292_v12 = vpop.f32.mrb[0].mxu0 }
 0x341   : > { %v10294_v13 = vpop.f32.mrb[1].mxu0  ;;  %v1008_v20 = vsel %vm1001_vm0, %v10292_v12, 0.0  ;;  %v1020_v21 = vmul.f32 %v10292_v12, %v10292_v12 }
 0x342   : > { %v10296_v14 = vpop.f32.mrb[2].mxu0  ;;  %v1002_v15 = vsel %vm1001_vm0, %v10294_v13, 0.0  ;;  %v1018_v19 = vmul.f32 %v10294_v13, %v10294_v13 }
 0x343   : > { %1003 = vadd.xlane.f32.xlu0 %v1002_v15  ;;  %v10300_v16 = vpop.f32.mrb[3].mxu0  ;;  %v1011_v18 = vsel %vm1001_vm0, %v10296_v14, 0.0  ;;  %v1028_v24 = vsel %vm1001_vm0, %v1020_v21, 0.0  ;;  %v1021_v26 = vmul.f32 %v10296_v14, %v10296_v14  ;;  %v1063_v15 = vld [vmem:[#allocation12 + $0x8] sm:$0xff]  ;;  %v9785_v21 = vmov 0.0  }
 0x344   : > { %v1005_v17 = vsel %vm1001_vm0, %v10300_v16, 0.0  ;;  %v1022_v22 = vsel %vm1001_vm0, %v1018_v19, 0.0  ;;  %v1019_v23 = vmul.f32 %v10300_v16, %v10300_v16  ;;  %v1065_v19 = vld [vmem:[#allocation12 + $0x18] sm:$0xff]  ;;  %7454 = vmatprep.subr.bf16.mxu1 %v9785_v21  ;;  %7474 = vmatprep.subr.bf16.mxu0 %v9785_v21 }
 0x345   : > { %1006 = vadd.xlane.f32.xlu1 %v1005_v17  ;;  %v1031_v27 = vsel %vm1001_vm0, %v1021_v26, 0.0  ;;  %7470 = vmatprep.mubr.msk.bf16.mxu1 %vm9789_vm5, %v9785_v21 }
 0x346   : > { %v1025_v25 = vsel %vm1001_vm0, %v1019_v23, 0.0  ;;  %7490 = vmatprep.mubr.msk.bf16.mxu0 %vm9789_vm5, %v9785_v21 }
 0x347   : > { %1012 = vadd.xlane.f32.xlu0 %v1011_v18 }
 0x349   : > { %1009 = vadd.xlane.f32.xlu1 %v1008_v20 }
 0x34b   : > { %1023 = vadd.xlane.f32.xlu0 %v1022_v22 }
 0x34d   : > { %1029 = vadd.xlane.f32.xlu1 %v1028_v24 }
 0x34f   : > { %1026 = vadd.xlane.f32.xlu0 %v1025_v25 }
 0x353   : > { %1032 = vadd.xlane.f32.xlu0 %v1031_v27 }
 0x3d0   : > { %v1004_v28 = vpop.xlane.xlu0 %1003 }
 0x3d1   : > { %v1014_v31 = vmul.f32 0.0625, %v1004_v28 }
 0x3d2   : > { %v1007_v29 = vpop.xlane.xlu1 %1006 }
 0x3d3   : > { %v1015_v34 = vmul.f32 0.0625, %v1007_v29  ;;  %v1038_v36 = vmul.f32 %v1014_v31, %v1014_v31 }
 0x3d4   : > { %v1013_v30 = vpop.xlane.xlu0 %1012 }
 0x3d5   : > { %v1039_v42 = vmul.f32 %v1015_v34, %v1015_v34  ;;  %v1017_v44 = vmul.f32 0.0625, %v1013_v30 }
 0x3d6   : > { %v1010_v32 = vpop.xlane.xlu1 %1009 }
 0x3d7   : > { %v1016_v33 = vmul.f32 0.0625, %v1010_v32  ;;  %v1041_v51 = vmul.f32 %v1017_v44, %v1017_v44 }
 0x3d8   : > { %v1024_v35 = vpop.xlane.xlu0 %1023 }
 0x3d9   : > { %v1034_v37 = vmul.f32 0.0625, %v1024_v35  ;;  %v1040_v39 = vmul.f32 %v1016_v33, %v1016_v33 }
 0x3da   : > { %v1030_v38 = vpop.xlane.xlu1 %1029 }
 0x3db   : > { %v1042_v40 = vsub.f32 %v1034_v37, %v1038_v36  ;;  %v1036_v41 = vmul.f32 0.0625, %v1030_v38  ;;  %v7134_v37 = vld [vmem:[#allocation7] ss:$0 sm:$0xff] }
 0x3dc   : > { %v1027_v43 = vpop.xlane.xlu0 %1026 }
 0x3dd   : > { %v1046_v45 = vadd.f32 1e-05, %v1042_v40  ;;  %v1044_v46 = vsub.f32 %v1036_v41, %v1040_v39  ;;  %v1035_v47 = vmul.f32 0.0625, %v1027_v43 }
 0x3df   : > { %9229 = vrsqrt.f32 %v1046_v45  ;;  %v1048_v48 = vadd.f32 1e-05, %v1044_v46  ;;  %v1043_v49 = vsub.f32 %v1035_v47, %v1039_v42 }
 0x3e0   : > { %v1033_v50 = vpop.xlane.xlu0 %1032 }
 0x3e1   : > { %9231 = vrsqrt.f32 %v1048_v48  ;;  %v1047_v52 = vadd.f32 1e-05, %v1043_v49  ;;  %v1037_v53 = vmul.f32 0.0625, %v1033_v50 }
 0x3e3   : > { %9233 = vrsqrt.f32 %v1047_v52  ;;  %v1045_v54 = vsub.f32 %v1037_v53, %v1041_v51 }
 0x3e5   : > { %v1049_v55 = vadd.f32 1e-05, %v1045_v54 }
 0x3e7   : > { %9235 = vrsqrt.f32 %v1049_v55 }
 0x3e9   : > { %v9230_v57 = vpop.eup %9229 }
 0x3ea   : > { %v1058_v58 = vmul.f32 %v9230_v57, %v1054_v56  ;;  %v9136_v57 = vld [vmem:[#allocation13] sm:$0xff]  }
 0x3eb   : > { %v9232_v59 = vpop.eup %9231 }
 0x3ec   : > { %1077 = vperm.xlu1 %9133, %v1058_v58   ;;  %v1060_v1 = vmul.f32 %v9232_v59, %v1056_v61  ;;  %v1066_v5 = vmul.f32 %v1058_v58, %v1014_v31 }
 0x3ed   : > { %v9234_v62 = vpop.eup %9233 }
 0x3ee   : > { %v1059_v63 = vmul.f32 %v9234_v62, %v1055_v60  ;;  %v1068_v6 = vmul.f32 %v1060_v1, %v1016_v33  ;;  %v1070_v9 = vsub.f32 %v1062_v7, %v1066_v5 }
 0x3f0   : > { %1082 = vperm.xlu0 %9132, %v1059_v63   ;;  %v1072_v10 = vsub.f32 %v1064_v8, %v1068_v6  ;;  %v1067_v11 = vmul.f32 %v1059_v63, %v1015_v34 }
 0x3f1   : > { %v9236_v3 = vpop.eup %9235 }
 0x3f2   : > { %v1061_v4 = vmul.f32 %v9236_v3, %v1057_v2  ;;  %v1071_v17 = vsub.f32 %v1063_v15, %v1067_v11 }
 0x3f4   : > { %1092 = vperm.xlu1 %9133, %v1061_v4   ;;  %1087 = vperm.xlu0 %9132, %v1060_v1   ;;  %v1069_v18 = vmul.f32 %v1061_v4, %v1017_v44  ;;  %v9137_v4 = vld [vmem:[#allocation13 + $0x8] sm:$0xff]  }
 0x3f6   : > { %v1073_v20 = vsub.f32 %v1065_v19, %v1069_v18  ;;  %v9139_v19 = vld [vmem:[#allocation13 + $0x18] sm:$0xff]  }
 0x3f8   : > { %1101 = vperm.xlu1 %9133, %v1070_v9   ;;  %1111 = vperm.xlu0 %9132, %v1072_v10   ;;  %v9138_v10 = vld [vmem:[#allocation13 + $0x10] sm:$0xff]  }
 0x3fc   : > { %1106 = vperm.xlu1 %9133, %v1071_v17  }
 0x400   : > { %1116 = vperm.xlu1 %9133, %v1073_v20   ;;  %v7136_v20 = vld [vmem:[#allocation18] ss:$0 sm:$0xff] }
 0x46b   : > { %v1078_v22 = vpop.permute.xlu1 %1077 }
 0x46c   : > { %v1095_v26 = vmul.f32 %v1078_v22, %v10294_v13 }
 0x46f   : > { %v1083_v23 = vpop.permute.xlu0 %1082 }
 0x470   : > { %v1096_v31 = vmul.f32 %v1083_v23, %v10300_v16 }
 0x473   : > { %v1088_v24 = vpop.permute.xlu0 %1087  ;;  %v1093_v25 = vpop.permute.xlu1 %1092 }
 0x474   : > { %v1097_v29 = vmul.f32 %v10292_v12, %v1088_v24  ;;  %v1098_v36 = vmul.f32 %v10296_v14, %v1093_v25 }
 0x477   : > { %v1112_v27 = vpop.permute.xlu0 %1111  ;;  %v1102_v28 = vpop.permute.xlu1 %1101 }
 0x478   : > { %v1119_v30 = vadd.f32 %v1102_v28, %v1095_v26  ;;  %v1121_v32 = vadd.f32 %v1112_v27, %v1097_v29 }
 0x47a   : > { %v1127_v33 = vmul.f32 0.01, %v1119_v30  ;;  %vm1123_vm1 = vcmp.ge.f32.partialorder %v1119_v30, 0.0  ;;  %v1129_v38 = vmul.f32 0.01, %v1121_v32  ;;  %vm1125_vm3 = vcmp.ge.f32.partialorder %v1121_v32, 0.0 }
 0x47b   : > { %v1107_v34 = vpop.permute.xlu1 %1106 }
 0x47c   : > { %v1120_v35 = vadd.f32 %v1107_v34, %v1096_v31  ;;  %v1131_v39 = vsel %vm1123_vm1, %v1119_v30, %v1127_v33  ;;  %v1133_v44 = vsel %vm1125_vm3, %v1121_v32, %v1129_v38  ;;  %vm1857_vm1 = vcmask 523264  }
 0x47d   : > { %v1141_v12 = vmul.f32 %v7134_v37, %v1131_v39  ;;  %v1143_v47 = vmul.f32 %v7134_v37, %v1133_v44 }
 0x47e   : > { %vm1124_vm2 = vcmp.ge.f32.partialorder %v1120_v35, 0.0  ;;  %v1128_v40 = vmul.f32 0.01, %v1120_v35 }
 0x47f   : > { %v1117_v13 = vpop.permute.xlu1 %1116 }
 0x480   : > { %v1132_v41 = vsel %vm1124_vm2, %v1120_v35, %v1128_v40  ;;  %v1122_v42 = vadd.f32 %v1117_v13, %v1098_v36  ;;  %vm1909_vm2 = vcmask 654336  }
 0x481   : > { %v1142_v43 = vmul.f32 %v7134_v37, %v1132_v41 }
 0x482   : > { %vm1126_vm4 = vcmp.ge.f32.partialorder %v1122_v42, 0.0  ;;  %v1130_v16 = vmul.f32 0.01, %v1122_v42 }
 0x483   : > { %v1145_v45 = vpack.c.bf16 %v1142_v43, %v1141_v12 }
 0x484   : > { %v1134_v46 = vsel %vm1126_vm4, %v1122_v42, %v1130_v16 }
 0x485   : > { %1147 = vst.msk [vmem:[#allocation2] sm:$0xff] %vm1001_vm0, %v1145_v45  ;;  %v1144_v14 = vmul.f32 %v7134_v37, %v1134_v46 }
 0x487   : > { %v1146_v48 = vpack.c.bf16 %v1144_v14, %v1143_v47 }
 0x489   : > { %1148 = vst.msk [vmem:[#allocation2 + $0x8] sm:$0xff] %vm1001_vm0, %v1146_v48  ;;  %vm1843_vm0 = vcmask 900096  }
 0x48c   : > { %v1149_v49 = vld [vmem:[#allocation2] sm:$0xff] }
 0x48d   : > { %1153 = vrot.lane.b32.xlu0 %v1149_v49, %s9786_s1  ;;  %7455 = vmatpush3.bf16.msra.mxu1 %v1149_v49 }
 0x48e   : > { %7456 = vmatprep.subr.bf16.mxu1 %v9785_v21 }
 0x490   : > { %v1150_v50 = vld [vmem:[#allocation2 + $0x8] sm:$0xff] }
 0x491   : > { %1159 = vrot.lane.b32.xlu0 %v1149_v49, %s9787_s21  ;;  %1155 = vrot.lane.b32.xlu1 %v1150_v50, %s9786_s1 }
 0x492   : > { %7457 = vmatpush3.bf16.msra.mxu1 %v1150_v50 }
 0x493   : > { %7458 = vmatprep.subr.bf16.mxu1 %v9785_v21 }
 0x495   : > { %1165 = vrot.lane.b32.xlu0 %v1149_v49, %s9788_s18  ;;  %1161 = vrot.lane.b32.xlu1 %v1150_v50, %s9787_s21 }
 0x499   : > { %1167 = vrot.lane.b32.xlu1 %v1150_v50, %s9788_s18 }
 0x4ff   : > { %v1154_v51 = vpop.permute.xlu0 %1153 }
 0x500   : > { %7475 = vmatpush3.bf16.msra.mxu0 %v1154_v51  ;;  %1257 = vrot.lane.b32.xlu0 %v1154_v51, %s9786_s1 }
 0x501   : > { %7459 = vmatpush3.bf16.msra.mxu1 %v1154_v51  ;;  %7476 = vmatprep.subr.bf16.mxu0 %v9785_v21 }
 0x502   : > { %7460 = vmatprep.subr.bf16.mxu1 %v9785_v21 }
 0x503   : > { %v1160_v52 = vpop.permute.xlu0 %1159  ;;  %v1156_v53 = vpop.permute.xlu1 %1155 }
 0x504   : > { %1261 = vrot.lane.b32.xlu0 %v1160_v52, %s9786_s1  ;;  %7477 = vmatpush3.bf16.msra.mxu0 %v1156_v53 }
 0x505   : > { %1259 = vrot.lane.b32.xlu1 %v1156_v53, %s9786_s1  ;;  %7461 = vmatpush3.bf16.msra.mxu1 %v1156_v53 }
 0x506   : > { %7462 = vmatprep.subr.bf16.mxu1 %v9785_v21  ;;  %7478 = vmatprep.subr.bf16.mxu0 %v9785_v21 }
 0x507   : > { %v10347_v54 = vpop.permute.xlu0 %1165  ;;  %v1162_v55 = vpop.permute.xlu1 %1161 }
 0x508   : > { %1265 = vrot.lane.b32.xlu0 %v10347_v54, %s9786_s1 }
 0x509   : > { %1263 = vrot.lane.b32.xlu1 %v1162_v55, %s9786_s1  ;;  %7463 = vmatpush3.bf16.msra.mxu1 %v1160_v52 }
 0x50a   : > { %7464 = vmatprep.subr.bf16.mxu1 %v9785_v21 }
 0x50b   : > { %v10353_v56 = vpop.permute.xlu1 %1167 }
 0x50c   : > { %1345 = vrot.lane.b32.xlu0 %v1154_v51, %s9787_s21 }
 0x50d   : > { %1267 = vrot.lane.b32.xlu1 %v10353_v56, %s9786_s1  ;;  %7465 = vmatpush3.bf16.msra.mxu1 %v1162_v55 }
 0x50e   : > { %7466 = vmatprep.subr.bf16.mxu1 %v9785_v21 }
 0x510   : > { %1347 = vrot.lane.b32.xlu0 %v1156_v53, %s9787_s21 }
 0x511   : > { %1433 = vrot.lane.b32.xlu1 %v1154_v51, %s9788_s18  ;;  %7467 = vmatpush3.bf16.msra.mxu1 %v10347_v54 }
 0x512   : > { %7468 = vmatprep.subr.bf16.mxu1 %v9785_v21 }
 0x514   : > { %1349 = vrot.lane.b32.xlu0 %v1160_v52, %s9787_s21 }
 0x515   : > { %1435 = vrot.lane.b32.xlu1 %v1156_v53, %s9788_s18  ;;  %7469 = vmatpush3.bf16.msra.mxu1 %v10353_v56 }
 0x516   : > { %7494 = vmatprep.subr.bf16.mxu1 %v9785_v21 }
 0x518   : > { %1351 = vrot.lane.b32.xlu0 %v1162_v55, %s9787_s21  ;;  %7471 = vmatmul.mubr.bf16.vlgmr.msra.gmra.mrb[0].mxu1 %v9136_v57 }
 0x519   : > { %1437 = vrot.lane.b32.xlu1 %v1160_v52, %s9788_s18  ;;  %7495 = vmatpush3.bf16.msra.mxu1 %v1160_v52 }
 0x51a   : > { %7496 = vmatprep.subr.bf16.mxu1 %v9785_v21  ;;  %7510 = vmatprep.mubr.msk.bf16.mxu1 %vm9789_vm5, %v9785_v21 }
 0x51c   : > { %1353 = vrot.lane.b32.xlu0 %v10347_v54, %s9787_s21 }
 0x51d   : > { %1439 = vrot.lane.b32.xlu1 %v1162_v55, %s9788_s18  ;;  %7497 = vmatpush3.bf16.msra.mxu1 %v1162_v55 }
 0x51e   : > { %7498 = vmatprep.subr.bf16.mxu1 %v9785_v21 }
 0x520   : > { %1355 = vrot.lane.b32.xlu0 %v10353_v56, %s9787_s21  ;;  %s11061_s21 = sld [smem:[#allocation49_spill]] }
 0x521   : > { %1441 = vrot.lane.b32.xlu1 %v10347_v54, %s9788_s18 }
 0x525   : > { %1443 = vrot.lane.b32.xlu1 %v10353_v56, %s9788_s18 }
 0x572   : > { %v1258_v58 = vpop.permute.xlu0 %1257 }
 0x573   : > { %7479 = vmatpush3.bf16.msra.mxu0 %v1258_v58 }
 0x574   : > { %7480 = vmatprep.subr.bf16.mxu0 %v9785_v21 }
 0x576   : > { %v1262_v59 = vpop.permute.xlu0 %1261 }
 0x577   : > { %v1260_v60 = vpop.permute.xlu1 %1259 }
 0x578   : > { %7481 = vmatpush3.bf16.msra.mxu0 %v1260_v60 }
 0x579   : > { %7482 = vmatprep.subr.bf16.mxu0 %v9785_v21 }
 0x57a   : > { %v1266_v61 = vpop.permute.xlu0 %1265 }
 0x57b   : > { %v1264_v62 = vpop.permute.xlu1 %1263 }
 0x57c   : > { %7483 = vmatpush3.bf16.msra.mxu0 %v1262_v59 }
 0x57d   : > { %7484 = vmatprep.subr.bf16.mxu0 %v9785_v21 }
 0x57e   : > { %v1346_v63 = vpop.permute.xlu0 %1345 }
 0x57f   : > { %7499 = vmatpush3.bf16.msra.mxu1 %v1346_v63  ;;  %v1268_v2 = vpop.permute.xlu1 %1267 }
 0x580   : > { %7485 = vmatpush3.bf16.msra.mxu0 %v1264_v62  ;;  %7500 = vmatprep.subr.bf16.mxu1 %v9785_v21 }
 0x581   : > { %7486 = vmatprep.subr.bf16.mxu0 %v9785_v21 }
 0x582   : > { %v1348_v1 = vpop.permute.xlu0 %1347 }
 0x583   : > { %7501 = vmatpush3.bf16.msra.mxu1 %v1348_v1  ;;  %v1434_v5 = vpop.permute.xlu1 %1433 }
 0x584   : > { %7487 = vmatpush3.bf16.msra.mxu0 %v1266_v61  ;;  %7502 = vmatprep.subr.bf16.mxu1 %v9785_v21 }
 0x585   : > { %7488 = vmatprep.subr.bf16.mxu0 %v9785_v21 }
 0x586   : > { %v1350_v3 = vpop.permute.xlu0 %1349 }
 0x587   : > { %7503 = vmatpush3.bf16.msra.mxu1 %v1350_v3  ;;  %v1436_v8 = vpop.permute.xlu1 %1435 }
 0x588   : > { %7489 = vmatpush3.bf16.msra.mxu0 %v1268_v2  ;;  %7504 = vmatprep.subr.bf16.mxu1 %v9785_v21 }
 0x589   : > { %7514 = vmatprep.subr.bf16.mxu0 %v9785_v21 }
 0x58a   : > { %v1352_v6 = vpop.permute.xlu0 %1351 }
 0x58b   : > { %7491 = vmatmul.mubr.bf16.vlgmr.msra.gmra.mrb[4].mxu0 %v9137_v4  ;;  %7505 = vmatpush3.bf16.msra.mxu1 %v1352_v6  ;;  %v1438_v11 = vpop.permute.xlu1 %1437 }
 0x58c   : > { %7515 = vmatpush3.bf16.msra.mxu0 %v10347_v54  ;;  %7506 = vmatprep.subr.bf16.mxu1 %v9785_v21 }
 0x58d   : > { %7516 = vmatprep.subr.bf16.mxu0 %v9785_v21  ;;  %7530 = vmatprep.mubr.msk.bf16.mxu0 %vm9789_vm5, %v9785_v21 }
 0x58e   : > { %v1354_v7 = vpop.permute.xlu0 %1353 }
 0x58f   : > { %7507 = vmatpush3.bf16.msra.mxu1 %v1354_v7  ;;  %v1440_v15 = vpop.permute.xlu1 %1439 }
 0x590   : > { %7517 = vmatpush3.bf16.msra.mxu0 %v10353_v56  ;;  %7508 = vmatprep.subr.bf16.mxu1 %v9785_v21 }
 0x591   : > { %7518 = vmatprep.subr.bf16.mxu0 %v9785_v21 }
 0x592   : > { %v1356_v9 = vpop.permute.xlu0 %1355 }
 0x593   : > { %7509 = vmatpush3.bf16.msra.mxu1 %v1356_v9  ;;  %v1442_v17 = vpop.permute.xlu1 %1441 }
 0x594   : > { %7519 = vmatpush3.bf16.msra.mxu0 %v1434_v5  ;;  %7534 = vmatprep.subr.bf16.mxu1 %v9785_v21 }
 0x595   : > { %7520 = vmatprep.subr.bf16.mxu0 %v9785_v21 }
 0x596   : > { %7511 = vmatmul.mubr.bf16.vlgmr.msra.gmra.mrb[4].mxu1 %v9138_v10 }
 0x597   : > { %7538 = vmatprep.mubr.msk.bf16.mxu1 %vm9789_vm5, %v9785_v21  ;;  %v1444_v18 = vpop.permute.xlu1 %1443 }
 0x598   : > { %7521 = vmatpush3.bf16.msra.mxu0 %v1436_v8 }
 0x599   : > { %7522 = vmatprep.subr.bf16.mxu0 %v9785_v21 }
 0x59c   : > { %7523 = vmatpush3.bf16.msra.mxu0 %v1438_v11 }
 0x59d   : > { %7524 = vmatprep.subr.bf16.mxu0 %v9785_v21 }
 0x5a0   : > { %7525 = vmatpush3.bf16.msra.mxu0 %v1440_v15 }
 0x5a1   : > { %7526 = vmatprep.subr.bf16.mxu0 %v9785_v21 }
 0x5a4   : > { %7527 = vmatpush3.bf16.msra.mxu0 %v1442_v17 }
 0x5a5   : > { %7528 = vmatprep.subr.bf16.mxu0 %v9785_v21 }
 0x5a8   : > { %7529 = vmatpush3.bf16.msra.mxu0 %v1444_v18 }
 0x5a9   : > { %7566 = vmatprep.subr.bf16.mxu0 %v9785_v21 }
 0x5ab   : > { %7531 = vmatmul.mubr.bf16.vlgmr.msra.gmra.mrb[8].mxu0 %v9139_v19 }
 0x5ac   : > { %7574 = vmatprep.mubr.msk.bf16.mxu0 %vm9789_vm5, %v9785_v21 }
 0x5eb   : > { %v10410_v22 = vpop.f32.mrb[0].mxu1 }
 0x5ec   : > { %v1227_v23 = vmul.f32 %v7136_v20, %v10410_v22  ;;  %v7472_v24 = vpop.f32.mrb[1].mxu1 }
 0x5ed   : > { %v10413_v25 = vpop.f32.mrb[2].mxu1 }
 0x5ee   : > { %v1228_v26 = vmul.f32 %v7136_v20, %v10413_v25  ;;  %v7473_v27 = vpop.f32.mrb[3].mxu1  ;;  %v1230_v28 = vsel %vm1229_vm6, %v1227_v23, 0.0  ;;  %v1238_v29 = vmul.f32 %v1227_v23, %v1227_v23 }
 0x5ef   : > { %1231 = vadd.xlane.f32.xlu0 %v1230_v28 }
 0x5f0   : > { %v1233_v30 = vsel %vm1229_vm6, %v1228_v26, 0.0  ;;  %v1239_v31 = vmul.f32 %v1228_v26, %v1228_v26  ;;  %v1240_v33 = vsel %vm1229_vm6, %v1238_v29, 0.0 }
 0x5f1   : > { %1234 = vadd.xlane.f32.xlu1 %v1233_v30 }
 0x5f2   : > { %v1243_v32 = vsel %vm1229_vm6, %v1239_v31, 0.0 }
 0x5f3   : > { %1244 = vadd.xlane.f32.xlu0 %v1243_v32 }
 0x5f5   : > { %1241 = vadd.xlane.f32.xlu1 %v1240_v33 }
 0x65e   : > { %v10420_v34 = vpop.f32.mrb[4].mxu0 }
 0x65f   : > { %v1316_v35 = vmul.f32 %v7136_v20, %v10420_v34  ;;  %v7492_v36 = vpop.f32.mrb[5].mxu0 }
 0x660   : > { %v10423_v37 = vpop.f32.mrb[6].mxu0 }
 0x661   : > { %v1317_v38 = vmul.f32 %v7136_v20, %v10423_v37  ;;  %v7493_v39 = vpop.f32.mrb[7].mxu0  ;;  %v1318_v40 = vsel %vm1229_vm6, %v1316_v35, 0.0  ;;  %v1326_v45 = vmul.f32 %v1316_v35, %v1316_v35 }
 0x662   : > { %1319 = vadd.xlane.f32.xlu0 %v1318_v40 }
 0x663   : > { %v1321_v13 = vsel %vm1229_vm6, %v1317_v38, 0.0  ;;  %v1327_v14 = vmul.f32 %v1317_v38, %v1317_v38  ;;  %v1328_v49 = vsel %vm1229_vm6, %v1326_v45, 0.0 }
 0x665   : > { %v1331_v51 = vsel %vm1229_vm6, %v1327_v14, 0.0 }
 0x666   : > { %1322 = vadd.xlane.f32.xlu0 %v1321_v13 }
 0x669   : > { %v10428_v41 = vpop.f32.mrb[4].mxu1 }
 0x66a   : > { %v1404_v42 = vmul.f32 %v7136_v20, %v10428_v41  ;;  %v7512_v12 = vpop.f32.mrb[5].mxu1 }
 0x66b   : > { %v10431_v43 = vpop.f32.mrb[6].mxu1 }
 0x66c   : > { %v1405_v44 = vmul.f32 %v7136_v20, %v10431_v43  ;;  %v1406_v16 = vsel %vm1229_vm6, %v1404_v42, 0.0  ;;  %v7513_v46 = vpop.f32.mrb[7].mxu1  ;;  %v1414_v48 = vmul.f32 %v1404_v42, %v1404_v42 }
 0x66d   : > { %1407 = vadd.xlane.f32.xlu1 %v1406_v16 }
 0x66e   : > { %v1409_v47 = vsel %vm1229_vm6, %v1405_v44, 0.0  ;;  %v1415_v50 = vmul.f32 %v1405_v44, %v1405_v44  ;;  %v1416_v52 = vsel %vm1229_vm6, %v1414_v48, 0.0  ;;  %v1524_v48 = vld [vmem:[#allocation15] sm:$0xff] }
 0x66f   : > { %1410 = vadd.xlane.f32.xlu0 %v1409_v47 }
 0x670   : > { %v1419_v53 = vsel %vm1229_vm6, %v1415_v50, 0.0  ;;  %v1525_v50 = vld [vmem:[#allocation15 + $0x8] sm:$0xff] }
 0x671   : > { %1329 = vadd.xlane.f32.xlu1 %v1328_v49 }
 0x673   : > { %1332 = vadd.xlane.f32.xlu0 %v1331_v51 }
 0x675   : > { %1417 = vadd.xlane.f32.xlu1 %v1416_v52 }
 0x677   : > { %1420 = vadd.xlane.f32.xlu0 %v1419_v53  ;;  %v1528_v53 = vld [vmem:[#allocation16] sm:$0xff] }
 0x67c   : > { %v1232_v3 = vpop.xlane.xlu0 %1231 }
 0x67e   : > { %v10440_v54 = vpop.f32.mrb[8].mxu0  ;;  %v1235_v5 = vpop.xlane.xlu1 %1234 }
 0x67f   : > { %v1492_v55 = vmul.f32 %v7136_v20, %v10440_v54  ;;  %v7532_v56 = vpop.f32.mrb[9].mxu0 }
 0x680   : > { %v10443_v57 = vpop.f32.mrb[10].mxu0  ;;  %v1245_v4 = vpop.xlane.xlu0 %1244 }
 0x681   : > { %v1493_v58 = vmul.f32 %v7136_v20, %v10443_v57  ;;  %v7533_v59 = vpop.f32.mrb[11].mxu0  ;;  %v1494_v60 = vsel %vm1229_vm6, %v1492_v55, 0.0  ;;  %v1502_v61 = vmul.f32 %v1492_v55, %v1492_v55 }
 0x682   : > { %1495 = vadd.xlane.f32.xlu1 %v1494_v60  ;;  %v1242_v7 = vpop.xlane.xlu1 %1241  ;;  %v1529_v60 = vld [vmem:[#allocation16 + $0x8] sm:$0xff] }
 0x683   : > { %v1497_v62 = vsel %vm1229_vm6, %v1493_v58, 0.0  ;;  %v1503_v63 = vmul.f32 %v1493_v58, %v1493_v58  ;;  %v1504_v1 = vsel %vm1229_vm6, %v1502_v61, 0.0 }
 0x684   : > { %1498 = vadd.xlane.f32.xlu0 %v1497_v62  ;;  %v9140_v62 = vld [vmem:[#allocation19 + $0xc] sm:$0xff]  }
 0x685   : > { %v1507_v2 = vsel %vm1229_vm6, %v1503_v63, 0.0  ;;  %7535 = vmatpush3.bf16.msra.mxu1 %v9140_v62  ;;  %v9141_v63 = vld [vmem:[#allocation19 + $0x14] ss:$0 sps:$4 sm:$0xff]  }
 0x686   : > { %1505 = vadd.xlane.f32.xlu1 %v1504_v1  ;;  %7536 = vmatprep.subr.bf16.mxu1 %v9785_v21  ;;  %v1597_v1 = vsel %vm1595_vm7, %v9141_v63, 0 }
 0x688   : > { %1508 = vadd.xlane.f32.xlu0 %v1507_v2 }
 0x689   : > { %7537 = vmatpush3.bf16.msra.mxu1 %v1597_v1 }
 0x68a   : > { %7542 = vmatprep.subr.bf16.mxu1 %v9785_v21 }
 0x6ef   : > { %v1320_v6 = vpop.xlane.xlu0 %1319 }
 0x6f0   : > { %v1324_v18 = vadd.f32 %v1320_v6, %v1232_v3 }
 0x6f3   : > { %v1323_v8 = vpop.xlane.xlu0 %1322 }
 0x6f4   : > { %v1325_v20 = vadd.f32 %v1323_v8, %v1235_v5 }
 0x6fa   : > { %v1408_v9 = vpop.xlane.xlu1 %1407 }
 0x6fb   : > { %v1412_v23 = vadd.f32 %v1408_v9, %v1324_v18 }
 0x6fc   : > { %v1411_v10 = vpop.xlane.xlu0 %1410 }
 0x6fd   : > { %v1413_v26 = vadd.f32 %v1411_v10, %v1325_v20 }
 0x6fe   : > { %v1330_v11 = vpop.xlane.xlu1 %1329 }
 0x6ff   : > { %v1334_v27 = vadd.f32 %v1330_v11, %v1242_v7 }
 0x700   : > { %v1333_v15 = vpop.xlane.xlu0 %1332 }
 0x701   : > { %v1335_v30 = vadd.f32 %v1333_v15, %v1245_v4 }
 0x702   : > { %v1418_v17 = vpop.xlane.xlu1 %1417 }
 0x703   : > { %v1422_v31 = vadd.f32 %v1418_v17, %v1334_v27 }
 0x704   : > { %v1421_v19 = vpop.xlane.xlu0 %1420 }
 0x705   : > { %v1423_v36 = vadd.f32 %v1421_v19, %v1335_v30 }
 0x70f   : > { %v1496_v24 = vpop.xlane.xlu1 %1495 }
 0x710   : > { %v1500_v28 = vadd.f32 %v1496_v24, %v1412_v23 }
 0x711   : > { %v1499_v29 = vpop.xlane.xlu0 %1498 }
 0x712   : > { %v1512_v32 = vmul.f32 0.015625, %v1500_v28  ;;  %v1501_v33 = vadd.f32 %v1499_v29, %v1413_v26 }
 0x713   : > { %v1506_v35 = vpop.xlane.xlu1 %1505 }
 0x714   : > { %v1513_v38 = vmul.f32 0.015625, %v1501_v33  ;;  %v1510_v39 = vadd.f32 %v1506_v35, %v1422_v31  ;;  %v1516_v13 = vmul.f32 %v1512_v32, %v1512_v32 }
 0x715   : > { %v1509_v40 = vpop.xlane.xlu0 %1508 }
 0x716   : > { %v1514_v42 = vmul.f32 0.015625, %v1510_v39  ;;  %v1511_v12 = vadd.f32 %v1509_v40, %v1423_v36  ;;  %v1517_v44 = vmul.f32 %v1513_v38, %v1513_v38  ;;  %v9142_v36 = vld [vmem:[#allocation19] sm:$0xff]  }
 0x718   : > { %v1518_v16 = vsub.f32 %v1514_v42, %v1516_v13  ;;  %v1515_v45 = vmul.f32 0.015625, %v1511_v12  ;;  %v9143_v42 = vld [vmem:[#allocation19 + $0x8] ss:$0 sps:$4 sm:$0xff]  }
 0x71a   : > { %v1520_v46 = vadd.f32 1e-05, %v1518_v16  ;;  %v1519_v47 = vsub.f32 %v1515_v45, %v1517_v44  ;;  %v1653_v16 = vsel %vm1595_vm7, %v9143_v42, 0  ;;  %v9144_v45 = vld [vmem:[#allocation19 + $0x18] sm:$0xff]  }
 0x71c   : > { %9237 = vrsqrt.f32 %v1520_v46  ;;  %v1521_v14 = vadd.f32 1e-05, %v1519_v47  ;;  %v9145_v46 = vld [vmem:[#allocation19 + $0x20] ss:$0 sps:$4 sm:$0xff]  }
 0x71d   : > { %v1724_v47 = vsel %vm1595_vm7, %v9145_v46, 0  ;;  %v9151_v46 = vld [vmem:[%s11060_s4 + $0x80] ss:$12 sps:$4 sm:$0xff]  }
 0x71e   : > { %9239 = vrsqrt.f32 %v1521_v14  ;;  %v9146_v14 = vld [vmem:[#allocation19 + $0x24] sm:$0xff]  }
 0x726   : > { %v9238_v49 = vpop.eup %9237 }
 0x727   : > { %v1526_v51 = vmul.f32 %v9238_v49, %v1524_v48  ;;  %v9147_v48 = vld [vmem:[#allocation19 + $0x2c] ss:$0 sps:$4 sm:$0xff]  }
 0x728   : > { %v9240_v52 = vpop.eup %9239  ;;  %v1797_v49 = vsel %vm1595_vm7, %v9147_v48, 0  ;;  %v9152_v48 = vld [vmem:[%s11060_s4 + $0x90] ss:$12 sps:$4 sm:$0xff]  }
 0x729   : > { %1536 = vperm.xlu1 %9133, %v1526_v51   ;;  %v1527_v55 = vmul.f32 %v9240_v52, %v1525_v50  ;;  %v1530_v56 = vmul.f32 %v1526_v51, %v1512_v32 }
 0x72b   : > { %1541 = vperm.xlu0 %9132, %v1527_v55   ;;  %v1532_v58 = vsub.f32 %v1528_v53, %v1530_v56  ;;  %v1531_v59 = vmul.f32 %v1527_v55, %v1513_v38 }
 0x72d   : > { %1548 = vperm.xlu1 %9133, %v1532_v58   ;;  %v1533_v61 = vsub.f32 %v1529_v60, %v1531_v59 }
 0x731   : > { %1553 = vperm.xlu1 %9133, %v1533_v61   ;;  %v1856_v61 = vld [vmem:[#allocation21] sm:$0xf] }
 0x7a8   : > { %v1537_v2 = vpop.permute.xlu1 %1536 }
 0x7a9   : > { %v1544_v3 = vmul.f32 %v1537_v2, %v10410_v22  ;;  %v1568_v4 = vmul.f32 %v1537_v2, %v10420_v34  ;;  %v1696_v5 = vmul.f32 %v1537_v2, %v10428_v41  ;;  %v1769_v6 = vmul.f32 %v1537_v2, %v10440_v54 }
 0x7aa   : > { %v1542_v7 = vpop.permute.xlu0 %1541 }
 0x7ab   : > { %v1545_v17 = vmul.f32 %v1542_v7, %v10413_v25  ;;  %v1569_v18 = vmul.f32 %v1542_v7, %v10423_v37  ;;  %v1697_v34 = vmul.f32 %v1542_v7, %v10431_v43  ;;  %v1770_v41 = vmul.f32 %v1542_v7, %v10443_v57  ;;  %v1984_v7 = vld [vmem:[#allocation21 + $0x8] sm:$0xf] }
 0x7ac   : > { %v1549_v8 = vpop.permute.xlu1 %1548 }
 0x7ad   : > { %v1556_v9 = vadd.f32 %v1549_v8, %v1544_v3  ;;  %v1570_v10 = vadd.f32 %v1568_v4, %v1549_v8  ;;  %v1698_v11 = vadd.f32 %v1696_v5, %v1549_v8  ;;  %v1771_v15 = vadd.f32 %v1769_v6, %v1549_v8  ;;  %v1920_v4 = vld [vmem:[#allocation21 + $0x4] sm:$0xf] }
 0x7af   : > { %vm1558_vm8 = vcmp.ge.f32.partialorder %v1556_v9, 0.0  ;;  %v1560_v19 = vmul.f32 0.01, %v1556_v9  ;;  %vm1572_vm9 = vcmp.ge.f32.partialorder %v1570_v10, 0.0  ;;  %v1574_v22 = vmul.f32 0.01, %v1570_v10 }
 0x7b0   : > { %vm1700_vm10 = vcmp.ge.f32.partialorder %v1698_v11, 0.0  ;;  %v1702_v54 = vmul.f32 0.01, %v1698_v11  ;;  %v1554_v20 = vpop.permute.xlu1 %1553  ;;  %vm1773_vm11 = vcmp.ge.f32.partialorder %v1771_v15, 0.0  ;;  %v1775_v23 = vmul.f32 0.01, %v1771_v15 }
 0x7b1   : > { %v1557_v24 = vadd.f32 %v1554_v20, %v1545_v17  ;;  %v1571_v26 = vadd.f32 %v1569_v18, %v1554_v20  ;;  %v1562_v27 = vsel %vm1558_vm8, %v1556_v9, %v1560_v19  ;;  %v1576_v28 = vsel %vm1572_vm9, %v1570_v10, %v1574_v22  ;;  %v2048_v10 = vld [vmem:[#allocation21 + $0xc] sm:$0xf] }
 0x7b2   : > { %v1699_v25 = vadd.f32 %v1697_v34, %v1554_v20  ;;  %v1772_v29 = vadd.f32 %v1770_v41, %v1554_v20  ;;  %v1704_v57 = vsel %vm1700_vm10, %v1698_v11, %v1702_v54  ;;  %v1777_v32 = vsel %vm1773_vm11, %v1771_v15, %v1775_v23  ;;  %v7153_v11 = vld [vmem:[#allocation25] ss:$0 sm:$0xff] }
 0x7b3   : > { %vm1559_vm12 = vcmp.ge.f32.partialorder %v1557_v24, 0.0  ;;  %v1561_v37 = vmul.f32 0.01, %v1557_v24  ;;  %vm1573_vm13 = vcmp.ge.f32.partialorder %v1571_v26, 0.0  ;;  %v1575_v30 = vmul.f32 0.01, %v1571_v26 }
 0x7b4   : > { %vm1701_vm14 = vcmp.ge.f32.partialorder %v1699_v25, 0.0  ;;  %v1703_v31 = vmul.f32 0.01, %v1699_v25  ;;  %vm1774_vm15 = vcmp.ge.f32.partialorder %v1772_v29, 0.0  ;;  %v1776_v43 = vmul.f32 0.01, %v1772_v29 }
 0x7b5   : > { %v1563_v33 = vsel %vm1559_vm12, %v1557_v24, %v1561_v37  ;;  %v1577_v35 = vsel %vm1573_vm13, %v1571_v26, %v1575_v30  ;;  %vm2915_vm9 = vcmask 699392   ;;  %vm2933_vm10 = vcmask 1039360  }
 0x7b6   : > { %v1564_v38 = vpack.c.bf16 %v1563_v33, %v1562_v27  ;;  %v1578_v39 = vpack.c.bf16 %v1577_v35, %v1576_v28  ;;  %v1705_v40 = vsel %vm1701_vm14, %v1699_v25, %v1703_v31  ;;  %v1778_v13 = vsel %vm1774_vm15, %v1772_v29, %v1776_v43 }
 0x7b7   : > { %v1706_v12 = vpack.c.bf16 %v1705_v40, %v1704_v57  ;;  %v1779_v44 = vpack.c.bf16 %v1778_v13, %v1777_v32  ;;  %vm2979_vm11 = vcmask 261120   ;;  %vm2951_vm12 = vcmask 891904  }
 0x7b8   : > { %7539 = vmatmul.mubr.msk.bf16.vlgmr.msra.gmra.mrb[8].mxu1 %vm1229_vm6, %v1578_v39 }
 0x7b9   : > { %7543 = vmatpush3.bf16.msra.mxu1 %v9142_v36  ;;  %7546 = vmatprep.mubr.msk.bf16.mxu1 %vm9789_vm5, %v9785_v21 }
 0x7ba   : > { %7544 = vmatprep.subr.bf16.mxu1 %v9785_v21 }
 0x7bd   : > { %7545 = vmatpush3.bf16.msra.mxu1 %v1653_v16  ;;  %v9148_v16 = vld [vmem:[%s11060_s4 + $0x78] ss:$12 sps:$4 sm:$0xff]  }
 0x7be   : > { %7550 = vmatprep.subr.bf16.mxu1 %v9785_v21 }
 0x7c4   : > { %7547 = vmatmul.mubr.msk.bf16.vlgmr.msra.gmra.mrb[8].mxu1 %vm1229_vm6, %v1564_v38 }
 0x7c5   : > { %7551 = vmatpush3.bf16.msra.mxu1 %v9144_v45  ;;  %7554 = vmatprep.mubr.msk.bf16.mxu1 %vm9789_vm5, %v9785_v21  ;;  %v9150_v45 = vld [vmem:[%s11060_s4 + $0x7c] ss:$12 sps:$4 sm:$0xff]  }
 0x7c6   : > { %7552 = vmatprep.subr.bf16.mxu1 %v9785_v21 }
 0x7c9   : > { %7553 = vmatpush3.bf16.msra.mxu1 %v1724_v47  ;;  %v9154_v47 = vld [vmem:[%s11060_s4 + $0x94] ss:$12 sps:$4 sm:$0xff]  }
 0x7ca   : > { %7558 = vmatprep.subr.bf16.mxu1 %v9785_v21 }
 0x7d0   : > { %7555 = vmatmul.mubr.msk.bf16.vlgmr.msra.gmra.mrb[8].mxu1 %vm1229_vm6, %v1706_v12 }
 0x7d1   : > { %7559 = vmatpush3.bf16.msra.mxu1 %v9146_v14  ;;  %7562 = vmatprep.mubr.msk.bf16.mxu1 %vm9789_vm5, %v9785_v21  ;;  %v9155_v14 = vld [vmem:[%s11060_s4 + $0x98] ss:$12 sps:$4 sm:$0xff]  }
 0x7d2   : > { %7560 = vmatprep.subr.bf16.mxu1 %v9785_v21 }
 0x7d5   : > { %7561 = vmatpush3.bf16.msra.mxu1 %v1797_v49  ;;  %v9158_v49 = vld [vmem:[%s11060_s4 + $0xac] ss:$12 sps:$4 sm:$0xff]  }
 0x7d6   : > { %7578 = vmatprep.subr.bf16.mxu1 %v9785_v21 }
 0x7dc   : > { %7563 = vmatmul.mubr.msk.bf16.vlgmr.msra.gmra.mrb[8].mxu1 %vm1229_vm6, %v1779_v44 }
 0x7dd   : > { %7586 = vmatprep.mubr.msk.bf16.mxu1 %vm9789_vm5, %v9785_v21 }
 0x8af   : > { %v1833_v50 = vpop.f32.mrb[8].mxu1 }
 0x8b0   : > { %v7564_v51 = vpop.f32.mrb[9].mxu1 }
 0x8b1   : > { %v1836_v52 = vpop.f32.mrb[10].mxu1  ;;  %v9156_v51 = vld [vmem:[%s11060_s4 + $0xa8] ss:$12 sps:$4 sm:$0xff]  }
 0x8b2   : > { %v1842_v53 = vpack.c.bf16 %v1836_v52, %v1833_v50  ;;  %v7565_v55 = vpop.f32.mrb[11].mxu1  ;;  %v9159_v50 = vld [vmem:[%s11060_s4 + $0xb0] ss:$12 sps:$4 sm:$0xff]  }
 0x8b4   : > { %1844 = vst.msk [vmem:[#allocation3] sm:$0xff] %vm1843_vm0, %v1842_v53 }
 0x8bb   : > { %v1845_v56 = vld [vmem:[#allocation3] sm:$0xff] }
 0x8bc   : > { %1850 = vrot.lane.b32.xlu1 %v1845_v56, %s9790_s23  ;;  %1847 = vrot.lane.b32.xlu0 %v1845_v56, %s9786_s1 }
 0x8bd   : > { %7567 = vmatpush3.bf16.msra.mxu0 %v1845_v56 }
 0x8be   : > { %7568 = vmatprep.subr.bf16.mxu0 %v9785_v21 }
 0x8c0   : > { %1853 = vrot.lane.b32.xlu0 %v1845_v56, %s9791_s15 }
 0x92e   : > { %v1851_v58 = vpop.permute.xlu1 %1850  ;;  %v1848_v59 = vpop.permute.xlu0 %1847 }
 0x92f   : > { %1923 = vrot.lane.b32.xlu0 %v1851_v58, %s9786_s1  ;;  %7579 = vmatpush3.bf16.msra.mxu1 %v1848_v59 }
 0x930   : > { %1921 = vrot.lane.b32.xlu1 %v1848_v59, %s9786_s1  ;;  %7569 = vmatpush3.bf16.msra.mxu0 %v1848_v59 }
 0x931   : > { %7570 = vmatprep.subr.bf16.mxu0 %v9785_v21  ;;  %7580 = vmatprep.subr.bf16.mxu1 %v9785_v21 }
 0x932   : > { %v1854_v60 = vpop.permute.xlu0 %1853 }
 0x933   : > { %1985 = vrot.lane.b32.xlu0 %v1848_v59, %s9790_s23 }
 0x934   : > { %1925 = vrot.lane.b32.xlu1 %v1854_v60, %s9786_s1  ;;  %7571 = vmatpush3.bf16.msra.mxu0 %v1851_v58 }
 0x935   : > { %7572 = vmatprep.subr.bf16.mxu0 %v9785_v21 }
 0x937   : > { %1987 = vrot.lane.b32.xlu0 %v1851_v58, %s9790_s23 }
 0x938   : > { %2049 = vrot.lane.b32.xlu1 %v1848_v59, %s9791_s15  ;;  %7573 = vmatpush3.bf16.msra.mxu0 %v1854_v60 }
 0x939   : > { %7590 = vmatprep.subr.bf16.mxu0 %v9785_v21 }
 0x93b   : > { %1989 = vrot.lane.b32.xlu0 %v1854_v60, %s9790_s23  ;;  %7575 = vmatmul.mubr.msk.bf16.vlgmr.msra.gmra.mrb[12].mxu0 %vm1857_vm1, %v1856_v61 }
 0x93c   : > { %2051 = vrot.lane.b32.xlu1 %v1851_v58, %s9791_s15  ;;  %7591 = vmatpush3.bf16.msra.mxu0 %v1851_v58 }
 0x93d   : > { %7592 = vmatprep.subr.bf16.mxu0 %v9785_v21  ;;  %7598 = vmatprep.mubr.msk.bf16.mxu0 %vm9789_vm5, %v9785_v21 }
 0x940   : > { %2053 = vrot.lane.b32.xlu1 %v1854_v60, %s9791_s15 }
 0x9a1   : > { %v1924_v62 = vpop.permute.xlu0 %1923 }
 0x9a2   : > { %v1922_v63 = vpop.permute.xlu1 %1921 }
 0x9a3   : > { %7581 = vmatpush3.bf16.msra.mxu1 %v1922_v63 }
 0x9a4   : > { %7582 = vmatprep.subr.bf16.mxu1 %v9785_v21 }
 0x9a5   : > { %v1986_v1 = vpop.permute.xlu0 %1985 }
 0x9a6   : > { %7593 = vmatpush3.bf16.msra.mxu0 %v1986_v1  ;;  %v1926_v2 = vpop.permute.xlu1 %1925 }
 0x9a7   : > { %7583 = vmatpush3.bf16.msra.mxu1 %v1924_v62  ;;  %7594 = vmatprep.subr.bf16.mxu0 %v9785_v21 }
 0x9a8   : > { %7584 = vmatprep.subr.bf16.mxu1 %v9785_v21 }
 0x9a9   : > { %v1988_v3 = vpop.permute.xlu0 %1987 }
 0x9aa   : > { %7595 = vmatpush3.bf16.msra.mxu0 %v1988_v3  ;;  %v2050_v6 = vpop.permute.xlu1 %2049 }
 0x9ab   : > { %7585 = vmatpush3.bf16.msra.mxu1 %v1926_v2  ;;  %7596 = vmatprep.subr.bf16.mxu0 %v9785_v21 }
 0x9ac   : > { %7602 = vmatprep.subr.bf16.mxu1 %v9785_v21 }
 0x9ad   : > { %v1990_v5 = vpop.permute.xlu0 %1989 }
 0x9ae   : > { %7587 = vmatmul.mubr.msk.bf16.vlgmr.msra.gmra.mrb[12].mxu1 %vm1857_vm1, %v1920_v4  ;;  %7597 = vmatpush3.bf16.msra.mxu0 %v1990_v5  ;;  %v2052_v8 = vpop.permute.xlu1 %2051 }
 0x9af   : > { %7603 = vmatpush3.bf16.msra.mxu1 %v1854_v60  ;;  %7610 = vmatprep.mubr.msk.bf16.mxu1 %vm9789_vm5, %v9785_v21 }
 0x9b0   : > { %7604 = vmatprep.subr.bf16.mxu1 %v9785_v21  ;;  %2268 = vmatprep.subr.bf16.mxu0 %v9150_v45  ;;  %v9186_v45 = vld [vmem:[%s11060_s4 + $0x64] ss:$12 sps:$4 sm:$0xff]  }
 0x9b1   : > { %7599 = vmatmul.mubr.msk.bf16.vlgmr.msra.gmra.mrb[16].mxu0 %vm1857_vm1, %v1984_v7 }
 0x9b2   : > { %2300 = vmatprep.mubr.bf16.mxu0 %v9784_v0  ;;  %v2054_v9 = vpop.permute.xlu1 %2053  ;;  %2269 = vmatpush1.bf16.msra.mxu0 %v9148_v16  ;;  %v9183_v16 = vld [vmem:[%s11060_s4 + $0x50] ss:$12 sps:$4 sm:$0xff]  }
 0x9b3   : > { %7605 = vmatpush3.bf16.msra.mxu1 %v2050_v6  ;;  %2270 = vmatprep.subr.bf16.mxu0 %v9154_v47  ;;  %v9184_v47 = vld [vmem:[%s11060_s4 + $0x60] ss:$12 sps:$4 sm:$0xff]  }
 0x9b4   : > { %7606 = vmatprep.subr.bf16.mxu1 %v9785_v21 }
 0x9b6   : > { %2271 = vmatpush1.bf16.msra.mxu0 %v9152_v48  ;;  %v9190_v48 = vld [vmem:[%s11060_s4 + $0xf4] ss:$12 sps:$4 sm:$0xff]  }
 0x9b7   : > { %7607 = vmatpush3.bf16.msra.mxu1 %v2052_v8  ;;  %2272 = vmatprep.subr.bf16.mxu0 %v9158_v49 }
 0x9b8   : > { %7608 = vmatprep.subr.bf16.mxu1 %v9785_v21 }
 0x9ba   : > { %2273 = vmatpush1.bf16.msra.mxu0 %v9156_v51  ;;  %v9191_v51 = vld [vmem:[%s11060_s4 + $0xf8] ss:$12 sps:$4 sm:$0xff]  }
 0x9bb   : > { %7609 = vmatpush3.bf16.msra.mxu1 %v2054_v9 }
 0x9bc   : > { %7614 = vmatprep.subr.bf16.mxu1 %v9785_v21 }
 0x9be   : > { %7611 = vmatmul.mubr.msk.bf16.vlgmr.msra.gmra.mrb[16].mxu1 %vm1857_vm1, %v2048_v10  ;;  %v2117_v10 = vld [vmem:[#allocation22] sm:$0xff] }
 0x9bf   : > { %7624 = vmatprep.mubr.msk.bf16.mxu1 %vm9789_vm5, %v9785_v21  ;;  %7615 = vmatpush3.bf16.msra.mxu1 %v9151_v46 }
 0x9c0   : > { %7616 = vmatprep.subr.bf16.mxu1 %v9785_v21 }
 0x9c3   : > { %7617 = vmatpush3.bf16.msra.mxu1 %v9155_v14  ;;  %v9187_v14 = vld [vmem:[%s11060_s4 + $0x68] ss:$12 sps:$4 sm:$0xff]  }
 0x9c4   : > { %7618 = vmatprep.subr.bf16.mxu1 %v9785_v21 }
 0x9c7   : > { %7619 = vmatpush3.bf16.msra.mxu1 %v9159_v50  ;;  %v9188_v50 = vld [vmem:[%s11060_s4 + $0xf0] ss:$12 sps:$4 sm:$0xff]  }
 0x9c8   : > { %7620 = vmatprep.subr.bf16.mxu1 %v9785_v21 }
 0xa0e   : > { %v10515_v15 = vpop.f32.mrb[12].mxu0 }
 0xa0f   : > { %v1908_v17 = vmul.f32 %v7153_v11, %v10515_v15  ;;  %v7576_v18 = vpop.f32.mrb[13].mxu0 }
 0xa10   : > { %v1898_v19 = vpop.f32.mrb[14].mxu0  ;;  %v2119_v18 = vld [vmem:[#allocation24] sm:$0xff] }
 0xa11   : > { %v7577_v22 = vpop.f32.mrb[15].mxu0  ;;  %v1910_v34 = vsel %vm1909_vm2, %v1908_v17, 0.0  ;;  %v1914_v41 = vmul.f32 %v1908_v17, %v1908_v17 }
 0xa12   : > { %1911 = vadd.xlane.f32.xlu0 %v1910_v34  ;;  %v9160_v22 = vld [vmem:[%s11060_s4 + $0xc0] ss:$12 sps:$4 sm:$0xff]   ;;  %v9162_v34 = vld [vmem:[%s11060_s4 + $0xc4] ss:$12 sps:$4 sm:$0xff]  }
 0xa13   : > { %v1915_v54 = vsel %vm1909_vm2, %v1914_v41, 0.0  ;;  %v9163_v41 = vld [vmem:[%s11060_s4 + $0xc8] ss:$12 sps:$4 sm:$0xff]   ;;  %2274 = vmatprep.subr.bf16.mxu0 %v9162_v34  ;;  %v9216_v34 = vld [vmem:[%s11060_s4 + $0x198] ss:$12 sps:$4 sm:$0xff]  }
 0xa14   : > { %7621 = vmatpush3.bf16.msra.mxu1 %v9163_v41  ;;  %2275 = vmatpush1.bf16.msra.mxu0 %v9160_v22  ;;  %v9219_v41 = vld [vmem:[%s11060_s4 + $0x1a0] ss:$12 sps:$4 sm:$0xff]  }
 0xa15   : > { %7622 = vmatprep.subr.bf16.mxu1 %v9785_v21 }
 0xa16   : > { %1916 = vadd.xlane.f32.xlu0 %v1915_v54 }
 0xa81   : > { %v10520_v20 = vpop.f32.mrb[12].mxu1 }
 0xa82   : > { %v1973_v23 = vmul.f32 %v7153_v11, %v10520_v20  ;;  %v7588_v24 = vpop.f32.mrb[13].mxu1 }
 0xa83   : > { %v1970_v26 = vpop.f32.mrb[14].mxu1  ;;  %v9164_v24 = vld [vmem:[%s11060_s4 + $0xd8] ss:$12 sps:$4 sm:$0xff]  }
 0xa84   : > { %v7589_v27 = vpop.f32.mrb[15].mxu1  ;;  %v10523_v28 = vpop.f32.mrb[16].mxu0  ;;  %v1974_v25 = vsel %vm1909_vm2, %v1973_v23, 0.0  ;;  %v1978_v29 = vmul.f32 %v1973_v23, %v1973_v23  ;;  %v9166_v23 = vld [vmem:[%s11060_s4 + $0xdc] ss:$12 sps:$4 sm:$0xff]  }
 0xa85   : > { %v2037_v37 = vmul.f32 %v7153_v11, %v10523_v28  ;;  %1975 = vadd.xlane.f32.xlu1 %v1974_v25  ;;  %v7600_v30 = vpop.f32.mrb[17].mxu0  ;;  %v9167_v26 = vld [vmem:[%s11060_s4 + $0xe0] ss:$12 sps:$4 sm:$0xff]   ;;  %2276 = vmatprep.subr.bf16.mxu0 %v9166_v23  ;;  %v9170_v27 = vld [vmem:[%s11060_s4 + $0x4] ss:$12 sps:$4 sm:$0xff]  }
 0xa86   : > { %v1979_v31 = vsel %vm1909_vm2, %v1978_v29, 0.0  ;;  %v2034_v43 = vpop.f32.mrb[18].mxu0  ;;  %2277 = vmatpush1.bf16.msra.mxu0 %v9164_v24  ;;  %7623 = vmatpush3.bf16.msra.mxu1 %v9167_v26  ;;  %v9223_v24 = vld [vmem:[%s11060_s4 + $0x1b8] ss:$12 sps:$4 sm:$0xff]  }
 0xa87   : > { %1980 = vadd.xlane.f32.xlu0 %v1979_v31  ;;  %v2038_v57 = vsel %vm1909_vm2, %v2037_v37, 0.0  ;;  %v2042_v32 = vmul.f32 %v2037_v37, %v2037_v37  ;;  %v7601_v33 = vpop.f32.mrb[19].mxu0  ;;  %7628 = vmatprep.subr.bf16.mxu1 %v9785_v21  ;;  %v9226_v26 = vld [vmem:[%s11060_s4 + $0x1cc] ss:$12 sps:$4 sm:$0xff]  }
 0xa88   : > { %2432 = vmatprep.subr.bf16.mxu0 %v9170_v27 }
 0xa89   : > { %2039 = vadd.xlane.f32.xlu1 %v2038_v57  ;;  %v2043_v35 = vsel %vm1909_vm2, %v2042_v32, 0.0  ;;  %v9168_v57 = vld [vmem:[%s11060_s4] ss:$12 sps:$4 sm:$0xff]   ;;  %v9171_v32 = vld [vmem:[%s11060_s4 + $0x8] ss:$12 sps:$4 sm:$0xff]  }
 0xa8b   : > { %2044 = vadd.xlane.f32.xlu0 %v2043_v35  ;;  %v9172_v35 = vld [vmem:[%s11060_s4 + $0x18] ss:$12 sps:$4 sm:$0xff]  }
 0xa91   : > { %v10530_v36 = vpop.f32.mrb[16].mxu1 }
 0xa92   : > { %v2101_v38 = vmul.f32 %v7153_v11, %v10530_v36  ;;  %v7612_v39 = vpop.f32.mrb[17].mxu1 }
 0xa93   : > { %v2098_v40 = vpop.f32.mrb[18].mxu1  ;;  %v9178_v39 = vld [vmem:[%s11060_s4 + $0x34] ss:$12 sps:$4 sm:$0xff]  }
 0xa94   : > { %v7613_v13 = vpop.f32.mrb[19].mxu1  ;;  %v2102_v42 = vsel %vm1909_vm2, %v2101_v38, 0.0  ;;  %v2106_v12 = vmul.f32 %v2101_v38, %v2101_v38  ;;  %v9175_v38 = vld [vmem:[%s11060_s4 + $0x20] ss:$12 sps:$4 sm:$0xff]  }
 0xa95   : > { %2103 = vadd.xlane.f32.xlu1 %v2102_v42  ;;  %v9176_v13 = vld [vmem:[%s11060_s4 + $0x30] ss:$12 sps:$4 sm:$0xff]   ;;  %v9179_v42 = vld [vmem:[%s11060_s4 + $0x38] ss:$12 sps:$4 sm:$0xff]  }
 0xa96   : > { %v2107_v44 = vsel %vm1909_vm2, %v2106_v12, 0.0  ;;  %v9182_v12 = vld [vmem:[%s11060_s4 + $0x4c] ss:$12 sps:$4 sm:$0xff]  }
 0xa97   : > { %2108 = vadd.xlane.f32.xlu0 %v2107_v44 }
 0xa9f   : > { %v1912_v52 = vpop.xlane.xlu0 %1911 }
 0xaa3   : > { %v1917_v53 = vpop.xlane.xlu0 %1916 }
 0xb12   : > { %v1976_v55 = vpop.xlane.xlu1 %1975 }
 0xb13   : > { %v1977_v59 = vadd.f32 %v1976_v55, %v1912_v52  ;;  %v9192_v55 = vld [vmem:[%s11060_s4 + $0x108] ss:$12 sps:$4 sm:$0xff]  }
 0xb14   : > { %v1981_v56 = vpop.xlane.xlu0 %1980 }
 0xb15   : > { %v1982_v61 = vadd.f32 %v1981_v56, %v1917_v53  ;;  %v9194_v53 = vld [vmem:[%s11060_s4 + $0x10c] ss:$12 sps:$4 sm:$0xff]   ;;  %v9195_v56 = vld [vmem:[%s11060_s4 + $0x110] ss:$12 sps:$4 sm:$0xff]  }
 0xb16   : > { %v2040_v58 = vpop.xlane.xlu1 %2039 }
 0xb17   : > { %v2041_v62 = vadd.f32 %v2040_v58, %v1977_v59  ;;  %v9198_v58 = vld [vmem:[%s11060_s4 + $0x124] ss:$12 sps:$4 sm:$0xff]  }
 0xb18   : > { %v2045_v60 = vpop.xlane.xlu0 %2044 }
 0xb19   : > { %v2046_v1 = vadd.f32 %v2045_v60, %v1982_v61  ;;  %v9196_v60 = vld [vmem:[%s11060_s4 + $0x120] ss:$12 sps:$4 sm:$0xff]   ;;  %v9199_v61 = vld [vmem:[%s11060_s4 + $0x128] ss:$12 sps:$4 sm:$0xff]  }
 0xb22   : > { %v2104_v63 = vpop.xlane.xlu1 %2103 }
 0xb23   : > { %v2105_v2 = vadd.f32 %v2104_v63, %v2041_v62  ;;  %v9202_v62 = vld [vmem:[%s11060_s4 + $0x13c] ss:$12 sps:$4 sm:$0xff]  }
 0xb24   : > { %v2109_v3 = vpop.xlane.xlu0 %2108 }
 0xb25   : > { %v2111_v4 = vmul.f32 0.00390625, %v2105_v2  ;;  %v2110_v5 = vadd.f32 %v2109_v3, %v2046_v1  ;;  %v9203_v1 = vld [vmem:[%s11060_s4 + $0x140] ss:$12 sps:$4 sm:$0xff]  }
 0xb26   : > { %v9206_v2 = vld [vmem:[%s11060_s4 + $0x154] ss:$12 sps:$4 sm:$0xff]  }
 0xb27   : > { %v2113_v6 = vmul.f32 %v2111_v4, %v2111_v4  ;;  %v2112_v7 = vmul.f32 0.00390625, %v2110_v5  ;;  %v9207_v5 = vld [vmem:[%s11060_s4 + $0x158] ss:$12 sps:$4 sm:$0xff]  }
 0xb29   : > { %v2114_v8 = vsub.f32 %v2112_v7, %v2113_v6  ;;  %v9210_v6 = vld [vmem:[%s11060_s4 + $0x16c] ss:$12 sps:$4 sm:$0xff]  }
 0xb2b   : > { %v2115_v9 = vadd.f32 1e-05, %v2114_v8  ;;  %v9208_v8 = vld [vmem:[%s11060_s4 + $0x168] ss:$12 sps:$4 sm:$0xff]  }
 0xb2d   : > { %9241 = vrsqrt.f32 %v2115_v9  ;;  %v9211_v9 = vld [vmem:[%s11060_s4 + $0x170] ss:$12 sps:$4 sm:$0xff]  }
 0xb37   : > { %v9242_v11 = vpop.eup %9241 }
 0xb38   : > { %v2118_v17 = vmul.f32 %v9242_v11, %v2117_v10  ;;  %v9214_v11 = vld [vmem:[%s11060_s4 + $0x184] ss:$12 sps:$4 sm:$0xff]  }
 0xb3a   : > { %2124 = vperm.xlu1 %9133, %v2118_v17   ;;  %v2120_v19 = vmul.f32 %v2118_v17, %v2111_v4  ;;  %v9204_v4 = vld [vmem:[%s11060_s4 + $0x150] ss:$12 sps:$4 sm:$0xff]   ;;  %v9212_v17 = vld [vmem:[%s11060_s4 + $0x180] ss:$12 sps:$4 sm:$0xff]  }
 0xb3c   : > { %v2121_v54 = vsub.f32 %v2119_v18, %v2120_v19  ;;  %v9215_v18 = vld [vmem:[%s11060_s4 + $0x188] ss:$12 sps:$4 sm:$0xff]  }
 0xb3d   : > { %v9218_v19 = vld [vmem:[%s11060_s4 + $0x19c] ss:$12 sps:$4 sm:$0xff]  }
 0xb3e   : > { %2130 = vperm.xlu0 %9132, %v2121_v54   ;;  %v9222_v54 = vld [vmem:[%s11060_s4 + $0x1b4] ss:$12 sps:$4 sm:$0xff]  }
 0xbb9   : > { %v10588_v25 = vpop.permute.xlu1 %2124 }
 0xbba   : > { %v2158_v29 = vmul.f32 %v10588_v25, %v10520_v20  ;;  %v9174_v20 = vld [vmem:[%s11060_s4 + $0x1c] ss:$12 sps:$4 sm:$0xff]   ;;  %v2127_v40 = vmul.f32 %v10588_v25, %v10515_v15  ;;  %v2513_v59 = vmul.f32 %v10588_v25, %v10523_v28  ;;  %v9200_v28 = vld [vmem:[%s11060_s4 + $0x138] ss:$12 sps:$4 sm:$0xff]   ;;  %v2707_v22 = vmul.f32 %v10588_v25, %v10530_v36 }
 0xbbb   : > { %v9180_v15 = vld [vmem:[%s11060_s4 + $0x48] ss:$12 sps:$4 sm:$0xff]   ;;  %v9220_v36 = vld [vmem:[%s11060_s4 + $0x1b0] ss:$12 sps:$4 sm:$0xff]  }
 0xbbc   : > { %v9224_v25 = vld [vmem:[%s11060_s4 + $0x1c8] ss:$12 sps:$4 sm:$0xff]  }
 0xbbd   : > { %v10592_v37 = vpop.permute.xlu0 %2130 }
 0xbbe   : > { %v2159_v30 = vadd.f32 %v2158_v29, %v10592_v37  ;;  %v2133_v44 = vadd.f32 %v10592_v37, %v2127_v40  ;;  %v2514_v63 = vadd.f32 %v2513_v59, %v10592_v37  ;;  %v2708_v23 = vadd.f32 %v2707_v22, %v10592_v37  ;;  %v9227_v29 = vld [vmem:[%s11060_s4 + $0x1d0] ss:$12 sps:$4 sm:$0xff]  }
 0xbc0   : > { %vm2160_vm3 = vcmp.ge.f32.partialorder %v2159_v30, 0.0  ;;  %v2161_v31 = vmul.f32 0.01, %v2159_v30  ;;  %v2135_v46 = vmul.f32 0.01, %v2133_v44  ;;  %vm2134_vm4 = vcmp.ge.f32.partialorder %v2133_v44, 0.0 }
 0xbc1   : > { %v2516_v3 = vmul.f32 0.01, %v2514_v63  ;;  %vm2515_vm6 = vcmp.ge.f32.partialorder %v2514_v63, 0.0  ;;  %v2710_v27 = vmul.f32 0.01, %v2708_v23  ;;  %vm2709_vm8 = vcmp.ge.f32.partialorder %v2708_v23, 0.0 }
 0xbc2   : > { %v2162_v43 = vsel %vm2160_vm3, %v2159_v30, %v2161_v31  ;;  %v2136_v49 = vsel %vm2134_vm4, %v2133_v44, %v2135_v46 }
 0xbc3   : > { %v2163_v33 = vpack.c.bf16 %v2162_v43, %v2162_v43  ;;  %v2137_v52 = vpack.c.bf16 %v2136_v49, %v2136_v49  ;;  %v2517_v7 = vsel %vm2515_vm6, %v2514_v63, %v2516_v3  ;;  %v2711_v37 = vsel %vm2709_vm8, %v2708_v23, %v2710_v27 }
 0xbc4   : > { %v2518_v10 = vpack.c.bf16 %v2517_v7, %v2517_v7  ;;  %v2712_v30 = vpack.c.bf16 %v2711_v37, %v2711_v37 }
 0xbc5   : > { %7192 = vmatmul.mubr.msk.bf16.vlgmr.msra.gmra.mrb[20].mxu0 %vm1909_vm2, %v2163_v33  ;;  %7625 = vmatmul.mubr.msk.bf16.vlgmr.msra.gmra.mrb[20].mxu1 %vm1909_vm2, %v2163_v33 }
 0xbc6   : > { %2433 = vmatpush1.bf16.msra.mxu0 %v9168_v57  ;;  %7629 = vmatpush3.bf16.msra.mxu1 %v9171_v32 }
 0xbc7   : > { %2434 = vmatprep.subr.bf16.mxu0 %v9174_v20  ;;  %7630 = vmatprep.subr.bf16.mxu1 %v9785_v21 }
 0xbc8   : > { %2464 = vmatprep.mubr.bf16.mxu0 %v9784_v0  ;;  %7638 = vmatprep.mubr.msk.bf16.mxu1 %vm9789_vm5, %v9785_v21 }
 0xbca   : > { %2435 = vmatpush1.bf16.msra.mxu0 %v9172_v35  ;;  %7631 = vmatpush3.bf16.msra.mxu1 %v9175_v38 }
 0xbcb   : > { %2436 = vmatprep.subr.bf16.mxu0 %v9178_v39  ;;  %7632 = vmatprep.subr.bf16.mxu1 %v9785_v21 }
 0xbce   : > { %2437 = vmatpush1.bf16.msra.mxu0 %v9176_v13  ;;  %7633 = vmatpush3.bf16.msra.mxu1 %v9179_v42 }
 0xbcf   : > { %2438 = vmatprep.subr.bf16.mxu0 %v9182_v12  ;;  %7634 = vmatprep.subr.bf16.mxu1 %v9785_v21 }
 0xbd2   : > { %2439 = vmatpush1.bf16.msra.mxu0 %v9180_v15  ;;  %7635 = vmatpush3.bf16.msra.mxu1 %v9183_v16 }
 0xbd3   : > { %2440 = vmatprep.subr.bf16.mxu0 %v9186_v45  ;;  %7636 = vmatprep.subr.bf16.mxu1 %v9785_v21 }
 0xbd6   : > { %2441 = vmatpush1.bf16.msra.mxu0 %v9184_v47  ;;  %7637 = vmatpush3.bf16.msra.mxu1 %v9187_v14 }
 0xbd7   : > { %2623 = vmatprep.subr.bf16.mxu0 %v9190_v48  ;;  %7642 = vmatprep.subr.bf16.mxu1 %v9785_v21  ;;  %v2978_v48 = vld [vmem:[#allocation27] sm:$0x3] }
 0xbd9   : > { %7209 = vmatmul.mubr.msk.bf16.vlgmr.msra.gmra.mrb[20].mxu0 %vm1909_vm2, %v2137_v52  ;;  %7639 = vmatmul.mubr.msk.bf16.vlgmr.msra.gmra.mrb[20].mxu1 %vm1909_vm2, %v2137_v52 }
 0xbda   : > { %2624 = vmatpush1.bf16.msra.mxu0 %v9188_v50  ;;  %7643 = vmatpush3.bf16.msra.mxu1 %v9191_v51 }
 0xbdb   : > { %2625 = vmatprep.subr.bf16.mxu0 %v9194_v53  ;;  %7644 = vmatprep.subr.bf16.mxu1 %v9785_v21 }
 0xbdc   : > { %2655 = vmatprep.mubr.bf16.mxu0 %v9784_v0  ;;  %7652 = vmatprep.mubr.msk.bf16.mxu1 %vm9789_vm5, %v9785_v21 }
 0xbde   : > { %2626 = vmatpush1.bf16.msra.mxu0 %v9192_v55  ;;  %7645 = vmatpush3.bf16.msra.mxu1 %v9195_v56 }
 0xbdf   : > { %2627 = vmatprep.subr.bf16.mxu0 %v9198_v58  ;;  %7646 = vmatprep.subr.bf16.mxu1 %v9785_v21 }
 0xbe2   : > { %2628 = vmatpush1.bf16.msra.mxu0 %v9196_v60  ;;  %7647 = vmatpush3.bf16.msra.mxu1 %v9199_v61 }
 0xbe3   : > { %2629 = vmatprep.subr.bf16.mxu0 %v9202_v62  ;;  %7648 = vmatprep.subr.bf16.mxu1 %v9785_v21 }
 0xbe6   : > { %2630 = vmatpush1.bf16.msra.mxu0 %v9200_v28  ;;  %7649 = vmatpush3.bf16.msra.mxu1 %v9203_v1 }
 0xbe7   : > { %2631 = vmatprep.subr.bf16.mxu0 %v9206_v2  ;;  %7650 = vmatprep.subr.bf16.mxu1 %v9785_v21 }
 0xbea   : > { %2632 = vmatpush1.bf16.msra.mxu0 %v9204_v4  ;;  %7651 = vmatpush3.bf16.msra.mxu1 %v9207_v5 }
 0xbeb   : > { %2817 = vmatprep.subr.bf16.mxu0 %v9210_v6  ;;  %7656 = vmatprep.subr.bf16.mxu1 %v9785_v21 }
 0xbed   : > { %7246 = vmatmul.mubr.msk.bf16.vlgmr.msra.gmra.mrb[20].mxu0 %vm1909_vm2, %v2518_v10  ;;  %7653 = vmatmul.mubr.msk.bf16.vlgmr.msra.gmra.mrb[20].mxu1 %vm1909_vm2, %v2518_v10 }
 0xbee   : > { %2818 = vmatpush1.bf16.msra.mxu0 %v9208_v8  ;;  %7657 = vmatpush3.bf16.msra.mxu1 %v9211_v9  ;;  %v3065_v8 = vld [vmem:[#allocation27 + $0x2] sm:$0x3] }
 0xbef   : > { %2819 = vmatprep.subr.bf16.mxu0 %v9214_v11  ;;  %7658 = vmatprep.subr.bf16.mxu1 %v9785_v21 }
 0xbf0   : > { %2849 = vmatprep.mubr.bf16.mxu0 %v9784_v0  ;;  %7666 = vmatprep.mubr.msk.bf16.mxu1 %vm9789_vm5, %v9785_v21 }
 0xbf2   : > { %2820 = vmatpush1.bf16.msra.mxu0 %v9212_v17  ;;  %7659 = vmatpush3.bf16.msra.mxu1 %v9215_v18 }
 0xbf3   : > { %2821 = vmatprep.subr.bf16.mxu0 %v9218_v19  ;;  %7660 = vmatprep.subr.bf16.mxu1 %v9785_v21 }
 0xbf6   : > { %2822 = vmatpush1.bf16.msra.mxu0 %v9216_v34  ;;  %7661 = vmatpush3.bf16.msra.mxu1 %v9219_v41 }
 0xbf7   : > { %2823 = vmatprep.subr.bf16.mxu0 %v9222_v54  ;;  %7662 = vmatprep.subr.bf16.mxu1 %v9785_v21  ;;  %v3179_v54 = vld [vmem:[#allocation27 + $0x4] sm:$0x3] }
 0xbfa   : > { %2824 = vmatpush1.bf16.msra.mxu0 %v9220_v36  ;;  %7663 = vmatpush3.bf16.msra.mxu1 %v9223_v24 }
 0xbfb   : > { %2825 = vmatprep.subr.bf16.mxu0 %v9226_v26  ;;  %7664 = vmatprep.subr.bf16.mxu1 %v9785_v21 }
 0xbfe   : > { %2826 = vmatpush1.bf16.msra.mxu0 %v9224_v25  ;;  %7665 = vmatpush3.bf16.msra.mxu1 %v9227_v29  ;;  %v3692_v25 = vld [vmem:[#allocation28 + $0x918] sm:$0xff] }
 0xbff   : > { %7670 = vmatprep.subr.bf16.mxu1 %v9785_v21  ;;  %v3700_v29 = vld [vmem:[#allocation28 + $0x958] sm:$0xff] }
 0xc01   : > { %7283 = vmatmul.mubr.msk.bf16.vlgmr.msra.gmra.mrb[20].mxu0 %vm1909_vm2, %v2712_v30  ;;  %7667 = vmatmul.mubr.msk.bf16.vlgmr.msra.gmra.mrb[20].mxu1 %vm1909_vm2, %v2712_v30 }
 0xc02   : > { %7674 = vmatprep.mubr.msk.bf16.mxu1 %vm9789_vm5, %v9785_v21  ;;  %3015 = vmatprep.mubr.bf16.mxu0 %v9784_v0 }
 0xcd4   : > { %v2851_v31 = vpop.f32.mrb[20].mxu0  ;;  %v2892_v43 = vpop.f32.mrb[20].mxu1 }
 0xcd5   : > { %v7319_v57 = vpack.c.bf16 %v2892_v43, %v2892_v43  ;;  %v2853_v32 = vpop.f32.mrb[21].mxu0  ;;  %v7668_v33 = vpop.f32.mrb[21].mxu1  ;;  %v9268_v42 = vpack.c.bf16 %v2851_v31, %v2851_v31  ;;  %v3691_v31 = vld [vmem:[#allocation28 + $0x910] sm:$0xff] }
 0xcd6   : > { %v2855_v20 = vpop.f32.mrb[22].mxu0  ;;  %v2895_v35 = vpop.f32.mrb[22].mxu1  ;;  %v9267_v13 = vpack.c.bf16 %v2853_v32, %v2853_v32  ;;  %v3699_v43 = vld [vmem:[#allocation28 + $0x950] sm:$0xff]  ;;  %v3708_v32 = vld [vmem:[#allocation28 + $0x998] sm:$0xff] }
 0xcd7   : > { %2916 = vst.msk [vmem:[#allocation4 + $0x8] sm:$0xf] %vm2915_vm9, %v7319_v57  ;;  %v2856_v38 = vpop.f32.mrb[23].mxu0  ;;  %v7669_v39 = vpop.f32.mrb[23].mxu1  ;;  %v7774_v57 = vpack.c.bf16 %v3700_v29, %v3692_v25  ;;  %v3716_v33 = vld [vmem:[#allocation28 + $0x9d8] sm:$0xff]  ;;  %v3754_v25 = vld [vmem:[#allocation28 + $0xb08] sm:$0xff] }
 0xcd8   : > { %v3690_v38 = vld [vmem:[#allocation28 + $0x908] sm:$0xff] }
 0xcd9   : > { %v3698_v39 = vld [vmem:[#allocation28 + $0x948] sm:$0xff] }
 0xcda   : > { %v3762_v29 = vld [vmem:[#allocation28 + $0xb48] sm:$0xff] }
 0xcde   : > { %v9228_v40 = vld [vmem:[#allocation4 + $0x8] ss:$0 sps:$4 sm:$0xff]  }
 0xcdf   : > { %2940 = vrot.lane.b32.xlu0 %v9228_v40, %s9792_s19  ;;  %2931 = vrot.lane.b32.xlu1 %v9228_v40, %s9786_s1 }
 0xce3   : > { %2949 = vrot.lane.b32.xlu0 %v9228_v40, %s9793_s0  ;;  %2929 = vrot.lane.b32.xlu1 %v9267_v13, %s9786_s1 }
 0xce7   : > { %2927 = vrot.lane.b32.xlu0 %v9268_v42, %s9786_s1  ;;  %2938 = vrot.lane.b32.xlu1 %v9267_v13, %s9792_s19 }
 0xceb   : > { %2945 = vrot.lane.b32.xlu0 %v9268_v42, %s9793_s0  ;;  %2947 = vrot.lane.b32.xlu1 %v9267_v13, %s9793_s0 }
 0xcef   : > { %2936 = vrot.lane.b32.xlu1 %v9268_v42, %s9792_s19 }
 0xd51   : > { %v2941_v12 = vpop.permute.xlu0 %2940  ;;  %v2932_v44 = vpop.permute.xlu1 %2931 }
 0xd52   : > { %v2964_v15 = vsel %vm1595_vm7, %v9228_v40, %v2932_v44 }
 0xd53   : > { %3076 = vrot.lane.b32.xlu0 %v2964_v15, %s9786_s1  ;;  %7671 = vmatpush3.bf16.msra.mxu1 %v2964_v15 }
 0xd54   : > { %7672 = vmatprep.subr.bf16.mxu1 %v9785_v21 }
 0xd55   : > { %v2950_v16 = vpop.permute.xlu0 %2949  ;;  %v2930_v45 = vpop.permute.xlu1 %2929 }
 0xd56   : > { %v2976_v46 = vsel %vm1595_vm7, %v2941_v12, %v2950_v16  ;;  %v2935_v47 = vsel %vm2933_vm10, %v2930_v45, %v2932_v44  ;;  %v3689_v44 = vld [vmem:[#allocation28 + $0x900] sm:$0xff] }
 0xd57   : > { %7673 = vmatpush3.bf16.msra.mxu1 %v2976_v46  ;;  %v2960_v14 = vsel %vm1595_vm7, %v9267_v13, %v2935_v47  ;;  %v3697_v47 = vld [vmem:[#allocation28 + $0x940] sm:$0xff] }
 0xd58   : > { %3074 = vrot.lane.b32.xlu1 %v2960_v14, %s9786_s1  ;;  %2983 = vmatprep.subr.bf16.mxu0 %v2960_v14 }
 0xd59   : > { %v2928_v49 = vpop.permute.xlu0 %2927  ;;  %v2939_v50 = vpop.permute.xlu1 %2938  ;;  %7678 = vmatprep.subr.bf16.mxu1 %v9785_v21 }
 0xd5a   : > { %v2934_v51 = vsel %vm2933_vm10, %v2928_v49, %v2930_v45  ;;  %7675 = vmatmul.mubr.msk.bf16.vlgmr.msra.gmra.mrb[24].mxu1 %vm2979_vm11, %v2978_v48  ;;  %v2944_v55 = vsel %vm1843_vm0, %v2939_v50, %v2941_v12  ;;  %v7776_v12 = vpack.c.bf16 %v3699_v43, %v3691_v31  ;;  %v3715_v45 = vld [vmem:[#allocation28 + $0x9d0] sm:$0xff]  ;;  %v3753_v31 = vld [vmem:[#allocation28 + $0xb00] sm:$0xff] }
 0xd5b   : > { %v2956_v52 = vsel %vm1595_vm7, %v9268_v42, %v2934_v51  ;;  %7682 = vmatprep.mubr.msk.bf16.mxu1 %vm9789_vm5, %v9785_v21  ;;  %v3287_v42 = vld [vmem:[#allocation27 + $0x6] sm:$0x3]  ;;  %v3714_v51 = vld [vmem:[#allocation28 + $0x9c8] sm:$0xff] }
 0xd5c   : > { %3072 = vrot.lane.b32.xlu1 %v2956_v52, %s9786_s1  ;;  %2984 = vmatpush1.bf16.msra.mxu0 %v2956_v52 }
 0xd5d   : > { %v2948_v53 = vpop.permute.xlu1 %2947  ;;  %v2946_v58 = vpop.permute.xlu0 %2945 }
 0xd5e   : > { %v2953_v56 = vsel %vm2951_vm12, %v2948_v53, %v2950_v16  ;;  %v2952_v61 = vsel %vm2951_vm12, %v2946_v58, %v2948_v53  ;;  %v3707_v16 = vld [vmem:[#allocation28 + $0x990] sm:$0xff] }
 0xd5f   : > { %v2972_v59 = vsel %vm1595_vm7, %v2944_v55, %v2953_v56  ;;  %v7780_v53 = vpack.c.bf16 %v3715_v45, %v3707_v16  ;;  %v3705_v55 = vld [vmem:[#allocation28 + $0x980] sm:$0xff]  ;;  %v3723_v58 = vld [vmem:[#allocation28 + $0xa10] sm:$0xff] }
 0xd60   : > { %3082 = vrot.lane.b32.xlu1 %v2976_v46, %s9786_s1  ;;  %3080 = vrot.lane.b32.xlu0 %v2972_v59, %s9786_s1  ;;  %v3795_v16 = vld [vmem:[#allocation28 + $0xc50] sm:$0xff] }
 0xd61   : > { %2985 = vmatprep.subr.bf16.mxu0 %v2972_v59  ;;  %v2937_v60 = vpop.permute.xlu1 %2936 }
 0xd62   : > { %v2943_v62 = vsel %vm1843_vm0, %v2937_v60, %v2939_v50  ;;  %v3706_v50 = vld [vmem:[#allocation28 + $0x988] sm:$0xff] }
 0xd63   : > { %v2968_v63 = vsel %vm1595_vm7, %v2943_v62, %v2952_v61  ;;  %v7706_v60 = vpack.c.bf16 %v3714_v51, %v3706_v50  ;;  %v3713_v61 = vld [vmem:[#allocation28 + $0x9c0] sm:$0xff]  ;;  %v3740_v62 = vld [vmem:[#allocation28 + $0xa98] sm:$0xff] }
 0xd64   : > { %3190 = vrot.lane.b32.xlu1 %v2976_v46, %s9792_s19  ;;  %3078 = vrot.lane.b32.xlu0 %v2968_v63, %s9786_s1  ;;  %s7317_s1 = sshll.u32 %s11064_s2, 5 }
 0xd65   : > { %2986 = vmatpush1.bf16.msra.mxu0 %v2968_v63  ;;  %s798_s18 = scalar_lea.vmem %s11061_s21, %s7317_s1 }
 0xd68   : > { %3182 = vrot.lane.b32.xlu1 %v2960_v14, %s9792_s19  ;;  %3184 = vrot.lane.b32.xlu0 %v2964_v15, %s9792_s19 }
 0xd69   : > { %7290 = vmatmul.mubr.msk.bf16.vlgmr.msra.gmra.mrb[24].mxu0 %vm2979_vm11, %v2978_v48  ;;  %v3732_v48 = vld [vmem:[#allocation28 + $0xa58] sm:$0xff] }
 0xd6a   : > { %3129 = vmatprep.mubr.bf16.mxu0 %v9784_v0 }
 0xd6c   : > { %3180 = vrot.lane.b32.xlu1 %v2956_v52, %s9792_s19  ;;  %3292 = vrot.lane.b32.xlu0 %v2964_v15, %s9793_s0  ;;  %v7778_v15 = vpack.c.bf16 %v3716_v33, %v3708_v32  ;;  %v3779_v32 = vld [vmem:[#allocation28 + $0xbd0] sm:$0xff]  ;;  %v7718_v33 = vpack.c.bf16 %v3762_v29, %v3754_v25  ;;  %v3833_v29 = vld [vmem:[#allocation28 + $0xd80] sm:$0xff] }
 0xd70   : > { %3290 = vrot.lane.b32.xlu1 %v2960_v14, %s9793_s0  ;;  %3188 = vrot.lane.b32.xlu0 %v2972_v59, %s9792_s19  ;;  %v3724_v14 = vld [vmem:[#allocation28 + $0xa18] sm:$0xff] }
 0xd71   : > { %v7782_v56 = vpack.c.bf16 %v3732_v48, %v3724_v14  ;;  %v3812_v14 = vld [vmem:[#allocation28 + $0xcd8] sm:$0xff]  ;;  %v3786_v48 = vld [vmem:[#allocation28 + $0xc08] sm:$0xff] }
 0xd74   : > { %3288 = vrot.lane.b32.xlu1 %v2956_v52, %s9793_s0  ;;  %3186 = vrot.lane.b32.xlu0 %v2968_v63, %s9792_s19 }
 0xd78   : > { %3298 = vrot.lane.b32.xlu1 %v2976_v46, %s9793_s0  ;;  %3296 = vrot.lane.b32.xlu0 %v2972_v59, %s9793_s0  ;;  %v7702_v46 = vpack.c.bf16 %v3698_v39, %v3690_v38  ;;  %v3731_v59 = vld [vmem:[#allocation28 + $0xa50] sm:$0xff]  ;;  %v3796_v38 = vld [vmem:[#allocation28 + $0xc58] sm:$0xff]  ;;  %v3770_v39 = vld [vmem:[#allocation28 + $0xb88] sm:$0xff] }
 0xd7c   : > { %3294 = vrot.lane.b32.xlu0 %v2968_v63, %s9793_s0  ;;  %v3748_v63 = vld [vmem:[#allocation28 + $0xad8] sm:$0xff] }
 0xdc5   : > { %v3077_v28 = vpop.permute.xlu0 %3076 }
 0xdc6   : > { %7679 = vmatpush3.bf16.msra.mxu1 %v3077_v28 }
 0xdc7   : > { %7680 = vmatprep.subr.bf16.mxu1 %v9785_v21 }
 0xdca   : > { %v3075_v1 = vpop.permute.xlu1 %3074 }
 0xdcb   : > { %v3085_v2 = vsel %vm2933_vm10, %v3075_v1, %v3077_v28  ;;  %v3722_v28 = vld [vmem:[#allocation28 + $0xa08] sm:$0xff] }
 0xdcc   : > { %3097 = vmatprep.subr.bf16.mxu0 %v3085_v2  ;;  %v7784_v2 = vpack.c.bf16 %v3731_v59, %v3723_v58  ;;  %v3793_v58 = vld [vmem:[#allocation28 + $0xc40] sm:$0xff]  ;;  %v3820_v59 = vld [vmem:[#allocation28 + $0xd18] sm:$0xff] }
 0xdce   : > { %v3073_v3 = vpop.permute.xlu1 %3072 }
 0xdcf   : > { %v3084_v4 = vsel %vm2933_vm10, %v3073_v3, %v3075_v1  ;;  %v3730_v1 = vld [vmem:[#allocation28 + $0xa48] sm:$0xff]  ;;  %v7708_v3 = vpack.c.bf16 %v3713_v61, %v3705_v55  ;;  %v3811_v55 = vld [vmem:[#allocation28 + $0xcd0] sm:$0xff] }
 0xdd0   : > { %3098 = vmatpush1.bf16.msra.mxu0 %v3084_v4  ;;  %v3721_v4 = vld [vmem:[#allocation28 + $0xa00] sm:$0xff]  ;;  %v3802_v61 = vld [vmem:[#allocation28 + $0xc88] sm:$0xff] }
 0xdd2   : > { %v3081_v5 = vpop.permute.xlu0 %3080  ;;  %v3083_v6 = vpop.permute.xlu1 %3082 }
 0xdd3   : > { %7681 = vmatpush3.bf16.msra.mxu1 %v3083_v6  ;;  %v3087_v7 = vsel %vm2933_vm10, %v3081_v5, %v3083_v6  ;;  %v3739_v6 = vld [vmem:[#allocation28 + $0xa90] sm:$0xff] }
 0xdd4   : > { %3099 = vmatprep.subr.bf16.mxu0 %v3087_v7  ;;  %7686 = vmatprep.subr.bf16.mxu1 %v9785_v21  ;;  %v3747_v7 = vld [vmem:[#allocation28 + $0xad0] sm:$0xff] }
 0xdd6   : > { %v3079_v9 = vpop.permute.xlu0 %3078  ;;  %v3191_v10 = vpop.permute.xlu1 %3190  ;;  %7683 = vmatmul.mubr.msk.bf16.vlgmr.msra.gmra.mrb[28].mxu1 %vm2979_vm11, %v3065_v8 }
 0xdd7   : > { %v3086_v11 = vsel %vm2933_vm10, %v3079_v9, %v3081_v5  ;;  %7690 = vmatprep.mubr.msk.bf16.mxu1 %vm9789_vm5, %v9785_v21  ;;  %v7786_v5 = vpack.c.bf16 %v3748_v63, %v3740_v62  ;;  %v3729_v9 = vld [vmem:[#allocation28 + $0xa40] sm:$0xff]  ;;  %v3810_v62 = vld [vmem:[#allocation28 + $0xcc8] sm:$0xff] }
 0xdd8   : > { %3100 = vmatpush1.bf16.msra.mxu0 %v3086_v11  ;;  %v3764_v11 = vld [vmem:[#allocation28 + $0xb58] sm:$0xff] }
 0xdda   : > { %v3185_v17 = vpop.permute.xlu0 %3184  ;;  %v3183_v18 = vpop.permute.xlu1 %3182 }
 0xddb   : > { %7292 = vmatmul.mubr.msk.bf16.vlgmr.msra.gmra.mrb[28].mxu0 %vm2979_vm11, %v3065_v8  ;;  %7687 = vmatpush3.bf16.msra.mxu1 %v3185_v17  ;;  %v3193_v19 = vsel %vm1843_vm0, %v3183_v18, %v3185_v17  ;;  %v7710_v8 = vpack.c.bf16 %v3730_v1, %v3722_v28  ;;  %v3738_v17 = vld [vmem:[#allocation28 + $0xa88] sm:$0xff]  ;;  %v3801_v1 = vld [vmem:[#allocation28 + $0xc80] sm:$0xff] }
 0xddc   : > { %3205 = vmatprep.subr.bf16.mxu0 %v3193_v19  ;;  %7688 = vmatprep.subr.bf16.mxu1 %v9785_v21  ;;  %v7788_v19 = vpack.c.bf16 %v3747_v7, %v3739_v6  ;;  %v3809_v6 = vld [vmem:[#allocation28 + $0xcc0] sm:$0xff]  ;;  %v3836_v7 = vld [vmem:[#allocation28 + $0xd98] sm:$0xff] }
 0xddd   : > { %3237 = vmatprep.mubr.bf16.mxu0 %v9784_v0 }
 0xdde   : > { %v3293_v22 = vpop.permute.xlu0 %3292  ;;  %v3181_v34 = vpop.permute.xlu1 %3180 }
 0xddf   : > { %v3192_v41 = vsel %vm1843_vm0, %v3181_v34, %v3183_v18  ;;  %7689 = vmatpush3.bf16.msra.mxu1 %v3191_v10  ;;  %v3746_v18 = vld [vmem:[#allocation28 + $0xac8] sm:$0xff]  ;;  %v3737_v34 = vld [vmem:[#allocation28 + $0xa80] sm:$0xff] }
 0xde0   : > { %3206 = vmatpush1.bf16.msra.mxu0 %v3192_v41  ;;  %7694 = vmatprep.subr.bf16.mxu1 %v9785_v21 }
 0xde2   : > { %v3189_v23 = vpop.permute.xlu0 %3188  ;;  %v3291_v36 = vpop.permute.xlu1 %3290  ;;  %7691 = vmatmul.mubr.msk.bf16.vlgmr.msra.gmra.mrb[32].mxu1 %vm2979_vm11, %v3179_v54 }
 0xde3   : > { %7695 = vmatpush3.bf16.msra.mxu1 %v3293_v22  ;;  %v3195_v24 = vsel %vm1843_vm0, %v3189_v23, %v3191_v10  ;;  %7698 = vmatprep.mubr.msk.bf16.mxu1 %vm9789_vm5, %v9785_v21  ;;  %v3301_v30 = vsel %vm2951_vm12, %v3291_v36, %v3293_v22  ;;  %v3756_v10 = vld [vmem:[#allocation28 + $0xb18] sm:$0xff]  ;;  %v7712_v22 = vpack.c.bf16 %v3729_v9, %v3721_v4  ;;  %v3827_v4 = vld [vmem:[#allocation28 + $0xd50] sm:$0xff]  ;;  %v3818_v9 = vld [vmem:[#allocation28 + $0xd08] sm:$0xff] }
 0xde4   : > { %3207 = vmatprep.subr.bf16.mxu0 %v3195_v24  ;;  %7696 = vmatprep.subr.bf16.mxu1 %v9785_v21  ;;  %v7790_v41 = vpack.c.bf16 %v3764_v11, %v3756_v10  ;;  %v3745_v24 = vld [vmem:[#allocation28 + $0xac0] sm:$0xff]  ;;  %v3826_v10 = vld [vmem:[#allocation28 + $0xd48] sm:$0xff] }
 0xde6   : > { %v3187_v26 = vpop.permute.xlu0 %3186  ;;  %v3289_v27 = vpop.permute.xlu1 %3288 }
 0xde7   : > { %v3194_v37 = vsel %vm1843_vm0, %v3187_v26, %v3189_v23  ;;  %v3300_v40 = vsel %vm2951_vm12, %v3289_v27, %v3291_v36  ;;  %v3763_v23 = vld [vmem:[#allocation28 + $0xb50] sm:$0xff]  ;;  %v7714_v36 = vpack.c.bf16 %v3746_v18, %v3738_v17  ;;  %v3772_v26 = vld [vmem:[#allocation28 + $0xb98] sm:$0xff]  ;;  %v7732_v17 = vpack.c.bf16 %v3809_v6, %v3801_v1  ;;  %v3817_v18 = vld [vmem:[#allocation28 + $0xd00] sm:$0xff] }
 0xde8   : > { %3208 = vmatpush1.bf16.msra.mxu0 %v3194_v37  ;;  %v3780_v27 = vld [vmem:[#allocation28 + $0xbd8] sm:$0xff]  ;;  %v3898_v1 = vld [vmem:[#allocation28 + $0xf88] sm:$0xff] }
 0xde9   : > { %3313 = vmatprep.subr.bf16.mxu0 %v3301_v30  ;;  %v7716_v30 = vpack.c.bf16 %v3745_v24, %v3737_v34  ;;  %v7794_v43 = vpack.c.bf16 %v3780_v27, %v3772_v26  ;;  %v3843_v34 = vld [vmem:[#allocation28 + $0xdd0] sm:$0xff]  ;;  %v3834_v24 = vld [vmem:[#allocation28 + $0xd88] sm:$0xff]  ;;  %v3908_v6 = vld [vmem:[#allocation28 + $0xfd8] sm:$0xff] }
 0xdea   : > { %v3297_v20 = vpop.permute.xlu0 %3296  ;;  %v3299_v35 = vpop.permute.xlu1 %3298  ;;  %v3842_v26 = vld [vmem:[#allocation28 + $0xdc8] sm:$0xff] }
 0xdeb   : > { %7697 = vmatpush3.bf16.msra.mxu1 %v3299_v35  ;;  %7294 = vmatmul.mubr.msk.bf16.vlgmr.msra.gmra.mrb[32].mxu0 %vm2979_vm11, %v3179_v54  ;;  %v3303_v13 = vsel %vm2951_vm12, %v3297_v20, %v3299_v35  ;;  %v3755_v54 = vld [vmem:[#allocation28 + $0xb10] sm:$0xff]  ;;  %v3788_v35 = vld [vmem:[#allocation28 + $0xc18] sm:$0xff] }
 0xdec   : > { %3314 = vmatpush1.bf16.msra.mxu0 %v3300_v40  ;;  %3345 = vmatprep.mubr.bf16.mxu0 %v9784_v0  ;;  %v7704_v0 = vpack.c.bf16 %v3697_v47, %v3689_v44  ;;  %v7792_v37 = vpack.c.bf16 %v3763_v23, %v3755_v54  ;;  %v3778_v40 = vld [vmem:[#allocation28 + $0xbc8] sm:$0xff]  ;;  %v7798_v44 = vpack.c.bf16 %v3796_v38, %v3788_v35  ;;  %v3804_v47 = vld [vmem:[#allocation28 + $0xc98] sm:$0xff]  ;;  %v3825_v54 = vld [vmem:[#allocation28 + $0xd40] sm:$0xff] }
 0xded   : > { %3315 = vmatprep.subr.bf16.mxu0 %v3303_v13  ;;  %7775 = vmatprep.subr.bf16.mxu1 %v7774_v57  ;;  %v3771_v57 = vld [vmem:[#allocation28 + $0xb90] sm:$0xff]  ;;  %v7722_v45 = vpack.c.bf16 %v3778_v40, %v3770_v39  ;;  %v3852_v23 = vld [vmem:[#allocation28 + $0xe18] sm:$0xff]  ;;  %v7736_v25 = vpack.c.bf16 %v3825_v54, %v3817_v18  ;;  %v3858_v35 = vld [vmem:[#allocation28 + $0xe48] sm:$0xff] }
 0xdee   : > { %v3295_v49 = vpop.permute.xlu0 %3294  ;;  %7699 = vmatmul.mubr.msk.bf16.vlgmr.msra.gmra.mrb[36].mxu1 %vm2979_vm11, %v3287_v42  ;;  %v7796_v13 = vpack.c.bf16 %v3779_v32, %v3771_v57  ;;  %v3841_v57 = vld [vmem:[#allocation28 + $0xdc0] sm:$0xff]  ;;  %v3868_v32 = vld [vmem:[#allocation28 + $0xe98] sm:$0xff]  ;;  %v3907_v18 = vld [vmem:[#allocation28 + $0xfd0] sm:$0xff] }
 0xdef   : > { %v3302_v52 = vsel %vm2951_vm12, %v3295_v49, %v3297_v20  ;;  %7777 = vmatpush1.bf16.msra.mxu1 %v7776_v12  ;;  %v3761_v20 = vld [vmem:[#allocation28 + $0xb40] sm:$0xff]  ;;  %v3794_v49 = vld [vmem:[#allocation28 + $0xc48] sm:$0xff]  ;;  %v7740_v39 = vpack.c.bf16 %v3841_v57, %v3833_v29  ;;  %v3916_v54 = vld [vmem:[#allocation28 + $0x1018] sm:$0xff] }
 0xdf0   : > { %3316 = vmatpush1.bf16.msra.mxu0 %v3302_v52  ;;  %7779 = vmatprep.subr.bf16.mxu1 %v7778_v15  ;;  %v3769_v12 = vld [vmem:[#allocation28 + $0xb80] sm:$0xff]  ;;  %v3787_v15 = vld [vmem:[#allocation28 + $0xc10] sm:$0xff]  ;;  %v3932_v57 = vld [vmem:[#allocation28 + $0x1098] sm:$0xff] }
 0xdf1   : > { %7703 = vmatprep.subr.bf16.mxu0 %v7702_v46  ;;  %v3777_v46 = vld [vmem:[#allocation28 + $0xbc0] sm:$0xff]  ;;  %v7800_v50 = vpack.c.bf16 %v3795_v16, %v3787_v15  ;;  %v3884_v16 = vld [vmem:[#allocation28 + $0xf18] sm:$0xff]  ;;  %v3915_v29 = vld [vmem:[#allocation28 + $0x1010] sm:$0xff] }
 0xdf2   : > { %v7724_v51 = vpack.c.bf16 %v3777_v46, %v3769_v12  ;;  %v3785_v52 = vld [vmem:[#allocation28 + $0xc00] sm:$0xff]  ;;  %v3875_v12 = vld [vmem:[#allocation28 + $0xed0] sm:$0xff]  ;;  %v3866_v46 = vld [vmem:[#allocation28 + $0xe88] sm:$0xff] }
 0xdf3   : > { %7296 = vmatmul.mubr.msk.bf16.vlgmr.msra.gmra.mrb[36].mxu0 %vm2979_vm11, %v3287_v42  ;;  %7781 = vmatpush1.bf16.msra.mxu1 %v7780_v53  ;;  %v7720_v42 = vpack.c.bf16 %v3761_v20, %v3753_v31  ;;  %v7802_v53 = vpack.c.bf16 %v3812_v14, %v3804_v47  ;;  %v7728_v28 = vpack.c.bf16 %v3793_v58, %v3785_v52  ;;  %v3859_v31 = vld [vmem:[#allocation28 + $0xe50] sm:$0xff]  ;;  %v3850_v20 = vld [vmem:[#allocation28 + $0xe08] sm:$0xff]  ;;  %v3849_v40 = vld [vmem:[#allocation28 + $0xe00] sm:$0xff] }
 0xdf4   : > { %7705 = vmatpush1.bf16.msra.mxu0 %v7704_v0  ;;  %7783 = vmatprep.subr.bf16.mxu1 %v7782_v56  ;;  %v3803_v0 = vld [vmem:[#allocation28 + $0xc90] sm:$0xff]  ;;  %v7726_v56 = vpack.c.bf16 %v3794_v49, %v3786_v48  ;;  %v3857_v15 = vld [vmem:[#allocation28 + $0xe40] sm:$0xff]  ;;  %v3874_v47 = vld [vmem:[#allocation28 + $0xec8] sm:$0xff] }
 0xdf5   : > { %7707 = vmatprep.subr.bf16.mxu0 %v7706_v60  ;;  %v3828_v60 = vld [vmem:[#allocation28 + $0xd58] sm:$0xff]  ;;  %v7804_v63 = vpack.c.bf16 %v3811_v55, %v3803_v0  ;;  %v7744_v48 = vpack.c.bf16 %v3857_v15, %v3849_v40  ;;  %v7746_v52 = vpack.c.bf16 %v3874_v47, %v3866_v46  ;;  %v3873_v0 = vld [vmem:[#allocation28 + $0xec0] sm:$0xff]  ;;  %v3882_v55 = vld [vmem:[#allocation28 + $0xf08] sm:$0xff] }
 0xdf6   : > { %v3948_v15 = vld [vmem:[#allocation28 + $0x1118] sm:$0xff] }
 0xdf7   : > { %7785 = vmatpush1.bf16.msra.mxu1 %v7784_v2  ;;  %v7806_v2 = vpack.c.bf16 %v3828_v60, %v3820_v59 }
 0xdf8   : > { %7709 = vmatpush1.bf16.msra.mxu0 %v7708_v3  ;;  %7787 = vmatprep.subr.bf16.mxu1 %v7786_v5  ;;  %v3819_v3 = vld [vmem:[#allocation28 + $0xd10] sm:$0xff]  ;;  %v7730_v5 = vpack.c.bf16 %v3810_v62, %v3802_v61  ;;  %v3881_v61 = vld [vmem:[#allocation28 + $0xf00] sm:$0xff] }
 0xdf9   : > { %7711 = vmatprep.subr.bf16.mxu0 %v7710_v8  ;;  %v3844_v8 = vld [vmem:[#allocation28 + $0xdd8] sm:$0xff]  ;;  %v7808_v11 = vpack.c.bf16 %v3827_v4, %v3819_v3  ;;  %v3889_v62 = vld [vmem:[#allocation28 + $0xf40] sm:$0xff] }
 0xdfa   : > { %v3900_v3 = vld [vmem:[#allocation28 + $0xf98] sm:$0xff] }
 0xdfb   : > { %7789 = vmatpush1.bf16.msra.mxu1 %v7788_v19  ;;  %v7810_v19 = vpack.c.bf16 %v3844_v8, %v3836_v7  ;;  %v3897_v7 = vld [vmem:[#allocation28 + $0xf80] sm:$0xff] }
 0xdfc   : > { %7713 = vmatpush1.bf16.msra.mxu0 %v7712_v22  ;;  %7791 = vmatprep.subr.bf16.mxu1 %v7790_v41  ;;  %v3835_v22 = vld [vmem:[#allocation28 + $0xd90] sm:$0xff]  ;;  %v7734_v41 = vpack.c.bf16 %v3826_v10, %v3818_v9  ;;  %v3905_v8 = vld [vmem:[#allocation28 + $0xfc0] sm:$0xff]  ;;  %v7826_v10 = vpack.c.bf16 %v3908_v6, %v3900_v3  ;;  %v3972_v3 = vld [vmem:[#allocation28 + $0x11d8] sm:$0xff] }
 0xdfd   : > { %7715 = vmatprep.subr.bf16.mxu0 %v7714_v36  ;;  %v3860_v36 = vld [vmem:[#allocation28 + $0xe58] sm:$0xff]  ;;  %v7812_v27 = vpack.c.bf16 %v3843_v34, %v3835_v22  ;;  %v3914_v34 = vld [vmem:[#allocation28 + $0x1008] sm:$0xff]  ;;  %v3961_v6 = vld [vmem:[#allocation28 + $0x1180] sm:$0xff] }
 0xdff   : > { %7793 = vmatpush1.bf16.msra.mxu1 %v7792_v37  ;;  %v7814_v37 = vpack.c.bf16 %v3860_v36, %v3852_v23  ;;  %v3924_v36 = vld [vmem:[#allocation28 + $0x1058] sm:$0xff] }
 0xe00   : > { %7717 = vmatpush1.bf16.msra.mxu0 %v7716_v30  ;;  %7795 = vmatprep.subr.bf16.mxu1 %v7794_v43  ;;  %v3851_v30 = vld [vmem:[#allocation28 + $0xe10] sm:$0xff]  ;;  %v7738_v43 = vpack.c.bf16 %v3842_v26, %v3834_v24  ;;  %v3913_v24 = vld [vmem:[#allocation28 + $0x1000] sm:$0xff] }
 0xe01   : > { %7719 = vmatprep.subr.bf16.mxu0 %v7718_v33  ;;  %v3876_v33 = vld [vmem:[#allocation28 + $0xed8] sm:$0xff]  ;;  %v7816_v38 = vpack.c.bf16 %v3859_v31, %v3851_v30  ;;  %v3921_v26 = vld [vmem:[#allocation28 + $0x1040] sm:$0xff]  ;;  %v3930_v30 = vld [vmem:[#allocation28 + $0x1088] sm:$0xff] }
 0xe03   : > { %7797 = vmatpush1.bf16.msra.mxu1 %v7796_v13  ;;  %v7818_v13 = vpack.c.bf16 %v3876_v33, %v3868_v32  ;;  %v3940_v32 = vld [vmem:[#allocation28 + $0x10d8] sm:$0xff] }
 0xe04   : > { %7721 = vmatpush1.bf16.msra.mxu0 %v7720_v42  ;;  %7799 = vmatprep.subr.bf16.mxu1 %v7798_v44  ;;  %v3867_v42 = vld [vmem:[#allocation28 + $0xe90] sm:$0xff]  ;;  %v7742_v44 = vpack.c.bf16 %v3858_v35, %v3850_v20  ;;  %v7834_v20 = vpack.c.bf16 %v3940_v32, %v3932_v57  ;;  %v3929_v35 = vld [vmem:[#allocation28 + $0x1080] sm:$0xff] }
 0xe05   : > { %7723 = vmatprep.subr.bf16.mxu0 %v7722_v45  ;;  %v3892_v45 = vld [vmem:[#allocation28 + $0xf58] sm:$0xff]  ;;  %v7820_v14 = vpack.c.bf16 %v3875_v12, %v3867_v42  ;;  %v3946_v12 = vld [vmem:[#allocation28 + $0x1108] sm:$0xff] }
 0xe06   : > { %v7822_v49 = vpack.c.bf16 %v3892_v45, %v3884_v16  ;;  %v3956_v45 = vld [vmem:[#allocation28 + $0x1158] sm:$0xff] }
 0xe07   : > { %7801 = vmatpush1.bf16.msra.mxu1 %v7800_v50  ;;  %v3883_v50 = vld [vmem:[#allocation28 + $0xf10] sm:$0xff]  ;;  %v7838_v46 = vpack.c.bf16 %v3956_v45, %v3948_v15  ;;  %v3736_v15 = vld [vmem:[#allocation28 + $0xa78] sm:$0xff] }
 0xe08   : > { %7725 = vmatpush1.bf16.msra.mxu0 %v7724_v51  ;;  %7803 = vmatprep.subr.bf16.mxu1 %v7802_v53  ;;  %v3891_v51 = vld [vmem:[#allocation28 + $0xf50] sm:$0xff]  ;;  %v3865_v53 = vld [vmem:[#allocation28 + $0xe80] sm:$0xff] }
 0xe09   : > { %7727 = vmatprep.subr.bf16.mxu0 %v7726_v56  ;;  %v3890_v56 = vld [vmem:[#allocation28 + $0xf48] sm:$0xff]  ;;  %v7824_v58 = vpack.c.bf16 %v3891_v51, %v3883_v50  ;;  %v7748_v59 = vpack.c.bf16 %v3873_v0, %v3865_v53 }
 0xe0a   : > { %v7750_v60 = vpack.c.bf16 %v3890_v56, %v3882_v55 }
 0xe0b   : > { %7805 = vmatpush1.bf16.msra.mxu1 %v7804_v63  ;;  %v7752_v63 = vpack.c.bf16 %v3889_v62, %v3881_v61  ;;  %v3947_v61 = vld [vmem:[#allocation28 + $0x1110] sm:$0xff] }
 0xe0c   : > { %7729 = vmatpush1.bf16.msra.mxu0 %v7728_v28  ;;  %7807 = vmatprep.subr.bf16.mxu1 %v7806_v2  ;;  %v3906_v2 = vld [vmem:[#allocation28 + $0xfc8] sm:$0xff]  ;;  %v3955_v62 = vld [vmem:[#allocation28 + $0x1150] sm:$0xff] }
 0xe0d   : > { %7731 = vmatprep.subr.bf16.mxu0 %v7730_v5  ;;  %v7754_v5 = vpack.c.bf16 %v3906_v2, %v3898_v1  ;;  %v3970_v1 = vld [vmem:[#allocation28 + $0x11c8] sm:$0xff]  ;;  %v3964_v2 = vld [vmem:[#allocation28 + $0x1198] sm:$0xff] }
 0xe0f   : > { %7809 = vmatpush1.bf16.msra.mxu1 %v7808_v11  ;;  %v7756_v11 = vpack.c.bf16 %v3905_v8, %v3897_v7  ;;  %v3969_v7 = vld [vmem:[#allocation28 + $0x11c0] sm:$0xff] }
 0xe10   : > { %7733 = vmatpush1.bf16.msra.mxu0 %v7732_v17  ;;  %7811 = vmatprep.subr.bf16.mxu1 %v7810_v19  ;;  %v3899_v17 = vld [vmem:[#allocation28 + $0xf90] sm:$0xff] }
 0xe11   : > { %7735 = vmatprep.subr.bf16.mxu0 %v7734_v41  ;;  %v7828_v22 = vpack.c.bf16 %v3907_v18, %v3899_v17  ;;  %v3922_v41 = vld [vmem:[#allocation28 + $0x1048] sm:$0xff]  ;;  %v3971_v17 = vld [vmem:[#allocation28 + $0x11d0] sm:$0xff] }
 0xe12   : > { %v7758_v23 = vpack.c.bf16 %v3922_v41, %v3914_v34  ;;  %v3694_v18 = vld [vmem:[#allocation28 + $0x928] sm:$0xff]  ;;  %v3696_v34 = vld [vmem:[#allocation28 + $0x938] sm:$0xff] }
 0xe13   : > { %7813 = vmatpush1.bf16.msra.mxu1 %v7812_v27  ;;  %v7830_v27 = vpack.c.bf16 %v3924_v36, %v3916_v54  ;;  %v3704_v41 = vld [vmem:[#allocation28 + $0x978] sm:$0xff]  ;;  %v7772_v54 = vpack.c.bf16 %v3969_v7, %v3961_v6  ;;  %v3693_v36 = vld [vmem:[#allocation28 + $0x920] sm:$0xff] }
 0xe14   : > { %7737 = vmatpush1.bf16.msra.mxu0 %v7736_v25  ;;  %7815 = vmatprep.subr.bf16.mxu1 %v7814_v37  ;;  %v7760_v25 = vpack.c.bf16 %v3921_v26, %v3913_v24  ;;  %v3923_v37 = vld [vmem:[#allocation28 + $0x1050] sm:$0xff]  ;;  %v7918_v26 = vpack.c.bf16 %v3704_v41, %v3696_v34  ;;  %v3749_v6 = vld [vmem:[#allocation28 + $0xae0] sm:$0xff] }
 0xe15   : > { %7739 = vmatprep.subr.bf16.mxu0 %v7738_v43  ;;  %v7832_v31 = vpack.c.bf16 %v3923_v37, %v3915_v29  ;;  %v3938_v43 = vld [vmem:[#allocation28 + $0x10c8] sm:$0xff]  ;;  %v3703_v29 = vld [vmem:[#allocation28 + $0x970] sm:$0xff] }
 0xe16   : > { %v7762_v33 = vpack.c.bf16 %v3938_v43, %v3930_v30  ;;  %v3710_v37 = vld [vmem:[#allocation28 + $0x9a8] sm:$0xff]  ;;  %v3720_v43 = vld [vmem:[#allocation28 + $0x9f8] sm:$0xff] }
 0xe17   : > { %7817 = vmatpush1.bf16.msra.mxu1 %v7816_v38  ;;  %v3937_v38 = vld [vmem:[#allocation28 + $0x10c0] sm:$0xff]  ;;  %v3718_v30 = vld [vmem:[#allocation28 + $0x9e8] sm:$0xff] }
 0xe18   : > { %7741 = vmatpush1.bf16.msra.mxu0 %v7740_v39  ;;  %7819 = vmatprep.subr.bf16.mxu1 %v7818_v13  ;;  %v3931_v39 = vld [vmem:[#allocation28 + $0x1090] sm:$0xff]  ;;  %v7764_v40 = vpack.c.bf16 %v3937_v38, %v3929_v35  ;;  %v3717_v35 = vld [vmem:[#allocation28 + $0x9e0] sm:$0xff] }
 0xe19   : > { %7743 = vmatprep.subr.bf16.mxu0 %v7742_v44  ;;  %v3939_v13 = vld [vmem:[#allocation28 + $0x10d0] sm:$0xff]  ;;  %v3954_v44 = vld [vmem:[#allocation28 + $0x1148] sm:$0xff] }
 0xe1a   : > { %v7836_v42 = vpack.c.bf16 %v3939_v13, %v3931_v39  ;;  %v7766_v16 = vpack.c.bf16 %v3954_v44, %v3946_v12  ;;  %v3711_v38 = vld [vmem:[#allocation28 + $0x9b0] sm:$0xff]  ;;  %v7850_v13 = vpack.c.bf16 %v3718_v30, %v3710_v37  ;;  %v3734_v12 = vld [vmem:[#allocation28 + $0xa68] sm:$0xff]  ;;  %v3728_v44 = vld [vmem:[#allocation28 + $0xa38] sm:$0xff] }
 0xe1b   : > { %7821 = vmatpush1.bf16.msra.mxu1 %v7820_v14  ;;  %v3719_v39 = vld [vmem:[#allocation28 + $0x9f0] sm:$0xff]  ;;  %v3774_v37 = vld [vmem:[#allocation28 + $0xba8] sm:$0xff] }
 0xe1c   : > { %7745 = vmatpush1.bf16.msra.mxu0 %v7744_v48  ;;  %7823 = vmatprep.subr.bf16.mxu1 %v7822_v49 }
 0xe1d   : > { %7747 = vmatprep.subr.bf16.mxu0 %v7746_v52 }
 0xe1f   : > { %7825 = vmatpush1.bf16.msra.mxu1 %v7824_v58 }
 0xe20   : > { %7749 = vmatpush1.bf16.msra.mxu0 %v7748_v59  ;;  %7827 = vmatprep.subr.bf16.mxu1 %v7826_v10  ;;  %v3945_v59 = vld [vmem:[#allocation28 + $0x1100] sm:$0xff]  ;;  %v7842_v10 = vpack.c.bf16 %v3972_v3, %v3964_v2 }
 0xe21   : > { %7751 = vmatprep.subr.bf16.mxu0 %v7750_v60  ;;  %v3953_v60 = vld [vmem:[#allocation28 + $0x1140] sm:$0xff] }
 0xe23   : > { %7829 = vmatpush1.bf16.msra.mxu1 %v7828_v22  ;;  %v3702_v22 = vld [vmem:[#allocation28 + $0x968] sm:$0xff] }
 0xe24   : > { %7753 = vmatpush1.bf16.msra.mxu0 %v7752_v63  ;;  %7831 = vmatprep.subr.bf16.mxu1 %v7830_v27  ;;  %v3962_v63 = vld [vmem:[#allocation28 + $0x1188] sm:$0xff]  ;;  %v7846_v24 = vpack.c.bf16 %v3702_v22, %v3694_v18  ;;  %v3701_v27 = vld [vmem:[#allocation28 + $0x960] sm:$0xff]  ;;  %v3760_v18 = vld [vmem:[#allocation28 + $0xb38] sm:$0xff] }
 0xe25   : > { %7755 = vmatprep.subr.bf16.mxu0 %v7754_v5  ;;  %v7840_v5 = vpack.c.bf16 %v3955_v62, %v3947_v61  ;;  %v7848_v32 = vpack.c.bf16 %v3701_v27, %v3693_v36  ;;  %v3750_v61 = vld [vmem:[#allocation28 + $0xae8] sm:$0xff]  ;;  %v3744_v62 = vld [vmem:[#allocation28 + $0xab8] sm:$0xff] }
 0xe26   : > { %v3768_v22 = vld [vmem:[#allocation28 + $0xb78] sm:$0xff] }
 0xe27   : > { %7833 = vmatpush1.bf16.msra.mxu1 %v7832_v31  ;;  %v3712_v31 = vld [vmem:[#allocation28 + $0x9b8] sm:$0xff]  ;;  %v7934_v27 = vpack.c.bf16 %v3768_v22, %v3760_v18  ;;  %v3830_v18 = vld [vmem:[#allocation28 + $0xd68] sm:$0xff] }
 0xe28   : > { %7757 = vmatpush1.bf16.msra.mxu0 %v7756_v11  ;;  %7835 = vmatprep.subr.bf16.mxu1 %v7834_v20  ;;  %v3963_v11 = vld [vmem:[#allocation28 + $0x1190] sm:$0xff]  ;;  %v3709_v20 = vld [vmem:[#allocation28 + $0x9a0] sm:$0xff]  ;;  %v3824_v22 = vld [vmem:[#allocation28 + $0xd38] sm:$0xff] }
 0xe29   : > { %7759 = vmatprep.subr.bf16.mxu0 %v7758_v23  ;;  %v7844_v23 = vpack.c.bf16 %v3971_v17, %v3963_v11  ;;  %v3758_v11 = vld [vmem:[#allocation28 + $0xb28] sm:$0xff] }
 0xe2a   : > { %v3766_v17 = vld [vmem:[#allocation28 + $0xb68] sm:$0xff] }
 0xe2b   : > { %7837 = vmatpush1.bf16.msra.mxu1 %v7836_v42  ;;  %v7922_v42 = vpack.c.bf16 %v3720_v43, %v3712_v31  ;;  %v3782_v43 = vld [vmem:[#allocation28 + $0xbe8] sm:$0xff] }
 0xe2c   : > { %7761 = vmatpush1.bf16.msra.mxu0 %v7760_v25  ;;  %7839 = vmatprep.subr.bf16.mxu1 %v7838_v46  ;;  %v3695_v25 = vld [vmem:[#allocation28 + $0x930] sm:$0xff] }
 0xe2d   : > { %v10846_v28 = vpop.f32.mrb[24].mxu1  ;;  %7763 = vmatprep.subr.bf16.mxu0 %v7762_v33  ;;  %v7920_v33 = vpack.c.bf16 %v3703_v29, %v3695_v25  ;;  %v3759_v25 = vld [vmem:[#allocation28 + $0xb30] sm:$0xff] }
 0xe2e   : > { %v7676_v4 = vpop.f32.mrb[25].mxu1  ;;  %v3767_v29 = vld [vmem:[#allocation28 + $0xb70] sm:$0xff] }
 0xe2f   : > { %v3061_v9 = vpop.f32.mrb[26].mxu1  ;;  %v7768_v4 = vpack.c.bf16 %v3953_v60, %v3945_v59 }
 0xe30   : > { %v7677_v19 = vpop.f32.mrb[27].mxu1  ;;  %7765 = vmatpush1.bf16.msra.mxu0 %v7764_v40  ;;  %v7770_v9 = vpack.c.bf16 %v3970_v1, %v3962_v63  ;;  %v3726_v40 = vld [vmem:[#allocation28 + $0xa28] sm:$0xff]  ;;  %v3752_v63 = vld [vmem:[#allocation28 + $0xaf8] sm:$0xff] }
 0xe31   : > { %7767 = vmatprep.subr.bf16.mxu0 %v7766_v16 }
 0xe3c   : > { %v10848_v47 = vpop.f32.mrb[24].mxu0 }
 0xe3d   : > { %v10850_v14 = vpop.f32.mrb[25].mxu0 }
 0xe3e   : > { %v3021_v48 = vpop.f32.mrb[26].mxu0 }
 0xe3f   : > { %v3022_v49 = vpop.f32.mrb[27].mxu0  ;;  %v7852_v48 = vpack.c.bf16 %v3717_v35, %v3709_v20 }
 0xe40   : > { %v7924_v49 = vpack.c.bf16 %v3719_v39, %v3711_v38 }
 0xea9   : > { %v3172_v50 = vpop.f32.mrb[28].mxu1 }
 0xeaa   : > { %v7684_v51 = vpop.f32.mrb[29].mxu1 }
 0xeab   : > { %v3175_v52 = vpop.f32.mrb[30].mxu1  ;;  %v3733_v51 = vld [vmem:[#allocation28 + $0xa60] sm:$0xff] }
 0xeac   : > { %v7685_v53 = vpop.f32.mrb[31].mxu1 }
 0xead   : > { %v7854_v53 = vpack.c.bf16 %v3734_v12, %v3726_v40  ;;  %v3781_v12 = vld [vmem:[#allocation28 + $0xbe0] sm:$0xff] }
 0xeae   : > { %v3131_v0 = vpop.f32.mrb[28].mxu0 }
 0xeaf   : > { %v3133_v55 = vpop.f32.mrb[29].mxu0 }
 0xeb0   : > { %9243 = vtanh.f32 %v3133_v55  ;;  %v3135_v56 = vpop.f32.mrb[30].mxu0  ;;  %v3727_v55 = vld [vmem:[#allocation28 + $0xa30] sm:$0xff] }
 0xeb1   : > { %9245 = vtanh.f32 %v3131_v0  ;;  %v3136_v58 = vpop.f32.mrb[31].mxu0  ;;  %v7926_v0 = vpack.c.bf16 %v3736_v15, %v3728_v44  ;;  %v3735_v56 = vld [vmem:[#allocation28 + $0xa70] sm:$0xff]  ;;  %v7866_v44 = vpack.c.bf16 %v3782_v43, %v3774_v37  ;;  %v3846_v43 = vld [vmem:[#allocation28 + $0xde8] sm:$0xff] }
 0xeb2   : > { %9247 = vtanh.f32 %v3172_v50  ;;  %v3725_v50 = vld [vmem:[#allocation28 + $0xa20] sm:$0xff]  ;;  %v3742_v58 = vld [vmem:[#allocation28 + $0xaa8] sm:$0xff]  ;;  %v3831_v37 = vld [vmem:[#allocation28 + $0xd70] sm:$0xff] }
 0xeb3   : > { %v7856_v3 = vpack.c.bf16 %v3733_v51, %v3725_v50  ;;  %v7858_v7 = vpack.c.bf16 %v3750_v61, %v3742_v58  ;;  %v3798_v50 = vld [vmem:[#allocation28 + $0xc68] sm:$0xff]  ;;  %v3792_v51 = vld [vmem:[#allocation28 + $0xc38] sm:$0xff]  ;;  %v3791_v61 = vld [vmem:[#allocation28 + $0xc30] sm:$0xff]  ;;  %9249 = vtanh.f32 %v10850_v14 }
 0xeb4   : > { %9251 = vtanh.f32 %v10848_v47 }
 0xeb5   : > { %v10862_v45 = vpop.f32.mrb[32].mxu1  ;;  %9253 = vtanh.f32 %v10846_v28  ;;  %v3412_v28 = vld [vmem:[#allocation28 + $0x78] sm:$0xff] }
 0xeb6   : > { %v7692_v46 = vpop.f32.mrb[33].mxu1 }
 0xeb7   : > { %v3283_v52 = vpop.f32.mrb[34].mxu1  ;;  %v3775_v46 = vld [vmem:[#allocation28 + $0xbb0] sm:$0xff] }
 0xeb8   : > { %v7693_v60 = vpop.f32.mrb[35].mxu1  ;;  %v3800_v52 = vld [vmem:[#allocation28 + $0xc78] sm:$0xff] }
 0xeb9   : > { %v7942_v60 = vpack.c.bf16 %v3800_v52, %v3792_v51  ;;  %v3853_v51 = vld [vmem:[#allocation28 + $0xe20] sm:$0xff] }
 0xeba   : > { %v9244_v8 = vpop.eup %9243  ;;  %v3861_v52 = vld [vmem:[#allocation28 + $0xe60] sm:$0xff] }
 0xebb   : > { %v10852_v19 = vpop.eup %9245  ;;  %4044 = vmatprep.mubr.f32.mxu0 %v9244_v8  ;;  %4186 = vmatprep.mubr.f32.mxu1 %v9244_v8 }
 0xebc   : > { %4045 = vmatmul.mubr.f32.vlgmr.msra.gmra.mrb[40].mxu0 %v10852_v19  ;;  %4187 = vmatmul.mubr.f32.vlgmr.msra.gmra.mrb[40].mxu1 %v10852_v19  ;;  %v10858_v57 = vpop.eup %9247 }
 0xebd   : > { %7769 = vmatpush1.bf16.msra.mxu0 %v7768_v4  ;;  %7841 = vmatpush1.bf16.msra.mxu1 %v7840_v5  ;;  %v7928_v4 = vpack.c.bf16 %v3735_v56, %v3727_v55  ;;  %v3741_v5 = vld [vmem:[#allocation28 + $0xaa0] sm:$0xff] }
 0xebe   : > { %7771 = vmatprep.subr.bf16.mxu0 %v7770_v9  ;;  %7843 = vmatprep.subr.bf16.mxu1 %v7842_v10  ;;  %v10860_v16 = vpop.f32.mrb[32].mxu0  ;;  %v3743_v9 = vld [vmem:[#allocation28 + $0xab0] sm:$0xff]  ;;  %v7860_v34 = vpack.c.bf16 %v3749_v6, %v3741_v5  ;;  %v3789_v55 = vld [vmem:[#allocation28 + $0xc20] sm:$0xff] }
 0xebf   : > { %4115 = vmatprep.mubr.f32.mxu0 %v9785_v21  ;;  %4257 = vmatprep.mubr.f32.mxu1 %v9785_v21  ;;  %v10868_v59 = vpop.f32.mrb[33].mxu0  ;;  %v3751_v10 = vld [vmem:[#allocation28 + $0xaf0] sm:$0xff]  ;;  %v3797_v56 = vld [vmem:[#allocation28 + $0xc60] sm:$0xff] }
 0xec0   : > { %v3243_v1 = vpop.f32.mrb[34].mxu0  ;;  %v7932_v41 = vpack.c.bf16 %v3751_v10, %v3743_v9  ;;  %v3805_v6 = vld [vmem:[#allocation28 + $0xca0] sm:$0xff]  ;;  %v3807_v10 = vld [vmem:[#allocation28 + $0xcb0] sm:$0xff]  ;;  %9255 = vtanh.f32 %v10868_v59 }
 0xec1   : > { %7773 = vmatpush1.bf16.msra.mxu0 %v7772_v54  ;;  %7845 = vmatpush1.bf16.msra.mxu1 %v7844_v23  ;;  %v3244_v2 = vpop.f32.mrb[35].mxu0  ;;  %v3757_v54 = vld [vmem:[#allocation28 + $0xb20] sm:$0xff]  ;;  %v3814_v1 = vld [vmem:[#allocation28 + $0xce8] sm:$0xff]  ;;  %9257 = vtanh.f32 %v10860_v16 }
 0xec2   : > { %7847 = vmatprep.subr.bf16.mxu0 %v7846_v24  ;;  %7919 = vmatprep.subr.bf16.mxu1 %v7918_v26  ;;  %v3765_v23 = vld [vmem:[#allocation28 + $0xb60] sm:$0xff]  ;;  %v10872_v24 = vpop.f32.mrb[36].mxu1  ;;  %v7862_v26 = vpack.c.bf16 %v3766_v17, %v3758_v11  ;;  %v3808_v2 = vld [vmem:[#allocation28 + $0xcb8] sm:$0xff]  ;;  %v3815_v11 = vld [vmem:[#allocation28 + $0xcf0] sm:$0xff]  ;;  %9259 = vtanh.f32 %v10862_v45 }
 0xec3   : > { %v7700_v31 = vpop.f32.mrb[37].mxu1  ;;  %v7864_v40 = vpack.c.bf16 %v3765_v23, %v3757_v54  ;;  %v3822_v17 = vld [vmem:[#allocation28 + $0xd28] sm:$0xff]  ;;  %v7948_v54 = vpack.c.bf16 %v3815_v11, %v3807_v10  ;;  %v3821_v23 = vld [vmem:[#allocation28 + $0xd20] sm:$0xff]  ;;  %v3888_v10 = vld [vmem:[#allocation28 + $0xf38] sm:$0xff] }
 0xec4   : > { %7298 = vmatmul.mubr.msk.f32.vlgmr.msra.gmra.mrb[40].mxu0 %vm2979_vm11, %v10858_v57  ;;  %7299 = vmatmul.mubr.msk.f32.vlgmr.msra.gmra.mrb[40].mxu1 %vm2979_vm11, %v10858_v57  ;;  %v3391_v35 = vpop.f32.mrb[38].mxu1  ;;  %v3838_v31 = vld [vmem:[#allocation28 + $0xda8] sm:$0xff]  ;;  %v3896_v11 = vld [vmem:[#allocation28 + $0xf78] sm:$0xff] }
 0xec5   : > { %7849 = vmatpush1.bf16.msra.mxu0 %v7848_v32  ;;  %7921 = vmatpush1.bf16.msra.mxu1 %v7920_v33  ;;  %v3776_v32 = vld [vmem:[#allocation28 + $0xbb8] sm:$0xff]  ;;  %v7701_v39 = vpop.f32.mrb[39].mxu1 }
 0xec6   : > { %4328 = vmatprep.mubr.f32.mxu0 %v9244_v8  ;;  %4470 = vmatprep.mubr.f32.mxu1 %v9244_v8  ;;  %v7930_v8 = vpack.c.bf16 %v3752_v63, %v3744_v62  ;;  %v10870_v36 = vpop.f32.mrb[36].mxu0  ;;  %v3784_v33 = vld [vmem:[#allocation28 + $0xbf8] sm:$0xff]  ;;  %v3799_v62 = vld [vmem:[#allocation28 + $0xc70] sm:$0xff]  ;;  %v3806_v63 = vld [vmem:[#allocation28 + $0xca8] sm:$0xff] }
 0xec7   : > { %7851 = vmatprep.subr.bf16.mxu0 %v7850_v13  ;;  %7923 = vmatprep.subr.bf16.mxu1 %v7922_v42  ;;  %v10874_v30 = vpop.f32.mrb[37].mxu0  ;;  %v7936_v13 = vpack.c.bf16 %v3767_v29, %v3759_v25  ;;  %v3773_v42 = vld [vmem:[#allocation28 + $0xba0] sm:$0xff]  ;;  %v7938_v15 = vpack.c.bf16 %v3784_v33, %v3776_v32  ;;  %v7944_v5 = vpack.c.bf16 %v3799_v62, %v3791_v61  ;;  %v3823_v29 = vld [vmem:[#allocation28 + $0xd30] sm:$0xff]  ;;  %v3840_v32 = vld [vmem:[#allocation28 + $0xdb8] sm:$0xff] }
 0xec8   : > { %v3351_v20 = vpop.f32.mrb[38].mxu0  ;;  %v3848_v33 = vld [vmem:[#allocation28 + $0xdf8] sm:$0xff]  ;;  %v7952_v35 = vpack.c.bf16 %v3831_v37, %v3823_v29  ;;  %v3845_v39 = vld [vmem:[#allocation28 + $0xde0] sm:$0xff]  ;;  %9261 = vtanh.f32 %v10874_v30 }
 0xec9   : > { %7853 = vmatpush1.bf16.msra.mxu0 %v7852_v48  ;;  %7925 = vmatpush1.bf16.msra.mxu1 %v7924_v49  ;;  %v3352_v38 = vpop.f32.mrb[39].mxu0  ;;  %v3783_v48 = vld [vmem:[#allocation28 + $0xbf0] sm:$0xff]  ;;  %v3790_v49 = vld [vmem:[#allocation28 + $0xc28] sm:$0xff]  ;;  %v3872_v61 = vld [vmem:[#allocation28 + $0xeb8] sm:$0xff]  ;;  %9263 = vtanh.f32 %v10870_v36 }
 0xeca   : > { %7855 = vmatprep.subr.bf16.mxu0 %v7854_v53  ;;  %7927 = vmatprep.subr.bf16.mxu1 %v7926_v0  ;;  %v7868_v53 = vpack.c.bf16 %v3781_v12, %v3773_v42  ;;  %v7940_v0 = vpack.c.bf16 %v3783_v48, %v3775_v46  ;;  %v7870_v58 = vpack.c.bf16 %v3798_v50, %v3790_v49  ;;  %v3837_v38 = vld [vmem:[#allocation28 + $0xda0] sm:$0xff]  ;;  %v3839_v42 = vld [vmem:[#allocation28 + $0xdb0] sm:$0xff]  ;;  %v3856_v46 = vld [vmem:[#allocation28 + $0xe38] sm:$0xff]  ;;  %9265 = vtanh.f32 %v10872_v24 }
 0xecb   : > { %v3847_v12 = vld [vmem:[#allocation28 + $0xdf0] sm:$0xff]  ;;  %v3864_v48 = vld [vmem:[#allocation28 + $0xe78] sm:$0xff]  ;;  %v7884_v49 = vpack.c.bf16 %v3845_v39, %v3837_v38 }
 0xecc   : > { %v7956_v50 = vpack.c.bf16 %v3847_v12, %v3839_v42  ;;  %v3880_v62 = vld [vmem:[#allocation28 + $0xef8] sm:$0xff]  ;;  %v3903_v38 = vld [vmem:[#allocation28 + $0xfb0] sm:$0xff] }
 0xecd   : > { %7857 = vmatpush1.bf16.msra.mxu0 %v7856_v3  ;;  %7929 = vmatpush1.bf16.msra.mxu1 %v7928_v4  ;;  %v3816_v3 = vld [vmem:[#allocation28 + $0xcf8] sm:$0xff]  ;;  %v7872_v4 = vpack.c.bf16 %v3797_v56, %v3789_v55  ;;  %v3855_v55 = vld [vmem:[#allocation28 + $0xe30] sm:$0xff] }
 0xece   : > { %7859 = vmatprep.subr.bf16.mxu0 %v7858_v7  ;;  %7931 = vmatprep.subr.bf16.mxu1 %v7930_v8  ;;  %v3813_v7 = vld [vmem:[#allocation28 + $0xce0] sm:$0xff]  ;;  %v7874_v8 = vpack.c.bf16 %v3814_v1, %v3806_v63  ;;  %v7946_v9 = vpack.c.bf16 %v3816_v3, %v3808_v2  ;;  %v3863_v56 = vld [vmem:[#allocation28 + $0xe70] sm:$0xff]  ;;  %v7888_v63 = vpack.c.bf16 %v3861_v52, %v3853_v51  ;;  %v3904_v29 = vld [vmem:[#allocation28 + $0xfb8] sm:$0xff] }
 0xecf   : > { %v7960_v1 = vpack.c.bf16 %v3863_v56, %v3855_v55  ;;  %v3869_v2 = vld [vmem:[#allocation28 + $0xea0] sm:$0xff]  ;;  %v3912_v37 = vld [vmem:[#allocation28 + $0xff8] sm:$0xff]  ;;  %v3911_v39 = vld [vmem:[#allocation28 + $0xff0] sm:$0xff] }
 0xed0   : > { %v3877_v3 = vld [vmem:[#allocation28 + $0xee0] sm:$0xff]  ;;  %v3920_v42 = vld [vmem:[#allocation28 + $0x1038] sm:$0xff]  ;;  %v3919_v51 = vld [vmem:[#allocation28 + $0x1030] sm:$0xff] }
 0xed1   : > { %7861 = vmatpush1.bf16.msra.mxu0 %v7860_v34  ;;  %7933 = vmatpush1.bf16.msra.mxu1 %v7932_v41  ;;  %v3832_v34 = vld [vmem:[#allocation28 + $0xd78] sm:$0xff]  ;;  %v7876_v41 = vpack.c.bf16 %v3813_v7, %v3805_v6  ;;  %v3871_v6 = vld [vmem:[#allocation28 + $0xeb0] sm:$0xff] }
 0xed2   : > { %7863 = vmatprep.subr.bf16.mxu0 %v7862_v26  ;;  %7935 = vmatprep.subr.bf16.mxu1 %v7934_v27  ;;  %v3829_v26 = vld [vmem:[#allocation28 + $0xd60] sm:$0xff]  ;;  %v7878_v27 = vpack.c.bf16 %v3830_v18, %v3822_v17  ;;  %v7950_v25 = vpack.c.bf16 %v3832_v34, %v3824_v22  ;;  %v3879_v7 = vld [vmem:[#allocation28 + $0xef0] sm:$0xff]  ;;  %v7892_v17 = vpack.c.bf16 %v3877_v3, %v3869_v2  ;;  %v3928_v12 = vld [vmem:[#allocation28 + $0x1078] sm:$0xff] }
 0xed3   : > { %v7880_v20 = vpack.c.bf16 %v3829_v26, %v3821_v23  ;;  %v7964_v18 = vpack.c.bf16 %v3879_v7, %v3871_v6  ;;  %v3885_v22 = vld [vmem:[#allocation28 + $0xf20] sm:$0xff]  ;;  %v3887_v23 = vld [vmem:[#allocation28 + $0xf30] sm:$0xff]  ;;  %v3936_v55 = vld [vmem:[#allocation28 + $0x10b8] sm:$0xff] }
 0xed4   : > { %v3893_v34 = vld [vmem:[#allocation28 + $0xf60] sm:$0xff]  ;;  %v3895_v26 = vld [vmem:[#allocation28 + $0xf70] sm:$0xff]  ;;  %v3944_v56 = vld [vmem:[#allocation28 + $0x10f8] sm:$0xff] }
 0xed5   : > { %7865 = vmatpush1.bf16.msra.mxu0 %v7864_v40  ;;  %7937 = vmatpush1.bf16.msra.mxu1 %v7936_v13  ;;  %v7882_v40 = vpack.c.bf16 %v3846_v43, %v3838_v31  ;;  %v7954_v13 = vpack.c.bf16 %v3848_v33, %v3840_v32  ;;  %v7896_v31 = vpack.c.bf16 %v3893_v34, %v3885_v22  ;;  %v3901_v32 = vld [vmem:[#allocation28 + $0xfa0] sm:$0xff]  ;;  %v3927_v52 = vld [vmem:[#allocation28 + $0x1070] sm:$0xff]  ;;  %v3952_v6 = vld [vmem:[#allocation28 + $0x1138] sm:$0xff] }
 0xed6   : > { %7867 = vmatprep.subr.bf16.mxu0 %v7866_v44  ;;  %7939 = vmatprep.subr.bf16.mxu1 %v7938_v15  ;;  %v3854_v44 = vld [vmem:[#allocation28 + $0xe28] sm:$0xff]  ;;  %v7968_v43 = vpack.c.bf16 %v3895_v26, %v3887_v23  ;;  %v3909_v33 = vld [vmem:[#allocation28 + $0xfe0] sm:$0xff]  ;;  %v3935_v2 = vld [vmem:[#allocation28 + $0x10b0] sm:$0xff] }
 0xed7   : > { %v3862_v15 = vld [vmem:[#allocation28 + $0xe68] sm:$0xff]  ;;  %v3943_v3 = vld [vmem:[#allocation28 + $0x10f0] sm:$0xff]  ;;  %v3960_v7 = vld [vmem:[#allocation28 + $0x1178] sm:$0xff] }
 0xed8   : > { %v3951_v22 = vld [vmem:[#allocation28 + $0x1130] sm:$0xff]  ;;  %v3968_v23 = vld [vmem:[#allocation28 + $0x11b8] sm:$0xff] }
 0xed9   : > { %7869 = vmatpush1.bf16.msra.mxu0 %v7868_v53  ;;  %7941 = vmatpush1.bf16.msra.mxu1 %v7940_v0  ;;  %v7886_v53 = vpack.c.bf16 %v3862_v15, %v3854_v44  ;;  %v7958_v0 = vpack.c.bf16 %v3864_v48, %v3856_v46  ;;  %v7900_v44 = vpack.c.bf16 %v3909_v33, %v3901_v32  ;;  %v3917_v46 = vld [vmem:[#allocation28 + $0x1020] sm:$0xff]  ;;  %v3959_v34 = vld [vmem:[#allocation28 + $0x1170] sm:$0xff]  ;;  %v3976_v26 = vld [vmem:[#allocation28 + $0x11f8] sm:$0xff] }
 0xeda   : > { %7871 = vmatprep.subr.bf16.mxu0 %v7870_v58  ;;  %7943 = vmatprep.subr.bf16.mxu1 %v7942_v60  ;;  %v3870_v58 = vld [vmem:[#allocation28 + $0xea8] sm:$0xff]  ;;  %v7972_v15 = vpack.c.bf16 %v3911_v39, %v3903_v38  ;;  %v3925_v48 = vld [vmem:[#allocation28 + $0x1060] sm:$0xff]  ;;  %v3967_v32 = vld [vmem:[#allocation28 + $0x11b0] sm:$0xff] }
 0xedb   : > { %v3878_v60 = vld [vmem:[#allocation28 + $0xee8] sm:$0xff]  ;;  %v3975_v33 = vld [vmem:[#allocation28 + $0x11f0] sm:$0xff]  ;;  %v3400_v38 = vld [vmem:[#allocation28 + $0x18] sm:$0xff] }
 0xedc   : > { %v3408_v39 = vld [vmem:[#allocation28 + $0x58] sm:$0xff] }
 0xedd   : > { %7873 = vmatpush1.bf16.msra.mxu0 %v7872_v4  ;;  %7945 = vmatpush1.bf16.msra.mxu1 %v7944_v5  ;;  %v7890_v4 = vpack.c.bf16 %v3878_v60, %v3870_v58  ;;  %v7962_v5 = vpack.c.bf16 %v3880_v62, %v3872_v61  ;;  %v7904_v58 = vpack.c.bf16 %v3925_v48, %v3917_v46  ;;  %v3933_v61 = vld [vmem:[#allocation28 + $0x10a0] sm:$0xff]  ;;  %v3407_v46 = vld [vmem:[#allocation28 + $0x50] sm:$0xff]  ;;  %v3414_v48 = vld [vmem:[#allocation28 + $0x88] sm:$0xff] }
 0xede   : > { %7875 = vmatprep.subr.bf16.mxu0 %v7874_v8  ;;  %7947 = vmatprep.subr.bf16.mxu1 %v7946_v9  ;;  %v3886_v8 = vld [vmem:[#allocation28 + $0xf28] sm:$0xff]  ;;  %v7976_v60 = vpack.c.bf16 %v3927_v52, %v3919_v51  ;;  %v3941_v62 = vld [vmem:[#allocation28 + $0x10e0] sm:$0xff]  ;;  %v5138_v45 = vld [vmem:[#allocation28 + $0x1278] sm:$0xff] }
 0xedf   : > { %v3894_v9 = vld [vmem:[#allocation28 + $0xf68] sm:$0xff]  ;;  %v6009_v24 = vld [vmem:[#allocation28 + $0x1b78] sm:$0xff] }
 0xee1   : > { %7877 = vmatpush1.bf16.msra.mxu0 %v7876_v41  ;;  %7949 = vmatpush1.bf16.msra.mxu1 %v7948_v54  ;;  %v7894_v41 = vpack.c.bf16 %v3894_v9, %v3886_v8  ;;  %v7966_v54 = vpack.c.bf16 %v3896_v11, %v3888_v10  ;;  %v7908_v8 = vpack.c.bf16 %v3941_v62, %v3933_v61  ;;  %v3949_v10 = vld [vmem:[#allocation28 + $0x1120] sm:$0xff]  ;;  %v3430_v61 = vld [vmem:[#allocation28 + $0x108] sm:$0xff] }
 0xee2   : > { %7879 = vmatprep.subr.bf16.mxu0 %v7878_v27  ;;  %7951 = vmatprep.subr.bf16.mxu1 %v7950_v25  ;;  %v3902_v27 = vld [vmem:[#allocation28 + $0xfa8] sm:$0xff]  ;;  %v7980_v9 = vpack.c.bf16 %v3943_v3, %v3935_v2  ;;  %v3957_v11 = vld [vmem:[#allocation28 + $0x1160] sm:$0xff]  ;;  %v3440_v2 = vld [vmem:[#allocation28 + $0x158] sm:$0xff] }
 0xee3   : > { %v3910_v25 = vld [vmem:[#allocation28 + $0xfe8] sm:$0xff] }
 0xee4   : > { %v3438_v62 = vld [vmem:[#allocation28 + $0x148] sm:$0xff] }
 0xee5   : > { %7881 = vmatpush1.bf16.msra.mxu0 %v7880_v20  ;;  %7953 = vmatpush1.bf16.msra.mxu1 %v7952_v35  ;;  %v7898_v20 = vpack.c.bf16 %v3910_v25, %v3902_v27  ;;  %v7970_v35 = vpack.c.bf16 %v3912_v37, %v3904_v29  ;;  %v7912_v27 = vpack.c.bf16 %v3957_v11, %v3949_v10  ;;  %v3965_v29 = vld [vmem:[#allocation28 + $0x11a0] sm:$0xff]  ;;  %v3439_v10 = vld [vmem:[#allocation28 + $0x150] sm:$0xff]  ;;  %v3446_v11 = vld [vmem:[#allocation28 + $0x188] sm:$0xff] }
 0xee6   : > { %7883 = vmatprep.subr.bf16.mxu0 %v7882_v40  ;;  %7955 = vmatprep.subr.bf16.mxu1 %v7954_v13  ;;  %v3918_v40 = vld [vmem:[#allocation28 + $0x1028] sm:$0xff]  ;;  %v7984_v25 = vpack.c.bf16 %v3959_v34, %v3951_v22  ;;  %v3973_v37 = vld [vmem:[#allocation28 + $0x11e0] sm:$0xff] }
 0xee7   : > { %v3926_v13 = vld [vmem:[#allocation28 + $0x1068] sm:$0xff] }
 0xee9   : > { %7885 = vmatpush1.bf16.msra.mxu0 %v7884_v49  ;;  %7957 = vmatpush1.bf16.msra.mxu1 %v7956_v50  ;;  %v7902_v49 = vpack.c.bf16 %v3926_v13, %v3918_v40  ;;  %v7974_v50 = vpack.c.bf16 %v3928_v12, %v3920_v42  ;;  %v7916_v40 = vpack.c.bf16 %v3973_v37, %v3965_v29  ;;  %v3397_v12 = vld [vmem:[#allocation28] sm:$0xff]  ;;  %v3462_v29 = vld [vmem:[#allocation28 + $0x208] sm:$0xff] }
 0xeea   : > { %7887 = vmatprep.subr.bf16.mxu0 %v7886_v53  ;;  %7959 = vmatprep.subr.bf16.mxu1 %v7958_v0  ;;  %v3934_v53 = vld [vmem:[#allocation28 + $0x10a8] sm:$0xff]  ;;  %v7988_v13 = vpack.c.bf16 %v3975_v33, %v3967_v32  ;;  %v8062_v42 = vpack.c.bf16 %v3408_v39, %v3400_v38  ;;  %v3469_v38 = vld [vmem:[#allocation28 + $0x240] sm:$0xff]  ;;  %v3463_v39 = vld [vmem:[#allocation28 + $0x210] sm:$0xff] }
 0xeeb   : > { %v3942_v0 = vld [vmem:[#allocation28 + $0x10e8] sm:$0xff] }
 0xeec   : > { %v3470_v37 = vld [vmem:[#allocation28 + $0x248] sm:$0xff] }
 0xeed   : > { %7889 = vmatpush1.bf16.msra.mxu0 %v7888_v63  ;;  %7961 = vmatpush1.bf16.msra.mxu1 %v7960_v1  ;;  %v7906_v63 = vpack.c.bf16 %v3942_v0, %v3934_v53  ;;  %v7978_v1 = vpack.c.bf16 %v3944_v56, %v3936_v55  ;;  %v3413_v53 = vld [vmem:[#allocation28 + $0x80] sm:$0xff]  ;;  %v3415_v55 = vld [vmem:[#allocation28 + $0x90] sm:$0xff] }
 0xeee   : > { %7891 = vmatprep.subr.bf16.mxu0 %v7890_v4  ;;  %7963 = vmatprep.subr.bf16.mxu1 %v7962_v5  ;;  %v3950_v4 = vld [vmem:[#allocation28 + $0x1128] sm:$0xff]  ;;  %v3421_v0 = vld [vmem:[#allocation28 + $0xc0] sm:$0xff] }
 0xeef   : > { %v3958_v5 = vld [vmem:[#allocation28 + $0x1168] sm:$0xff]  ;;  %v7996_v3 = vpack.c.bf16 %v3421_v0, %v3413_v53 }
 0xef0   : > { %v3494_v53 = vld [vmem:[#allocation28 + $0x308] sm:$0xff] }
 0xef1   : > { %7893 = vmatpush1.bf16.msra.mxu0 %v7892_v17  ;;  %7965 = vmatpush1.bf16.msra.mxu1 %v7964_v18  ;;  %v7910_v17 = vpack.c.bf16 %v3958_v5, %v3950_v4  ;;  %v7982_v18 = vpack.c.bf16 %v3960_v7, %v3952_v6  ;;  %v7998_v5 = vpack.c.bf16 %v3438_v62, %v3430_v61  ;;  %v3429_v6 = vld [vmem:[#allocation28 + $0x100] sm:$0xff]  ;;  %v3502_v0 = vld [vmem:[#allocation28 + $0x348] sm:$0xff] }
 0xef2   : > { %7895 = vmatprep.subr.bf16.mxu0 %v7894_v41  ;;  %7967 = vmatprep.subr.bf16.mxu1 %v7966_v54  ;;  %v3966_v41 = vld [vmem:[#allocation28 + $0x11a8] sm:$0xff]  ;;  %v3437_v7 = vld [vmem:[#allocation28 + $0x140] sm:$0xff]  ;;  %v8014_v61 = vpack.c.bf16 %v3502_v0, %v3494_v53 }
 0xef3   : > { %v3974_v54 = vld [vmem:[#allocation28 + $0x11e8] sm:$0xff]  ;;  %v8000_v22 = vpack.c.bf16 %v3437_v7, %v3429_v6  ;;  %v3493_v62 = vld [vmem:[#allocation28 + $0x300] sm:$0xff]  ;;  %v3512_v7 = vld [vmem:[#allocation28 + $0x398] sm:$0xff] }
 0xef4   : > { %v3518_v6 = vld [vmem:[#allocation28 + $0x3c8] sm:$0xff]  ;;  %v3557_v0 = vld [vmem:[#allocation28 + $0x500] sm:$0xff] }
 0xef5   : > { %7897 = vmatpush1.bf16.msra.mxu0 %v7896_v31  ;;  %7969 = vmatpush1.bf16.msra.mxu1 %v7968_v43  ;;  %v7914_v31 = vpack.c.bf16 %v3974_v54, %v3966_v41  ;;  %v7986_v43 = vpack.c.bf16 %v3976_v26, %v3968_v23  ;;  %v3445_v54 = vld [vmem:[#allocation28 + $0x180] sm:$0xff]  ;;  %v3447_v26 = vld [vmem:[#allocation28 + $0x190] sm:$0xff] }
 0xef6   : > { %7899 = vmatprep.subr.bf16.mxu0 %v7898_v20  ;;  %7971 = vmatprep.subr.bf16.mxu1 %v7970_v35  ;;  %v3398_v20 = vld [vmem:[#allocation28 + $0x8] sm:$0xff]  ;;  %v3453_v23 = vld [vmem:[#allocation28 + $0x1c0] sm:$0xff] }
 0xef7   : > { %v3406_v35 = vld [vmem:[#allocation28 + $0x48] sm:$0xff]  ;;  %v8004_v32 = vpack.c.bf16 %v3453_v23, %v3445_v54  ;;  %v3528_v23 = vld [vmem:[#allocation28 + $0x418] sm:$0xff] }
 0xef8   : > { %v7990_v14 = vpack.c.bf16 %v3406_v35, %v3398_v20  ;;  %v8006_v20 = vpack.c.bf16 %v3470_v37, %v3462_v29  ;;  %v3461_v35 = vld [vmem:[#allocation28 + $0x200] sm:$0xff]  ;;  %v3534_v54 = vld [vmem:[#allocation28 + $0x448] sm:$0xff] }
 0xef9   : > { %7901 = vmatpush1.bf16.msra.mxu0 %v7900_v44  ;;  %7973 = vmatpush1.bf16.msra.mxu1 %v7972_v15  ;;  %v3405_v44 = vld [vmem:[#allocation28 + $0x40] sm:$0xff]  ;;  %v3399_v15 = vld [vmem:[#allocation28 + $0x10] sm:$0xff] }
 0xefa   : > { %7903 = vmatprep.subr.bf16.mxu0 %v7902_v49  ;;  %7975 = vmatprep.subr.bf16.mxu1 %v7974_v50  ;;  %v3422_v49 = vld [vmem:[#allocation28 + $0xc8] sm:$0xff]  ;;  %v3416_v50 = vld [vmem:[#allocation28 + $0x98] sm:$0xff]  ;;  %v7992_v51 = vpack.c.bf16 %v3405_v44, %v3397_v12  ;;  %v8064_v52 = vpack.c.bf16 %v3407_v46, %v3399_v15  ;;  %v8008_v15 = vpack.c.bf16 %v3469_v38, %v3461_v35  ;;  %v3525_v37 = vld [vmem:[#allocation28 + $0x400] sm:$0xff] }
 0xefb   : > { %v7994_v56 = vpack.c.bf16 %v3422_v49, %v3414_v48  ;;  %v3480_v12 = vld [vmem:[#allocation28 + $0x298] sm:$0xff]  ;;  %v3477_v49 = vld [vmem:[#allocation28 + $0x280] sm:$0xff]  ;;  %v3550_v35 = vld [vmem:[#allocation28 + $0x4c8] sm:$0xff] }
 0xefc   : > { %v3488_v44 = vld [vmem:[#allocation28 + $0x2d8] sm:$0xff] }
 0xefd   : > { %7905 = vmatpush1.bf16.msra.mxu0 %v7904_v58  ;;  %7977 = vmatpush1.bf16.msra.mxu1 %v7976_v60  ;;  %v3423_v60 = vld [vmem:[#allocation28 + $0xd0] sm:$0xff]  ;;  %v3544_v38 = vld [vmem:[#allocation28 + $0x498] sm:$0xff] }
 0xefe   : > { %7907 = vmatprep.subr.bf16.mxu0 %v7906_v63  ;;  %7979 = vmatprep.subr.bf16.mxu1 %v7978_v1  ;;  %v10881_v63 = vpop.eup %9249  ;;  %v3432_v1 = vld [vmem:[#allocation28 + $0x118] sm:$0xff]  ;;  %v8068_v4 = vpack.c.bf16 %v3423_v60, %v3415_v55 }
 0xeff   : > { %v3496_v55 = vld [vmem:[#allocation28 + $0x318] sm:$0xff] }
 0xf01   : > { %7909 = vmatpush1.bf16.msra.mxu0 %v7908_v8  ;;  %7981 = vmatpush1.bf16.msra.mxu1 %v7980_v9  ;;  %v3431_v8 = vld [vmem:[#allocation28 + $0x110] sm:$0xff]  ;;  %v8070_v9 = vpack.c.bf16 %v3440_v2, %v3432_v1  ;;  %v3501_v1 = vld [vmem:[#allocation28 + $0x340] sm:$0xff] }
 0xf02   : > { %7911 = vmatprep.subr.bf16.mxu0 %v7910_v17  ;;  %7983 = vmatprep.subr.bf16.mxu1 %v7982_v18  ;;  %v3448_v17 = vld [vmem:[#allocation28 + $0x198] sm:$0xff]  ;;  %v8072_v34 = vpack.c.bf16 %v3439_v10, %v3431_v8  ;;  %v3495_v2 = vld [vmem:[#allocation28 + $0x310] sm:$0xff] }
 0xf03   : > { %v3456_v18 = vld [vmem:[#allocation28 + $0x1d8] sm:$0xff] }
 0xf04   : > { %4329 = vmatmul.mubr.f32.vlgmr.msra.gmra.mrb[42].mxu0 %v10852_v19  ;;  %4471 = vmatmul.mubr.f32.vlgmr.msra.gmra.mrb[42].mxu1 %v10852_v19  ;;  %v3424_v19 = vld [vmem:[#allocation28 + $0xd8] sm:$0xff] }
 0xf05   : > { %7913 = vmatpush1.bf16.msra.mxu0 %v7912_v27  ;;  %7985 = vmatpush1.bf16.msra.mxu1 %v7984_v25  ;;  %v8066_v58 = vpack.c.bf16 %v3424_v19, %v3416_v50  ;;  %v8074_v27 = vpack.c.bf16 %v3456_v18, %v3448_v17  ;;  %v3455_v25 = vld [vmem:[#allocation28 + $0x1d0] sm:$0xff]  ;;  %v3485_v50 = vld [vmem:[#allocation28 + $0x2c0] sm:$0xff]  ;;  %v3520_v8 = vld [vmem:[#allocation28 + $0x3d8] sm:$0xff] }
 0xf06   : > { %7915 = vmatprep.subr.bf16.mxu0 %v7914_v31  ;;  %7987 = vmatprep.subr.bf16.mxu1 %v7986_v43  ;;  %v3464_v31 = vld [vmem:[#allocation28 + $0x218] sm:$0xff]  ;;  %v8076_v33 = vpack.c.bf16 %v3455_v25, %v3447_v26  ;;  %v3479_v19 = vld [vmem:[#allocation28 + $0x290] sm:$0xff]  ;;  %v3517_v17 = vld [vmem:[#allocation28 + $0x3c0] sm:$0xff] }
 0xf07   : > { %4399 = vmatprep.mubr.f32.mxu0 %v9785_v21  ;;  %4541 = vmatprep.mubr.f32.mxu1 %v9785_v21  ;;  %v3472_v43 = vld [vmem:[#allocation28 + $0x258] sm:$0xff]  ;;  %v3511_v18 = vld [vmem:[#allocation28 + $0x390] sm:$0xff] }
 0xf08   : > { %v3536_v26 = vld [vmem:[#allocation28 + $0x458] sm:$0xff] }
 0xf09   : > { %7917 = vmatpush1.bf16.msra.mxu0 %v7916_v40  ;;  %7989 = vmatpush1.bf16.msra.mxu1 %v7988_v13  ;;  %v8078_v40 = vpack.c.bf16 %v3472_v43, %v3464_v31  ;;  %v3471_v13 = vld [vmem:[#allocation28 + $0x250] sm:$0xff]  ;;  %v3533_v31 = vld [vmem:[#allocation28 + $0x440] sm:$0xff] }
 0xf0a   : > { %7991 = vmatprep.subr.bf16.mxu0 %v7990_v14  ;;  %8063 = vmatprep.subr.bf16.mxu1 %v8062_v42  ;;  %v3478_v14 = vld [vmem:[#allocation28 + $0x288] sm:$0xff]  ;;  %v8080_v46 = vpack.c.bf16 %v3471_v13, %v3463_v39  ;;  %v3527_v43 = vld [vmem:[#allocation28 + $0x410] sm:$0xff]  ;;  %v3552_v39 = vld [vmem:[#allocation28 + $0x4d8] sm:$0xff] }
 0xf0b   : > { %v3486_v42 = vld [vmem:[#allocation28 + $0x2c8] sm:$0xff] }
 0xf0c   : > { %7300 = vmatmul.mubr.msk.f32.vlgmr.msra.gmra.mrb[42].mxu0 %vm2979_vm11, %v10858_v57  ;;  %7301 = vmatmul.mubr.msk.f32.vlgmr.msra.gmra.mrb[42].mxu1 %vm2979_vm11, %v10858_v57  ;;  %v3454_v57 = vld [vmem:[#allocation28 + $0x1c8] sm:$0xff]  ;;  %v8010_v48 = vpack.c.bf16 %v3486_v42, %v3478_v14  ;;  %v3541_v42 = vld [vmem:[#allocation28 + $0x480] sm:$0xff] }
 0xf0d   : > { %7993 = vmatpush1.bf16.msra.mxu0 %v7992_v51  ;;  %4615 = vmatprep.mubr.f32.mxu0 %v10881_v63  ;;  %v8002_v41 = vpack.c.bf16 %v3454_v57, %v3446_v11  ;;  %v8082_v51 = vpack.c.bf16 %v3488_v44, %v3480_v12  ;;  %v3509_v57 = vld [vmem:[#allocation28 + $0x380] sm:$0xff]  ;;  %v3543_v44 = vld [vmem:[#allocation28 + $0x490] sm:$0xff] }
 0xf0e   : > { %8065 = vmatpush1.bf16.msra.mxu1 %v8064_v52  ;;  %4757 = vmatprep.mubr.f32.mxu1 %v10881_v63  ;;  %v3487_v52 = vld [vmem:[#allocation28 + $0x2d0] sm:$0xff]  ;;  %v3549_v12 = vld [vmem:[#allocation28 + $0x4c0] sm:$0xff] }
 0xf0f   : > { %7995 = vmatprep.subr.bf16.mxu0 %v7994_v56  ;;  %8067 = vmatprep.subr.bf16.mxu1 %v8066_v58  ;;  %v3504_v56 = vld [vmem:[#allocation28 + $0x358] sm:$0xff]  ;;  %v8012_v58 = vpack.c.bf16 %v3485_v50, %v3477_v49  ;;  %v8084_v60 = vpack.c.bf16 %v3487_v52, %v3479_v19  ;;  %v3566_v49 = vld [vmem:[#allocation28 + $0x548] sm:$0xff] }
 0xf10   : > { %v3560_v50 = vld [vmem:[#allocation28 + $0x518] sm:$0xff] }
 0xf11   : > { %7997 = vmatpush1.bf16.msra.mxu0 %v7996_v3  ;;  %v8086_v3 = vpack.c.bf16 %v3504_v56, %v3496_v55  ;;  %v3568_v19 = vld [vmem:[#allocation28 + $0x558] sm:$0xff]  ;;  %v3565_v55 = vld [vmem:[#allocation28 + $0x540] sm:$0xff]  ;;  %v3559_v56 = vld [vmem:[#allocation28 + $0x510] sm:$0xff] }
 0xf12   : > { %8069 = vmatpush1.bf16.msra.mxu1 %v8068_v4  ;;  %7999 = vmatprep.subr.bf16.mxu0 %v7998_v5  ;;  %v3503_v4 = vld [vmem:[#allocation28 + $0x350] sm:$0xff]  ;;  %v3510_v5 = vld [vmem:[#allocation28 + $0x388] sm:$0xff] }
 0xf13   : > { %8071 = vmatprep.subr.bf16.mxu1 %v8070_v9  ;;  %v8016_v9 = vpack.c.bf16 %v3501_v1, %v3493_v62  ;;  %v8088_v10 = vpack.c.bf16 %v3503_v4, %v3495_v2  ;;  %v8018_v11 = vpack.c.bf16 %v3518_v6, %v3510_v5  ;;  %v3582_v62 = vld [vmem:[#allocation28 + $0x5c8] sm:$0xff]  ;;  %v3576_v1 = vld [vmem:[#allocation28 + $0x598] sm:$0xff]  ;;  %v3573_v6 = vld [vmem:[#allocation28 + $0x580] sm:$0xff] }
 0xf14   : > { %v3584_v2 = vld [vmem:[#allocation28 + $0x5d8] sm:$0xff] }
 0xf15   : > { %8001 = vmatpush1.bf16.msra.mxu0 %v8000_v22  ;;  %v8090_v22 = vpack.c.bf16 %v3520_v8, %v3512_v7  ;;  %v3581_v7 = vld [vmem:[#allocation28 + $0x5c0] sm:$0xff]  ;;  %v3575_v8 = vld [vmem:[#allocation28 + $0x590] sm:$0xff] }
 0xf16   : > { %8073 = vmatpush1.bf16.msra.mxu1 %v8072_v34  ;;  %8003 = vmatprep.subr.bf16.mxu0 %v8002_v41  ;;  %v3519_v34 = vld [vmem:[#allocation28 + $0x3d0] sm:$0xff]  ;;  %v3526_v41 = vld [vmem:[#allocation28 + $0x408] sm:$0xff] }
 0xf17   : > { %8075 = vmatprep.subr.bf16.mxu1 %v8074_v27  ;;  %v8020_v27 = vpack.c.bf16 %v3517_v17, %v3509_v57  ;;  %v8092_v25 = vpack.c.bf16 %v3519_v34, %v3511_v18  ;;  %v8022_v29 = vpack.c.bf16 %v3534_v54, %v3526_v41  ;;  %v3598_v57 = vld [vmem:[#allocation28 + $0x648] sm:$0xff]  ;;  %v3592_v17 = vld [vmem:[#allocation28 + $0x618] sm:$0xff]  ;;  %v3589_v54 = vld [vmem:[#allocation28 + $0x600] sm:$0xff] }
 0xf18   : > { %v3600_v18 = vld [vmem:[#allocation28 + $0x658] sm:$0xff] }
 0xf19   : > { %8005 = vmatpush1.bf16.msra.mxu0 %v8004_v32  ;;  %v8094_v32 = vpack.c.bf16 %v3536_v26, %v3528_v23  ;;  %v3597_v23 = vld [vmem:[#allocation28 + $0x640] sm:$0xff]  ;;  %v3591_v26 = vld [vmem:[#allocation28 + $0x610] sm:$0xff] }
 0xf1a   : > { %8077 = vmatpush1.bf16.msra.mxu1 %v8076_v33  ;;  %8007 = vmatprep.subr.bf16.mxu0 %v8006_v20  ;;  %v3535_v33 = vld [vmem:[#allocation28 + $0x450] sm:$0xff]  ;;  %v3542_v20 = vld [vmem:[#allocation28 + $0x488] sm:$0xff] }
 0xf1b   : > { %8079 = vmatprep.subr.bf16.mxu1 %v8078_v40  ;;  %v8024_v40 = vpack.c.bf16 %v3533_v31, %v3525_v37  ;;  %v8096_v13 = vpack.c.bf16 %v3535_v33, %v3527_v43  ;;  %v8026_v14 = vpack.c.bf16 %v3550_v35, %v3542_v20  ;;  %v3614_v37 = vld [vmem:[#allocation28 + $0x6c8] sm:$0xff]  ;;  %v3608_v31 = vld [vmem:[#allocation28 + $0x698] sm:$0xff]  ;;  %v3605_v35 = vld [vmem:[#allocation28 + $0x680] sm:$0xff] }
 0xf1c   : > { %v3616_v43 = vld [vmem:[#allocation28 + $0x6d8] sm:$0xff] }
 0xf1d   : > { %8009 = vmatpush1.bf16.msra.mxu0 %v8008_v15  ;;  %v8098_v15 = vpack.c.bf16 %v3552_v39, %v3544_v38  ;;  %v3613_v38 = vld [vmem:[#allocation28 + $0x6c0] sm:$0xff]  ;;  %v3607_v39 = vld [vmem:[#allocation28 + $0x690] sm:$0xff] }
 0xf1e   : > { %8081 = vmatpush1.bf16.msra.mxu1 %v8080_v46  ;;  %8011 = vmatprep.subr.bf16.mxu0 %v8010_v48  ;;  %v3551_v46 = vld [vmem:[#allocation28 + $0x4d0] sm:$0xff]  ;;  %v3558_v48 = vld [vmem:[#allocation28 + $0x508] sm:$0xff] }
 0xf1f   : > { %8083 = vmatprep.subr.bf16.mxu1 %v8082_v51  ;;  %v8028_v51 = vpack.c.bf16 %v3549_v12, %v3541_v42  ;;  %v8100_v52 = vpack.c.bf16 %v3551_v46, %v3543_v44  ;;  %v8030_v53 = vpack.c.bf16 %v3566_v49, %v3558_v48  ;;  %v3630_v42 = vld [vmem:[#allocation28 + $0x748] sm:$0xff]  ;;  %v3624_v12 = vld [vmem:[#allocation28 + $0x718] sm:$0xff]  ;;  %v3621_v49 = vld [vmem:[#allocation28 + $0x700] sm:$0xff] }
 0xf20   : > { %v3632_v44 = vld [vmem:[#allocation28 + $0x758] sm:$0xff] }
 0xf21   : > { %8013 = vmatpush1.bf16.msra.mxu0 %v8012_v58  ;;  %v8102_v58 = vpack.c.bf16 %v3568_v19, %v3560_v50  ;;  %v3629_v50 = vld [vmem:[#allocation28 + $0x740] sm:$0xff]  ;;  %v3623_v19 = vld [vmem:[#allocation28 + $0x710] sm:$0xff] }
 0xf22   : > { %8085 = vmatpush1.bf16.msra.mxu1 %v8084_v60  ;;  %8015 = vmatprep.subr.bf16.mxu0 %v8014_v61  ;;  %v3567_v60 = vld [vmem:[#allocation28 + $0x550] sm:$0xff]  ;;  %v3574_v61 = vld [vmem:[#allocation28 + $0x588] sm:$0xff] }
 0xf23   : > { %8087 = vmatprep.subr.bf16.mxu1 %v8086_v3  ;;  %v8032_v3 = vpack.c.bf16 %v3565_v55, %v3557_v0  ;;  %v8104_v4 = vpack.c.bf16 %v3567_v60, %v3559_v56  ;;  %v8034_v5 = vpack.c.bf16 %v3582_v62, %v3574_v61  ;;  %v3646_v0 = vld [vmem:[#allocation28 + $0x7c8] sm:$0xff]  ;;  %v3640_v55 = vld [vmem:[#allocation28 + $0x798] sm:$0xff]  ;;  %v3637_v62 = vld [vmem:[#allocation28 + $0x780] sm:$0xff] }
 0xf24   : > { %v3648_v56 = vld [vmem:[#allocation28 + $0x7d8] sm:$0xff] }
 0xf25   : > { %8017 = vmatpush1.bf16.msra.mxu0 %v8016_v9  ;;  %v8106_v9 = vpack.c.bf16 %v3584_v2, %v3576_v1  ;;  %v3645_v1 = vld [vmem:[#allocation28 + $0x7c0] sm:$0xff]  ;;  %v3639_v2 = vld [vmem:[#allocation28 + $0x790] sm:$0xff] }
 0xf26   : > { %8089 = vmatpush1.bf16.msra.mxu1 %v8088_v10  ;;  %8019 = vmatprep.subr.bf16.mxu0 %v8018_v11  ;;  %v3583_v10 = vld [vmem:[#allocation28 + $0x5d0] sm:$0xff]  ;;  %v3590_v11 = vld [vmem:[#allocation28 + $0x608] sm:$0xff] }
 0xf27   : > { %8091 = vmatprep.subr.bf16.mxu1 %v8090_v22  ;;  %v8036_v22 = vpack.c.bf16 %v3581_v7, %v3573_v6  ;;  %v8108_v34 = vpack.c.bf16 %v3583_v10, %v3575_v8  ;;  %v8038_v41 = vpack.c.bf16 %v3598_v57, %v3590_v11  ;;  %v3662_v6 = vld [vmem:[#allocation28 + $0x848] sm:$0xff]  ;;  %v3656_v7 = vld [vmem:[#allocation28 + $0x818] sm:$0xff]  ;;  %v3653_v11 = vld [vmem:[#allocation28 + $0x800] sm:$0xff] }
 0xf28   : > { %v3664_v8 = vld [vmem:[#allocation28 + $0x858] sm:$0xff]  ;;  %v3661_v57 = vld [vmem:[#allocation28 + $0x840] sm:$0xff] }
 0xf29   : > { %8021 = vmatpush1.bf16.msra.mxu0 %v8020_v27  ;;  %v8110_v27 = vpack.c.bf16 %v3600_v18, %v3592_v17  ;;  %v3655_v17 = vld [vmem:[#allocation28 + $0x810] sm:$0xff]  ;;  %v8126_v18 = vpack.c.bf16 %v3664_v8, %v3656_v7  ;;  %v3441_v7 = vld [vmem:[#allocation28 + $0x160] sm:$0xff] }
 0xf2a   : > { %8093 = vmatpush1.bf16.msra.mxu1 %v8092_v25  ;;  %8023 = vmatprep.subr.bf16.mxu0 %v8022_v29  ;;  %v3599_v25 = vld [vmem:[#allocation28 + $0x650] sm:$0xff]  ;;  %v3606_v29 = vld [vmem:[#allocation28 + $0x688] sm:$0xff] }
 0xf2b   : > { %8095 = vmatprep.subr.bf16.mxu1 %v8094_v32  ;;  %v8040_v32 = vpack.c.bf16 %v3597_v23, %v3589_v54  ;;  %v8112_v33 = vpack.c.bf16 %v3599_v25, %v3591_v26  ;;  %v8042_v20 = vpack.c.bf16 %v3614_v37, %v3606_v29  ;;  %v3672_v54 = vld [vmem:[#allocation28 + $0x898] sm:$0xff]  ;;  %v8056_v26 = vpack.c.bf16 %v3661_v57, %v3653_v11  ;;  %v3669_v29 = vld [vmem:[#allocation28 + $0x880] sm:$0xff]  ;;  %v3435_v8 = vld [vmem:[#allocation28 + $0x130] sm:$0xff] }
 0xf2c   : > { %v3680_v23 = vld [vmem:[#allocation28 + $0x8d8] sm:$0xff]  ;;  %v3677_v37 = vld [vmem:[#allocation28 + $0x8c0] sm:$0xff]  ;;  %v3458_v11 = vld [vmem:[#allocation28 + $0x1e8] sm:$0xff] }
 0xf2d   : > { %8025 = vmatpush1.bf16.msra.mxu0 %v8024_v40  ;;  %v8114_v40 = vpack.c.bf16 %v3616_v43, %v3608_v31  ;;  %v3671_v31 = vld [vmem:[#allocation28 + $0x890] sm:$0xff]  ;;  %v10891_v43 = vpop.eup %9251  ;;  %v3452_v57 = vld [vmem:[#allocation28 + $0x1b8] sm:$0xff] }
 0xf2e   : > { %8097 = vmatpush1.bf16.msra.mxu1 %v8096_v13  ;;  %8027 = vmatprep.subr.bf16.mxu0 %v8026_v14  ;;  %v3615_v13 = vld [vmem:[#allocation28 + $0x6d0] sm:$0xff]  ;;  %v3622_v14 = vld [vmem:[#allocation28 + $0x708] sm:$0xff] }
 0xf2f   : > { %8099 = vmatprep.subr.bf16.mxu1 %v8098_v15  ;;  %v8044_v15 = vpack.c.bf16 %v3613_v38, %v3605_v35  ;;  %v8116_v46 = vpack.c.bf16 %v3615_v13, %v3607_v39  ;;  %v8046_v48 = vpack.c.bf16 %v3630_v42, %v3622_v14  ;;  %v3410_v35 = vld [vmem:[#allocation28 + $0x68] sm:$0xff]  ;;  %v3404_v38 = vld [vmem:[#allocation28 + $0x38] sm:$0xff]  ;;  %v8060_v39 = vpack.c.bf16 %v3677_v37, %v3669_v29  ;;  %v3401_v14 = vld [vmem:[#allocation28 + $0x20] sm:$0xff] }
 0xf30   : > { %v3409_v42 = vld [vmem:[#allocation28 + $0x60] sm:$0xff]  ;;  %v3468_v29 = vld [vmem:[#allocation28 + $0x238] sm:$0xff] }
 0xf31   : > { %8029 = vmatpush1.bf16.msra.mxu0 %v8028_v51  ;;  %v8118_v51 = vpack.c.bf16 %v3632_v44, %v3624_v12  ;;  %v8206_v12 = vpack.c.bf16 %v3412_v28, %v3404_v38  ;;  %v3403_v44 = vld [vmem:[#allocation28 + $0x30] sm:$0xff]  ;;  %v3476_v37 = vld [vmem:[#allocation28 + $0x278] sm:$0xff] }
 0xf32   : > { %8101 = vmatpush1.bf16.msra.mxu1 %v8100_v52  ;;  %8031 = vmatprep.subr.bf16.mxu0 %v8030_v53  ;;  %v3631_v52 = vld [vmem:[#allocation28 + $0x750] sm:$0xff]  ;;  %v3638_v53 = vld [vmem:[#allocation28 + $0x788] sm:$0xff]  ;;  %v8222_v28 = vpack.c.bf16 %v3476_v37, %v3468_v29 }
 0xf33   : > { %8103 = vmatprep.subr.bf16.mxu1 %v8102_v58  ;;  %v8048_v58 = vpack.c.bf16 %v3629_v50, %v3621_v49  ;;  %v8120_v60 = vpack.c.bf16 %v3631_v52, %v3623_v19  ;;  %v8050_v61 = vpack.c.bf16 %v3646_v0, %v3638_v53  ;;  %v8136_v49 = vpack.c.bf16 %v3409_v42, %v3401_v14  ;;  %v3420_v50 = vld [vmem:[#allocation28 + $0xb8] sm:$0xff]  ;;  %v3417_v52 = vld [vmem:[#allocation28 + $0xa0] sm:$0xff]  ;;  %v3419_v0 = vld [vmem:[#allocation28 + $0xb0] sm:$0xff] }
 0xf34   : > { %v3428_v19 = vld [vmem:[#allocation28 + $0xf8] sm:$0xff]  ;;  %v3425_v53 = vld [vmem:[#allocation28 + $0xe0] sm:$0xff]  ;;  %v3467_v38 = vld [vmem:[#allocation28 + $0x230] sm:$0xff] }
 0xf35   : > { %8033 = vmatpush1.bf16.msra.mxu0 %v8032_v3  ;;  %v8122_v3 = vpack.c.bf16 %v3648_v56, %v3640_v55  ;;  %v10897_v55 = vpop.eup %9253  ;;  %v3484_v14 = vld [vmem:[#allocation28 + $0x2b8] sm:$0xff]  ;;  %v3531_v29 = vld [vmem:[#allocation28 + $0x430] sm:$0xff] }
 0xf36   : > { %8105 = vmatpush1.bf16.msra.mxu1 %v8104_v4  ;;  %8035 = vmatprep.subr.bf16.mxu0 %v8034_v5  ;;  %v3647_v4 = vld [vmem:[#allocation28 + $0x7d0] sm:$0xff]  ;;  %v3654_v5 = vld [vmem:[#allocation28 + $0x808] sm:$0xff]  ;;  %v3492_v42 = vld [vmem:[#allocation28 + $0x2f8] sm:$0xff] }
 0xf37   : > { %8107 = vmatprep.subr.bf16.mxu1 %v8106_v9  ;;  %v8052_v9 = vpack.c.bf16 %v3645_v1, %v3637_v62  ;;  %v8124_v47 = vpack.c.bf16 %v3647_v4, %v3639_v2  ;;  %v8054_v10 = vpack.c.bf16 %v3662_v6, %v3654_v5  ;;  %v8210_v62 = vpack.c.bf16 %v3428_v19, %v3420_v50  ;;  %v3436_v1 = vld [vmem:[#allocation28 + $0x138] sm:$0xff]  ;;  %v3433_v6 = vld [vmem:[#allocation28 + $0x120] sm:$0xff]  ;;  %v3491_v19 = vld [vmem:[#allocation28 + $0x2f0] sm:$0xff] }
 0xf38   : > { %v3444_v2 = vld [vmem:[#allocation28 + $0x178] sm:$0xff]  ;;  %v8226_v50 = vpack.c.bf16 %v3492_v42, %v3484_v14  ;;  %v3547_v14 = vld [vmem:[#allocation28 + $0x4b0] sm:$0xff] }
 0xf39   : > { %8037 = vmatpush1.bf16.msra.mxu0 %v8036_v22  ;;  %v3663_v22 = vld [vmem:[#allocation28 + $0x850] sm:$0xff] }
 0xf3a   : > { %8109 = vmatpush1.bf16.msra.mxu1 %v8108_v34  ;;  %8039 = vmatprep.subr.bf16.mxu0 %v8038_v41  ;;  %v3670_v34 = vld [vmem:[#allocation28 + $0x888] sm:$0xff] }
 0xf3b   : > { %8111 = vmatprep.subr.bf16.mxu1 %v8110_v27  ;;  %v3678_v41 = vld [vmem:[#allocation28 + $0x8c8] sm:$0xff]  ;;  %v8128_v27 = vpack.c.bf16 %v3663_v22, %v3655_v17  ;;  %v3460_v17 = vld [vmem:[#allocation28 + $0x1f8] sm:$0xff] }
 0xf3c   : > { %v8058_v25 = vpack.c.bf16 %v3678_v41, %v3670_v34  ;;  %v3449_v41 = vld [vmem:[#allocation28 + $0x1a0] sm:$0xff] }
 0xf3d   : > { %8041 = vmatpush1.bf16.msra.mxu0 %v8040_v32  ;;  %v8130_v32 = vpack.c.bf16 %v3680_v23, %v3672_v54  ;;  %v3457_v54 = vld [vmem:[#allocation28 + $0x1e0] sm:$0xff]  ;;  %v3451_v23 = vld [vmem:[#allocation28 + $0x1b0] sm:$0xff] }
 0xf3e   : > { %8113 = vmatpush1.bf16.msra.mxu1 %v8112_v33  ;;  %8043 = vmatprep.subr.bf16.mxu0 %v8042_v20  ;;  %v3679_v33 = vld [vmem:[#allocation28 + $0x8d0] sm:$0xff]  ;;  %v3402_v20 = vld [vmem:[#allocation28 + $0x28] sm:$0xff] }
 0xf3f   : > { %8115 = vmatprep.subr.bf16.mxu1 %v8114_v40  ;;  %v8132_v40 = vpack.c.bf16 %v3679_v33, %v3671_v31  ;;  %v8134_v13 = vpack.c.bf16 %v3410_v35, %v3402_v20  ;;  %v8148_v31 = vpack.c.bf16 %v3457_v54, %v3449_v41  ;;  %v3465_v20 = vld [vmem:[#allocation28 + $0x220] sm:$0xff]  ;;  %v3532_v41 = vld [vmem:[#allocation28 + $0x438] sm:$0xff] }
 0xf40   : > { %v3473_v35 = vld [vmem:[#allocation28 + $0x260] sm:$0xff]  ;;  %v3540_v54 = vld [vmem:[#allocation28 + $0x478] sm:$0xff] }
 0xf41   : > { %8045 = vmatpush1.bf16.msra.mxu0 %v8044_v15  ;;  %v3411_v15 = vld [vmem:[#allocation28 + $0x70] sm:$0xff]  ;;  %v8238_v37 = vpack.c.bf16 %v3540_v54, %v3532_v41 }
 0xf42   : > { %8117 = vmatpush1.bf16.msra.mxu1 %v8116_v46  ;;  %8047 = vmatprep.subr.bf16.mxu0 %v8046_v48  ;;  %v3418_v46 = vld [vmem:[#allocation28 + $0xa8] sm:$0xff]  ;;  %v3595_v41 = vld [vmem:[#allocation28 + $0x630] sm:$0xff] }
 0xf43   : > { %8119 = vmatprep.subr.bf16.mxu1 %v8118_v51  ;;  %v3426_v48 = vld [vmem:[#allocation28 + $0xe8] sm:$0xff]  ;;  %v8208_v51 = vpack.c.bf16 %v3411_v15, %v3403_v44 }
 0xf44   : > { %v8138_v56 = vpack.c.bf16 %v3426_v48, %v3418_v46  ;;  %v3481_v46 = vld [vmem:[#allocation28 + $0x2a0] sm:$0xff] }
 0xf45   : > { %8049 = vmatpush1.bf16.msra.mxu0 %v8048_v58  ;;  %v3427_v58 = vld [vmem:[#allocation28 + $0xf0] sm:$0xff]  ;;  %v3489_v48 = vld [vmem:[#allocation28 + $0x2e0] sm:$0xff] }
 0xf46   : > { %8121 = vmatpush1.bf16.msra.mxu1 %v8120_v60  ;;  %8051 = vmatprep.subr.bf16.mxu0 %v8050_v61  ;;  %v3434_v60 = vld [vmem:[#allocation28 + $0x128] sm:$0xff]  ;;  %v8212_v4 = vpack.c.bf16 %v3427_v58, %v3419_v0  ;;  %v3508_v0 = vld [vmem:[#allocation28 + $0x378] sm:$0xff] }
 0xf47   : > { %8123 = vmatprep.subr.bf16.mxu1 %v8122_v3  ;;  %v3442_v61 = vld [vmem:[#allocation28 + $0x168] sm:$0xff]  ;;  %v8140_v3 = vpack.c.bf16 %v3425_v53, %v3417_v52  ;;  %v3500_v53 = vld [vmem:[#allocation28 + $0x338] sm:$0xff] }
 0xf48   : > { %v8142_v5 = vpack.c.bf16 %v3442_v61, %v3434_v60  ;;  %v3506_v52 = vld [vmem:[#allocation28 + $0x368] sm:$0xff]  ;;  %v3497_v61 = vld [vmem:[#allocation28 + $0x320] sm:$0xff] }
 0xf49   : > { %8053 = vmatpush1.bf16.msra.mxu0 %v8052_v9  ;;  %v8214_v9 = vpack.c.bf16 %v3444_v2, %v3436_v1  ;;  %v3499_v1 = vld [vmem:[#allocation28 + $0x330] sm:$0xff]  ;;  %v8230_v2 = vpack.c.bf16 %v3508_v0, %v3500_v53 }
 0xf4a   : > { %8125 = vmatpush1.bf16.msra.mxu1 %v8124_v47  ;;  %8055 = vmatprep.subr.bf16.mxu0 %v8054_v10  ;;  %v3443_v47 = vld [vmem:[#allocation28 + $0x170] sm:$0xff]  ;;  %v3450_v10 = vld [vmem:[#allocation28 + $0x1a8] sm:$0xff] }
 0xf4b   : > { %8127 = vmatprep.subr.bf16.mxu1 %v8126_v18  ;;  %v8144_v18 = vpack.c.bf16 %v3441_v7, %v3433_v6  ;;  %v8216_v22 = vpack.c.bf16 %v3443_v47, %v3435_v8  ;;  %v8146_v34 = vpack.c.bf16 %v3458_v11, %v3450_v10  ;;  %v3516_v6 = vld [vmem:[#allocation28 + $0x3b8] sm:$0xff]  ;;  %v3513_v10 = vld [vmem:[#allocation28 + $0x3a0] sm:$0xff]  ;;  %v3563_v53 = vld [vmem:[#allocation28 + $0x530] sm:$0xff] }
 0xf4c   : > { %4616 = vmatmul.mubr.f32.vlgmr.msra.gmra.mrb[40].mxu0 %v10891_v43  ;;  %v3524_v7 = vld [vmem:[#allocation28 + $0x3f8] sm:$0xff]  ;;  %v3521_v11 = vld [vmem:[#allocation28 + $0x3e0] sm:$0xff] }
 0xf4d   : > { %4758 = vmatmul.mubr.f32.vlgmr.msra.gmra.mrb[40].mxu1 %v10891_v43  ;;  %8057 = vmatpush1.bf16.msra.mxu0 %v8056_v26  ;;  %v8218_v26 = vpack.c.bf16 %v3460_v17, %v3452_v57  ;;  %v3515_v57 = vld [vmem:[#allocation28 + $0x3b0] sm:$0xff]  ;;  %v8234_v17 = vpack.c.bf16 %v3524_v7, %v3516_v6 }
 0xf4e   : > { %8129 = vmatpush1.bf16.msra.mxu1 %v8128_v27  ;;  %8059 = vmatprep.subr.bf16.mxu0 %v8058_v25  ;;  %v3466_v27 = vld [vmem:[#allocation28 + $0x228] sm:$0xff]  ;;  %v3579_v6 = vld [vmem:[#allocation28 + $0x5b0] sm:$0xff] }
 0xf4f   : > { %8131 = vmatprep.subr.bf16.mxu1 %v8130_v32  ;;  %4686 = vmatprep.mubr.f32.mxu0 %v9785_v21  ;;  %v3474_v25 = vld [vmem:[#allocation28 + $0x268] sm:$0xff] }
 0xf50   : > { %4828 = vmatprep.mubr.f32.mxu1 %v9785_v21  ;;  %v8150_v33 = vpack.c.bf16 %v3474_v25, %v3466_v27  ;;  %v3529_v27 = vld [vmem:[#allocation28 + $0x420] sm:$0xff] }
 0xf51   : > { %8061 = vmatpush1.bf16.msra.mxu0 %v8060_v39  ;;  %v3475_v39 = vld [vmem:[#allocation28 + $0x270] sm:$0xff]  ;;  %v3537_v25 = vld [vmem:[#allocation28 + $0x460] sm:$0xff] }
 0xf52   : > { %8133 = vmatpush1.bf16.msra.mxu1 %v8132_v40  ;;  %8135 = vmatprep.subr.bf16.mxu0 %v8134_v13  ;;  %v3482_v40 = vld [vmem:[#allocation28 + $0x2a8] sm:$0xff]  ;;  %v8224_v44 = vpack.c.bf16 %v3475_v39, %v3467_v38  ;;  %v8168_v38 = vpack.c.bf16 %v3537_v25, %v3529_v27  ;;  %v3612_v27 = vld [vmem:[#allocation28 + $0x6b8] sm:$0xff] }
 0xf53   : > { %8207 = vmatprep.subr.bf16.mxu1 %v8206_v12  ;;  %v3490_v13 = vld [vmem:[#allocation28 + $0x2e8] sm:$0xff]  ;;  %v8152_v12 = vpack.c.bf16 %v3473_v35, %v3465_v20  ;;  %v3548_v20 = vld [vmem:[#allocation28 + $0x4b8] sm:$0xff] }
 0xf54   : > { %7302 = vmatmul.mubr.msk.f32.vlgmr.msra.gmra.mrb[40].mxu0 %vm2979_vm11, %v10897_v55  ;;  %v8154_v15 = vpack.c.bf16 %v3490_v13, %v3482_v40  ;;  %v3556_v35 = vld [vmem:[#allocation28 + $0x4f8] sm:$0xff]  ;;  %v3545_v40 = vld [vmem:[#allocation28 + $0x4a0] sm:$0xff] }
 0xf55   : > { %7303 = vmatmul.mubr.msk.f32.vlgmr.msra.gmra.mrb[40].mxu1 %vm2979_vm11, %v10897_v55  ;;  %8137 = vmatpush1.bf16.msra.mxu0 %v8136_v49  ;;  %v3483_v49 = vld [vmem:[#allocation28 + $0x2b0] sm:$0xff]  ;;  %v3553_v13 = vld [vmem:[#allocation28 + $0x4e0] sm:$0xff]  ;;  %v8242_v42 = vpack.c.bf16 %v3556_v35, %v3548_v20  ;;  %v3620_v25 = vld [vmem:[#allocation28 + $0x6f8] sm:$0xff] }
 0xf56   : > { %4899 = vmatprep.mubr.f32.mxu0 %v10881_v63  ;;  %8209 = vmatpush1.bf16.msra.mxu1 %v8208_v51  ;;  %v3498_v51 = vld [vmem:[#allocation28 + $0x328] sm:$0xff]  ;;  %v8228_v58 = vpack.c.bf16 %v3491_v19, %v3483_v49  ;;  %v8172_v49 = vpack.c.bf16 %v3553_v13, %v3545_v40  ;;  %v3611_v20 = vld [vmem:[#allocation28 + $0x6b0] sm:$0xff]  ;;  %v8258_v35 = vpack.c.bf16 %v3620_v25, %v3612_v27  ;;  %v3628_v40 = vld [vmem:[#allocation28 + $0x738] sm:$0xff] }
 0xf57   : > { %5041 = vmatprep.mubr.f32.mxu1 %v10881_v63  ;;  %8139 = vmatprep.subr.bf16.mxu0 %v8138_v56  ;;  %v3459_v63 = vld [vmem:[#allocation28 + $0x1f0] sm:$0xff]  ;;  %v8156_v56 = vpack.c.bf16 %v3489_v48, %v3481_v46  ;;  %v8158_v60 = vpack.c.bf16 %v3506_v52, %v3498_v51  ;;  %v3564_v46 = vld [vmem:[#allocation28 + $0x538] sm:$0xff]  ;;  %v3561_v51 = vld [vmem:[#allocation28 + $0x520] sm:$0xff] }
 0xf58   : > { %8211 = vmatprep.subr.bf16.mxu1 %v8210_v62  ;;  %v8220_v32 = vpack.c.bf16 %v3459_v63, %v3451_v23  ;;  %v3505_v62 = vld [vmem:[#allocation28 + $0x360] sm:$0xff]  ;;  %v8164_v23 = vpack.c.bf16 %v3521_v11, %v3513_v10  ;;  %v3572_v48 = vld [vmem:[#allocation28 + $0x578] sm:$0xff]  ;;  %v3675_v27 = vld [vmem:[#allocation28 + $0x8b0] sm:$0xff] }
 0xf59   : > { %8141 = vmatpush1.bf16.msra.mxu0 %v8140_v3  ;;  %v3507_v3 = vld [vmem:[#allocation28 + $0x370] sm:$0xff]  ;;  %v8160_v8 = vpack.c.bf16 %v3505_v62, %v3497_v61  ;;  %v3569_v52 = vld [vmem:[#allocation28 + $0x560] sm:$0xff]  ;;  %v8246_v0 = vpack.c.bf16 %v3572_v48, %v3564_v46  ;;  %v3580_v61 = vld [vmem:[#allocation28 + $0x5b8] sm:$0xff] }
 0xf5a   : > { %8213 = vmatpush1.bf16.msra.mxu1 %v8212_v4  ;;  %8143 = vmatprep.subr.bf16.mxu0 %v8142_v5  ;;  %v3514_v4 = vld [vmem:[#allocation28 + $0x3a8] sm:$0xff]  ;;  %v3588_v62 = vld [vmem:[#allocation28 + $0x5f8] sm:$0xff]  ;;  %v3627_v46 = vld [vmem:[#allocation28 + $0x730] sm:$0xff] }
 0xf5b   : > { %8215 = vmatprep.subr.bf16.mxu1 %v8214_v9  ;;  %v3522_v5 = vld [vmem:[#allocation28 + $0x3e8] sm:$0xff]  ;;  %v8232_v9 = vpack.c.bf16 %v3507_v3, %v3499_v1  ;;  %v8176_v1 = vpack.c.bf16 %v3569_v52, %v3561_v51  ;;  %v8250_v7 = vpack.c.bf16 %v3588_v62, %v3580_v61  ;;  %v3596_v10 = vld [vmem:[#allocation28 + $0x638] sm:$0xff]  ;;  %v3643_v61 = vld [vmem:[#allocation28 + $0x7b0] sm:$0xff] }
 0xf5c   : > { %v8162_v47 = vpack.c.bf16 %v3522_v5, %v3514_v4  ;;  %v3577_v4 = vld [vmem:[#allocation28 + $0x5a0] sm:$0xff]  ;;  %v3604_v11 = vld [vmem:[#allocation28 + $0x678] sm:$0xff] }
 0xf5d   : > { %8145 = vmatpush1.bf16.msra.mxu0 %v8144_v18  ;;  %v3523_v18 = vld [vmem:[#allocation28 + $0x3f0] sm:$0xff]  ;;  %v3585_v5 = vld [vmem:[#allocation28 + $0x5e0] sm:$0xff]  ;;  %v8254_v54 = vpack.c.bf16 %v3604_v11, %v3596_v10  ;;  %v3636_v13 = vld [vmem:[#allocation28 + $0x778] sm:$0xff] }
 0xf5e   : > { %8217 = vmatpush1.bf16.msra.mxu1 %v8216_v22  ;;  %8147 = vmatprep.subr.bf16.mxu0 %v8146_v34  ;;  %v3530_v22 = vld [vmem:[#allocation28 + $0x428] sm:$0xff]  ;;  %v8262_v48 = vpack.c.bf16 %v3636_v13, %v3628_v40  ;;  %v3644_v51 = vld [vmem:[#allocation28 + $0x7b8] sm:$0xff]  ;;  %v3659_v10 = vld [vmem:[#allocation28 + $0x830] sm:$0xff] }
 0xf5f   : > { %8219 = vmatprep.subr.bf16.mxu1 %v8218_v26  ;;  %v3538_v34 = vld [vmem:[#allocation28 + $0x468] sm:$0xff]  ;;  %v8236_v26 = vpack.c.bf16 %v3523_v18, %v3515_v57  ;;  %v8180_v57 = vpack.c.bf16 %v3585_v5, %v3577_v4  ;;  %v3652_v52 = vld [vmem:[#allocation28 + $0x7f8] sm:$0xff]  ;;  %v5125_v40 = vld [vmem:[#allocation28 + $0x1210] sm:$0xff] }
 0xf60   : > { %v8166_v63 = vpack.c.bf16 %v3538_v34, %v3530_v22  ;;  %v3593_v22 = vld [vmem:[#allocation28 + $0x620] sm:$0xff]  ;;  %v8266_v62 = vpack.c.bf16 %v3652_v52, %v3644_v51  ;;  %v3660_v4 = vld [vmem:[#allocation28 + $0x838] sm:$0xff]  ;;  %v5133_v13 = vld [vmem:[#allocation28 + $0x1250] sm:$0xff] }
 0xf61   : > { %8149 = vmatpush1.bf16.msra.mxu0 %v8148_v31  ;;  %v3539_v31 = vld [vmem:[#allocation28 + $0x470] sm:$0xff]  ;;  %v3601_v34 = vld [vmem:[#allocation28 + $0x660] sm:$0xff]  ;;  %v3668_v5 = vld [vmem:[#allocation28 + $0x878] sm:$0xff] }
 0xf62   : > { %8221 = vmatpush1.bf16.msra.mxu1 %v8220_v32  ;;  %8151 = vmatprep.subr.bf16.mxu0 %v8150_v33  ;;  %v3546_v32 = vld [vmem:[#allocation28 + $0x4a8] sm:$0xff]  ;;  %v8270_v11 = vpack.c.bf16 %v3668_v5, %v3660_v4  ;;  %v5165_v5 = vld [vmem:[#allocation28 + $0x1350] sm:$0xff] }
 0xf63   : > { %8223 = vmatprep.subr.bf16.mxu1 %v8222_v28  ;;  %v3554_v33 = vld [vmem:[#allocation28 + $0x4e8] sm:$0xff]  ;;  %v8240_v28 = vpack.c.bf16 %v3539_v31, %v3531_v29  ;;  %v8184_v29 = vpack.c.bf16 %v3601_v34, %v3593_v22  ;;  %v3676_v22 = vld [vmem:[#allocation28 + $0x8b8] sm:$0xff] }
 0xf64   : > { %v8170_v39 = vpack.c.bf16 %v3554_v33, %v3546_v32  ;;  %v3609_v32 = vld [vmem:[#allocation28 + $0x6a0] sm:$0xff]  ;;  %v3684_v34 = vld [vmem:[#allocation28 + $0x8f8] sm:$0xff]  ;;  %v5156_v51 = vld [vmem:[#allocation28 + $0x1308] sm:$0xff] }
 0xf65   : > { %8153 = vmatpush1.bf16.msra.mxu0 %v8152_v12  ;;  %v3555_v12 = vld [vmem:[#allocation28 + $0x4f0] sm:$0xff]  ;;  %v3617_v33 = vld [vmem:[#allocation28 + $0x6e0] sm:$0xff]  ;;  %v8274_v25 = vpack.c.bf16 %v3684_v34, %v3676_v22  ;;  %v5164_v52 = vld [vmem:[#allocation28 + $0x1348] sm:$0xff] }
 0xf66   : > { %8225 = vmatpush1.bf16.msra.mxu1 %v8224_v44  ;;  %8155 = vmatprep.subr.bf16.mxu0 %v8154_v15  ;;  %v3562_v44 = vld [vmem:[#allocation28 + $0x528] sm:$0xff]  ;;  %v5181_v22 = vld [vmem:[#allocation28 + $0x13d0] sm:$0xff] }
 0xf67   : > { %8227 = vmatprep.subr.bf16.mxu1 %v8226_v50  ;;  %v3570_v15 = vld [vmem:[#allocation28 + $0x568] sm:$0xff]  ;;  %v8244_v50 = vpack.c.bf16 %v3555_v12, %v3547_v14  ;;  %v8188_v14 = vpack.c.bf16 %v3617_v33, %v3609_v32  ;;  %v5126_v32 = vld [vmem:[#allocation28 + $0x1218] sm:$0xff] }
 0xf68   : > { %v8174_v19 = vpack.c.bf16 %v3570_v15, %v3562_v44  ;;  %v3625_v44 = vld [vmem:[#allocation28 + $0x720] sm:$0xff]  ;;  %v5134_v33 = vld [vmem:[#allocation28 + $0x1258] sm:$0xff]  ;;  %v5188_v34 = vld [vmem:[#allocation28 + $0x1408] sm:$0xff] }
 0xf69   : > { %8157 = vmatpush1.bf16.msra.mxu0 %v8156_v56  ;;  %v3571_v56 = vld [vmem:[#allocation28 + $0x570] sm:$0xff]  ;;  %v3633_v15 = vld [vmem:[#allocation28 + $0x760] sm:$0xff]  ;;  %v8350_v59 = vpack.c.bf16 %v5134_v33, %v5126_v32  ;;  %v5204_v33 = vld [vmem:[#allocation28 + $0x1488] sm:$0xff] }
 0xf6a   : > { %8229 = vmatpush1.bf16.msra.mxu1 %v8228_v58  ;;  %8159 = vmatprep.subr.bf16.mxu0 %v8158_v60  ;;  %v3578_v58 = vld [vmem:[#allocation28 + $0x5a8] sm:$0xff]  ;;  %v5197_v32 = vld [vmem:[#allocation28 + $0x1450] sm:$0xff] }
 0xf6b   : > { %8231 = vmatprep.subr.bf16.mxu1 %v8230_v2  ;;  %v3586_v60 = vld [vmem:[#allocation28 + $0x5e8] sm:$0xff]  ;;  %v8248_v2 = vpack.c.bf16 %v3571_v56, %v3563_v53  ;;  %v8192_v53 = vpack.c.bf16 %v3633_v15, %v3625_v44  ;;  %v5150_v44 = vld [vmem:[#allocation28 + $0x12d8] sm:$0xff]  ;;  %v8352_v15 = vpack.c.bf16 %v5133_v13, %v5125_v40  ;;  %v5203_v40 = vld [vmem:[#allocation28 + $0x1480] sm:$0xff] }
 0xf6c   : > { %v8178_v3 = vpack.c.bf16 %v3586_v60, %v3578_v58  ;;  %v3641_v58 = vld [vmem:[#allocation28 + $0x7a0] sm:$0xff] }
 0xf6d   : > { %8161 = vmatpush1.bf16.msra.mxu0 %v8160_v8  ;;  %v3587_v8 = vld [vmem:[#allocation28 + $0x5f0] sm:$0xff]  ;;  %v3649_v60 = vld [vmem:[#allocation28 + $0x7e0] sm:$0xff] }
 0xf6e   : > { %8233 = vmatpush1.bf16.msra.mxu1 %v8232_v9  ;;  %8163 = vmatprep.subr.bf16.mxu0 %v8162_v47  ;;  %v3594_v9 = vld [vmem:[#allocation28 + $0x628] sm:$0xff]  ;;  %v5211_v13 = vld [vmem:[#allocation28 + $0x14c0] sm:$0xff] }
 0xf6f   : > { %8235 = vmatprep.subr.bf16.mxu1 %v8234_v17  ;;  %v3602_v47 = vld [vmem:[#allocation28 + $0x668] sm:$0xff]  ;;  %v8252_v17 = vpack.c.bf16 %v3587_v8, %v3579_v6  ;;  %v8196_v6 = vpack.c.bf16 %v3649_v60, %v3641_v58  ;;  %v10912_v58 = vpop.eup %9255 }
 0xf70   : > { %v8182_v18 = vpack.c.bf16 %v3602_v47, %v3594_v9  ;;  %v3657_v9 = vld [vmem:[#allocation28 + $0x820] sm:$0xff] }
 0xf71   : > { %8165 = vmatpush1.bf16.msra.mxu0 %v8164_v23  ;;  %v3603_v23 = vld [vmem:[#allocation28 + $0x670] sm:$0xff]  ;;  %v3665_v47 = vld [vmem:[#allocation28 + $0x860] sm:$0xff] }
 0xf72   : > { %8237 = vmatpush1.bf16.msra.mxu1 %v8236_v26  ;;  %8167 = vmatprep.subr.bf16.mxu0 %v8166_v63  ;;  %v3610_v26 = vld [vmem:[#allocation28 + $0x6a8] sm:$0xff] }
 0xf73   : > { %8239 = vmatprep.subr.bf16.mxu1 %v8238_v37  ;;  %v3618_v63 = vld [vmem:[#allocation28 + $0x6e8] sm:$0xff]  ;;  %v8256_v37 = vpack.c.bf16 %v3603_v23, %v3595_v41  ;;  %v8200_v41 = vpack.c.bf16 %v3665_v47, %v3657_v9 }
 0xf74   : > { %v8186_v31 = vpack.c.bf16 %v3618_v63, %v3610_v26  ;;  %v3673_v26 = vld [vmem:[#allocation28 + $0x8a0] sm:$0xff] }
 0xf75   : > { %8169 = vmatpush1.bf16.msra.mxu0 %v8168_v38  ;;  %v3619_v38 = vld [vmem:[#allocation28 + $0x6f0] sm:$0xff]  ;;  %v3681_v63 = vld [vmem:[#allocation28 + $0x8e0] sm:$0xff] }
 0xf76   : > { %8241 = vmatpush1.bf16.msra.mxu1 %v8240_v28  ;;  %8171 = vmatprep.subr.bf16.mxu0 %v8170_v39  ;;  %v3626_v28 = vld [vmem:[#allocation28 + $0x728] sm:$0xff] }
 0xf77   : > { %8243 = vmatprep.subr.bf16.mxu1 %v8242_v42  ;;  %v3634_v39 = vld [vmem:[#allocation28 + $0x768] sm:$0xff]  ;;  %v8260_v42 = vpack.c.bf16 %v3619_v38, %v3611_v20  ;;  %v8204_v20 = vpack.c.bf16 %v3681_v63, %v3673_v26 }
 0xf78   : > { %v8190_v12 = vpack.c.bf16 %v3634_v39, %v3626_v28  ;;  %v5123_v28 = vld [vmem:[#allocation28 + $0x1200] sm:$0xff] }
 0xf79   : > { %8173 = vmatpush1.bf16.msra.mxu0 %v8172_v49  ;;  %v3635_v49 = vld [vmem:[#allocation28 + $0x770] sm:$0xff]  ;;  %v5131_v39 = vld [vmem:[#allocation28 + $0x1240] sm:$0xff] }
 0xf7a   : > { %8245 = vmatpush1.bf16.msra.mxu1 %v8244_v50  ;;  %8175 = vmatprep.subr.bf16.mxu0 %v8174_v19  ;;  %v3642_v50 = vld [vmem:[#allocation28 + $0x7a8] sm:$0xff] }
 0xf7b   : > { %8247 = vmatprep.subr.bf16.mxu1 %v8246_v0  ;;  %v3650_v19 = vld [vmem:[#allocation28 + $0x7e8] sm:$0xff]  ;;  %v8264_v0 = vpack.c.bf16 %v3635_v49, %v3627_v46  ;;  %v5139_v46 = vld [vmem:[#allocation28 + $0x1280] sm:$0xff]  ;;  %v5141_v49 = vld [vmem:[#allocation28 + $0x1290] sm:$0xff] }
 0xf7c   : > { %v8194_v56 = vpack.c.bf16 %v3650_v19, %v3642_v50  ;;  %v5149_v19 = vld [vmem:[#allocation28 + $0x12d0] sm:$0xff] }
 0xf7d   : > { %8177 = vmatpush1.bf16.msra.mxu0 %v8176_v1  ;;  %v3651_v1 = vld [vmem:[#allocation28 + $0x7f0] sm:$0xff] }
 0xf7e   : > { %8249 = vmatpush1.bf16.msra.mxu1 %v8248_v2  ;;  %8179 = vmatprep.subr.bf16.mxu0 %v8178_v3  ;;  %v3658_v2 = vld [vmem:[#allocation28 + $0x828] sm:$0xff] }
 0xf7f   : > { %8251 = vmatprep.subr.bf16.mxu1 %v8250_v7  ;;  %v3666_v3 = vld [vmem:[#allocation28 + $0x868] sm:$0xff]  ;;  %v8268_v7 = vpack.c.bf16 %v3651_v1, %v3643_v61  ;;  %v8356_v61 = vpack.c.bf16 %v5149_v19, %v5141_v49  ;;  %v5155_v1 = vld [vmem:[#allocation28 + $0x1300] sm:$0xff] }
 0xf80   : > { %v8198_v8 = vpack.c.bf16 %v3666_v3, %v3658_v2  ;;  %v5163_v2 = vld [vmem:[#allocation28 + $0x1340] sm:$0xff]  ;;  %v5157_v3 = vld [vmem:[#allocation28 + $0x1310] sm:$0xff] }
 0xf81   : > { %8181 = vmatpush1.bf16.msra.mxu0 %v8180_v57  ;;  %v3667_v57 = vld [vmem:[#allocation28 + $0x870] sm:$0xff]  ;;  %v8288_v9 = vpack.c.bf16 %v5163_v2, %v5155_v1  ;;  %v8360_v47 = vpack.c.bf16 %v5165_v5, %v5157_v3  ;;  %v5219_v19 = vld [vmem:[#allocation28 + $0x1500] sm:$0xff] }
 0xf82   : > { %8253 = vmatpush1.bf16.msra.mxu1 %v8252_v17  ;;  %8183 = vmatprep.subr.bf16.mxu0 %v8182_v18  ;;  %v3674_v17 = vld [vmem:[#allocation28 + $0x8a8] sm:$0xff]  ;;  %v5243_v5 = vld [vmem:[#allocation28 + $0x15c0] sm:$0xff] }
 0xf83   : > { %8255 = vmatprep.subr.bf16.mxu1 %v8254_v54  ;;  %v3682_v18 = vld [vmem:[#allocation28 + $0x8e8] sm:$0xff]  ;;  %v8272_v54 = vpack.c.bf16 %v3667_v57, %v3659_v10  ;;  %v5179_v57 = vld [vmem:[#allocation28 + $0x13c0] sm:$0xff] }
 0xf84   : > { %v8202_v23 = vpack.c.bf16 %v3682_v18, %v3674_v17  ;;  %v5173_v17 = vld [vmem:[#allocation28 + $0x1390] sm:$0xff] }
 0xf85   : > { %8185 = vmatpush1.bf16.msra.mxu0 %v8184_v29  ;;  %v3683_v29 = vld [vmem:[#allocation28 + $0x8f0] sm:$0xff]  ;;  %v8364_v63 = vpack.c.bf16 %v5181_v22, %v5173_v17  ;;  %v5259_v22 = vld [vmem:[#allocation28 + $0x1640] sm:$0xff] }
 0xf86   : > { %8257 = vmatpush1.bf16.msra.mxu1 %v8256_v37  ;;  %8187 = vmatprep.subr.bf16.mxu0 %v8186_v31  ;;  %v5124_v37 = vld [vmem:[#allocation28 + $0x1208] sm:$0xff] }
 0xf87   : > { %8259 = vmatprep.subr.bf16.mxu1 %v8258_v35  ;;  %v5132_v31 = vld [vmem:[#allocation28 + $0x1248] sm:$0xff]  ;;  %v8276_v35 = vpack.c.bf16 %v3683_v29, %v3675_v27  ;;  %v5195_v29 = vld [vmem:[#allocation28 + $0x1440] sm:$0xff] }
 0xf88   : > { %v8278_v38 = vpack.c.bf16 %v5132_v31, %v5124_v37  ;;  %v5189_v37 = vld [vmem:[#allocation28 + $0x1410] sm:$0xff] }
 0xf89   : > { %8189 = vmatpush1.bf16.msra.mxu0 %v8188_v14  ;;  %v5140_v14 = vld [vmem:[#allocation28 + $0x1288] sm:$0xff] }
 0xf8a   : > { %8261 = vmatpush1.bf16.msra.mxu1 %v8260_v42  ;;  %8191 = vmatprep.subr.bf16.mxu0 %v8190_v12  ;;  %v5148_v42 = vld [vmem:[#allocation28 + $0x12c8] sm:$0xff]  ;;  %v5142_v12 = vld [vmem:[#allocation28 + $0x1298] sm:$0xff] }
 0xf8b   : > { %8263 = vmatprep.subr.bf16.mxu1 %v8262_v48  ;;  %v5147_v48 = vld [vmem:[#allocation28 + $0x12c0] sm:$0xff]  ;;  %v8282_v50 = vpack.c.bf16 %v5148_v42, %v5140_v14  ;;  %v5205_v14 = vld [vmem:[#allocation28 + $0x1490] sm:$0xff] }
 0xf8c   : > { %v8284_v60 = vpack.c.bf16 %v5147_v48, %v5139_v46  ;;  %v5230_v46 = vld [vmem:[#allocation28 + $0x1558] sm:$0xff]  ;;  %v8300_v48 = vpack.c.bf16 %v5211_v13, %v5203_v40 }
 0xf8d   : > { %8193 = vmatpush1.bf16.msra.mxu0 %v8192_v53  ;;  %v8354_v53 = vpack.c.bf16 %v5150_v44, %v5142_v12  ;;  %v5220_v12 = vld [vmem:[#allocation28 + $0x1508] sm:$0xff] }
 0xf8e   : > { %8265 = vmatpush1.bf16.msra.mxu1 %v8264_v0  ;;  %8195 = vmatprep.subr.bf16.mxu0 %v8194_v56  ;;  %v5158_v0 = vld [vmem:[#allocation28 + $0x1318] sm:$0xff]  ;;  %v5228_v44 = vld [vmem:[#allocation28 + $0x1548] sm:$0xff] }
 0xf8f   : > { %8267 = vmatprep.subr.bf16.mxu1 %v8266_v62  ;;  %v5166_v56 = vld [vmem:[#allocation28 + $0x1358] sm:$0xff]  ;;  %v8286_v62 = vpack.c.bf16 %v5164_v52, %v5156_v51  ;;  %v5227_v51 = vld [vmem:[#allocation28 + $0x1540] sm:$0xff]  ;;  %v5221_v52 = vld [vmem:[#allocation28 + $0x1510] sm:$0xff] }
 0xf90   : > { %v8358_v4 = vpack.c.bf16 %v5166_v56, %v5158_v0  ;;  %v5229_v0 = vld [vmem:[#allocation28 + $0x1550] sm:$0xff]  ;;  %v5236_v56 = vld [vmem:[#allocation28 + $0x1588] sm:$0xff]  ;;  %v8304_v1 = vpack.c.bf16 %v5227_v51, %v5219_v19 }
 0xf91   : > { %8197 = vmatpush1.bf16.msra.mxu0 %v8196_v6  ;;  %v5172_v6 = vld [vmem:[#allocation28 + $0x1388] sm:$0xff]  ;;  %v8376_v2 = vpack.c.bf16 %v5229_v0, %v5221_v52  ;;  %v5307_v0 = vld [vmem:[#allocation28 + $0x17c0] sm:$0xff] }
 0xf92   : > { %8269 = vmatpush1.bf16.msra.mxu1 %v8268_v7  ;;  %8199 = vmatprep.subr.bf16.mxu0 %v8198_v8  ;;  %v5180_v7 = vld [vmem:[#allocation28 + $0x13c8] sm:$0xff]  ;;  %v5174_v8 = vld [vmem:[#allocation28 + $0x1398] sm:$0xff] }
 0xf93   : > { %8271 = vmatprep.subr.bf16.mxu1 %v8270_v11  ;;  %v8290_v10 = vpack.c.bf16 %v5180_v7, %v5172_v6  ;;  %v5171_v11 = vld [vmem:[#allocation28 + $0x1380] sm:$0xff]  ;;  %v5237_v6 = vld [vmem:[#allocation28 + $0x1590] sm:$0xff] }
 0xf94   : > { %4900 = vmatmul.mubr.f32.vlgmr.msra.gmra.mrb[42].mxu0 %v10891_v43  ;;  %v8292_v26 = vpack.c.bf16 %v5179_v57, %v5171_v11 }
 0xf95   : > { %5042 = vmatmul.mubr.f32.vlgmr.msra.gmra.mrb[42].mxu1 %v10891_v43  ;;  %8201 = vmatpush1.bf16.msra.mxu0 %v8200_v41  ;;  %v8280_v43 = vpack.c.bf16 %v5131_v39, %v5123_v28  ;;  %v5196_v41 = vld [vmem:[#allocation28 + $0x1448] sm:$0xff]  ;;  %v8368_v39 = vpack.c.bf16 %v5197_v32, %v5189_v37  ;;  %v5275_v32 = vld [vmem:[#allocation28 + $0x16c0] sm:$0xff] }
 0xf96   : > { %8273 = vmatpush1.bf16.msra.mxu1 %v8272_v54  ;;  %8203 = vmatprep.subr.bf16.mxu0 %v8202_v23  ;;  %v5190_v54 = vld [vmem:[#allocation28 + $0x1418] sm:$0xff]  ;;  %v8294_v27 = vpack.c.bf16 %v5196_v41, %v5188_v34  ;;  %v5253_v34 = vld [vmem:[#allocation28 + $0x1610] sm:$0xff] }
 0xf97   : > { %8275 = vmatprep.subr.bf16.mxu1 %v8274_v25  ;;  %4970 = vmatprep.mubr.f32.mxu0 %v9785_v21  ;;  %v5198_v23 = vld [vmem:[#allocation28 + $0x1458] sm:$0xff]  ;;  %v5187_v25 = vld [vmem:[#allocation28 + $0x1400] sm:$0xff] }
 0xf98   : > { %5112 = vmatprep.mubr.f32.mxu1 %v9785_v21  ;;  %v8366_v31 = vpack.c.bf16 %v5198_v23, %v5190_v54  ;;  %v8296_v28 = vpack.c.bf16 %v5195_v29, %v5187_v25  ;;  %v5261_v54 = vld [vmem:[#allocation28 + $0x1650] sm:$0xff]  ;;  %v5268_v23 = vld [vmem:[#allocation28 + $0x1688] sm:$0xff] }
 0xf99   : > { %8205 = vmatpush1.bf16.msra.mxu0 %v8204_v20  ;;  %v5212_v20 = vld [vmem:[#allocation28 + $0x14c8] sm:$0xff]  ;;  %v8384_v29 = vpack.c.bf16 %v5261_v54, %v5253_v34  ;;  %v5339_v54 = vld [vmem:[#allocation28 + $0x18c0] sm:$0xff] }
 0xf9a   : > { %8277 = vmatpush1.bf16.msra.mxu1 %v8276_v35  ;;  %8279 = vmatprep.subr.bf16.mxu0 %v8278_v38  ;;  %v5206_v35 = vld [vmem:[#allocation28 + $0x1498] sm:$0xff] }
 0xf9b   : > { %8351 = vmatprep.subr.bf16.mxu1 %v8350_v59  ;;  %v5214_v38 = vld [vmem:[#allocation28 + $0x14d8] sm:$0xff]  ;;  %v8298_v59 = vpack.c.bf16 %v5212_v20, %v5204_v33  ;;  %v5269_v33 = vld [vmem:[#allocation28 + $0x1690] sm:$0xff] }
 0xf9c   : > { %7304 = vmatmul.mubr.msk.f32.vlgmr.msra.gmra.mrb[42].mxu0 %vm2979_vm11, %v10897_v55  ;;  %v8370_v42 = vpack.c.bf16 %v5214_v38, %v5206_v35  ;;  %v5277_v35 = vld [vmem:[#allocation28 + $0x16d0] sm:$0xff]  ;;  %v5284_v38 = vld [vmem:[#allocation28 + $0x1708] sm:$0xff] }
 0xf9d   : > { %7305 = vmatmul.mubr.msk.f32.vlgmr.msra.gmra.mrb[42].mxu1 %vm2979_vm11, %v10897_v55  ;;  %8281 = vmatpush1.bf16.msra.mxu0 %v8280_v43  ;;  %v5182_v55 = vld [vmem:[#allocation28 + $0x13d8] sm:$0xff]  ;;  %v5213_v43 = vld [vmem:[#allocation28 + $0x14d0] sm:$0xff]  ;;  %v8388_v13 = vpack.c.bf16 %v5277_v35, %v5269_v33  ;;  %v5355_v35 = vld [vmem:[#allocation28 + $0x1940] sm:$0xff] }
 0xf9e   : > { %5478 = vmatprep.mubr.f32.mxu0 %v10912_v58  ;;  %8353 = vmatpush1.bf16.msra.mxu1 %v8352_v15  ;;  %v8362_v18 = vpack.c.bf16 %v5182_v55, %v5174_v8  ;;  %v5222_v15 = vld [vmem:[#allocation28 + $0x1518] sm:$0xff]  ;;  %v8372_v49 = vpack.c.bf16 %v5213_v43, %v5205_v14  ;;  %v5245_v8 = vld [vmem:[#allocation28 + $0x15d0] sm:$0xff]  ;;  %v5252_v55 = vld [vmem:[#allocation28 + $0x1608] sm:$0xff] }
 0xf9f   : > { %5620 = vmatprep.mubr.f32.mxu1 %v10912_v58  ;;  %8283 = vmatprep.subr.bf16.mxu0 %v8282_v50  ;;  %v8302_v50 = vpack.c.bf16 %v5228_v44, %v5220_v12  ;;  %v8380_v57 = vpack.c.bf16 %v5245_v8, %v5237_v6  ;;  %v5291_v43 = vld [vmem:[#allocation28 + $0x1740] sm:$0xff]  ;;  %v5285_v12 = vld [vmem:[#allocation28 + $0x1710] sm:$0xff] }
 0xfa0   : > { %8355 = vmatprep.subr.bf16.mxu1 %v8354_v53  ;;  %v8374_v53 = vpack.c.bf16 %v5230_v46, %v5222_v15  ;;  %v5293_v15 = vld [vmem:[#allocation28 + $0x1750] sm:$0xff]  ;;  %v5300_v46 = vld [vmem:[#allocation28 + $0x1788] sm:$0xff]  ;;  %v5323_v8 = vld [vmem:[#allocation28 + $0x1840] sm:$0xff] }
 0xfa1   : > { %8285 = vmatpush1.bf16.msra.mxu0 %v8284_v60  ;;  %v5244_v60 = vld [vmem:[#allocation28 + $0x15c8] sm:$0xff]  ;;  %v8392_v51 = vpack.c.bf16 %v5293_v15, %v5285_v12  ;;  %v5371_v15 = vld [vmem:[#allocation28 + $0x19c0] sm:$0xff] }
 0xfa2   : > { %8357 = vmatpush1.bf16.msra.mxu1 %v8356_v61  ;;  %8287 = vmatprep.subr.bf16.mxu0 %v8286_v62  ;;  %v5238_v61 = vld [vmem:[#allocation28 + $0x1598] sm:$0xff]  ;;  %v8306_v3 = vpack.c.bf16 %v5244_v60, %v5236_v56  ;;  %v5301_v56 = vld [vmem:[#allocation28 + $0x1790] sm:$0xff] }
 0xfa3   : > { %8359 = vmatprep.subr.bf16.mxu1 %v8358_v4  ;;  %v5246_v62 = vld [vmem:[#allocation28 + $0x15d8] sm:$0xff]  ;;  %v5235_v4 = vld [vmem:[#allocation28 + $0x1580] sm:$0xff] }
 0xfa4   : > { %v8378_v7 = vpack.c.bf16 %v5246_v62, %v5238_v61  ;;  %v8308_v11 = vpack.c.bf16 %v5243_v5, %v5235_v4  ;;  %v5309_v61 = vld [vmem:[#allocation28 + $0x17d0] sm:$0xff]  ;;  %v5316_v62 = vld [vmem:[#allocation28 + $0x1808] sm:$0xff] }
 0xfa5   : > { %8289 = vmatpush1.bf16.msra.mxu0 %v8288_v9  ;;  %v5260_v9 = vld [vmem:[#allocation28 + $0x1648] sm:$0xff]  ;;  %v8396_v5 = vpack.c.bf16 %v5309_v61, %v5301_v56  ;;  %v5379_v56 = vld [vmem:[#allocation28 + $0x1a00] sm:$0xff]  ;;  %v5381_v61 = vld [vmem:[#allocation28 + $0x1a10] sm:$0xff] }
 0xfa6   : > { %8361 = vmatpush1.bf16.msra.mxu1 %v8360_v47  ;;  %8291 = vmatprep.subr.bf16.mxu0 %v8290_v10  ;;  %v5254_v47 = vld [vmem:[#allocation28 + $0x1618] sm:$0xff]  ;;  %v8310_v17 = vpack.c.bf16 %v5260_v9, %v5252_v55  ;;  %v5317_v55 = vld [vmem:[#allocation28 + $0x1810] sm:$0xff] }
 0xfa7   : > { %8363 = vmatprep.subr.bf16.mxu1 %v8362_v18  ;;  %v5262_v10 = vld [vmem:[#allocation28 + $0x1658] sm:$0xff]  ;;  %v5251_v18 = vld [vmem:[#allocation28 + $0x1600] sm:$0xff] }
 0xfa8   : > { %v8382_v41 = vpack.c.bf16 %v5262_v10, %v5254_v47  ;;  %v8312_v25 = vpack.c.bf16 %v5259_v22, %v5251_v18  ;;  %v5325_v47 = vld [vmem:[#allocation28 + $0x1850] sm:$0xff]  ;;  %v5332_v10 = vld [vmem:[#allocation28 + $0x1888] sm:$0xff] }
 0xfa9   : > { %8293 = vmatpush1.bf16.msra.mxu0 %v8292_v26  ;;  %v5276_v26 = vld [vmem:[#allocation28 + $0x16c8] sm:$0xff]  ;;  %v8400_v22 = vpack.c.bf16 %v5325_v47, %v5317_v55  ;;  %v5395_v55 = vld [vmem:[#allocation28 + $0x1a80] sm:$0xff]  ;;  %v5397_v47 = vld [vmem:[#allocation28 + $0x1a90] sm:$0xff] }
 0xfaa   : > { %8365 = vmatpush1.bf16.msra.mxu1 %v8364_v63  ;;  %8295 = vmatprep.subr.bf16.mxu0 %v8294_v27  ;;  %v5270_v63 = vld [vmem:[#allocation28 + $0x1698] sm:$0xff]  ;;  %v8314_v37 = vpack.c.bf16 %v5276_v26, %v5268_v23  ;;  %v5333_v23 = vld [vmem:[#allocation28 + $0x1890] sm:$0xff] }
 0xfab   : > { %8367 = vmatprep.subr.bf16.mxu1 %v8366_v31  ;;  %v5278_v27 = vld [vmem:[#allocation28 + $0x16d8] sm:$0xff]  ;;  %v5267_v31 = vld [vmem:[#allocation28 + $0x1680] sm:$0xff] }
 0xfac   : > { %v8386_v20 = vpack.c.bf16 %v5278_v27, %v5270_v63  ;;  %v8316_v40 = vpack.c.bf16 %v5275_v32, %v5267_v31  ;;  %v5341_v63 = vld [vmem:[#allocation28 + $0x18d0] sm:$0xff]  ;;  %v5348_v27 = vld [vmem:[#allocation28 + $0x1908] sm:$0xff] }
 0xfad   : > { %8297 = vmatpush1.bf16.msra.mxu0 %v8296_v28  ;;  %v5292_v28 = vld [vmem:[#allocation28 + $0x1748] sm:$0xff]  ;;  %v8404_v32 = vpack.c.bf16 %v5341_v63, %v5333_v23  ;;  %v5127_v23 = vld [vmem:[#allocation28 + $0x1220] sm:$0xff] }
 0xfae   : > { %8369 = vmatpush1.bf16.msra.mxu1 %v8368_v39  ;;  %8299 = vmatprep.subr.bf16.mxu0 %v8298_v59  ;;  %v5286_v39 = vld [vmem:[#allocation28 + $0x1718] sm:$0xff]  ;;  %v8318_v14 = vpack.c.bf16 %v5292_v28, %v5284_v38  ;;  %v5349_v38 = vld [vmem:[#allocation28 + $0x1910] sm:$0xff] }
 0xfaf   : > { %8371 = vmatprep.subr.bf16.mxu1 %v8370_v42  ;;  %v5294_v59 = vld [vmem:[#allocation28 + $0x1758] sm:$0xff]  ;;  %v5283_v42 = vld [vmem:[#allocation28 + $0x1700] sm:$0xff] }
 0xfb0   : > { %v8390_v44 = vpack.c.bf16 %v5294_v59, %v5286_v39  ;;  %v8320_v19 = vpack.c.bf16 %v5291_v43, %v5283_v42  ;;  %v5357_v39 = vld [vmem:[#allocation28 + $0x1950] sm:$0xff]  ;;  %v5364_v59 = vld [vmem:[#allocation28 + $0x1988] sm:$0xff] }
 0xfb1   : > { %8301 = vmatpush1.bf16.msra.mxu0 %v8300_v48  ;;  %v5308_v48 = vld [vmem:[#allocation28 + $0x17c8] sm:$0xff]  ;;  %v8408_v43 = vpack.c.bf16 %v5357_v39, %v5349_v38  ;;  %v5151_v38 = vld [vmem:[#allocation28 + $0x12e0] sm:$0xff] }
 0xfb2   : > { %8373 = vmatpush1.bf16.msra.mxu1 %v8372_v49  ;;  %8303 = vmatprep.subr.bf16.mxu0 %v8302_v50  ;;  %v5302_v49 = vld [vmem:[#allocation28 + $0x1798] sm:$0xff]  ;;  %v8322_v52 = vpack.c.bf16 %v5308_v48, %v5300_v46  ;;  %v5365_v46 = vld [vmem:[#allocation28 + $0x1990] sm:$0xff] }
 0xfb3   : > { %8375 = vmatprep.subr.bf16.mxu1 %v8374_v53  ;;  %v5310_v50 = vld [vmem:[#allocation28 + $0x17d8] sm:$0xff]  ;;  %v5299_v53 = vld [vmem:[#allocation28 + $0x1780] sm:$0xff] }
 0xfb4   : > { %v8394_v60 = vpack.c.bf16 %v5310_v50, %v5302_v49  ;;  %v8324_v4 = vpack.c.bf16 %v5307_v0, %v5299_v53  ;;  %v5373_v49 = vld [vmem:[#allocation28 + $0x19d0] sm:$0xff]  ;;  %v5380_v50 = vld [vmem:[#allocation28 + $0x1a08] sm:$0xff] }
 0xfb5   : > { %8305 = vmatpush1.bf16.msra.mxu0 %v8304_v1  ;;  %v5324_v1 = vld [vmem:[#allocation28 + $0x1848] sm:$0xff]  ;;  %v8412_v16 = vpack.c.bf16 %v5373_v49, %v5365_v46  ;;  %v5167_v49 = vld [vmem:[#allocation28 + $0x1360] sm:$0xff] }
 0xfb6   : > { %8377 = vmatpush1.bf16.msra.mxu1 %v8376_v2  ;;  %8307 = vmatprep.subr.bf16.mxu0 %v8306_v3  ;;  %v5318_v2 = vld [vmem:[#allocation28 + $0x1818] sm:$0xff]  ;;  %v8326_v6 = vpack.c.bf16 %v5324_v1, %v5316_v62  ;;  %v5389_v1 = vld [vmem:[#allocation28 + $0x1a50] sm:$0xff] }
 0xfb7   : > { %8379 = vmatprep.subr.bf16.mxu1 %v8378_v7  ;;  %v5326_v3 = vld [vmem:[#allocation28 + $0x1858] sm:$0xff]  ;;  %v5315_v7 = vld [vmem:[#allocation28 + $0x1800] sm:$0xff] }
 0xfb8   : > { %v8398_v9 = vpack.c.bf16 %v5326_v3, %v5318_v2  ;;  %v8328_v18 = vpack.c.bf16 %v5323_v8, %v5315_v7  ;;  %v5396_v2 = vld [vmem:[#allocation28 + $0x1a88] sm:$0xff]  ;;  %v8416_v7 = vpack.c.bf16 %v5389_v1, %v5381_v61  ;;  %v5183_v1 = vld [vmem:[#allocation28 + $0x13e0] sm:$0xff] }
 0xfb9   : > { %8309 = vmatpush1.bf16.msra.mxu0 %v8308_v11  ;;  %v5340_v11 = vld [vmem:[#allocation28 + $0x18c8] sm:$0xff] }
 0xfba   : > { %8381 = vmatpush1.bf16.msra.mxu1 %v8380_v57  ;;  %8311 = vmatprep.subr.bf16.mxu0 %v8310_v17  ;;  %v5334_v57 = vld [vmem:[#allocation28 + $0x1898] sm:$0xff]  ;;  %v8330_v34 = vpack.c.bf16 %v5340_v11, %v5332_v10  ;;  %v5404_v3 = vld [vmem:[#allocation28 + $0x1ac8] sm:$0xff]  ;;  %v10920_v10 = vpop.eup %9257 }
 0xfbb   : > { %8383 = vmatprep.subr.bf16.mxu1 %v8382_v41  ;;  %v5342_v17 = vld [vmem:[#allocation28 + $0x18d8] sm:$0xff]  ;;  %v5331_v41 = vld [vmem:[#allocation28 + $0x1880] sm:$0xff]  ;;  %v8346_v8 = vpack.c.bf16 %v5404_v3, %v5396_v2  ;;  %v10926_v39 = vpop.eup %9259  ;;  %v5177_v2 = vld [vmem:[#allocation28 + $0x13b0] sm:$0xff] }
 0xfbc   : > { %v8402_v26 = vpack.c.bf16 %v5342_v17, %v5334_v57  ;;  %v8332_v31 = vpack.c.bf16 %v5339_v54, %v5331_v41  ;;  %v5405_v57 = vld [vmem:[#allocation28 + $0x1ad0] sm:$0xff]  ;;  %v5128_v17 = vld [vmem:[#allocation28 + $0x1228] sm:$0xff] }
 0xfbd   : > { %8313 = vmatpush1.bf16.msra.mxu0 %v8312_v25  ;;  %v5356_v25 = vld [vmem:[#allocation28 + $0x1948] sm:$0xff]  ;;  %v8420_v41 = vpack.c.bf16 %v5405_v57, %v5397_v47  ;;  %v5191_v47 = vld [vmem:[#allocation28 + $0x1420] sm:$0xff]  ;;  %v5193_v57 = vld [vmem:[#allocation28 + $0x1430] sm:$0xff] }
 0xfbe   : > { %8385 = vmatpush1.bf16.msra.mxu1 %v8384_v29  ;;  %8315 = vmatprep.subr.bf16.mxu0 %v8314_v37  ;;  %v5350_v29 = vld [vmem:[#allocation28 + $0x1918] sm:$0xff]  ;;  %v8334_v33 = vpack.c.bf16 %v5356_v25, %v5348_v27  ;;  %v5129_v27 = vld [vmem:[#allocation28 + $0x1230] sm:$0xff] }
 0xfbf   : > { %8387 = vmatprep.subr.bf16.mxu1 %v8386_v20  ;;  %v5358_v37 = vld [vmem:[#allocation28 + $0x1958] sm:$0xff]  ;;  %v5347_v20 = vld [vmem:[#allocation28 + $0x1900] sm:$0xff]  ;;  %v5137_v25 = vld [vmem:[#allocation28 + $0x1270] sm:$0xff] }
 0xfc0   : > { %v8406_v28 = vpack.c.bf16 %v5358_v37, %v5350_v29  ;;  %v8336_v42 = vpack.c.bf16 %v5355_v35, %v5347_v20  ;;  %v5144_v29 = vld [vmem:[#allocation28 + $0x12a8] sm:$0xff]  ;;  %v8496_v20 = vpack.c.bf16 %v5137_v25, %v5129_v27  ;;  %v5143_v35 = vld [vmem:[#allocation28 + $0x12a0] sm:$0xff]  ;;  %v5209_v25 = vld [vmem:[#allocation28 + $0x14b0] sm:$0xff] }
 0xfc1   : > { %8317 = vmatpush1.bf16.msra.mxu0 %v8316_v40  ;;  %v5372_v40 = vld [vmem:[#allocation28 + $0x19c8] sm:$0xff]  ;;  %v5215_v27 = vld [vmem:[#allocation28 + $0x14e0] sm:$0xff] }
 0xfc2   : > { %8389 = vmatpush1.bf16.msra.mxu1 %v8388_v13  ;;  %8319 = vmatprep.subr.bf16.mxu0 %v8318_v14  ;;  %v5366_v13 = vld [vmem:[#allocation28 + $0x1998] sm:$0xff]  ;;  %v8338_v12 = vpack.c.bf16 %v5372_v40, %v5364_v59  ;;  %v5152_v37 = vld [vmem:[#allocation28 + $0x12e8] sm:$0xff]  ;;  %v5153_v40 = vld [vmem:[#allocation28 + $0x12f0] sm:$0xff] }
 0xfc3   : > { %8391 = vmatprep.subr.bf16.mxu1 %v8390_v44  ;;  %v5374_v14 = vld [vmem:[#allocation28 + $0x19d8] sm:$0xff]  ;;  %v5363_v44 = vld [vmem:[#allocation28 + $0x1980] sm:$0xff]  ;;  %v8426_v59 = vpack.c.bf16 %v5152_v37, %v5144_v29  ;;  %v5217_v37 = vld [vmem:[#allocation28 + $0x14f0] sm:$0xff] }
 0xfc4   : > { %v8410_v48 = vpack.c.bf16 %v5374_v14, %v5366_v13  ;;  %v8340_v53 = vpack.c.bf16 %v5371_v15, %v5363_v44  ;;  %v5160_v13 = vld [vmem:[#allocation28 + $0x1328] sm:$0xff]  ;;  %v8428_v44 = vpack.c.bf16 %v5151_v38, %v5143_v35  ;;  %v8516_v38 = vpack.c.bf16 %v5217_v37, %v5209_v25  ;;  %v5287_v25 = vld [vmem:[#allocation28 + $0x1720] sm:$0xff]  ;;  %v5289_v37 = vld [vmem:[#allocation28 + $0x1730] sm:$0xff] }
 0xfc5   : > { %8321 = vmatpush1.bf16.msra.mxu0 %v8320_v19  ;;  %v5388_v19 = vld [vmem:[#allocation28 + $0x1a48] sm:$0xff] }
 0xfc6   : > { %8393 = vmatpush1.bf16.msra.mxu1 %v8392_v51  ;;  %8323 = vmatprep.subr.bf16.mxu0 %v8322_v52  ;;  %v5382_v51 = vld [vmem:[#allocation28 + $0x1a18] sm:$0xff]  ;;  %v8342_v0 = vpack.c.bf16 %v5388_v19, %v5380_v50  ;;  %v5168_v14 = vld [vmem:[#allocation28 + $0x1368] sm:$0xff]  ;;  %v5161_v50 = vld [vmem:[#allocation28 + $0x1330] sm:$0xff] }
 0xfc7   : > { %8395 = vmatprep.subr.bf16.mxu1 %v8394_v60  ;;  %v5390_v52 = vld [vmem:[#allocation28 + $0x1a58] sm:$0xff]  ;;  %v5387_v60 = vld [vmem:[#allocation28 + $0x1a40] sm:$0xff]  ;;  %v8430_v46 = vpack.c.bf16 %v5168_v14, %v5160_v13  ;;  %v5225_v13 = vld [vmem:[#allocation28 + $0x1530] sm:$0xff] }
 0xfc8   : > { %v8414_v62 = vpack.c.bf16 %v5390_v52, %v5382_v51  ;;  %v5169_v51 = vld [vmem:[#allocation28 + $0x1370] sm:$0xff]  ;;  %v5176_v52 = vld [vmem:[#allocation28 + $0x13a8] sm:$0xff] }
 0xfc9   : > { %8325 = vmatpush1.bf16.msra.mxu0 %v8324_v4  ;;  %v5398_v4 = vld [vmem:[#allocation28 + $0x1a98] sm:$0xff] }
 0xfca   : > { %8397 = vmatpush1.bf16.msra.mxu1 %v8396_v5  ;;  %8327 = vmatprep.subr.bf16.mxu0 %v8326_v6  ;;  %v5406_v5 = vld [vmem:[#allocation28 + $0x1ad8] sm:$0xff]  ;;  %v8344_v6 = vpack.c.bf16 %v5387_v60, %v5379_v56  ;;  %v8504_v60 = vpack.c.bf16 %v5169_v51, %v5161_v50  ;;  %v5239_v50 = vld [vmem:[#allocation28 + $0x15a0] sm:$0xff]  ;;  %v5241_v51 = vld [vmem:[#allocation28 + $0x15b0] sm:$0xff] }
 0xfcb   : > { %8399 = vmatprep.subr.bf16.mxu1 %v8398_v9  ;;  %v5403_v9 = vld [vmem:[#allocation28 + $0x1ac0] sm:$0xff]  ;;  %v8418_v11 = vpack.c.bf16 %v5406_v5, %v5398_v4  ;;  %v5192_v4 = vld [vmem:[#allocation28 + $0x1428] sm:$0xff] }
 0xfcc   : > { %v5200_v5 = vld [vmem:[#allocation28 + $0x1468] sm:$0xff] }
 0xfcd   : > { %8329 = vmatpush1.bf16.msra.mxu0 %v8328_v18  ;;  %v5136_v18 = vld [vmem:[#allocation28 + $0x1268] sm:$0xff] }
 0xfce   : > { %8401 = vmatpush1.bf16.msra.mxu1 %v8400_v22  ;;  %8331 = vmatprep.subr.bf16.mxu0 %v8330_v34  ;;  %v5130_v22 = vld [vmem:[#allocation28 + $0x1238] sm:$0xff]  ;;  %v8348_v34 = vpack.c.bf16 %v5403_v9, %v5395_v55  ;;  %v8422_v54 = vpack.c.bf16 %v5136_v18, %v5128_v17  ;;  %v8438_v9 = vpack.c.bf16 %v5200_v5, %v5192_v4  ;;  %v5201_v18 = vld [vmem:[#allocation28 + $0x1470] sm:$0xff] }
 0xfcf   : > { %8403 = vmatprep.subr.bf16.mxu1 %v8402_v26  ;;  %v5135_v26 = vld [vmem:[#allocation28 + $0x1260] sm:$0xff]  ;;  %v8494_v63 = vpack.c.bf16 %v5138_v45, %v5130_v22  ;;  %v5208_v22 = vld [vmem:[#allocation28 + $0x14a8] sm:$0xff]  ;;  %v5265_v5 = vld [vmem:[#allocation28 + $0x1670] sm:$0xff] }
 0xfd0   : > { %v5216_v45 = vld [vmem:[#allocation28 + $0x14e8] sm:$0xff] }
 0xfd1   : > { %8333 = vmatpush1.bf16.msra.mxu0 %v8332_v31  ;;  %v8424_v31 = vpack.c.bf16 %v5135_v26, %v5127_v23  ;;  %v8512_v23 = vpack.c.bf16 %v5201_v18, %v5193_v57  ;;  %v8442_v26 = vpack.c.bf16 %v5216_v45, %v5208_v22  ;;  %v5271_v57 = vld [vmem:[#allocation28 + $0x16a0] sm:$0xff]  ;;  %v5273_v18 = vld [vmem:[#allocation28 + $0x16b0] sm:$0xff] }
 0xfd2   : > { %8405 = vmatpush1.bf16.msra.mxu1 %v8404_v32  ;;  %8335 = vmatprep.subr.bf16.mxu0 %v8334_v33  ;;  %v5146_v32 = vld [vmem:[#allocation28 + $0x12b8] sm:$0xff]  ;;  %v5281_v45 = vld [vmem:[#allocation28 + $0x16f0] sm:$0xff] }
 0xfd3   : > { %8407 = vmatprep.subr.bf16.mxu1 %v8406_v28  ;;  %v5154_v33 = vld [vmem:[#allocation28 + $0x12f8] sm:$0xff]  ;;  %v5145_v28 = vld [vmem:[#allocation28 + $0x12b0] sm:$0xff] }
 0xfd4   : > { %v8500_v15 = vpack.c.bf16 %v5153_v40, %v5145_v28  ;;  %v5231_v40 = vld [vmem:[#allocation28 + $0x1560] sm:$0xff] }
 0xfd5   : > { %8337 = vmatpush1.bf16.msra.mxu0 %v8336_v42  ;;  %v8498_v42 = vpack.c.bf16 %v5154_v33, %v5146_v32  ;;  %v5232_v32 = vld [vmem:[#allocation28 + $0x1568] sm:$0xff]  ;;  %v5226_v33 = vld [vmem:[#allocation28 + $0x1538] sm:$0xff] }
 0xfd6   : > { %8409 = vmatpush1.bf16.msra.mxu1 %v8408_v43  ;;  %8339 = vmatprep.subr.bf16.mxu0 %v8338_v12  ;;  %v5162_v43 = vld [vmem:[#allocation28 + $0x1338] sm:$0xff] }
 0xfd7   : > { %8411 = vmatprep.subr.bf16.mxu1 %v8410_v48  ;;  %v5170_v12 = vld [vmem:[#allocation28 + $0x1378] sm:$0xff]  ;;  %v5159_v48 = vld [vmem:[#allocation28 + $0x1320] sm:$0xff] }
 0xfd8   : > { %v8502_v19 = vpack.c.bf16 %v5170_v12, %v5162_v43  ;;  %v8432_v56 = vpack.c.bf16 %v5167_v49, %v5159_v48  ;;  %v5240_v43 = vld [vmem:[#allocation28 + $0x15a8] sm:$0xff] }
 0xfd9   : > { %8341 = vmatpush1.bf16.msra.mxu0 %v8340_v53  ;;  %v5184_v53 = vld [vmem:[#allocation28 + $0x13e8] sm:$0xff] }
 0xfda   : > { %8413 = vmatpush1.bf16.msra.mxu1 %v8412_v16  ;;  %8343 = vmatprep.subr.bf16.mxu0 %v8342_v0  ;;  %v5178_v16 = vld [vmem:[#allocation28 + $0x13b8] sm:$0xff]  ;;  %v8434_v61 = vpack.c.bf16 %v5184_v53, %v5176_v52  ;;  %v5248_v12 = vld [vmem:[#allocation28 + $0x15e8] sm:$0xff]  ;;  %v5249_v53 = vld [vmem:[#allocation28 + $0x15f0] sm:$0xff] }
 0xfdb   : > { %8415 = vmatprep.subr.bf16.mxu1 %v8414_v62  ;;  %v5186_v0 = vld [vmem:[#allocation28 + $0x13f8] sm:$0xff]  ;;  %v5175_v62 = vld [vmem:[#allocation28 + $0x13a0] sm:$0xff]  ;;  %v8450_v49 = vpack.c.bf16 %v5248_v12, %v5240_v43  ;;  %v5313_v12 = vld [vmem:[#allocation28 + $0x17f0] sm:$0xff] }
 0xfdc   : > { %5479 = vmatmul.mubr.f32.vlgmr.msra.gmra.mrb[40].mxu0 %v10920_v10  ;;  %v8506_v3 = vpack.c.bf16 %v5186_v0, %v5178_v16  ;;  %v5256_v16 = vld [vmem:[#allocation28 + $0x1628] sm:$0xff] }
 0xfdd   : > { %5621 = vmatmul.mubr.f32.vlgmr.msra.gmra.mrb[40].mxu1 %v10920_v10  ;;  %8345 = vmatpush1.bf16.msra.mxu0 %v8344_v6  ;;  %v5194_v6 = vld [vmem:[#allocation28 + $0x1438] sm:$0xff]  ;;  %v5264_v0 = vld [vmem:[#allocation28 + $0x1668] sm:$0xff] }
 0xfde   : > { %8417 = vmatpush1.bf16.msra.mxu1 %v8416_v7  ;;  %8347 = vmatprep.subr.bf16.mxu0 %v8346_v8  ;;  %v5202_v7 = vld [vmem:[#allocation28 + $0x1478] sm:$0xff]  ;;  %v8436_v8 = vpack.c.bf16 %v5183_v1, %v5175_v62  ;;  %v8524_v62 = vpack.c.bf16 %v5249_v53, %v5241_v51  ;;  %v8454_v1 = vpack.c.bf16 %v5264_v0, %v5256_v16  ;;  %v5319_v51 = vld [vmem:[#allocation28 + $0x1820] sm:$0xff]  ;;  %v5321_v53 = vld [vmem:[#allocation28 + $0x1830] sm:$0xff] }
 0xfdf   : > { %8419 = vmatprep.subr.bf16.mxu1 %v8418_v11  ;;  %5549 = vmatprep.mubr.f32.mxu0 %v9785_v21  ;;  %v5199_v11 = vld [vmem:[#allocation28 + $0x1460] sm:$0xff]  ;;  %v8510_v17 = vpack.c.bf16 %v5202_v7, %v5194_v6  ;;  %v5272_v6 = vld [vmem:[#allocation28 + $0x16a8] sm:$0xff]  ;;  %v5329_v0 = vld [vmem:[#allocation28 + $0x1870] sm:$0xff] }
 0xfe0   : > { %5691 = vmatprep.mubr.f32.mxu1 %v9785_v21  ;;  %v5280_v7 = vld [vmem:[#allocation28 + $0x16e8] sm:$0xff] }
 0xfe1   : > { %8349 = vmatpush1.bf16.msra.mxu0 %v8348_v34  ;;  %v5210_v34 = vld [vmem:[#allocation28 + $0x14b8] sm:$0xff] }
 0xfe2   : > { %8421 = vmatpush1.bf16.msra.mxu1 %v8420_v41  ;;  %8423 = vmatprep.subr.bf16.mxu0 %v8422_v54  ;;  %v5218_v41 = vld [vmem:[#allocation28 + $0x14f8] sm:$0xff]  ;;  %v8440_v54 = vpack.c.bf16 %v5199_v11, %v5191_v47  ;;  %v8458_v11 = vpack.c.bf16 %v5280_v7, %v5272_v6  ;;  %v5345_v7 = vld [vmem:[#allocation28 + $0x18f0] sm:$0xff] }
 0xfe3   : > { %8495 = vmatprep.subr.bf16.mxu1 %v8494_v63  ;;  %v5207_v63 = vld [vmem:[#allocation28 + $0x14a0] sm:$0xff]  ;;  %v8514_v29 = vpack.c.bf16 %v5218_v41, %v5210_v34  ;;  %v5288_v34 = vld [vmem:[#allocation28 + $0x1728] sm:$0xff] }
 0xfe4   : > { %7306 = vmatmul.mubr.msk.f32.vlgmr.msra.gmra.mrb[40].mxu0 %vm2979_vm11, %v10926_v39  ;;  %v8444_v35 = vpack.c.bf16 %v5215_v27, %v5207_v63  ;;  %v5296_v41 = vld [vmem:[#allocation28 + $0x1768] sm:$0xff]  ;;  %v8532_v63 = vpack.c.bf16 %v5281_v45, %v5273_v18  ;;  %v5351_v18 = vld [vmem:[#allocation28 + $0x1920] sm:$0xff]  ;;  %v5353_v45 = vld [vmem:[#allocation28 + $0x1930] sm:$0xff] }
 0xfe5   : > { %7307 = vmatmul.mubr.msk.f32.vlgmr.msra.gmra.mrb[40].mxu1 %vm2979_vm11, %v10926_v39  ;;  %8425 = vmatpush1.bf16.msra.mxu0 %v8424_v31  ;;  %v5224_v31 = vld [vmem:[#allocation28 + $0x1528] sm:$0xff]  ;;  %v8462_v27 = vpack.c.bf16 %v5296_v41, %v5288_v34  ;;  %v5361_v41 = vld [vmem:[#allocation28 + $0x1970] sm:$0xff] }
 0xfe6   : > { %5762 = vmatprep.mubr.f32.mxu0 %v10912_v58  ;;  %8497 = vmatpush1.bf16.msra.mxu1 %v8496_v20  ;;  %v5234_v20 = vld [vmem:[#allocation28 + $0x1578] sm:$0xff]  ;;  %v8446_v28 = vpack.c.bf16 %v5232_v32, %v5224_v31  ;;  %v5297_v32 = vld [vmem:[#allocation28 + $0x1770] sm:$0xff] }
 0xfe7   : > { %5904 = vmatprep.mubr.f32.mxu1 %v10912_v58  ;;  %8427 = vmatprep.subr.bf16.mxu0 %v8426_v59  ;;  %v5185_v58 = vld [vmem:[#allocation28 + $0x13f0] sm:$0xff]  ;;  %v5223_v59 = vld [vmem:[#allocation28 + $0x1520] sm:$0xff]  ;;  %v8518_v14 = vpack.c.bf16 %v5234_v20, %v5226_v33  ;;  %v5304_v33 = vld [vmem:[#allocation28 + $0x17a8] sm:$0xff] }
 0xfe8   : > { %8499 = vmatprep.subr.bf16.mxu1 %v8498_v42  ;;  %v8508_v55 = vpack.c.bf16 %v5185_v58, %v5177_v2  ;;  %v5233_v42 = vld [vmem:[#allocation28 + $0x1570] sm:$0xff]  ;;  %v5255_v2 = vld [vmem:[#allocation28 + $0x1620] sm:$0xff]  ;;  %v5312_v20 = vld [vmem:[#allocation28 + $0x17e8] sm:$0xff] }
 0xfe9   : > { %8429 = vmatpush1.bf16.msra.mxu0 %v8428_v44  ;;  %v5242_v44 = vld [vmem:[#allocation28 + $0x15b8] sm:$0xff]  ;;  %v8520_v48 = vpack.c.bf16 %v5233_v42, %v5225_v13  ;;  %v5257_v58 = vld [vmem:[#allocation28 + $0x1630] sm:$0xff]  ;;  %v5303_v13 = vld [vmem:[#allocation28 + $0x17a0] sm:$0xff] }
 0xfea   : > { %8501 = vmatpush1.bf16.msra.mxu1 %v8500_v15  ;;  %8431 = vmatprep.subr.bf16.mxu0 %v8430_v46  ;;  %v5250_v15 = vld [vmem:[#allocation28 + $0x15f8] sm:$0xff]  ;;  %v8448_v46 = vpack.c.bf16 %v5231_v40, %v5223_v59  ;;  %v8528_v47 = vpack.c.bf16 %v5265_v5, %v5257_v58  ;;  %v8536_v59 = vpack.c.bf16 %v5297_v32, %v5289_v37  ;;  %v5305_v42 = vld [vmem:[#allocation28 + $0x17b0] sm:$0xff]  ;;  %v5335_v58 = vld [vmem:[#allocation28 + $0x18a0] sm:$0xff] }
 0xfeb   : > { %8503 = vmatprep.subr.bf16.mxu1 %v8502_v19  ;;  %v5247_v19 = vld [vmem:[#allocation28 + $0x15e0] sm:$0xff]  ;;  %v8522_v52 = vpack.c.bf16 %v5250_v15, %v5242_v44  ;;  %v8466_v40 = vpack.c.bf16 %v5312_v20, %v5304_v33  ;;  %v5320_v44 = vld [vmem:[#allocation28 + $0x1828] sm:$0xff]  ;;  %v5337_v5 = vld [vmem:[#allocation28 + $0x18b0] sm:$0xff] }
 0xfec   : > { %v5328_v15 = vld [vmem:[#allocation28 + $0x1868] sm:$0xff]  ;;  %v5367_v37 = vld [vmem:[#allocation28 + $0x19a0] sm:$0xff]  ;;  %v5369_v32 = vld [vmem:[#allocation28 + $0x19b0] sm:$0xff] }
 0xfed   : > { %8433 = vmatpush1.bf16.msra.mxu0 %v8432_v56  ;;  %v5258_v56 = vld [vmem:[#allocation28 + $0x1638] sm:$0xff]  ;;  %v5377_v20 = vld [vmem:[#allocation28 + $0x19f0] sm:$0xff] }
 0xfee   : > { %8505 = vmatpush1.bf16.msra.mxu1 %v8504_v60  ;;  %8435 = vmatprep.subr.bf16.mxu0 %v8434_v61  ;;  %v5266_v60 = vld [vmem:[#allocation28 + $0x1678] sm:$0xff]  ;;  %v8452_v61 = vpack.c.bf16 %v5247_v19, %v5239_v50  ;;  %v8540_v50 = vpack.c.bf16 %v5313_v12, %v5305_v42  ;;  %v8470_v19 = vpack.c.bf16 %v5328_v15, %v5320_v44  ;;  %v5383_v42 = vld [vmem:[#allocation28 + $0x1a20] sm:$0xff]  ;;  %v5385_v12 = vld [vmem:[#allocation28 + $0x1a30] sm:$0xff] }
 0xfef   : > { %8507 = vmatprep.subr.bf16.mxu1 %v8506_v3  ;;  %v5263_v3 = vld [vmem:[#allocation28 + $0x1660] sm:$0xff]  ;;  %v8526_v4 = vpack.c.bf16 %v5266_v60, %v5258_v56  ;;  %v5336_v56 = vld [vmem:[#allocation28 + $0x18a8] sm:$0xff]  ;;  %v5393_v15 = vld [vmem:[#allocation28 + $0x1a70] sm:$0xff] }
 0xff0   : > { %v5344_v60 = vld [vmem:[#allocation28 + $0x18e8] sm:$0xff] }
 0xff1   : > { %8437 = vmatpush1.bf16.msra.mxu0 %v8436_v8  ;;  %v5274_v8 = vld [vmem:[#allocation28 + $0x16b8] sm:$0xff] }
 0xff2   : > { %8509 = vmatpush1.bf16.msra.mxu1 %v8508_v55  ;;  %8439 = vmatprep.subr.bf16.mxu0 %v8438_v9  ;;  %v5282_v55 = vld [vmem:[#allocation28 + $0x16f8] sm:$0xff]  ;;  %v8456_v9 = vpack.c.bf16 %v5263_v3, %v5255_v2  ;;  %v8544_v2 = vpack.c.bf16 %v5329_v0, %v5321_v53  ;;  %v8474_v3 = vpack.c.bf16 %v5344_v60, %v5336_v56  ;;  %v5399_v53 = vld [vmem:[#allocation28 + $0x1aa0] sm:$0xff]  ;;  %v5401_v0 = vld [vmem:[#allocation28 + $0x1ab0] sm:$0xff] }
 0xff3   : > { %8511 = vmatprep.subr.bf16.mxu1 %v8510_v17  ;;  %v5279_v17 = vld [vmem:[#allocation28 + $0x16e0] sm:$0xff]  ;;  %v8530_v22 = vpack.c.bf16 %v5282_v55, %v5274_v8  ;;  %v5352_v8 = vld [vmem:[#allocation28 + $0x1928] sm:$0xff]  ;;  %v5409_v60 = vld [vmem:[#allocation28 + $0x1af0] sm:$0xff] }
 0xff4   : > { %v5360_v55 = vld [vmem:[#allocation28 + $0x1968] sm:$0xff] }
 0xff5   : > { %8441 = vmatpush1.bf16.msra.mxu0 %v8440_v54  ;;  %v5290_v54 = vld [vmem:[#allocation28 + $0x1738] sm:$0xff] }
 0xff6   : > { %8513 = vmatpush1.bf16.msra.mxu1 %v8512_v23  ;;  %8443 = vmatprep.subr.bf16.mxu0 %v8442_v26  ;;  %v5298_v23 = vld [vmem:[#allocation28 + $0x1778] sm:$0xff]  ;;  %v8460_v26 = vpack.c.bf16 %v5279_v17, %v5271_v57  ;;  %v8548_v57 = vpack.c.bf16 %v5345_v7, %v5337_v5  ;;  %v8478_v17 = vpack.c.bf16 %v5360_v55, %v5352_v8  ;;  %v5994_v5 = vld [vmem:[#allocation28 + $0x1b00] sm:$0xff]  ;;  %v5996_v7 = vld [vmem:[#allocation28 + $0x1b10] sm:$0xff] }
 0xff7   : > { %8515 = vmatprep.subr.bf16.mxu1 %v8514_v29  ;;  %v5295_v29 = vld [vmem:[#allocation28 + $0x1760] sm:$0xff]  ;;  %v8534_v31 = vpack.c.bf16 %v5298_v23, %v5290_v54  ;;  %v5368_v54 = vld [vmem:[#allocation28 + $0x19a8] sm:$0xff]  ;;  %v6004_v8 = vld [vmem:[#allocation28 + $0x1b50] sm:$0xff] }
 0xff8   : > { %v5376_v23 = vld [vmem:[#allocation28 + $0x19e8] sm:$0xff] }
 0xff9   : > { %8445 = vmatpush1.bf16.msra.mxu0 %v8444_v35  ;;  %v5306_v35 = vld [vmem:[#allocation28 + $0x17b8] sm:$0xff]  ;;  %v6011_v55 = vld [vmem:[#allocation28 + $0x1b88] sm:$0xff] }
 0xffa   : > { %8517 = vmatpush1.bf16.msra.mxu1 %v8516_v38  ;;  %8447 = vmatprep.subr.bf16.mxu0 %v8446_v28  ;;  %v5314_v38 = vld [vmem:[#allocation28 + $0x17f8] sm:$0xff]  ;;  %v8464_v28 = vpack.c.bf16 %v5295_v29, %v5287_v25  ;;  %v8552_v25 = vpack.c.bf16 %v5361_v41, %v5353_v45  ;;  %v8482_v29 = vpack.c.bf16 %v5376_v23, %v5368_v54  ;;  %v6027_v41 = vld [vmem:[#allocation28 + $0x1c08] sm:$0xff] }
 0xffb   : > { %8519 = vmatprep.subr.bf16.mxu1 %v8518_v14  ;;  %v5311_v14 = vld [vmem:[#allocation28 + $0x17e0] sm:$0xff]  ;;  %v8538_v43 = vpack.c.bf16 %v5314_v38, %v5306_v35  ;;  %v5384_v35 = vld [vmem:[#allocation28 + $0x1a28] sm:$0xff] }
 0xffc   : > { %v5392_v38 = vld [vmem:[#allocation28 + $0x1a68] sm:$0xff] }
 0xffd   : > { %8449 = vmatpush1.bf16.msra.mxu0 %v8448_v46  ;;  %v5322_v46 = vld [vmem:[#allocation28 + $0x1838] sm:$0xff]  ;;  %v6035_v54 = vld [vmem:[#allocation28 + $0x1c48] sm:$0xff] }
 0xffe   : > { %8521 = vmatpush1.bf16.msra.mxu1 %v8520_v48  ;;  %8451 = vmatprep.subr.bf16.mxu0 %v8450_v49  ;;  %v5330_v48 = vld [vmem:[#allocation28 + $0x1878] sm:$0xff]  ;;  %v8468_v49 = vpack.c.bf16 %v5311_v14, %v5303_v13  ;;  %v8556_v13 = vpack.c.bf16 %v5377_v20, %v5369_v32  ;;  %v8486_v14 = vpack.c.bf16 %v5392_v38, %v5384_v35  ;;  %v6034_v32 = vld [vmem:[#allocation28 + $0x1c40] sm:$0xff]  ;;  %v6036_v35 = vld [vmem:[#allocation28 + $0x1c50] sm:$0xff] }
 0xfff   : > { %8523 = vmatprep.subr.bf16.mxu1 %v8522_v52  ;;  %v5327_v52 = vld [vmem:[#allocation28 + $0x1860] sm:$0xff]  ;;  %v8542_v16 = vpack.c.bf16 %v5330_v48, %v5322_v46  ;;  %v5400_v46 = vld [vmem:[#allocation28 + $0x1aa8] sm:$0xff] }
0x1000   : > { %v5408_v48 = vld [vmem:[#allocation28 + $0x1ae8] sm:$0xff] }
0x1001   : > { %8453 = vmatpush1.bf16.msra.mxu0 %v8452_v61  ;;  %v5338_v61 = vld [vmem:[#allocation28 + $0x18b8] sm:$0xff]  ;;  %v6043_v38 = vld [vmem:[#allocation28 + $0x1c88] sm:$0xff] }
0x1002   : > { %8525 = vmatpush1.bf16.msra.mxu1 %v8524_v62  ;;  %8455 = vmatprep.subr.bf16.mxu0 %v8454_v1  ;;  %v5346_v62 = vld [vmem:[#allocation28 + $0x18f8] sm:$0xff]  ;;  %v8472_v1 = vpack.c.bf16 %v5327_v52, %v5319_v51  ;;  %v8560_v51 = vpack.c.bf16 %v5393_v15, %v5385_v12  ;;  %v8490_v52 = vpack.c.bf16 %v5408_v48, %v5400_v46  ;;  %v6044_v12 = vld [vmem:[#allocation28 + $0x1c90] sm:$0xff]  ;;  %v6059_v46 = vld [vmem:[#allocation28 + $0x1d08] sm:$0xff] }
0x1003   : > { %8527 = vmatprep.subr.bf16.mxu1 %v8526_v4  ;;  %v5343_v4 = vld [vmem:[#allocation28 + $0x18e0] sm:$0xff]  ;;  %v8546_v6 = vpack.c.bf16 %v5346_v62, %v5338_v61  ;;  %v5995_v61 = vld [vmem:[#allocation28 + $0x1b08] sm:$0xff]  ;;  %v6052_v15 = vld [vmem:[#allocation28 + $0x1cd0] sm:$0xff] }
0x1004   : > { %v6003_v62 = vld [vmem:[#allocation28 + $0x1b48] sm:$0xff] }
0x1005   : > { %8457 = vmatpush1.bf16.msra.mxu0 %v8456_v9  ;;  %v5354_v9 = vld [vmem:[#allocation28 + $0x1938] sm:$0xff]  ;;  %v6067_v48 = vld [vmem:[#allocation28 + $0x1d48] sm:$0xff] }
0x1006   : > { %8529 = vmatpush1.bf16.msra.mxu1 %v8528_v47  ;;  %8459 = vmatprep.subr.bf16.mxu0 %v8458_v11  ;;  %v5362_v47 = vld [vmem:[#allocation28 + $0x1978] sm:$0xff]  ;;  %v8476_v11 = vpack.c.bf16 %v5343_v4, %v5335_v58  ;;  %v8564_v58 = vpack.c.bf16 %v5409_v60, %v5401_v0  ;;  %v8566_v4 = vpack.c.bf16 %v6003_v62, %v5995_v61  ;;  %v6060_v0 = vld [vmem:[#allocation28 + $0x1d10] sm:$0xff]  ;;  %v6075_v61 = vld [vmem:[#allocation28 + $0x1d88] sm:$0xff] }
0x1007   : > { %8531 = vmatprep.subr.bf16.mxu1 %v8530_v22  ;;  %v5359_v22 = vld [vmem:[#allocation28 + $0x1960] sm:$0xff]  ;;  %v8550_v34 = vpack.c.bf16 %v5362_v47, %v5354_v9  ;;  %v6019_v9 = vld [vmem:[#allocation28 + $0x1bc8] sm:$0xff]  ;;  %v6013_v47 = vld [vmem:[#allocation28 + $0x1b98] sm:$0xff] }
0x1008   : > { %v8570_v45 = vpack.c.bf16 %v6019_v9, %v6011_v55  ;;  %v6068_v60 = vld [vmem:[#allocation28 + $0x1d50] sm:$0xff]  ;;  %v6083_v62 = vld [vmem:[#allocation28 + $0x1dc8] sm:$0xff] }
0x1009   : > { %8461 = vmatpush1.bf16.msra.mxu0 %v8460_v26  ;;  %v5370_v26 = vld [vmem:[#allocation28 + $0x19b8] sm:$0xff]  ;;  %v6091_v55 = vld [vmem:[#allocation28 + $0x1e08] sm:$0xff] }
0x100a   : > { %8533 = vmatpush1.bf16.msra.mxu1 %v8532_v63  ;;  %8463 = vmatprep.subr.bf16.mxu0 %v8462_v27  ;;  %v5378_v63 = vld [vmem:[#allocation28 + $0x19f8] sm:$0xff]  ;;  %v8480_v27 = vpack.c.bf16 %v5359_v22, %v5351_v18  ;;  %v6018_v18 = vld [vmem:[#allocation28 + $0x1bc0] sm:$0xff]  ;;  %v6012_v22 = vld [vmem:[#allocation28 + $0x1b90] sm:$0xff] }
0x100b   : > { %8535 = vmatprep.subr.bf16.mxu1 %v8534_v31  ;;  %v5375_v31 = vld [vmem:[#allocation28 + $0x19e0] sm:$0xff]  ;;  %v8554_v33 = vpack.c.bf16 %v5378_v63, %v5370_v26  ;;  %v6029_v26 = vld [vmem:[#allocation28 + $0x1c18] sm:$0xff]  ;;  %v6099_v9 = vld [vmem:[#allocation28 + $0x1e48] sm:$0xff] }
0x100c   : > { %v6037_v63 = vld [vmem:[#allocation28 + $0x1c58] sm:$0xff] }
0x100d   : > { %8465 = vmatpush1.bf16.msra.mxu0 %v8464_v28  ;;  %v5386_v28 = vld [vmem:[#allocation28 + $0x1a38] sm:$0xff]  ;;  %v8646_v20 = vpack.c.bf16 %v6037_v63, %v6029_v26 }
0x100e   : > { %8537 = vmatpush1.bf16.msra.mxu1 %v8536_v59  ;;  %8467 = vmatprep.subr.bf16.mxu0 %v8466_v40  ;;  %v5394_v59 = vld [vmem:[#allocation28 + $0x1a78] sm:$0xff]  ;;  %v8484_v40 = vpack.c.bf16 %v5375_v31, %v5367_v37  ;;  %v8574_v37 = vpack.c.bf16 %v6035_v54, %v6027_v41  ;;  %v6026_v31 = vld [vmem:[#allocation28 + $0x1c00] sm:$0xff]  ;;  %v6100_v41 = vld [vmem:[#allocation28 + $0x1e50] sm:$0xff] }
0x100f   : > { %8539 = vmatprep.subr.bf16.mxu1 %v8538_v43  ;;  %v5391_v43 = vld [vmem:[#allocation28 + $0x1a60] sm:$0xff]  ;;  %v8558_v44 = vpack.c.bf16 %v5394_v59, %v5386_v28  ;;  %v6051_v28 = vld [vmem:[#allocation28 + $0x1cc8] sm:$0xff]  ;;  %v6045_v59 = vld [vmem:[#allocation28 + $0x1c98] sm:$0xff] }
0x1010   : > { %v6107_v54 = vld [vmem:[#allocation28 + $0x1e88] sm:$0xff]  ;;  %v6109_v26 = vld [vmem:[#allocation28 + $0x1e98] sm:$0xff] }
0x1011   : > { %8469 = vmatpush1.bf16.msra.mxu0 %v8468_v49  ;;  %v5402_v49 = vld [vmem:[#allocation28 + $0x1ab8] sm:$0xff] }
0x1012   : > { %8541 = vmatpush1.bf16.msra.mxu1 %v8540_v50  ;;  %8471 = vmatprep.subr.bf16.mxu0 %v8470_v19  ;;  %v5410_v50 = vld [vmem:[#allocation28 + $0x1af8] sm:$0xff]  ;;  %v8488_v19 = vpack.c.bf16 %v5391_v43, %v5383_v42  ;;  %v6042_v42 = vld [vmem:[#allocation28 + $0x1c80] sm:$0xff] }
0x1013   : > { %8543 = vmatprep.subr.bf16.mxu1 %v8542_v16  ;;  %v5407_v16 = vld [vmem:[#allocation28 + $0x1ae0] sm:$0xff]  ;;  %v8562_v56 = vpack.c.bf16 %v5410_v50, %v5402_v49  ;;  %v6061_v49 = vld [vmem:[#allocation28 + $0x1d18] sm:$0xff] }
0x1014   : > { %v6050_v43 = vld [vmem:[#allocation28 + $0x1cc0] sm:$0xff]  ;;  %v6069_v50 = vld [vmem:[#allocation28 + $0x1d58] sm:$0xff] }
0x1015   : > { %8473 = vmatpush1.bf16.msra.mxu0 %v8472_v1  ;;  %v5997_v1 = vld [vmem:[#allocation28 + $0x1b18] sm:$0xff] }
0x1016   : > { %8545 = vmatpush1.bf16.msra.mxu1 %v8544_v2  ;;  %8475 = vmatprep.subr.bf16.mxu0 %v8474_v3  ;;  %v6005_v2 = vld [vmem:[#allocation28 + $0x1b58] sm:$0xff]  ;;  %v8492_v3 = vpack.c.bf16 %v5407_v16, %v5399_v53  ;;  %v6058_v53 = vld [vmem:[#allocation28 + $0x1d00] sm:$0xff] }
0x1017   : > { %8547 = vmatprep.subr.bf16.mxu1 %v8546_v6  ;;  %v6002_v6 = vld [vmem:[#allocation28 + $0x1b40] sm:$0xff]  ;;  %v8638_v30 = vpack.c.bf16 %v6005_v2, %v5997_v1  ;;  %v6077_v1 = vld [vmem:[#allocation28 + $0x1d98] sm:$0xff] }
0x1018   : > { %v6066_v16 = vld [vmem:[#allocation28 + $0x1d40] sm:$0xff]  ;;  %v6085_v2 = vld [vmem:[#allocation28 + $0x1dd8] sm:$0xff] }
0x1019   : > { %8477 = vmatpush1.bf16.msra.mxu0 %v8476_v11  ;;  %v6021_v11 = vld [vmem:[#allocation28 + $0x1bd8] sm:$0xff] }
0x101a   : > { %8549 = vmatpush1.bf16.msra.mxu1 %v8548_v57  ;;  %8479 = vmatprep.subr.bf16.mxu0 %v8478_v17  ;;  %v8640_v57 = vpack.c.bf16 %v6004_v8, %v5996_v7  ;;  %v6010_v17 = vld [vmem:[#allocation28 + $0x1b80] sm:$0xff]  ;;  %v8642_v23 = vpack.c.bf16 %v6021_v11, %v6013_v47  ;;  %v8658_v7 = vpack.c.bf16 %v6085_v2, %v6077_v1  ;;  %v6084_v8 = vld [vmem:[#allocation28 + $0x1dd0] sm:$0xff]  ;;  %v6101_v47 = vld [vmem:[#allocation28 + $0x1e58] sm:$0xff] }
0x101b   : > { %8551 = vmatprep.subr.bf16.mxu1 %v8550_v34  ;;  %v6020_v34 = vld [vmem:[#allocation28 + $0x1bd0] sm:$0xff]  ;;  %v6117_v63 = vld [vmem:[#allocation28 + $0x1ed8] sm:$0xff] }
0x101c   : > { %v6157_v1 = vld [vmem:[#allocation28 + $0x2018] sm:$0xff] }
0x101d   : > { %8481 = vmatpush1.bf16.msra.mxu0 %v8480_v27  ;;  %v10941_v27 = vpop.eup %9261  ;;  %v6165_v2 = vld [vmem:[#allocation28 + $0x2058] sm:$0xff] }
0x101e   : > { %8553 = vmatpush1.bf16.msra.mxu1 %v8552_v25  ;;  %8483 = vmatprep.subr.bf16.mxu0 %v8482_v29  ;;  %v8572_v25 = vpack.c.bf16 %v6018_v18, %v6010_v17  ;;  %v8644_v29 = vpack.c.bf16 %v6020_v34, %v6012_v22  ;;  %v8590_v17 = vpack.c.bf16 %v6099_v9, %v6091_v55  ;;  %v6090_v18 = vld [vmem:[#allocation28 + $0x1e00] sm:$0xff]  ;;  %v6171_v55 = vld [vmem:[#allocation28 + $0x2088] sm:$0xff] }
0x101f   : > { %8555 = vmatprep.subr.bf16.mxu1 %v8554_v33  ;;  %v6028_v33 = vld [vmem:[#allocation28 + $0x1c10] sm:$0xff]  ;;  %v6098_v22 = vld [vmem:[#allocation28 + $0x1e40] sm:$0xff]  ;;  %v6179_v9 = vld [vmem:[#allocation28 + $0x20c8] sm:$0xff] }
0x1021   : > { %8485 = vmatpush1.bf16.msra.mxu0 %v8484_v40  ;;  %v8576_v40 = vpack.c.bf16 %v6034_v32, %v6026_v31  ;;  %v6106_v31 = vld [vmem:[#allocation28 + $0x1e80] sm:$0xff] }
0x1022   : > { %8557 = vmatpush1.bf16.msra.mxu1 %v8556_v13  ;;  %8487 = vmatprep.subr.bf16.mxu0 %v8486_v14  ;;  %v8648_v13 = vpack.c.bf16 %v6036_v35, %v6028_v33  ;;  %v8578_v14 = vpack.c.bf16 %v6051_v28, %v6043_v38  ;;  %v6114_v32 = vld [vmem:[#allocation28 + $0x1ec0] sm:$0xff]  ;;  %v6108_v33 = vld [vmem:[#allocation28 + $0x1e90] sm:$0xff]  ;;  %v6123_v38 = vld [vmem:[#allocation28 + $0x1f08] sm:$0xff] }
0x1023   : > { %8559 = vmatprep.subr.bf16.mxu1 %v8558_v44  ;;  %v6116_v35 = vld [vmem:[#allocation28 + $0x1ed0] sm:$0xff]  ;;  %v6131_v28 = vld [vmem:[#allocation28 + $0x1f48] sm:$0xff] }
0x1024   : > { %5763 = vmatmul.mubr.f32.vlgmr.msra.gmra.mrb[42].mxu0 %v10920_v10 }
0x1025   : > { %5905 = vmatmul.mubr.f32.vlgmr.msra.gmra.mrb[42].mxu1 %v10920_v10  ;;  %8489 = vmatpush1.bf16.msra.mxu0 %v8488_v19  ;;  %v8568_v10 = vpack.c.bf16 %v6002_v6, %v5994_v5  ;;  %v8580_v19 = vpack.c.bf16 %v6050_v43, %v6042_v42  ;;  %v6074_v5 = vld [vmem:[#allocation28 + $0x1d80] sm:$0xff] }
0x1026   : > { %8561 = vmatpush1.bf16.msra.mxu1 %v8560_v51  ;;  %8491 = vmatprep.subr.bf16.mxu0 %v8490_v52  ;;  %v8652_v51 = vpack.c.bf16 %v6052_v15, %v6044_v12  ;;  %v8582_v52 = vpack.c.bf16 %v6067_v48, %v6059_v46  ;;  %v6082_v6 = vld [vmem:[#allocation28 + $0x1dc0] sm:$0xff]  ;;  %v6124_v12 = vld [vmem:[#allocation28 + $0x1f10] sm:$0xff]  ;;  %v6139_v46 = vld [vmem:[#allocation28 + $0x1f88] sm:$0xff] }
0x1027   : > { %8563 = vmatprep.subr.bf16.mxu1 %v8562_v56  ;;  %5833 = vmatprep.mubr.f32.mxu0 %v9785_v21  ;;  %v8654_v56 = vpack.c.bf16 %v6069_v50, %v6061_v49  ;;  %v8588_v11 = vpack.c.bf16 %v6082_v6, %v6074_v5  ;;  %v6122_v42 = vld [vmem:[#allocation28 + $0x1f00] sm:$0xff]  ;;  %v6132_v15 = vld [vmem:[#allocation28 + $0x1f50] sm:$0xff]  ;;  %v6147_v48 = vld [vmem:[#allocation28 + $0x1fc8] sm:$0xff] }
0x1028   : > { %5975 = vmatprep.mubr.f32.mxu1 %v9785_v21  ;;  %v6130_v43 = vld [vmem:[#allocation28 + $0x1f40] sm:$0xff]  ;;  %v6141_v49 = vld [vmem:[#allocation28 + $0x1f98] sm:$0xff] }
0x1029   : > { %8493 = vmatpush1.bf16.msra.mxu0 %v8492_v3  ;;  %v8584_v3 = vpack.c.bf16 %v6066_v16, %v6058_v53  ;;  %v6149_v50 = vld [vmem:[#allocation28 + $0x1fd8] sm:$0xff]  ;;  %v6138_v53 = vld [vmem:[#allocation28 + $0x1f80] sm:$0xff] }
0x102a   : > { %8565 = vmatpush1.bf16.msra.mxu1 %v8564_v58  ;;  %8567 = vmatprep.subr.bf16.mxu0 %v8566_v4  ;;  %v8656_v58 = vpack.c.bf16 %v6068_v60, %v6060_v0  ;;  %v8586_v4 = vpack.c.bf16 %v6083_v62, %v6075_v61  ;;  %v6146_v16 = vld [vmem:[#allocation28 + $0x1fc0] sm:$0xff]  ;;  %v6140_v0 = vld [vmem:[#allocation28 + $0x1f90] sm:$0xff]  ;;  %v6155_v61 = vld [vmem:[#allocation28 + $0x2008] sm:$0xff] }
0x102b   : > { %8639 = vmatprep.subr.bf16.mxu1 %v8638_v30  ;;  %v6076_v30 = vld [vmem:[#allocation28 + $0x1d90] sm:$0xff]  ;;  %v6163_v62 = vld [vmem:[#allocation28 + $0x2048] sm:$0xff]  ;;  %v6154_v5 = vld [vmem:[#allocation28 + $0x2000] sm:$0xff] }
0x102c   : > { %7308 = vmatmul.mubr.msk.f32.vlgmr.msra.gmra.mrb[42].mxu0 %vm2979_vm11, %v10926_v39  ;;  %v6148_v60 = vld [vmem:[#allocation28 + $0x1fd0] sm:$0xff]  ;;  %v6162_v6 = vld [vmem:[#allocation28 + $0x2040] sm:$0xff] }
0x102d   : > { %7309 = vmatmul.mubr.msk.f32.vlgmr.msra.gmra.mrb[42].mxu1 %vm2979_vm11, %v10926_v39  ;;  %8569 = vmatpush1.bf16.msra.mxu0 %v8568_v10  ;;  %v6053_v39 = vld [vmem:[#allocation28 + $0x1cd8] sm:$0xff] }
0x102e   : > { %6349 = vmatprep.mubr.f32.mxu0 %v10941_v27  ;;  %8641 = vmatpush1.bf16.msra.mxu1 %v8640_v57  ;;  %v8650_v44 = vpack.c.bf16 %v6053_v39, %v6045_v59  ;;  %v6093_v10 = vld [vmem:[#allocation28 + $0x1e18] sm:$0xff]  ;;  %v8660_v57 = vpack.c.bf16 %v6084_v8, %v6076_v30  ;;  %v6156_v30 = vld [vmem:[#allocation28 + $0x2010] sm:$0xff] }
0x102f   : > { %6491 = vmatprep.mubr.f32.mxu1 %v10941_v27  ;;  %8571 = vmatprep.subr.bf16.mxu0 %v8570_v45  ;;  %v6092_v45 = vld [vmem:[#allocation28 + $0x1e10] sm:$0xff]  ;;  %v8662_v34 = vpack.c.bf16 %v6101_v47, %v6093_v10  ;;  %v6125_v59 = vld [vmem:[#allocation28 + $0x1f18] sm:$0xff] }
0x1030   : > { %8643 = vmatprep.subr.bf16.mxu1 %v8642_v23  ;;  %v6115_v23 = vld [vmem:[#allocation28 + $0x1ec8] sm:$0xff]  ;;  %v6133_v39 = vld [vmem:[#allocation28 + $0x1f58] sm:$0xff]  ;;  %v6164_v8 = vld [vmem:[#allocation28 + $0x2050] sm:$0xff] }
0x1031   : > { %8573 = vmatpush1.bf16.msra.mxu0 %v8572_v25  ;;  %v8592_v25 = vpack.c.bf16 %v6098_v22, %v6090_v18  ;;  %v6173_v10 = vld [vmem:[#allocation28 + $0x2098] sm:$0xff]  ;;  %v6170_v18 = vld [vmem:[#allocation28 + $0x2080] sm:$0xff] }
0x1032   : > { %8645 = vmatpush1.bf16.msra.mxu1 %v8644_v29  ;;  %8575 = vmatprep.subr.bf16.mxu0 %v8574_v37  ;;  %v8664_v29 = vpack.c.bf16 %v6100_v41, %v6092_v45  ;;  %v8594_v37 = vpack.c.bf16 %v6115_v23, %v6107_v54  ;;  %v6181_v47 = vld [vmem:[#allocation28 + $0x20d8] sm:$0xff]  ;;  %v6178_v22 = vld [vmem:[#allocation28 + $0x20c0] sm:$0xff]  ;;  %v6172_v45 = vld [vmem:[#allocation28 + $0x2090] sm:$0xff] }
0x1033   : > { %8647 = vmatprep.subr.bf16.mxu1 %v8646_v20  ;;  %v8666_v20 = vpack.c.bf16 %v6117_v63, %v6109_v26  ;;  %v6180_v41 = vld [vmem:[#allocation28 + $0x20d0] sm:$0xff]  ;;  %v6187_v54 = vld [vmem:[#allocation28 + $0x2108] sm:$0xff]  ;;  %v6189_v26 = vld [vmem:[#allocation28 + $0x2118] sm:$0xff] }
0x1034   : > { %v6195_v23 = vld [vmem:[#allocation28 + $0x2148] sm:$0xff]  ;;  %v6197_v63 = vld [vmem:[#allocation28 + $0x2158] sm:$0xff] }
0x1035   : > { %8577 = vmatpush1.bf16.msra.mxu0 %v8576_v40  ;;  %v8596_v40 = vpack.c.bf16 %v6114_v32, %v6106_v31  ;;  %v6186_v31 = vld [vmem:[#allocation28 + $0x2100] sm:$0xff] }
0x1036   : > { %8649 = vmatpush1.bf16.msra.mxu1 %v8648_v13  ;;  %8579 = vmatprep.subr.bf16.mxu0 %v8578_v14  ;;  %v8668_v13 = vpack.c.bf16 %v6116_v35, %v6108_v33  ;;  %v8598_v14 = vpack.c.bf16 %v6131_v28, %v6123_v38  ;;  %v6194_v32 = vld [vmem:[#allocation28 + $0x2140] sm:$0xff]  ;;  %v6188_v33 = vld [vmem:[#allocation28 + $0x2110] sm:$0xff]  ;;  %v6203_v38 = vld [vmem:[#allocation28 + $0x2188] sm:$0xff] }
0x1037   : > { %8651 = vmatprep.subr.bf16.mxu1 %v8650_v44  ;;  %v8670_v44 = vpack.c.bf16 %v6133_v39, %v6125_v59  ;;  %v6196_v35 = vld [vmem:[#allocation28 + $0x2150] sm:$0xff]  ;;  %v6211_v28 = vld [vmem:[#allocation28 + $0x21c8] sm:$0xff]  ;;  %v6205_v59 = vld [vmem:[#allocation28 + $0x2198] sm:$0xff] }
0x1038   : > { %v6213_v39 = vld [vmem:[#allocation28 + $0x21d8] sm:$0xff] }
0x1039   : > { %8581 = vmatpush1.bf16.msra.mxu0 %v8580_v19  ;;  %v8600_v19 = vpack.c.bf16 %v6130_v43, %v6122_v42  ;;  %v6202_v42 = vld [vmem:[#allocation28 + $0x2180] sm:$0xff] }
0x103a   : > { %8653 = vmatpush1.bf16.msra.mxu1 %v8652_v51  ;;  %8583 = vmatprep.subr.bf16.mxu0 %v8582_v52  ;;  %v8672_v51 = vpack.c.bf16 %v6132_v15, %v6124_v12  ;;  %v8602_v52 = vpack.c.bf16 %v6147_v48, %v6139_v46  ;;  %v6210_v43 = vld [vmem:[#allocation28 + $0x21c0] sm:$0xff]  ;;  %v6204_v12 = vld [vmem:[#allocation28 + $0x2190] sm:$0xff]  ;;  %v6219_v46 = vld [vmem:[#allocation28 + $0x2208] sm:$0xff] }
0x103b   : > { %8655 = vmatprep.subr.bf16.mxu1 %v8654_v56  ;;  %v8674_v56 = vpack.c.bf16 %v6149_v50, %v6141_v49  ;;  %v6212_v15 = vld [vmem:[#allocation28 + $0x21d0] sm:$0xff]  ;;  %v6227_v48 = vld [vmem:[#allocation28 + $0x2248] sm:$0xff]  ;;  %v6221_v49 = vld [vmem:[#allocation28 + $0x2218] sm:$0xff] }
0x103c   : > { %v6229_v50 = vld [vmem:[#allocation28 + $0x2258] sm:$0xff] }
0x103d   : > { %8585 = vmatpush1.bf16.msra.mxu0 %v8584_v3  ;;  %v8604_v3 = vpack.c.bf16 %v6146_v16, %v6138_v53  ;;  %v6218_v53 = vld [vmem:[#allocation28 + $0x2200] sm:$0xff] }
0x103e   : > { %8657 = vmatpush1.bf16.msra.mxu1 %v8656_v58  ;;  %8587 = vmatprep.subr.bf16.mxu0 %v8586_v4  ;;  %v8676_v58 = vpack.c.bf16 %v6148_v60, %v6140_v0  ;;  %v8606_v4 = vpack.c.bf16 %v6163_v62, %v6155_v61  ;;  %v6226_v16 = vld [vmem:[#allocation28 + $0x2240] sm:$0xff]  ;;  %v6220_v0 = vld [vmem:[#allocation28 + $0x2210] sm:$0xff]  ;;  %v6235_v61 = vld [vmem:[#allocation28 + $0x2288] sm:$0xff] }
0x103f   : > { %8659 = vmatprep.subr.bf16.mxu1 %v8658_v7  ;;  %v8678_v7 = vpack.c.bf16 %v6165_v2, %v6157_v1  ;;  %v6228_v60 = vld [vmem:[#allocation28 + $0x2250] sm:$0xff]  ;;  %v6243_v62 = vld [vmem:[#allocation28 + $0x22c8] sm:$0xff]  ;;  %v6237_v1 = vld [vmem:[#allocation28 + $0x2298] sm:$0xff] }
0x1040   : > { %v6245_v2 = vld [vmem:[#allocation28 + $0x22d8] sm:$0xff] }
0x1041   : > { %8589 = vmatpush1.bf16.msra.mxu0 %v8588_v11  ;;  %v8608_v11 = vpack.c.bf16 %v6162_v6, %v6154_v5  ;;  %v6234_v5 = vld [vmem:[#allocation28 + $0x2280] sm:$0xff] }
0x1042   : > { %8661 = vmatpush1.bf16.msra.mxu1 %v8660_v57  ;;  %8591 = vmatprep.subr.bf16.mxu0 %v8590_v17  ;;  %v8680_v57 = vpack.c.bf16 %v6164_v8, %v6156_v30  ;;  %v8610_v17 = vpack.c.bf16 %v6179_v9, %v6171_v55  ;;  %v6242_v6 = vld [vmem:[#allocation28 + $0x22c0] sm:$0xff]  ;;  %v6236_v30 = vld [vmem:[#allocation28 + $0x2290] sm:$0xff]  ;;  %v6251_v55 = vld [vmem:[#allocation28 + $0x2308] sm:$0xff] }
0x1043   : > { %8663 = vmatprep.subr.bf16.mxu1 %v8662_v34  ;;  %v8682_v34 = vpack.c.bf16 %v6181_v47, %v6173_v10  ;;  %v6244_v8 = vld [vmem:[#allocation28 + $0x22d0] sm:$0xff]  ;;  %v6259_v9 = vld [vmem:[#allocation28 + $0x2348] sm:$0xff]  ;;  %v6253_v10 = vld [vmem:[#allocation28 + $0x2318] sm:$0xff] }
0x1044   : > { %v6261_v47 = vld [vmem:[#allocation28 + $0x2358] sm:$0xff]  ;;  %v8700_v36 = vpack.c.bf16 %v6244_v8, %v6236_v30  ;;  %v6032_v30 = vld [vmem:[#allocation28 + $0x1c30] sm:$0xff] }
0x1045   : > { %8593 = vmatpush1.bf16.msra.mxu0 %v8592_v25  ;;  %v8612_v25 = vpack.c.bf16 %v6178_v22, %v6170_v18  ;;  %v6258_v18 = vld [vmem:[#allocation28 + $0x2340] sm:$0xff]  ;;  %v6252_v22 = vld [vmem:[#allocation28 + $0x2310] sm:$0xff] }
0x1046   : > { %8665 = vmatpush1.bf16.msra.mxu1 %v8664_v29  ;;  %8595 = vmatprep.subr.bf16.mxu0 %v8594_v37  ;;  %v8684_v29 = vpack.c.bf16 %v6180_v41, %v6172_v45  ;;  %v8614_v37 = vpack.c.bf16 %v6195_v23, %v6187_v54  ;;  %v8702_v45 = vpack.c.bf16 %v6261_v47, %v6253_v10  ;;  %v6267_v41 = vld [vmem:[#allocation28 + $0x2388] sm:$0xff]  ;;  %v6269_v23 = vld [vmem:[#allocation28 + $0x2398] sm:$0xff]  ;;  %v6040_v8 = vld [vmem:[#allocation28 + $0x1c70] sm:$0xff] }
0x1047   : > { %8667 = vmatprep.subr.bf16.mxu1 %v8666_v20  ;;  %v8686_v20 = vpack.c.bf16 %v6197_v63, %v6189_v26  ;;  %v6275_v54 = vld [vmem:[#allocation28 + $0x23c8] sm:$0xff]  ;;  %v6277_v26 = vld [vmem:[#allocation28 + $0x23d8] sm:$0xff] }
0x1048   : > { %v6049_v10 = vld [vmem:[#allocation28 + $0x1cb8] sm:$0xff] }
0x1049   : > { %8597 = vmatpush1.bf16.msra.mxu0 %v8596_v40  ;;  %v8616_v40 = vpack.c.bf16 %v6194_v32, %v6186_v31  ;;  %v6274_v31 = vld [vmem:[#allocation28 + $0x23c0] sm:$0xff]  ;;  %v6268_v32 = vld [vmem:[#allocation28 + $0x2390] sm:$0xff]  ;;  %v6057_v47 = vld [vmem:[#allocation28 + $0x1cf8] sm:$0xff] }
0x104a   : > { %8669 = vmatpush1.bf16.msra.mxu1 %v8668_v13  ;;  %8599 = vmatprep.subr.bf16.mxu0 %v8598_v14  ;;  %v8688_v13 = vpack.c.bf16 %v6196_v35, %v6188_v33  ;;  %v8618_v14 = vpack.c.bf16 %v6211_v28, %v6203_v38  ;;  %v10949_v33 = vpop.eup %9263  ;;  %v6276_v35 = vld [vmem:[#allocation28 + $0x23d0] sm:$0xff]  ;;  %v5999_v38 = vld [vmem:[#allocation28 + $0x1b28] sm:$0xff] }
0x104b   : > { %8671 = vmatprep.subr.bf16.mxu1 %v8670_v44  ;;  %v8690_v44 = vpack.c.bf16 %v6213_v39, %v6205_v59  ;;  %v6007_v28 = vld [vmem:[#allocation28 + $0x1b68] sm:$0xff]  ;;  %v6001_v59 = vld [vmem:[#allocation28 + $0x1b38] sm:$0xff] }
0x104d   : > { %8601 = vmatpush1.bf16.msra.mxu0 %v8600_v19  ;;  %v8620_v19 = vpack.c.bf16 %v6210_v43, %v6202_v42  ;;  %v6006_v42 = vld [vmem:[#allocation28 + $0x1b60] sm:$0xff]  ;;  %v8782_v43 = vpack.c.bf16 %v6009_v24, %v6001_v59  ;;  %v6089_v59 = vld [vmem:[#allocation28 + $0x1df8] sm:$0xff] }
0x104e   : > { %8673 = vmatpush1.bf16.msra.mxu1 %v8672_v51  ;;  %8603 = vmatprep.subr.bf16.mxu0 %v8602_v52  ;;  %v8692_v51 = vpack.c.bf16 %v6212_v15, %v6204_v12  ;;  %v8622_v52 = vpack.c.bf16 %v6227_v48, %v6219_v46  ;;  %v6000_v12 = vld [vmem:[#allocation28 + $0x1b30] sm:$0xff]  ;;  %v6015_v15 = vld [vmem:[#allocation28 + $0x1ba8] sm:$0xff] }
0x104f   : > { %8675 = vmatprep.subr.bf16.mxu1 %v8674_v56  ;;  %v8694_v56 = vpack.c.bf16 %v6229_v50, %v6221_v49  ;;  %v6023_v46 = vld [vmem:[#allocation28 + $0x1be8] sm:$0xff]  ;;  %v6017_v49 = vld [vmem:[#allocation28 + $0x1bb8] sm:$0xff] }
0x1050   : > { %v6025_v50 = vld [vmem:[#allocation28 + $0x1bf8] sm:$0xff] }
0x1051   : > { %8605 = vmatpush1.bf16.msra.mxu0 %v8604_v3  ;;  %v8624_v3 = vpack.c.bf16 %v6226_v16, %v6218_v53  ;;  %v6016_v53 = vld [vmem:[#allocation28 + $0x1bb0] sm:$0xff]  ;;  %v10955_v16 = vpop.eup %9265 }
0x1052   : > { %8677 = vmatpush1.bf16.msra.mxu1 %v8676_v58  ;;  %8607 = vmatprep.subr.bf16.mxu0 %v8606_v4  ;;  %v8696_v58 = vpack.c.bf16 %v6228_v60, %v6220_v0  ;;  %v8626_v4 = vpack.c.bf16 %v6243_v62, %v6235_v61  ;;  %v8714_v0 = vpack.c.bf16 %v6023_v46, %v6015_v15  ;;  %v6031_v60 = vld [vmem:[#allocation28 + $0x1c28] sm:$0xff]  ;;  %v6097_v46 = vld [vmem:[#allocation28 + $0x1e38] sm:$0xff] }
0x1053   : > { %8679 = vmatprep.subr.bf16.mxu1 %v8678_v7  ;;  %v8698_v7 = vpack.c.bf16 %v6245_v2, %v6237_v1  ;;  %v6039_v61 = vld [vmem:[#allocation28 + $0x1c68] sm:$0xff]  ;;  %v8786_v62 = vpack.c.bf16 %v6025_v50, %v6017_v49  ;;  %v6033_v1 = vld [vmem:[#allocation28 + $0x1c38] sm:$0xff] }
0x1054   : > { %v6041_v2 = vld [vmem:[#allocation28 + $0x1c78] sm:$0xff]  ;;  %v6103_v15 = vld [vmem:[#allocation28 + $0x1e68] sm:$0xff] }
0x1055   : > { %8609 = vmatpush1.bf16.msra.mxu0 %v8608_v11  ;;  %v8628_v11 = vpack.c.bf16 %v6242_v6, %v6234_v5  ;;  %v6030_v5 = vld [vmem:[#allocation28 + $0x1c20] sm:$0xff] }
0x1056   : > { %8681 = vmatpush1.bf16.msra.mxu1 %v8680_v57  ;;  %8611 = vmatprep.subr.bf16.mxu0 %v8610_v17  ;;  %v8630_v57 = vpack.c.bf16 %v6259_v9, %v6251_v55  ;;  %v6250_v17 = vld [vmem:[#allocation28 + $0x2300] sm:$0xff]  ;;  %v6047_v55 = vld [vmem:[#allocation28 + $0x1ca8] sm:$0xff] }
0x1057   : > { %8683 = vmatprep.subr.bf16.mxu1 %v8682_v34  ;;  %v6260_v34 = vld [vmem:[#allocation28 + $0x2350] sm:$0xff]  ;;  %v8632_v63 = vpack.c.bf16 %v6258_v18, %v6250_v17  ;;  %v6038_v6 = vld [vmem:[#allocation28 + $0x1c60] sm:$0xff]  ;;  %v6055_v9 = vld [vmem:[#allocation28 + $0x1ce8] sm:$0xff] }
0x1058   : > { %v6046_v17 = vld [vmem:[#allocation28 + $0x1ca0] sm:$0xff] }
0x1059   : > { %8613 = vmatpush1.bf16.msra.mxu0 %v8612_v25  ;;  %v8704_v25 = vpack.c.bf16 %v6260_v34, %v6252_v22  ;;  %v6054_v18 = vld [vmem:[#allocation28 + $0x1ce0] sm:$0xff]  ;;  %v6048_v22 = vld [vmem:[#allocation28 + $0x1cb0] sm:$0xff]  ;;  %v6063_v34 = vld [vmem:[#allocation28 + $0x1d28] sm:$0xff] }
0x105a   : > { %8685 = vmatpush1.bf16.msra.mxu1 %v8684_v29  ;;  %8615 = vmatprep.subr.bf16.mxu0 %v8614_v37  ;;  %v8634_v29 = vpack.c.bf16 %v6275_v54, %v6267_v41  ;;  %v6266_v37 = vld [vmem:[#allocation28 + $0x2380] sm:$0xff]  ;;  %v6071_v41 = vld [vmem:[#allocation28 + $0x1d68] sm:$0xff]  ;;  %v6065_v54 = vld [vmem:[#allocation28 + $0x1d38] sm:$0xff] }
0x105b   : > { %8687 = vmatprep.subr.bf16.mxu1 %v8686_v20  ;;  %v8706_v20 = vpack.c.bf16 %v6277_v26, %v6269_v23  ;;  %v8636_v39 = vpack.c.bf16 %v6274_v31, %v6266_v37  ;;  %v6073_v23 = vld [vmem:[#allocation28 + $0x1d78] sm:$0xff]  ;;  %v8724_v26 = vpack.c.bf16 %v6054_v18, %v6046_v17  ;;  %v6070_v37 = vld [vmem:[#allocation28 + $0x1d60] sm:$0xff]  ;;  %v6064_v31 = vld [vmem:[#allocation28 + $0x1d30] sm:$0xff] }
0x105c   : > { %v6134_v17 = vld [vmem:[#allocation28 + $0x1f60] sm:$0xff]  ;;  %v6128_v18 = vld [vmem:[#allocation28 + $0x1f30] sm:$0xff] }
0x105d   : > { %8617 = vmatpush1.bf16.msra.mxu0 %v8616_v40  ;;  %v8708_v40 = vpack.c.bf16 %v6276_v35, %v6268_v32  ;;  %v8798_v32 = vpack.c.bf16 %v6073_v23, %v6065_v54  ;;  %v6079_v35 = vld [vmem:[#allocation28 + $0x1da8] sm:$0xff]  ;;  %v6153_v54 = vld [vmem:[#allocation28 + $0x1ff8] sm:$0xff] }
0x105e   : > { %8689 = vmatpush1.bf16.msra.mxu1 %v8688_v13  ;;  %8619 = vmatprep.subr.bf16.mxu0 %v8618_v14  ;;  %v8710_v13 = vpack.c.bf16 %v6007_v28, %v5999_v38  ;;  %v5998_v14 = vld [vmem:[#allocation28 + $0x1b20] sm:$0xff]  ;;  %v6087_v38 = vld [vmem:[#allocation28 + $0x1de8] sm:$0xff]  ;;  %v6081_v28 = vld [vmem:[#allocation28 + $0x1db8] sm:$0xff] }
0x105f   : > { %8691 = vmatprep.subr.bf16.mxu1 %v8690_v44  ;;  %v6008_v44 = vld [vmem:[#allocation28 + $0x1b70] sm:$0xff]  ;;  %v8712_v48 = vpack.c.bf16 %v6006_v42, %v5998_v14  ;;  %v6086_v14 = vld [vmem:[#allocation28 + $0x1de0] sm:$0xff] }
0x1060   : > { %v6080_v42 = vld [vmem:[#allocation28 + $0x1db0] sm:$0xff] }
0x1061   : > { %8621 = vmatpush1.bf16.msra.mxu0 %v8620_v19  ;;  %v8784_v19 = vpack.c.bf16 %v6008_v44, %v6000_v12  ;;  %v6088_v12 = vld [vmem:[#allocation28 + $0x1df0] sm:$0xff]  ;;  %v6095_v44 = vld [vmem:[#allocation28 + $0x1e28] sm:$0xff] }
0x1062   : > { %8693 = vmatpush1.bf16.msra.mxu1 %v8692_v51  ;;  %8623 = vmatprep.subr.bf16.mxu0 %v8622_v52  ;;  %v6014_v51 = vld [vmem:[#allocation28 + $0x1ba0] sm:$0xff]  ;;  %v8804_v50 = vpack.c.bf16 %v6088_v12, %v6080_v42  ;;  %v6175_v12 = vld [vmem:[#allocation28 + $0x20a8] sm:$0xff] }
0x1063   : > { %8695 = vmatprep.subr.bf16.mxu1 %v8694_v56  ;;  %v6022_v52 = vld [vmem:[#allocation28 + $0x1be0] sm:$0xff]  ;;  %v6024_v56 = vld [vmem:[#allocation28 + $0x1bf0] sm:$0xff] }
0x1065   : > { %8625 = vmatpush1.bf16.msra.mxu0 %v8624_v3  ;;  %v8716_v3 = vpack.c.bf16 %v6022_v52, %v6014_v51  ;;  %v6094_v51 = vld [vmem:[#allocation28 + $0x1e20] sm:$0xff] }
0x1066   : > { %8697 = vmatpush1.bf16.msra.mxu1 %v8696_v58  ;;  %8627 = vmatprep.subr.bf16.mxu0 %v8626_v4  ;;  %v8788_v58 = vpack.c.bf16 %v6024_v56, %v6016_v53  ;;  %v8718_v4 = vpack.c.bf16 %v6039_v61, %v6031_v60  ;;  %v6102_v52 = vld [vmem:[#allocation28 + $0x1e60] sm:$0xff]  ;;  %v6096_v53 = vld [vmem:[#allocation28 + $0x1e30] sm:$0xff]  ;;  %v6111_v60 = vld [vmem:[#allocation28 + $0x1ea8] sm:$0xff] }
0x1067   : > { %8699 = vmatprep.subr.bf16.mxu1 %v8698_v7  ;;  %v8790_v7 = vpack.c.bf16 %v6041_v2, %v6033_v1  ;;  %v6104_v56 = vld [vmem:[#allocation28 + $0x1e70] sm:$0xff]  ;;  %v6119_v61 = vld [vmem:[#allocation28 + $0x1ee8] sm:$0xff]  ;;  %v6121_v1 = vld [vmem:[#allocation28 + $0x1ef8] sm:$0xff]  ;;  %v8736_v2 = vpack.c.bf16 %v6102_v52, %v6094_v51 }
0x1068   : > { %v6182_v51 = vld [vmem:[#allocation28 + $0x20e0] sm:$0xff]  ;;  %v6176_v52 = vld [vmem:[#allocation28 + $0x20b0] sm:$0xff] }
0x1069   : > { %8629 = vmatpush1.bf16.msra.mxu0 %v8628_v11  ;;  %v8720_v11 = vpack.c.bf16 %v6038_v6, %v6030_v5  ;;  %v6118_v5 = vld [vmem:[#allocation28 + $0x1ee0] sm:$0xff]  ;;  %v6112_v6 = vld [vmem:[#allocation28 + $0x1eb0] sm:$0xff] }
0x106a   : > { %8701 = vmatpush1.bf16.msra.mxu1 %v8700_v36  ;;  %8631 = vmatprep.subr.bf16.mxu0 %v8630_v57  ;;  %v8792_v36 = vpack.c.bf16 %v6040_v8, %v6032_v30  ;;  %v8722_v57 = vpack.c.bf16 %v6055_v9, %v6047_v55  ;;  %v6127_v8 = vld [vmem:[#allocation28 + $0x1f28] sm:$0xff]  ;;  %v6129_v9 = vld [vmem:[#allocation28 + $0x1f38] sm:$0xff] }
0x106b   : > { %8703 = vmatprep.subr.bf16.mxu1 %v8702_v45  ;;  %v8794_v45 = vpack.c.bf16 %v6057_v47, %v6049_v10  ;;  %v6135_v55 = vld [vmem:[#allocation28 + $0x1f68] sm:$0xff]  ;;  %v6137_v10 = vld [vmem:[#allocation28 + $0x1f78] sm:$0xff] }
0x106c   : > { %6350 = vmatmul.mubr.f32.vlgmr.msra.gmra.mrb[40].mxu0 %v10949_v33 }
0x106d   : > { %6492 = vmatmul.mubr.f32.vlgmr.msra.gmra.mrb[40].mxu1 %v10949_v33  ;;  %8633 = vmatpush1.bf16.msra.mxu0 %v8632_v63 }
0x106e   : > { %8705 = vmatpush1.bf16.msra.mxu1 %v8704_v25  ;;  %8635 = vmatprep.subr.bf16.mxu0 %v8634_v29  ;;  %v8726_v25 = vpack.c.bf16 %v6071_v41, %v6063_v34  ;;  %v6062_v29 = vld [vmem:[#allocation28 + $0x1d20] sm:$0xff]  ;;  %v6151_v34 = vld [vmem:[#allocation28 + $0x1fe8] sm:$0xff]  ;;  %v6145_v41 = vld [vmem:[#allocation28 + $0x1fb8] sm:$0xff] }
0x106f   : > { %8707 = vmatprep.subr.bf16.mxu1 %v8706_v20  ;;  %6420 = vmatprep.mubr.f32.mxu0 %v9785_v21  ;;  %v6072_v20 = vld [vmem:[#allocation28 + $0x1d70] sm:$0xff]  ;;  %v8728_v24 = vpack.c.bf16 %v6070_v37, %v6062_v29  ;;  %v6150_v29 = vld [vmem:[#allocation28 + $0x1fe0] sm:$0xff] }
0x1070   : > { %6562 = vmatprep.mubr.f32.mxu1 %v9785_v21  ;;  %v6144_v37 = vld [vmem:[#allocation28 + $0x1fb0] sm:$0xff] }
0x1071   : > { %8637 = vmatpush1.bf16.msra.mxu0 %v8636_v39  ;;  %v8800_v39 = vpack.c.bf16 %v6072_v20, %v6064_v31  ;;  %v8818_v31 = vpack.c.bf16 %v6153_v54, %v6145_v41  ;;  %v6159_v20 = vld [vmem:[#allocation28 + $0x2028] sm:$0xff]  ;;  %v6233_v41 = vld [vmem:[#allocation28 + $0x2278] sm:$0xff] }
0x1072   : > { %8709 = vmatpush1.bf16.msra.mxu1 %v8708_v40  ;;  %8711 = vmatprep.subr.bf16.mxu0 %v8710_v13  ;;  %v8730_v40 = vpack.c.bf16 %v6087_v38, %v6079_v35  ;;  %v6078_v13 = vld [vmem:[#allocation28 + $0x1da0] sm:$0xff]  ;;  %v6167_v35 = vld [vmem:[#allocation28 + $0x2068] sm:$0xff]  ;;  %v6161_v38 = vld [vmem:[#allocation28 + $0x2038] sm:$0xff] }
0x1073   : > { %8783 = vmatprep.subr.bf16.mxu1 %v8782_v43  ;;  %v8802_v43 = vpack.c.bf16 %v6089_v59, %v6081_v28  ;;  %v8732_v49 = vpack.c.bf16 %v6086_v14, %v6078_v13  ;;  %v6169_v28 = vld [vmem:[#allocation28 + $0x2078] sm:$0xff]  ;;  %v6166_v13 = vld [vmem:[#allocation28 + $0x2060] sm:$0xff]  ;;  %v6160_v14 = vld [vmem:[#allocation28 + $0x2030] sm:$0xff] }
0x1074   : > { %7310 = vmatmul.mubr.msk.f32.vlgmr.msra.gmra.mrb[40].mxu0 %vm2979_vm11, %v10955_v16  ;;  %v8822_v42 = vpack.c.bf16 %v6169_v28, %v6161_v38  ;;  %v6249_v38 = vld [vmem:[#allocation28 + $0x22f8] sm:$0xff] }
0x1075   : > { %7311 = vmatmul.mubr.msk.f32.vlgmr.msra.gmra.mrb[40].mxu1 %vm2979_vm11, %v10955_v16  ;;  %8713 = vmatpush1.bf16.msra.mxu0 %v8712_v48  ;;  %v6105_v48 = vld [vmem:[#allocation28 + $0x1e78] sm:$0xff] }
0x1076   : > { %6633 = vmatprep.mubr.f32.mxu0 %v10941_v27  ;;  %8785 = vmatpush1.bf16.msra.mxu1 %v8784_v19  ;;  %v8734_v19 = vpack.c.bf16 %v6103_v15, %v6095_v44  ;;  %v6183_v44 = vld [vmem:[#allocation28 + $0x20e8] sm:$0xff]  ;;  %v6177_v15 = vld [vmem:[#allocation28 + $0x20b8] sm:$0xff] }
0x1077   : > { %6775 = vmatprep.mubr.f32.mxu1 %v10941_v27  ;;  %8715 = vmatprep.subr.bf16.mxu0 %v8714_v0  ;;  %v6056_v27 = vld [vmem:[#allocation28 + $0x1cf0] sm:$0xff]  ;;  %v8806_v0 = vpack.c.bf16 %v6105_v48, %v6097_v46  ;;  %v6185_v46 = vld [vmem:[#allocation28 + $0x20f8] sm:$0xff] }
0x1078   : > { %8787 = vmatprep.subr.bf16.mxu1 %v8786_v62  ;;  %v8796_v63 = vpack.c.bf16 %v6056_v27, %v6048_v22  ;;  %v6113_v62 = vld [vmem:[#allocation28 + $0x1eb8] sm:$0xff]  ;;  %v8814_v22 = vpack.c.bf16 %v6137_v10, %v6129_v9  ;;  %v6143_v27 = vld [vmem:[#allocation28 + $0x1fa8] sm:$0xff] }
0x1079   : > { %8717 = vmatpush1.bf16.msra.mxu0 %v8716_v3  ;;  %v8808_v3 = vpack.c.bf16 %v6104_v56, %v6096_v53  ;;  %v8810_v30 = vpack.c.bf16 %v6121_v1, %v6113_v62  ;;  %v8826_v53 = vpack.c.bf16 %v6185_v46, %v6177_v15  ;;  %v6191_v56 = vld [vmem:[#allocation28 + $0x2128] sm:$0xff]  ;;  %v6201_v62 = vld [vmem:[#allocation28 + $0x2178] sm:$0xff] }
0x107a   : > { %8789 = vmatpush1.bf16.msra.mxu1 %v8788_v58  ;;  %8719 = vmatprep.subr.bf16.mxu0 %v8718_v4  ;;  %v8738_v58 = vpack.c.bf16 %v6119_v61, %v6111_v60  ;;  %v6110_v4 = vld [vmem:[#allocation28 + $0x1ea0] sm:$0xff]  ;;  %v6199_v60 = vld [vmem:[#allocation28 + $0x2168] sm:$0xff]  ;;  %v6193_v61 = vld [vmem:[#allocation28 + $0x2138] sm:$0xff] }
0x107b   : > { %8791 = vmatprep.subr.bf16.mxu1 %v8790_v7  ;;  %v6120_v7 = vld [vmem:[#allocation28 + $0x1ef0] sm:$0xff]  ;;  %v8740_v47 = vpack.c.bf16 %v6118_v5, %v6110_v4  ;;  %v6198_v4 = vld [vmem:[#allocation28 + $0x2160] sm:$0xff]  ;;  %v6217_v9 = vld [vmem:[#allocation28 + $0x21f8] sm:$0xff] }
0x107c   : > { %v6192_v5 = vld [vmem:[#allocation28 + $0x2130] sm:$0xff]  ;;  %v6265_v15 = vld [vmem:[#allocation28 + $0x2378] sm:$0xff] }
0x107d   : > { %8721 = vmatpush1.bf16.msra.mxu0 %v8720_v11  ;;  %v8812_v11 = vpack.c.bf16 %v6120_v7, %v6112_v6  ;;  %v8830_v6 = vpack.c.bf16 %v6201_v62, %v6193_v61  ;;  %v6207_v7 = vld [vmem:[#allocation28 + $0x21a8] sm:$0xff]  ;;  %v6281_v61 = vld [vmem:[#allocation28 + $0x23f8] sm:$0xff] }
0x107e   : > { %8793 = vmatpush1.bf16.msra.mxu1 %v8792_v36  ;;  %8723 = vmatprep.subr.bf16.mxu0 %v8722_v57  ;;  %v8742_v36 = vpack.c.bf16 %v6135_v55, %v6127_v8  ;;  %v6126_v57 = vld [vmem:[#allocation28 + $0x1f20] sm:$0xff]  ;;  %v6215_v8 = vld [vmem:[#allocation28 + $0x21e8] sm:$0xff]  ;;  %v6209_v55 = vld [vmem:[#allocation28 + $0x21b8] sm:$0xff] }
0x107f   : > { %8795 = vmatprep.subr.bf16.mxu1 %v8794_v45  ;;  %v6136_v45 = vld [vmem:[#allocation28 + $0x1f70] sm:$0xff]  ;;  %v8744_v23 = vpack.c.bf16 %v6134_v17, %v6126_v57  ;;  %v6214_v57 = vld [vmem:[#allocation28 + $0x21e0] sm:$0xff] }
0x1080   : > { %v6208_v17 = vld [vmem:[#allocation28 + $0x21b0] sm:$0xff] }
0x1081   : > { %8725 = vmatpush1.bf16.msra.mxu0 %v8724_v26  ;;  %v8816_v26 = vpack.c.bf16 %v6136_v45, %v6128_v18  ;;  %v8834_v18 = vpack.c.bf16 %v6217_v9, %v6209_v55  ;;  %v6223_v45 = vld [vmem:[#allocation28 + $0x2228] sm:$0xff] }
0x1082   : > { %8797 = vmatpush1.bf16.msra.mxu1 %v8796_v63  ;;  %8727 = vmatprep.subr.bf16.mxu0 %v8726_v25  ;;  %v8746_v63 = vpack.c.bf16 %v6151_v34, %v6143_v27  ;;  %v6142_v25 = vld [vmem:[#allocation28 + $0x1fa0] sm:$0xff]  ;;  %v6231_v27 = vld [vmem:[#allocation28 + $0x2268] sm:$0xff]  ;;  %v6225_v34 = vld [vmem:[#allocation28 + $0x2238] sm:$0xff] }
0x1083   : > { %8799 = vmatprep.subr.bf16.mxu1 %v8798_v32  ;;  %v6152_v32 = vld [vmem:[#allocation28 + $0x1ff0] sm:$0xff]  ;;  %v8748_v59 = vpack.c.bf16 %v6150_v29, %v6142_v25  ;;  %v6230_v25 = vld [vmem:[#allocation28 + $0x2260] sm:$0xff] }
0x1084   : > { %v6224_v29 = vld [vmem:[#allocation28 + $0x2230] sm:$0xff] }
0x1085   : > { %8729 = vmatpush1.bf16.msra.mxu0 %v8728_v24  ;;  %v8820_v24 = vpack.c.bf16 %v6152_v32, %v6144_v37  ;;  %v8838_v37 = vpack.c.bf16 %v6233_v41, %v6225_v34  ;;  %v6239_v32 = vld [vmem:[#allocation28 + $0x22a8] sm:$0xff] }
0x1086   : > { %8801 = vmatpush1.bf16.msra.mxu1 %v8800_v39  ;;  %8731 = vmatprep.subr.bf16.mxu0 %v8730_v40  ;;  %v8750_v39 = vpack.c.bf16 %v6167_v35, %v6159_v20  ;;  %v6158_v40 = vld [vmem:[#allocation28 + $0x2020] sm:$0xff]  ;;  %v6247_v20 = vld [vmem:[#allocation28 + $0x22e8] sm:$0xff]  ;;  %v6241_v35 = vld [vmem:[#allocation28 + $0x22b8] sm:$0xff] }
0x1087   : > { %8803 = vmatprep.subr.bf16.mxu1 %v8802_v43  ;;  %v6168_v43 = vld [vmem:[#allocation28 + $0x2070] sm:$0xff]  ;;  %v8752_v48 = vpack.c.bf16 %v6166_v13, %v6158_v40  ;;  %v6246_v40 = vld [vmem:[#allocation28 + $0x22e0] sm:$0xff] }
0x1088   : > { %v6240_v13 = vld [vmem:[#allocation28 + $0x22b0] sm:$0xff] }
0x1089   : > { %8733 = vmatpush1.bf16.msra.mxu0 %v8732_v49  ;;  %v8824_v49 = vpack.c.bf16 %v6168_v43, %v6160_v14  ;;  %v8842_v14 = vpack.c.bf16 %v6249_v38, %v6241_v35  ;;  %v6255_v43 = vld [vmem:[#allocation28 + $0x2328] sm:$0xff] }
0x108a   : > { %8805 = vmatpush1.bf16.msra.mxu1 %v8804_v50  ;;  %8735 = vmatprep.subr.bf16.mxu0 %v8734_v19  ;;  %v8754_v50 = vpack.c.bf16 %v6183_v44, %v6175_v12  ;;  %v6174_v19 = vld [vmem:[#allocation28 + $0x20a0] sm:$0xff]  ;;  %v6263_v12 = vld [vmem:[#allocation28 + $0x2368] sm:$0xff]  ;;  %v6257_v44 = vld [vmem:[#allocation28 + $0x2338] sm:$0xff] }
0x108b   : > { %8807 = vmatprep.subr.bf16.mxu1 %v8806_v0  ;;  %v6184_v0 = vld [vmem:[#allocation28 + $0x20f0] sm:$0xff]  ;;  %v8756_v1 = vpack.c.bf16 %v6182_v51, %v6174_v19  ;;  %v6262_v19 = vld [vmem:[#allocation28 + $0x2360] sm:$0xff] }
0x108c   : > { %v6256_v51 = vld [vmem:[#allocation28 + $0x2330] sm:$0xff] }
0x108d   : > { %8737 = vmatpush1.bf16.msra.mxu0 %v8736_v2  ;;  %v8828_v2 = vpack.c.bf16 %v6184_v0, %v6176_v52  ;;  %v8846_v52 = vpack.c.bf16 %v6265_v15, %v6257_v44  ;;  %v6271_v0 = vld [vmem:[#allocation28 + $0x23a8] sm:$0xff] }
0x108e   : > { %8809 = vmatpush1.bf16.msra.mxu1 %v8808_v3  ;;  %8739 = vmatprep.subr.bf16.mxu0 %v8738_v58  ;;  %v8758_v3 = vpack.c.bf16 %v6199_v60, %v6191_v56  ;;  %v6190_v58 = vld [vmem:[#allocation28 + $0x2120] sm:$0xff]  ;;  %v6279_v56 = vld [vmem:[#allocation28 + $0x23e8] sm:$0xff]  ;;  %v6273_v60 = vld [vmem:[#allocation28 + $0x23b8] sm:$0xff] }
0x108f   : > { %8811 = vmatprep.subr.bf16.mxu1 %v8810_v30  ;;  %v6200_v30 = vld [vmem:[#allocation28 + $0x2170] sm:$0xff]  ;;  %v8760_v10 = vpack.c.bf16 %v6198_v4, %v6190_v58  ;;  %v6278_v58 = vld [vmem:[#allocation28 + $0x23e0] sm:$0xff]  ;;  %v8850_v4 = vpack.c.bf16 %v6281_v61, %v6273_v60 }
0x1091   : > { %8741 = vmatpush1.bf16.msra.mxu0 %v8740_v47  ;;  %v8832_v47 = vpack.c.bf16 %v6200_v30, %v6192_v5  ;;  %v6272_v5 = vld [vmem:[#allocation28 + $0x23b0] sm:$0xff] }
0x1092   : > { %8813 = vmatpush1.bf16.msra.mxu1 %v8812_v11  ;;  %8743 = vmatprep.subr.bf16.mxu0 %v8742_v36  ;;  %v8762_v11 = vpack.c.bf16 %v6215_v8, %v6207_v7  ;;  %v6206_v36 = vld [vmem:[#allocation28 + $0x21a0] sm:$0xff] }
0x1093   : > { %8815 = vmatprep.subr.bf16.mxu1 %v8814_v22  ;;  %v6216_v22 = vld [vmem:[#allocation28 + $0x21f0] sm:$0xff]  ;;  %v8764_v54 = vpack.c.bf16 %v6214_v57, %v6206_v36 }
0x1095   : > { %8745 = vmatpush1.bf16.msra.mxu0 %v8744_v23  ;;  %v8836_v23 = vpack.c.bf16 %v6216_v22, %v6208_v17 }
0x1096   : > { %8817 = vmatpush1.bf16.msra.mxu1 %v8816_v26  ;;  %8747 = vmatprep.subr.bf16.mxu0 %v8746_v63  ;;  %v8766_v26 = vpack.c.bf16 %v6231_v27, %v6223_v45  ;;  %v6222_v63 = vld [vmem:[#allocation28 + $0x2220] sm:$0xff] }
0x1097   : > { %8819 = vmatprep.subr.bf16.mxu1 %v8818_v31  ;;  %v6232_v31 = vld [vmem:[#allocation28 + $0x2270] sm:$0xff]  ;;  %v8768_v28 = vpack.c.bf16 %v6230_v25, %v6222_v63 }
0x1099   : > { %8749 = vmatpush1.bf16.msra.mxu0 %v8748_v59  ;;  %v8840_v59 = vpack.c.bf16 %v6232_v31, %v6224_v29 }
0x109a   : > { %8821 = vmatpush1.bf16.msra.mxu1 %v8820_v24  ;;  %8751 = vmatprep.subr.bf16.mxu0 %v8750_v39  ;;  %v8770_v24 = vpack.c.bf16 %v6247_v20, %v6239_v32  ;;  %v6238_v39 = vld [vmem:[#allocation28 + $0x22a0] sm:$0xff] }
0x109b   : > { %8823 = vmatprep.subr.bf16.mxu1 %v8822_v42  ;;  %v6248_v42 = vld [vmem:[#allocation28 + $0x22f0] sm:$0xff]  ;;  %v8772_v46 = vpack.c.bf16 %v6246_v40, %v6238_v39 }
0x109d   : > { %8753 = vmatpush1.bf16.msra.mxu0 %v8752_v48  ;;  %v8844_v48 = vpack.c.bf16 %v6248_v42, %v6240_v13 }
0x109e   : > { %8825 = vmatpush1.bf16.msra.mxu1 %v8824_v49  ;;  %8755 = vmatprep.subr.bf16.mxu0 %v8754_v50  ;;  %v8774_v49 = vpack.c.bf16 %v6263_v12, %v6255_v43  ;;  %v6254_v50 = vld [vmem:[#allocation28 + $0x2320] sm:$0xff] }
0x109f   : > { %8827 = vmatprep.subr.bf16.mxu1 %v8826_v53  ;;  %v6264_v53 = vld [vmem:[#allocation28 + $0x2370] sm:$0xff]  ;;  %v8776_v62 = vpack.c.bf16 %v6262_v19, %v6254_v50 }
0x10a1   : > { %8757 = vmatpush1.bf16.msra.mxu0 %v8756_v1  ;;  %v8848_v1 = vpack.c.bf16 %v6264_v53, %v6256_v51 }
0x10a2   : > { %8829 = vmatpush1.bf16.msra.mxu1 %v8828_v2  ;;  %8759 = vmatprep.subr.bf16.mxu0 %v8758_v3  ;;  %v8778_v2 = vpack.c.bf16 %v6279_v56, %v6271_v0  ;;  %v6270_v3 = vld [vmem:[#allocation28 + $0x23a0] sm:$0xff] }
0x10a3   : > { %8831 = vmatprep.subr.bf16.mxu1 %v8830_v6  ;;  %v6280_v6 = vld [vmem:[#allocation28 + $0x23f0] sm:$0xff]  ;;  %v8780_v30 = vpack.c.bf16 %v6278_v58, %v6270_v3 }
0x10a4   : > { %v8852_v7 = vpack.c.bf16 %v6280_v6, %v6272_v5 }
0x10a5   : > { %8761 = vmatpush1.bf16.msra.mxu0 %v8760_v10 }
0x10a6   : > { %8833 = vmatpush1.bf16.msra.mxu1 %v8832_v47  ;;  %8763 = vmatprep.subr.bf16.mxu0 %v8762_v11 }
0x10a7   : > { %8835 = vmatprep.subr.bf16.mxu1 %v8834_v18 }
0x10a9   : > { %8765 = vmatpush1.bf16.msra.mxu0 %v8764_v54 }
0x10aa   : > { %8837 = vmatpush1.bf16.msra.mxu1 %v8836_v23  ;;  %8767 = vmatprep.subr.bf16.mxu0 %v8766_v26 }
0x10ab   : > { %8839 = vmatprep.subr.bf16.mxu1 %v8838_v37 }
0x10ad   : > { %8769 = vmatpush1.bf16.msra.mxu0 %v8768_v28 }
0x10ae   : > { %8841 = vmatpush1.bf16.msra.mxu1 %v8840_v59  ;;  %8771 = vmatprep.subr.bf16.mxu0 %v8770_v24 }
0x10af   : > { %8843 = vmatprep.subr.bf16.mxu1 %v8842_v14 }
0x10b1   : > { %8773 = vmatpush1.bf16.msra.mxu0 %v8772_v46 }
0x10b2   : > { %8845 = vmatpush1.bf16.msra.mxu1 %v8844_v48  ;;  %8775 = vmatprep.subr.bf16.mxu0 %v8774_v49 }
0x10b3   : > { %8847 = vmatprep.subr.bf16.mxu1 %v8846_v52 }
0x10b4   : > { %6634 = vmatmul.mubr.f32.vlgmr.msra.gmra.mrb[42].mxu0 %v10949_v33 }
0x10b5   : > { %6776 = vmatmul.mubr.f32.vlgmr.msra.gmra.mrb[42].mxu1 %v10949_v33  ;;  %8777 = vmatpush1.bf16.msra.mxu0 %v8776_v62 }
0x10b6   : > { %8849 = vmatpush1.bf16.msra.mxu1 %v8848_v1  ;;  %8779 = vmatprep.subr.bf16.mxu0 %v8778_v2 }
0x10b7   : > { %8851 = vmatprep.subr.bf16.mxu1 %v8850_v4  ;;  %6704 = vmatprep.mubr.f32.mxu0 %v9785_v21 }
0x10b8   : > { %6846 = vmatprep.mubr.f32.mxu1 %v9785_v21 }
0x10b9   : > { %8781 = vmatpush1.bf16.msra.mxu0 %v8780_v30 }
0x10ba   : > { %8853 = vmatpush1.bf16.msra.mxu1 %v8852_v7 }
0x10bc   : > { %7312 = vmatmul.mubr.msk.f32.vlgmr.msra.gmra.mrb[42].mxu0 %vm2979_vm11, %v10955_v16 }
0x10bd   : > { %7313 = vmatmul.mubr.msk.f32.vlgmr.msra.gmra.mrb[42].mxu1 %vm2979_vm11, %v10955_v16 }
0x1147   : > { %v6422_v33 = vpop.f32.mrb[40].mxu0 }
0x1148   : > { %v6564_v8 = vpop.f32.mrb[40].mxu1  ;;  %v6424_v55 = vpop.f32.mrb[41].mxu0 }
0x1149   : > { %v6869_v9 = vcombine.low %v6422_v33, %v6424_v55  ;;  %v6566_v10 = vpop.f32.mrb[41].mxu1 }
0x114a   : > { %v6870_v47 = vcombine.low %v6564_v8, %v6566_v10 }
0x114b   : > { %6877 = vst [vmem:[%s798_s18] sm:$0x77] %v6869_v9 }
0x114c   : > { %6878 = vst [vmem:[%s798_s18 + $0x8] sm:$0x77] %v6870_v47 }
0x118f   : > { %v6706_v21 = vpop.f32.mrb[42].mxu0 }
0x1190   : > { %v6848_v11 = vpop.f32.mrb[42].mxu1  ;;  %v6708_v36 = vpop.f32.mrb[43].mxu0 }
0x1191   : > { %v6871_v57 = vcombine.low %v6706_v21, %v6708_v36  ;;  %v6850_v17 = vpop.f32.mrb[43].mxu1 }
0x1192   : > { %v6872_v18 = vcombine.low %v6848_v11, %v6850_v17 }
0x1193   : > { %6879 = vst [vmem:[%s798_s18 + $0x10] sm:$0x77] %v6871_v57 }
0x1194   : > { %6880 = vst [vmem:[%s798_s18 + $0x18] sm:$0x77] %v6872_v18 }
0x1195 PF: > { %s11062_s2 = sld [smem:[#allocation39_spill]] }
0x119b   : > { %s37_s27 = sadd.s32 1, %s11062_s2  }
0x119c   : > { %p34_p5 = scmp.ge.s32.totalorder %s37_s27, 4  }
0x119e   :  { %36 = sbr.rel (!%p34_p5) target bundleno = 18 (0x12), region = 205 }
0x11a5   :  { %6902 = vsyncpa [#allocation6], 1 }
0x11a6   :  { %6904 = vsyncpa [#allocation6 + $0x1], 1 }
0x11a7   :  { %6905 = vsyncpa [#allocation8], 1 }
0x11a8   :  { %6906 = vsyncpa [#allocation11], 1 }
0x11a9   :  { %6907 = vsyncpa [#allocation14], 1 }
0x11aa   :  { %6908 = vsyncpa [#allocation17], 1 }
0x11ab   :  { %6909 = vsyncpa [#allocation20], 1 }
0x11ac   :  { %6910 = vsyncpa [#allocation23], 1 }
0x11ad   :  { %6911 = vsyncpa [#allocation26], 1 }
0x11ae   :  { %6912 = vsyncpa [#allocation29], 1 }

</bundles_post_ra>
